<compile_context>
chip_gen: v7x
topology: tpu7x:2x2x1
jax: 0.10.0
libtpu: 0.0.40
codegen_flags: <defaults>
</compile_context>

<pallas_src>
import math
import functools

import jax
import jax.numpy as jnp
from jax.experimental import pallas as pl
from jax.experimental.pallas import tpu as pltpu


_VMEM_LIMIT = 32 * 1024 * 1024  # safe on v5e/v6e/v7x scoped-VMEM budgets


def _pad_rows(a, mult):
    m = a.shape[0]
    mp = ((m + mult - 1) // mult) * mult
    if mp == m:
        return a
    return jnp.pad(a, ((0, mp - m), (0, 0)))


def _pick_tile_m(m, tile_m):
    tm = min(tile_m, m)
    if tm < m:
        tm = max(8, (tm // 8) * 8)
    return tm


# ----------------------------------------------------------------------------
# Kernel 1: fused 1x1 conv (as row-tiled matmul) + folded BN + ReLU
# ----------------------------------------------------------------------------

def _mm_bn_relu_kernel(x_ref, w_ref, s_ref, b_ref, o_ref):
    y = jnp.dot(x_ref[...], w_ref[...], preferred_element_type=jnp.float32)
    o_ref[...] = jnp.maximum(y * s_ref[...] + b_ref[...], 0.0)


def conv1x1_bn_relu(x2d, w, scale, bias, *, tile_m=512):
    m, cin = x2d.shape
    cout = w.shape[1]
    tm = _pick_tile_m(m, tile_m)
    xp = _pad_rows(x2d, tm)
    mp = xp.shape[0]
    out = pl.pallas_call(
        _mm_bn_relu_kernel,
        out_shape=jax.ShapeDtypeStruct((mp, cout), jnp.float32),
        grid=(mp // tm,),
        in_specs=[
            pl.BlockSpec((tm, cin), lambda i: (i, 0)),
            pl.BlockSpec((cin, cout), lambda i: (0, 0)),
            pl.BlockSpec((1, cout), lambda i: (0, 0)),
            pl.BlockSpec((1, cout), lambda i: (0, 0)),
        ],
        out_specs=pl.BlockSpec((tm, cout), lambda i: (i, 0)),
        compiler_params=pltpu.CompilerParams(
            dimension_semantics=("parallel",),
            vmem_limit_bytes=_VMEM_LIMIT),
    )(xp, w, scale, bias)
    return out[:m] if mp != m else out


# ----------------------------------------------------------------------------
# Kernel 2: 3x3 conv (pad=1, stride=1), gridded over (batch, row tiles)
# ----------------------------------------------------------------------------

def _conv3x3_accumulate(xw, w_ref, *, tile_h, W, cout):
    """xw: (tile_h+2, W+2, Cin) padded window (value). Returns (tile_h*W, cout).

    Only 3 flatten/relayout copies (one per kx shift); the ky taps are cheap
    contiguous row slices of the flattened window.
    """
    cin = xw.shape[-1]
    acc = jnp.zeros((tile_h * W, cout), jnp.float32)
    for kx in range(3):
        xk = xw[:, kx:kx + W, :].reshape((tile_h + 2) * W, cin)
        for ky in range(3):
            acc = acc + jnp.dot(xk[ky * W:(ky + tile_h) * W, :], w_ref[ky, kx],
                                preferred_element_type=jnp.float32)
    return acc


def _conv3x3_kernel(xpad_ref, w_ref, o_ref, *, tile_h, W):
    cout = o_ref.shape[-1]
    row0 = pl.program_id(1) * tile_h
    xw = xpad_ref[0, pl.ds(row0, tile_h + 2), :, :]
    acc = _conv3x3_accumulate(xw, w_ref, tile_h=tile_h, W=W, cout=cout)
    o_ref[...] = acc.reshape(o_ref.shape)


def _conv3x3_bn_relu_kernel(xpad_ref, w_ref, s_ref, b_ref, o_ref, *, tile_h, W):
    cout = o_ref.shape[-1]
    row0 = pl.program_id(1) * tile_h
    xw = xpad_ref[0, pl.ds(row0, tile_h + 2), :, :]
    acc = _conv3x3_accumulate(xw, w_ref, tile_h=tile_h, W=W, cout=cout)
    acc = jnp.maximum(acc * s_ref[...] + b_ref[...], 0.0)
    o_ref[...] = acc.reshape(o_ref.shape)


def conv3x3(xpad, w, scale=None, bias=None, *, tile_h=None):
    """xpad: (B, H+2, W+2, Cin) zero-padded NHWC.  w: (3, 3, Cin, Cout).

    If scale/bias are given, a folded-BN + ReLU epilogue is applied.
    """
    B, Hp, Wp, cin = xpad.shape
    H, W = Hp - 2, Wp - 2
    cout = w.shape[-1]
    if tile_h is None:
        tile_h = 8 if H % 8 == 0 else H
    nh = H // tile_h

    in_specs = [
        pl.BlockSpec((1, Hp, Wp, cin), lambda b, h: (b, 0, 0, 0)),
        pl.BlockSpec((3, 3, cin, cout), lambda b, h: (0, 0, 0, 0)),
    ]
    args = [xpad, w]
    if scale is not None:
        in_specs += [pl.BlockSpec((1, cout), lambda b, h: (0, 0)),
                     pl.BlockSpec((1, cout), lambda b, h: (0, 0))]
        args += [scale, bias]
        kernel = functools.partial(_conv3x3_bn_relu_kernel, tile_h=tile_h, W=W)
    else:
        kernel = functools.partial(_conv3x3_kernel, tile_h=tile_h, W=W)

    return pl.pallas_call(
        kernel,
        out_shape=jax.ShapeDtypeStruct((B, H, W, cout), jnp.float32),
        grid=(B, nh),
        in_specs=in_specs,
        out_specs=pl.BlockSpec((1, tile_h, W, cout), lambda b, h: (b, h, 0, 0)),
        compiler_params=pltpu.CompilerParams(
            dimension_semantics=("parallel", "arbitrary"),
            vmem_limit_bytes=_VMEM_LIMIT),
    )(*args)


# ----------------------------------------------------------------------------
# Kernel 3: fused bn_concat + ReLU + final 1x1 conv + BN + residual + ReLU
#           (branches passed separately; no HBM concat)
# ----------------------------------------------------------------------------

def _final_kernel(b1_ref, b2_ref, res_ref, s1_ref, bb1_ref, s2_ref, bb2_ref,
                  w1_ref, w2_ref, sbn_ref, bbn_ref, o_ref):
    y1 = jnp.maximum(b1_ref[...] * s1_ref[...] + bb1_ref[...], 0.0)
    y2 = jnp.maximum(b2_ref[...] * s2_ref[...] + bb2_ref[...], 0.0)
    o = jnp.dot(y1, w1_ref[...], preferred_element_type=jnp.float32)
    o = o + jnp.dot(y2, w2_ref[...], preferred_element_type=jnp.float32)
    o = o * sbn_ref[...] + bbn_ref[...] + res_ref[...]
    o_ref[...] = jnp.maximum(o, 0.0)


def final_block(b1_2d, b2_2d, res2d, s1, bb1, s2, bb2, w1, w2, sbn, bbn, *,
                tile_m=512):
    m, dc = b1_2d.shape
    dch = b2_2d.shape[1]
    cres = res2d.shape[1]
    cout = w1.shape[1]
    tm = _pick_tile_m(m, tile_m)
    b1p, b2p, rp = _pad_rows(b1_2d, tm), _pad_rows(b2_2d, tm), _pad_rows(res2d, tm)
    mp = b1p.shape[0]
    out = pl.pallas_call(
        _final_kernel,
        out_shape=jax.ShapeDtypeStruct((mp, cout), jnp.float32),
        grid=(mp // tm,),
        in_specs=[
            pl.BlockSpec((tm, dc), lambda i: (i, 0)),
            pl.BlockSpec((tm, dch), lambda i: (i, 0)),
            pl.BlockSpec((tm, cres), lambda i: (i, 0)),
            pl.BlockSpec((1, dc), lambda i: (0, 0)),
            pl.BlockSpec((1, dc), lambda i: (0, 0)),
            pl.BlockSpec((1, dch), lambda i: (0, 0)),
            pl.BlockSpec((1, dch), lambda i: (0, 0)),
            pl.BlockSpec((dc, cout), lambda i: (0, 0)),
            pl.BlockSpec((dch, cout), lambda i: (0, 0)),
            pl.BlockSpec((1, cout), lambda i: (0, 0)),
            pl.BlockSpec((1, cout), lambda i: (0, 0)),
        ],
        out_specs=pl.BlockSpec((tm, cout), lambda i: (i, 0)),
        compiler_params=pltpu.CompilerParams(
            dimension_semantics=("parallel",),
            vmem_limit_bytes=_VMEM_LIMIT),
    )(b1p, b2p, rp, s1, bb1, s2, bb2, w1, w2, sbn, bbn)
    return out[:m] if mp != m else out


# ----------------------------------------------------------------------------
# AlignedBottleneck forward (Pallas path)
# ----------------------------------------------------------------------------

def _pad_hw(x_nhwc):
    return jnp.pad(x_nhwc, ((0, 0), (1, 1), (1, 1), (0, 0)))


def aligned_bottleneck_pallas(x_nchw, p, *, tile_m=512):
    """p holds torch-layout weights (OIHW) and folded BN scale/bias."""
    B, C, H, W = x_nchw.shape
    x_nhwc = jnp.transpose(x_nchw, (0, 2, 3, 1))           # (B, H, W, C)
    x2d = x_nhwc.reshape(B * H * W, C)
    row = lambda v: v.reshape(1, -1)

    # kernel-layout weights (glue)
    w1_1 = p['w1_1'][:, :, 0, 0].T                          # (Cin, dc)
    w2_1 = p['w2_1'][:, :, 0, 0].T                          # (Cin, dch)
    dc, dch = w1_1.shape[1], w2_1.shape[1]
    w_b = jnp.concatenate([w1_1, w2_1], axis=1)             # (Cin, dc+dch)
    s_b = row(jnp.concatenate([p['s1_1'], p['s2_1']]))
    bb_b = row(jnp.concatenate([p['b1_1'], p['b2_1']]))

    w1_2 = jnp.transpose(p['w1_2'], (2, 3, 1, 0))           # (3,3,Cin,Cout)
    w2_2 = jnp.transpose(p['w2_2'], (2, 3, 1, 0))
    w2_3 = jnp.transpose(p['w2_3'], (2, 3, 1, 0))

    w_conv = p['w_conv'][:, :, 0, 0].T                      # (dc+dch, planes*4)
    w_conv1, w_conv2 = w_conv[:dc], w_conv[dc:]

    # fused branch 1x1 convs + BN + ReLU (x2d read from HBM once)
    br = conv1x1_bn_relu(x2d, w_b, s_b, bb_b, tile_m=tile_m)   # (M, dc+dch)
    b1 = br[:, :dc].reshape(B, H, W, dc)
    b2 = br[:, dc:].reshape(B, H, W, dch)

    # branch 1: 3x3 conv (no BN / ReLU)
    b1 = conv3x3(_pad_hw(b1), w1_2)

    # branch 2: 3x3 conv + BN + ReLU, then 3x3 conv
    b2 = conv3x3(_pad_hw(b2), w2_2, row(p['s2_2']), row(p['b2_2']))
    b2 = conv3x3(_pad_hw(b2), w2_3)

    # fused bn_concat + ReLU + final 1x1 conv + BN + residual add + ReLU
    out2d = final_block(
        b1.reshape(B * H * W, dc), b2.reshape(B * H * W, dch), x2d,
        row(p['s_cat'][:dc]), row(p['b_cat'][:dc]),
        row(p['s_cat'][dc:]), row(p['b_cat'][dc:]),
        w_conv1, w_conv2, row(p['s_bn']), row(p['b_bn']),
        tile_m=tile_m)
    out = out2d.reshape(B, H, W, C)
    return jnp.transpose(out, (0, 3, 1, 2))                 # back to NCHW


# ----------------------------------------------------------------------------
# Pure-JAX reference (lax.conv) for verification
# ----------------------------------------------------------------------------

def _ref_forward(x, p):
    def conv2d(t, w, pad):
        return jax.lax.conv_general_dilated(
            t, w, window_strides=(1, 1),
            padding=((pad, pad), (pad, pad)),
            dimension_numbers=('NCHW', 'OIHW', 'NCHW'))

    def bn(t, s, b):
        return t * s[None, :, None, None] + b[None, :, None, None]

    relu = lambda t: jnp.maximum(t, 0.0)
    br1 = relu(bn(conv2d(x, p['w1_1'], 0), p['s1_1'], p['b1_1']))
    br1 = conv2d(br1, p['w1_2'], 1)
    br2 = relu(bn(conv2d(x, p['w2_1'], 0), p['s2_1'], p['b2_1']))
    br2 = conv2d(br2, p['w2_2'], 1)
    br2 = relu(bn(br2, p['s2_2'], p['b2_2']))
    br2 = conv2d(br2, p['w2_3'], 1)
    out = jnp.concatenate([br1, br2], axis=1)
    out = relu(bn(out, p['s_cat'], p['b_cat']))
    out = conv2d(out, p['w_conv'], 0)
    out = bn(out, p['s_bn'], p['b_bn'])
    out = out + x
    return relu(out)


# ----------------------------------------------------------------------------
# Deterministic parameter construction
# ----------------------------------------------------------------------------

def make_params(key, inplanes, planes, base_width=64, cardinality=1):
    D = int(math.floor(planes * (base_width / 64.0)))
    C = cardinality
    dc, dch = D * C, D * C // 2
    exp_out = planes * 4
    ks = jax.random.split(key, 12)

    def conv_w(k, o, i, kh, kw):
        fan_in = i * kh * kw
        return jax.random.normal(k, (o, i, kh, kw), jnp.float32) / math.sqrt(fan_in)

    def bn_fold(k, c):
        k1, k2, k3, k4 = jax.random.split(k, 4)
        gamma = 1.0 + 0.1 * jax.random.normal(k1, (c,), jnp.float32)
        beta = 0.1 * jax.random.normal(k2, (c,), jnp.float32)
        mean = 0.1 * jax.random.normal(k3, (c,), jnp.float32)
        var = 0.5 + jnp.abs(jax.random.normal(k4, (c,), jnp.float32))
        scale = gamma * jax.lax.rsqrt(var + 1e-5)
        bias = beta - mean * scale
        return scale, bias

    p = {}
    p['w1_1'] = conv_w(ks[0], dc, inplanes, 1, 1)
    p['s1_1'], p['b1_1'] = bn_fold(ks[1], dc)
    p['w1_2'] = conv_w(ks[2], dc, dc, 3, 3)
    p['w2_1'] = conv_w(ks[3], dch, inplanes, 1, 1)
    p['s2_1'], p['b2_1'] = bn_fold(ks[4], dch)
    p['w2_2'] = conv_w(ks[5], dch, dch, 3, 3)
    p['s2_2'], p['b2_2'] = bn_fold(ks[6], dch)
    p['w2_3'] = conv_w(ks[7], dch, dch, 3, 3)
    p['s_cat'], p['b_cat'] = bn_fold(ks[8], dc + dch)
    p['w_conv'] = conv_w(ks[9], exp_out, dc + dch, 1, 1)
    p['s_bn'], p['b_bn'] = bn_fold(ks[10], exp_out)
    return p


# ----------------------------------------------------------------------------

if __name__ == "__main__":
    planes = 16
    inplanes = planes * 4      # residual add requires inplanes == planes*expansion
    B, H, W = 2, 32, 32        # M = B*H*W = 2048 rows -> 4 row-tiles of 512

    key = jax.random.PRNGKey(0)
    kx, kp = jax.random.split(key)
    x = jax.random.normal(kx, (B, inplanes, H, W), jnp.float32)   # NCHW input
    params = make_params(kp, inplanes, planes)

    fwd = jax.jit(aligned_bottleneck_pallas)
    out = fwd(x, params)
    out = jax.block_until_ready(out)

    ref = _ref_forward(x, params)
    err = float(jnp.max(jnp.abs(out - ref)))
    if err > 1e-3:
        raise AssertionError(f"Pallas output mismatch vs reference: max err {err}")

    # TODO(synk): training-mode BatchNorm (batch statistics) not implemented;
    # BN is evaluated in inference mode with folded scale/bias.
    print("KERNEL_OK")
</pallas_src>

<mosaic_0001>
module attributes {stable_mosaic.version = 11 : i64} {
  func.func @_mm_bn_relu_kernel(%arg0: i32, %arg1: memref<512x64xf32, #tpu.memory_space<vmem>>, %arg2: memref<64x24xf32, #tpu.memory_space<vmem>>, %arg3: memref<1x24xf32, #tpu.memory_space<vmem>>, %arg4: memref<1x24xf32, #tpu.memory_space<vmem>>, %arg5: memref<512x24xf32, #tpu.memory_space<vmem>>) attributes {dimension_semantics = [#tpu.dimension_semantics<parallel>], iteration_bounds = array<i64: 4>, scalar_prefetch = 0 : i64, scratch_operands = 0 : i64, tpu.core_type = #tpu.core_type<tc>, window_params = [{transform_indices = @transform_0, window_bounds = array<i64: 512, 64>}, {pipeline_mode = #tpu.pipeline_mode<synchronous>, transform_indices = @transform_1, window_bounds = array<i64: 64, 24>}, {pipeline_mode = #tpu.pipeline_mode<synchronous>, transform_indices = @transform_2, window_bounds = array<i64: 1, 24>}, {pipeline_mode = #tpu.pipeline_mode<synchronous>, transform_indices = @transform_3, window_bounds = array<i64: 1, 24>}, {transform_indices = @transform_4, window_bounds = array<i64: 512, 24>}]} {
    %c0 = arith.constant 0 : index
    %c0_0 = arith.constant 0 : index
    %0 = vector.load %arg1[%c0, %c0_0] : memref<512x64xf32, #tpu.memory_space<vmem>>, vector<512x64xf32>
    %c0_1 = arith.constant 0 : index
    %c0_2 = arith.constant 0 : index
    %1 = vector.load %arg2[%c0_1, %c0_2] : memref<64x24xf32, #tpu.memory_space<vmem>>, vector<64x24xf32>
    %cst = arith.constant dense<0.000000e+00> : vector<512x24xf32>
    %2 = tpu.matmul %0, %1, %cst {dimension_numbers = #tpu.dot_dimension_numbers<[1], [0], [0], [1], [0, 0, 1, 1], [], []>} : vector<512x64xf32>, vector<64x24xf32>, vector<512x24xf32> -> vector<512x24xf32>
    %c0_3 = arith.constant 0 : index
    %c0_4 = arith.constant 0 : index
    %3 = vector.load %arg3[%c0_3, %c0_4] : memref<1x24xf32, #tpu.memory_space<vmem>>, vector<1x24xf32>
    %4 = vector.broadcast %3 : vector<1x24xf32> to vector<512x24xf32>
    %5 = arith.mulf %2, %4 : vector<512x24xf32>
    %c0_5 = arith.constant 0 : index
    %c0_6 = arith.constant 0 : index
    %6 = vector.load %arg4[%c0_5, %c0_6] : memref<1x24xf32, #tpu.memory_space<vmem>>, vector<1x24xf32>
    %7 = vector.broadcast %6 : vector<1x24xf32> to vector<512x24xf32>
    %8 = arith.addf %5, %7 : vector<512x24xf32>
    %cst_7 = arith.constant 0.000000e+00 : f32
    %9 = vector.broadcast %cst_7 : f32 to vector<512x24xf32>
    %10 = arith.maximumf %8, %9 : vector<512x24xf32>
    %c0_8 = arith.constant 0 : index
    %c0_9 = arith.constant 0 : index
    %11 = vector.load %arg5[%c0_8, %c0_9] : memref<512x24xf32, #tpu.memory_space<vmem>>, vector<512x24xf32>
    tpu.vector_store %arg5[%c0_8, %c0_9], %10 {strides = array<i32>} : memref<512x24xf32, #tpu.memory_space<vmem>>, vector<512x24xf32>,
    return
  }
  func.func @transform_0(%arg0: i32) -> (i32, i32) {
    %c0_i32 = arith.constant 0 : i32
    %c0_i32_0 = arith.constant 0 : i32
    return %arg0, %c0_i32 : i32, i32
  }
  func.func @transform_1(%arg0: i32) -> (i32, i32) {
    %c0_i32 = arith.constant 0 : i32
    %c0_i32_0 = arith.constant 0 : i32
    %c0_i32_1 = arith.constant 0 : i32
    return %c0_i32, %c0_i32_0 : i32, i32
  }
  func.func @transform_2(%arg0: i32) -> (i32, i32) {
    %c0_i32 = arith.constant 0 : i32
    %c0_i32_0 = arith.constant 0 : i32
    %c0_i32_1 = arith.constant 0 : i32
    return %c0_i32, %c0_i32_0 : i32, i32
  }
  func.func @transform_3(%arg0: i32) -> (i32, i32) {
    %c0_i32 = arith.constant 0 : i32
    %c0_i32_0 = arith.constant 0 : i32
    %c0_i32_1 = arith.constant 0 : i32
    return %c0_i32, %c0_i32_0 : i32, i32
  }
  func.func @transform_4(%arg0: i32) -> (i32, i32) {
    %c0_i32 = arith.constant 0 : i32
    %c0_i32_0 = arith.constant 0 : i32
    return %arg0, %c0_i32 : i32, i32
  }
}

module attributes {stable_mosaic.version = 11 : i64} {
  func.func @_conv3x3_bn_relu_kernel(%arg0: i32, %arg1: i32, %arg2: memref<1x34x34x8xf32, #tpu.memory_space<vmem>>, %arg3: memref<3x3x8x8xf32, #tpu.memory_space<vmem>>, %arg4: memref<1x8xf32, #tpu.memory_space<vmem>>, %arg5: memref<1x8xf32, #tpu.memory_space<vmem>>, %arg6: memref<1x8x32x8xf32, #tpu.memory_space<vmem>>) attributes {dimension_semantics = [#tpu.dimension_semantics<parallel>, #tpu.dimension_semantics<arbitrary>], iteration_bounds = array<i64: 2, 4>, scalar_prefetch = 0 : i64, scratch_operands = 0 : i64, tpu.core_type = #tpu.core_type<tc>, window_params = [{transform_indices = @transform_0, window_bounds = array<i64: 1, 34, 34, 8>}, {pipeline_mode = #tpu.pipeline_mode<synchronous>, transform_indices = @transform_1, window_bounds = array<i64: 3, 3, 8, 8>}, {pipeline_mode = #tpu.pipeline_mode<synchronous>, transform_indices = @transform_2, window_bounds = array<i64: 1, 8>}, {pipeline_mode = #tpu.pipeline_mode<synchronous>, transform_indices = @transform_3, window_bounds = array<i64: 1, 8>}, {transform_indices = @transform_4, window_bounds = array<i64: 1, 8, 32, 8>}]} {
    %c8_i32 = arith.constant 8 : i32
    %0 = arith.muli %arg1, %c8_i32 : i32
    %c0 = arith.constant 0 : index
    %1 = arith.index_cast %0 : i32 to index
    %c0_0 = arith.constant 0 : index
    %c0_1 = arith.constant 0 : index
    %2 = vector.load %arg2[%c0, %1, %c0_0, %c0_1] : memref<1x34x34x8xf32, #tpu.memory_space<vmem>>, vector<1x10x34x8xf32>
    %3 = vector.shape_cast %2 : vector<1x10x34x8xf32> to vector<10x34x8xf32>
    %cst = arith.constant 0.000000e+00 : f32
    %4 = vector.broadcast %cst : f32 to vector<256x8xf32>
    %5 = vector.extract_strided_slice %3 {offsets = [0, 0, 0], sizes = [10, 32, 8], strides = [1, 1, 1]} : vector<10x34x8xf32> to vector<10x32x8xf32>
    %6 = vector.shape_cast %5 : vector<10x32x8xf32> to vector<320x8xf32>
    %7 = vector.extract_strided_slice %6 {offsets = [0, 0], sizes = [256, 8], strides = [1, 1]} : vector<320x8xf32> to vector<256x8xf32>
    %c0_2 = arith.constant 0 : index
    %c0_3 = arith.constant 0 : index
    %c0_4 = arith.constant 0 : index
    %c0_5 = arith.constant 0 : index
    %8 = vector.load %arg3[%c0_2, %c0_3, %c0_4, %c0_5] : memref<3x3x8x8xf32, #tpu.memory_space<vmem>>, vector<1x1x8x8xf32>
    %9 = vector.shape_cast %8 : vector<1x1x8x8xf32> to vector<8x8xf32>
    %cst_6 = arith.constant dense<0.000000e+00> : vector<256x8xf32>
    %10 = tpu.matmul %7, %9, %cst_6 {dimension_numbers = #tpu.dot_dimension_numbers<[1], [0], [0], [1], [0, 0, 1, 1], [], []>} : vector<256x8xf32>, vector<8x8xf32>, vector<256x8xf32> -> vector<256x8xf32>
    %11 = arith.addf %4, %10 : vector<256x8xf32>
    %12 = vector.extract_strided_slice %6 {offsets = [32, 0], sizes = [256, 8], strides = [1, 1]} : vector<320x8xf32> to vector<256x8xf32>
    %c1 = arith.constant 1 : index
    %c0_7 = arith.constant 0 : index
    %c0_8 = arith.constant 0 : index
    %c0_9 = arith.constant 0 : index
    %13 = vector.load %arg3[%c1, %c0_7, %c0_8, %c0_9] : memref<3x3x8x8xf32, #tpu.memory_space<vmem>>, vector<1x1x8x8xf32>
    %14 = vector.shape_cast %13 : vector<1x1x8x8xf32> to vector<8x8xf32>
    %cst_10 = arith.constant dense<0.000000e+00> : vector<256x8xf32>
    %15 = tpu.matmul %12, %14, %cst_10 {dimension_numbers = #tpu.dot_dimension_numbers<[1], [0], [0], [1], [0, 0, 1, 1], [], []>} : vector<256x8xf32>, vector<8x8xf32>, vector<256x8xf32> -> vector<256x8xf32>
    %16 = arith.addf %11, %15 : vector<256x8xf32>
    %17 = vector.extract_strided_slice %6 {offsets = [64, 0], sizes = [256, 8], strides = [1, 1]} : vector<320x8xf32> to vector<256x8xf32>
    %c2 = arith.constant 2 : index
    %c0_11 = arith.constant 0 : index
    %c0_12 = arith.constant 0 : index
    %c0_13 = arith.constant 0 : index
    %18 = vector.load %arg3[%c2, %c0_11, %c0_12, %c0_13] : memref<3x3x8x8xf32, #tpu.memory_space<vmem>>, vector<1x1x8x8xf32>
    %19 = vector.shape_cast %18 : vector<1x1x8x8xf32> to vector<8x8xf32>
    %cst_14 = arith.constant dense<0.000000e+00> : vector<256x8xf32>
    %20 = tpu.matmul %17, %19, %cst_14 {dimension_numbers = #tpu.dot_dimension_numbers<[1], [0], [0], [1], [0, 0, 1, 1], [], []>} : vector<256x8xf32>, vector<8x8xf32>, vector<256x8xf32> -> vector<256x8xf32>
    %21 = arith.addf %16, %20 : vector<256x8xf32>
    %22 = vector.extract_strided_slice %3 {offsets = [0, 1, 0], sizes = [10, 32, 8], strides = [1, 1, 1]} : vector<10x34x8xf32> to vector<10x32x8xf32>
    %23 = vector.shape_cast %22 : vector<10x32x8xf32> to vector<320x8xf32>
    %24 = vector.extract_strided_slice %23 {offsets = [0, 0], sizes = [256, 8], strides = [1, 1]} : vector<320x8xf32> to vector<256x8xf32>
    %c0_15 = arith.constant 0 : index
    %c1_16 = arith.constant 1 : index
    %c0_17 = arith.constant 0 : index
    %c0_18 = arith.constant 0 : index
    %25 = vector.load %arg3[%c0_15, %c1_16, %c0_17, %c0_18] : memref<3x3x8x8xf32, #tpu.memory_space<vmem>>, vector<1x1x8x8xf32>
    %26 = vector.shape_cast %25 : vector<1x1x8x8xf32> to vector<8x8xf32>
    %cst_19 = arith.constant dense<0.000000e+00> : vector<256x8xf32>
    %27 = tpu.matmul %24, %26, %cst_19 {dimension_numbers = #tpu.dot_dimension_numbers<[1], [0], [0], [1], [0, 0, 1, 1], [], []>} : vector<256x8xf32>, vector<8x8xf32>, vector<256x8xf32> -> vector<256x8xf32>
    %28 = arith.addf %21, %27 : vector<256x8xf32>
    %29 = vector.extract_strided_slice %23 {offsets = [32, 0], sizes = [256, 8], strides = [1, 1]} : vector<320x8xf32> to vector<256x8xf32>
    %c1_20 = arith.constant 1 : index
    %c1_21 = arith.constant 1 : index
    %c0_22 = arith.constant 0 : index
    %c0_23 = arith.constant 0 : index
    %30 = vector.load %arg3[%c1_20, %c1_21, %c0_22, %c0_23] : memref<3x3x8x8xf32, #tpu.memory_space<vmem>>, vector<1x1x8x8xf32>
    %31 = vector.shape_cast %30 : vector<1x1x8x8xf32> to vector<8x8xf32>
    %cst_24 = arith.constant dense<0.000000e+00> : vector<256x8xf32>
    %32 = tpu.matmul %29, %31, %cst_24 {dimension_numbers = #tpu.dot_dimension_numbers<[1], [0], [0], [1], [0, 0, 1, 1], [], []>} : vector<256x8xf32>, vector<8x8xf32>, vector<256x8xf32> -> vector<256x8xf32>
    %33 = arith.addf %28, %32 : vector<256x8xf32>
    %34 = vector.extract_strided_slice %23 {offsets = [64, 0], sizes = [256, 8], strides = [1, 1]} : vector<320x8xf32> to vector<256x8xf32>
    %c2_25 = arith.constant 2 : index
    %c1_26 = arith.constant 1 : index
    %c0_27 = arith.constant 0 : index
    %c0_28 = arith.constant 0 : index
    %35 = vector.load %arg3[%c2_25, %c1_26, %c0_27, %c0_28] : memref<3x3x8x8xf32, #tpu.memory_space<vmem>>, vector<1x1x8x8xf32>
    %36 = vector.shape_cast %35 : vector<1x1x8x8xf32> to vector<8x8xf32>
    %cst_29 = arith.constant dense<0.000000e+00> : vector<256x8xf32>
    %37 = tpu.matmul %34, %36, %cst_29 {dimension_numbers = #tpu.dot_dimension_numbers<[1], [0], [0], [1], [0, 0, 1, 1], [], []>} : vector<256x8xf32>, vector<8x8xf32>, vector<256x8xf32> -> vector<256x8xf32>
    %38 = arith.addf %33, %37 : vector<256x8xf32>
    %39 = vector.extract_strided_slice %3 {offsets = [0, 2, 0], sizes = [10, 32, 8], strides = [1, 1, 1]} : vector<10x34x8xf32> to vector<10x32x8xf32>
    %40 = vector.shape_cast %39 : vector<10x32x8xf32> to vector<320x8xf32>
    %41 = vector.extract_strided_slice %40 {offsets = [0, 0], sizes = [256, 8], strides = [1, 1]} : vector<320x8xf32> to vector<256x8xf32>
    %c0_30 = arith.constant 0 : index
    %c2_31 = arith.constant 2 : index
    %c0_32 = arith.constant 0 : index
    %c0_33 = arith.constant 0 : index
    %42 = vector.load %arg3[%c0_30, %c2_31, %c0_32, %c0_33] : memref<3x3x8x8xf32, #tpu.memory_space<vmem>>, vector<1x1x8x8xf32>
    %43 = vector.shape_cast %42 : vector<1x1x8x8xf32> to vector<8x8xf32>
    %cst_34 = arith.constant dense<0.000000e+00> : vector<256x8xf32>
    %44 = tpu.matmul %41, %43, %cst_34 {dimension_numbers = #tpu.dot_dimension_numbers<[1], [0], [0], [1], [0, 0, 1, 1], [], []>} : vector<256x8xf32>, vector<8x8xf32>, vector<256x8xf32> -> vector<256x8xf32>
    %45 = arith.addf %38, %44 : vector<256x8xf32>
    %46 = vector.extract_strided_slice %40 {offsets = [32, 0], sizes = [256, 8], strides = [1, 1]} : vector<320x8xf32> to vector<256x8xf32>
    %c1_35 = arith.constant 1 : index
    %c2_36 = arith.constant 2 : index
    %c0_37 = arith.constant 0 : index
    %c0_38 = arith.constant 0 : index
    %47 = vector.load %arg3[%c1_35, %c2_36, %c0_37, %c0_38] : memref<3x3x8x8xf32, #tpu.memory_space<vmem>>, vector<1x1x8x8xf32>
    %48 = vector.shape_cast %47 : vector<1x1x8x8xf32> to vector<8x8xf32>
    %cst_39 = arith.constant dense<0.000000e+00> : vector<256x8xf32>
    %49 = tpu.matmul %46, %48, %cst_39 {dimension_numbers = #tpu.dot_dimension_numbers<[1], [0], [0], [1], [0, 0, 1, 1], [], []>} : vector<256x8xf32>, vector<8x8xf32>, vector<256x8xf32> -> vector<256x8xf32>
    %50 = arith.addf %45, %49 : vector<256x8xf32>
    %51 = vector.extract_strided_slice %40 {offsets = [64, 0], sizes = [256, 8], strides = [1, 1]} : vector<320x8xf32> to vector<256x8xf32>
    %c2_40 = arith.constant 2 : index
    %c2_41 = arith.constant 2 : index
    %c0_42 = arith.constant 0 : index
    %c0_43 = arith.constant 0 : index
    %52 = vector.load %arg3[%c2_40, %c2_41, %c0_42, %c0_43] : memref<3x3x8x8xf32, #tpu.memory_space<vmem>>, vector<1x1x8x8xf32>
    %53 = vector.shape_cast %52 : vector<1x1x8x8xf32> to vector<8x8xf32>
    %cst_44 = arith.constant dense<0.000000e+00> : vector<256x8xf32>
    %54 = tpu.matmul %51, %53, %cst_44 {dimension_numbers = #tpu.dot_dimension_numbers<[1], [0], [0], [1], [0, 0, 1, 1], [], []>} : vector<256x8xf32>, vector<8x8xf32>, vector<256x8xf32> -> vector<256x8xf32>
    %55 = arith.addf %50, %54 : vector<256x8xf32>
    %c0_45 = arith.constant 0 : index
    %c0_46 = arith.constant 0 : index
    %56 = vector.load %arg4[%c0_45, %c0_46] : memref<1x8xf32, #tpu.memory_space<vmem>>, vector<1x8xf32>
    %57 = vector.broadcast %56 : vector<1x8xf32> to vector<256x8xf32>
    %58 = arith.mulf %55, %57 : vector<256x8xf32>
    %c0_47 = arith.constant 0 : index
    %c0_48 = arith.constant 0 : index
    %59 = vector.load %arg5[%c0_47, %c0_48] : memref<1x8xf32, #tpu.memory_space<vmem>>, vector<1x8xf32>
    %60 = vector.broadcast %59 : vector<1x8xf32> to vector<256x8xf32>
    %61 = arith.addf %58, %60 : vector<256x8xf32>
    %cst_49 = arith.constant 0.000000e+00 : f32
    %62 = vector.broadcast %cst_49 : f32 to vector<256x8xf32>
    %63 = arith.maximumf %61, %62 : vector<256x8xf32>
    %64 = vector.shape_cast %63 : vector<256x8xf32> to vector<1x8x32x8xf32>
    %c0_50 = arith.constant 0 : index
    %c0_51 = arith.constant 0 : index
    %c0_52 = arith.constant 0 : index
    %c0_53 = arith.constant 0 : index
    %65 = vector.load %arg6[%c0_50, %c0_51, %c0_52, %c0_53] : memref<1x8x32x8xf32, #tpu.memory_space<vmem>>, vector<1x8x32x8xf32>
    tpu.vector_store %arg6[%c0_50, %c0_51, %c0_52, %c0_53], %64 {strides = array<i32>} : memref<1x8x32x8xf32, #tpu.memory_space<vmem>>, vector<1x8x32x8xf32>,
    return
  }
  func.func @transform_0(%arg0: i32, %arg1: i32) -> (i32, i32, i32, i32) {
    %c0_i32 = arith.constant 0 : i32
    %c0_i32_0 = arith.constant 0 : i32
    %c0_i32_1 = arith.constant 0 : i32
    %c0_i32_2 = arith.constant 0 : i32
    return %arg0, %c0_i32, %c0_i32_0, %c0_i32_1 : i32, i32, i32, i32
  }
  func.func @transform_1(%arg0: i32, %arg1: i32) -> (i32, i32, i32, i32) {
    %c0_i32 = arith.constant 0 : i32
    %c0_i32_0 = arith.constant 0 : i32
    %c0_i32_1 = arith.constant 0 : i32
    %c0_i32_2 = arith.constant 0 : i32
    %c0_i32_3 = arith.constant 0 : i32
    return %c0_i32, %c0_i32_0, %c0_i32_1, %c0_i32_2 : i32, i32, i32, i32
  }
  func.func @transform_2(%arg0: i32, %arg1: i32) -> (i32, i32) {
    %c0_i32 = arith.constant 0 : i32
    %c0_i32_0 = arith.constant 0 : i32
    %c0_i32_1 = arith.constant 0 : i32
    return %c0_i32, %c0_i32_0 : i32, i32
  }
  func.func @transform_3(%arg0: i32, %arg1: i32) -> (i32, i32) {
    %c0_i32 = arith.constant 0 : i32
    %c0_i32_0 = arith.constant 0 : i32
    %c0_i32_1 = arith.constant 0 : i32
    return %c0_i32, %c0_i32_0 : i32, i32
  }
  func.func @transform_4(%arg0: i32, %arg1: i32) -> (i32, i32, i32, i32) {
    %c0_i32 = arith.constant 0 : i32
    %c0_i32_0 = arith.constant 0 : i32
    %c0_i32_1 = arith.constant 0 : i32
    return %arg0, %arg1, %c0_i32, %c0_i32_0 : i32, i32, i32, i32
  }
}

module attributes {stable_mosaic.version = 11 : i64} {
  func.func @_conv3x3_kernel(%arg0: i32, %arg1: i32, %arg2: memref<1x34x34x8xf32, #tpu.memory_space<vmem>>, %arg3: memref<3x3x8x8xf32, #tpu.memory_space<vmem>>, %arg4: memref<1x8x32x8xf32, #tpu.memory_space<vmem>>) attributes {dimension_semantics = [#tpu.dimension_semantics<parallel>, #tpu.dimension_semantics<arbitrary>], iteration_bounds = array<i64: 2, 4>, scalar_prefetch = 0 : i64, scratch_operands = 0 : i64, tpu.core_type = #tpu.core_type<tc>, window_params = [{transform_indices = @transform_0, window_bounds = array<i64: 1, 34, 34, 8>}, {pipeline_mode = #tpu.pipeline_mode<synchronous>, transform_indices = @transform_1, window_bounds = array<i64: 3, 3, 8, 8>}, {transform_indices = @transform_2, window_bounds = array<i64: 1, 8, 32, 8>}]} {
    %c8_i32 = arith.constant 8 : i32
    %0 = arith.muli %arg1, %c8_i32 : i32
    %c0 = arith.constant 0 : index
    %1 = arith.index_cast %0 : i32 to index
    %c0_0 = arith.constant 0 : index
    %c0_1 = arith.constant 0 : index
    %2 = vector.load %arg2[%c0, %1, %c0_0, %c0_1] : memref<1x34x34x8xf32, #tpu.memory_space<vmem>>, vector<1x10x34x8xf32>
    %3 = vector.shape_cast %2 : vector<1x10x34x8xf32> to vector<10x34x8xf32>
    %cst = arith.constant 0.000000e+00 : f32
    %4 = vector.broadcast %cst : f32 to vector<256x8xf32>
    %5 = vector.extract_strided_slice %3 {offsets = [0, 0, 0], sizes = [10, 32, 8], strides = [1, 1, 1]} : vector<10x34x8xf32> to vector<10x32x8xf32>
    %6 = vector.shape_cast %5 : vector<10x32x8xf32> to vector<320x8xf32>
    %7 = vector.extract_strided_slice %6 {offsets = [0, 0], sizes = [256, 8], strides = [1, 1]} : vector<320x8xf32> to vector<256x8xf32>
    %c0_2 = arith.constant 0 : index
    %c0_3 = arith.constant 0 : index
    %c0_4 = arith.constant 0 : index
    %c0_5 = arith.constant 0 : index
    %8 = vector.load %arg3[%c0_2, %c0_3, %c0_4, %c0_5] : memref<3x3x8x8xf32, #tpu.memory_space<vmem>>, vector<1x1x8x8xf32>
    %9 = vector.shape_cast %8 : vector<1x1x8x8xf32> to vector<8x8xf32>
    %cst_6 = arith.constant dense<0.000000e+00> : vector<256x8xf32>
    %10 = tpu.matmul %7, %9, %cst_6 {dimension_numbers = #tpu.dot_dimension_numbers<[1], [0], [0], [1], [0, 0, 1, 1], [], []>} : vector<256x8xf32>, vector<8x8xf32>, vector<256x8xf32> -> vector<256x8xf32>
    %11 = arith.addf %4, %10 : vector<256x8xf32>
    %12 = vector.extract_strided_slice %6 {offsets = [32, 0], sizes = [256, 8], strides = [1, 1]} : vector<320x8xf32> to vector<256x8xf32>
    %c1 = arith.constant 1 : index
    %c0_7 = arith.constant 0 : index
    %c0_8 = arith.constant 0 : index
    %c0_9 = arith.constant 0 : index
    %13 = vector.load %arg3[%c1, %c0_7, %c0_8, %c0_9] : memref<3x3x8x8xf32, #tpu.memory_space<vmem>>, vector<1x1x8x8xf32>
    %14 = vector.shape_cast %13 : vector<1x1x8x8xf32> to vector<8x8xf32>
    %cst_10 = arith.constant dense<0.000000e+00> : vector<256x8xf32>
    %15 = tpu.matmul %12, %14, %cst_10 {dimension_numbers = #tpu.dot_dimension_numbers<[1], [0], [0], [1], [0, 0, 1, 1], [], []>} : vector<256x8xf32>, vector<8x8xf32>, vector<256x8xf32> -> vector<256x8xf32>
    %16 = arith.addf %11, %15 : vector<256x8xf32>
    %17 = vector.extract_strided_slice %6 {offsets = [64, 0], sizes = [256, 8], strides = [1, 1]} : vector<320x8xf32> to vector<256x8xf32>
    %c2 = arith.constant 2 : index
    %c0_11 = arith.constant 0 : index
    %c0_12 = arith.constant 0 : index
    %c0_13 = arith.constant 0 : index
    %18 = vector.load %arg3[%c2, %c0_11, %c0_12, %c0_13] : memref<3x3x8x8xf32, #tpu.memory_space<vmem>>, vector<1x1x8x8xf32>
    %19 = vector.shape_cast %18 : vector<1x1x8x8xf32> to vector<8x8xf32>
    %cst_14 = arith.constant dense<0.000000e+00> : vector<256x8xf32>
    %20 = tpu.matmul %17, %19, %cst_14 {dimension_numbers = #tpu.dot_dimension_numbers<[1], [0], [0], [1], [0, 0, 1, 1], [], []>} : vector<256x8xf32>, vector<8x8xf32>, vector<256x8xf32> -> vector<256x8xf32>
    %21 = arith.addf %16, %20 : vector<256x8xf32>
    %22 = vector.extract_strided_slice %3 {offsets = [0, 1, 0], sizes = [10, 32, 8], strides = [1, 1, 1]} : vector<10x34x8xf32> to vector<10x32x8xf32>
    %23 = vector.shape_cast %22 : vector<10x32x8xf32> to vector<320x8xf32>
    %24 = vector.extract_strided_slice %23 {offsets = [0, 0], sizes = [256, 8], strides = [1, 1]} : vector<320x8xf32> to vector<256x8xf32>
    %c0_15 = arith.constant 0 : index
    %c1_16 = arith.constant 1 : index
    %c0_17 = arith.constant 0 : index
    %c0_18 = arith.constant 0 : index
    %25 = vector.load %arg3[%c0_15, %c1_16, %c0_17, %c0_18] : memref<3x3x8x8xf32, #tpu.memory_space<vmem>>, vector<1x1x8x8xf32>
    %26 = vector.shape_cast %25 : vector<1x1x8x8xf32> to vector<8x8xf32>
    %cst_19 = arith.constant dense<0.000000e+00> : vector<256x8xf32>
    %27 = tpu.matmul %24, %26, %cst_19 {dimension_numbers = #tpu.dot_dimension_numbers<[1], [0], [0], [1], [0, 0, 1, 1], [], []>} : vector<256x8xf32>, vector<8x8xf32>, vector<256x8xf32> -> vector<256x8xf32>
    %28 = arith.addf %21, %27 : vector<256x8xf32>
    %29 = vector.extract_strided_slice %23 {offsets = [32, 0], sizes = [256, 8], strides = [1, 1]} : vector<320x8xf32> to vector<256x8xf32>
    %c1_20 = arith.constant 1 : index
    %c1_21 = arith.constant 1 : index
    %c0_22 = arith.constant 0 : index
    %c0_23 = arith.constant 0 : index
    %30 = vector.load %arg3[%c1_20, %c1_21, %c0_22, %c0_23] : memref<3x3x8x8xf32, #tpu.memory_space<vmem>>, vector<1x1x8x8xf32>
    %31 = vector.shape_cast %30 : vector<1x1x8x8xf32> to vector<8x8xf32>
    %cst_24 = arith.constant dense<0.000000e+00> : vector<256x8xf32>
    %32 = tpu.matmul %29, %31, %cst_24 {dimension_numbers = #tpu.dot_dimension_numbers<[1], [0], [0], [1], [0, 0, 1, 1], [], []>} : vector<256x8xf32>, vector<8x8xf32>, vector<256x8xf32> -> vector<256x8xf32>
    %33 = arith.addf %28, %32 : vector<256x8xf32>
    %34 = vector.extract_strided_slice %23 {offsets = [64, 0], sizes = [256, 8], strides = [1, 1]} : vector<320x8xf32> to vector<256x8xf32>
    %c2_25 = arith.constant 2 : index
    %c1_26 = arith.constant 1 : index
    %c0_27 = arith.constant 0 : index
    %c0_28 = arith.constant 0 : index
    %35 = vector.load %arg3[%c2_25, %c1_26, %c0_27, %c0_28] : memref<3x3x8x8xf32, #tpu.memory_space<vmem>>, vector<1x1x8x8xf32>
    %36 = vector.shape_cast %35 : vector<1x1x8x8xf32> to vector<8x8xf32>
    %cst_29 = arith.constant dense<0.000000e+00> : vector<256x8xf32>
    %37 = tpu.matmul %34, %36, %cst_29 {dimension_numbers = #tpu.dot_dimension_numbers<[1], [0], [0], [1], [0, 0, 1, 1], [], []>} : vector<256x8xf32>, vector<8x8xf32>, vector<256x8xf32> -> vector<256x8xf32>
    %38 = arith.addf %33, %37 : vector<256x8xf32>
    %39 = vector.extract_strided_slice %3 {offsets = [0, 2, 0], sizes = [10, 32, 8], strides = [1, 1, 1]} : vector<10x34x8xf32> to vector<10x32x8xf32>
    %40 = vector.shape_cast %39 : vector<10x32x8xf32> to vector<320x8xf32>
    %41 = vector.extract_strided_slice %40 {offsets = [0, 0], sizes = [256, 8], strides = [1, 1]} : vector<320x8xf32> to vector<256x8xf32>
    %c0_30 = arith.constant 0 : index
    %c2_31 = arith.constant 2 : index
    %c0_32 = arith.constant 0 : index
    %c0_33 = arith.constant 0 : index
    %42 = vector.load %arg3[%c0_30, %c2_31, %c0_32, %c0_33] : memref<3x3x8x8xf32, #tpu.memory_space<vmem>>, vector<1x1x8x8xf32>
    %43 = vector.shape_cast %42 : vector<1x1x8x8xf32> to vector<8x8xf32>
    %cst_34 = arith.constant dense<0.000000e+00> : vector<256x8xf32>
    %44 = tpu.matmul %41, %43, %cst_34 {dimension_numbers = #tpu.dot_dimension_numbers<[1], [0], [0], [1], [0, 0, 1, 1], [], []>} : vector<256x8xf32>, vector<8x8xf32>, vector<256x8xf32> -> vector<256x8xf32>
    %45 = arith.addf %38, %44 : vector<256x8xf32>
    %46 = vector.extract_strided_slice %40 {offsets = [32, 0], sizes = [256, 8], strides = [1, 1]} : vector<320x8xf32> to vector<256x8xf32>
    %c1_35 = arith.constant 1 : index
    %c2_36 = arith.constant 2 : index
    %c0_37 = arith.constant 0 : index
    %c0_38 = arith.constant 0 : index
    %47 = vector.load %arg3[%c1_35, %c2_36, %c0_37, %c0_38] : memref<3x3x8x8xf32, #tpu.memory_space<vmem>>, vector<1x1x8x8xf32>
    %48 = vector.shape_cast %47 : vector<1x1x8x8xf32> to vector<8x8xf32>
    %cst_39 = arith.constant dense<0.000000e+00> : vector<256x8xf32>
    %49 = tpu.matmul %46, %48, %cst_39 {dimension_numbers = #tpu.dot_dimension_numbers<[1], [0], [0], [1], [0, 0, 1, 1], [], []>} : vector<256x8xf32>, vector<8x8xf32>, vector<256x8xf32> -> vector<256x8xf32>
    %50 = arith.addf %45, %49 : vector<256x8xf32>
    %51 = vector.extract_strided_slice %40 {offsets = [64, 0], sizes = [256, 8], strides = [1, 1]} : vector<320x8xf32> to vector<256x8xf32>
    %c2_40 = arith.constant 2 : index
    %c2_41 = arith.constant 2 : index
    %c0_42 = arith.constant 0 : index
    %c0_43 = arith.constant 0 : index
    %52 = vector.load %arg3[%c2_40, %c2_41, %c0_42, %c0_43] : memref<3x3x8x8xf32, #tpu.memory_space<vmem>>, vector<1x1x8x8xf32>
    %53 = vector.shape_cast %52 : vector<1x1x8x8xf32> to vector<8x8xf32>
    %cst_44 = arith.constant dense<0.000000e+00> : vector<256x8xf32>
    %54 = tpu.matmul %51, %53, %cst_44 {dimension_numbers = #tpu.dot_dimension_numbers<[1], [0], [0], [1], [0, 0, 1, 1], [], []>} : vector<256x8xf32>, vector<8x8xf32>, vector<256x8xf32> -> vector<256x8xf32>
    %55 = arith.addf %50, %54 : vector<256x8xf32>
    %56 = vector.shape_cast %55 : vector<256x8xf32> to vector<1x8x32x8xf32>
    %c0_45 = arith.constant 0 : index
    %c0_46 = arith.constant 0 : index
    %c0_47 = arith.constant 0 : index
    %c0_48 = arith.constant 0 : index
    %57 = vector.load %arg4[%c0_45, %c0_46, %c0_47, %c0_48] : memref<1x8x32x8xf32, #tpu.memory_space<vmem>>, vector<1x8x32x8xf32>
    tpu.vector_store %arg4[%c0_45, %c0_46, %c0_47, %c0_48], %56 {strides = array<i32>} : memref<1x8x32x8xf32, #tpu.memory_space<vmem>>, vector<1x8x32x8xf32>,
    return
  }
  func.func @transform_0(%arg0: i32, %arg1: i32) -> (i32, i32, i32, i32) {
    %c0_i32 = arith.constant 0 : i32
    %c0_i32_0 = arith.constant 0 : i32
    %c0_i32_1 = arith.constant 0 : i32
    %c0_i32_2 = arith.constant 0 : i32
    return %arg0, %c0_i32, %c0_i32_0, %c0_i32_1 : i32, i32, i32, i32
  }
  func.func @transform_1(%arg0: i32, %arg1: i32) -> (i32, i32, i32, i32) {
    %c0_i32 = arith.constant 0 : i32
    %c0_i32_0 = arith.constant 0 : i32
    %c0_i32_1 = arith.constant 0 : i32
    %c0_i32_2 = arith.constant 0 : i32
    %c0_i32_3 = arith.constant 0 : i32
    return %c0_i32, %c0_i32_0, %c0_i32_1, %c0_i32_2 : i32, i32, i32, i32
  }
  func.func @transform_2(%arg0: i32, %arg1: i32) -> (i32, i32, i32, i32) {
    %c0_i32 = arith.constant 0 : i32
    %c0_i32_0 = arith.constant 0 : i32
    %c0_i32_1 = arith.constant 0 : i32
    return %arg0, %arg1, %c0_i32, %c0_i32_0 : i32, i32, i32, i32
  }
}

module attributes {stable_mosaic.version = 11 : i64} {
  func.func @_conv3x3_kernel(%arg0: i32, %arg1: i32, %arg2: memref<1x34x34x16xf32, #tpu.memory_space<vmem>>, %arg3: memref<3x3x16x16xf32, #tpu.memory_space<vmem>>, %arg4: memref<1x8x32x16xf32, #tpu.memory_space<vmem>>) attributes {dimension_semantics = [#tpu.dimension_semantics<parallel>, #tpu.dimension_semantics<arbitrary>], iteration_bounds = array<i64: 2, 4>, scalar_prefetch = 0 : i64, scratch_operands = 0 : i64, tpu.core_type = #tpu.core_type<tc>, window_params = [{transform_indices = @transform_0, window_bounds = array<i64: 1, 34, 34, 16>}, {pipeline_mode = #tpu.pipeline_mode<synchronous>, transform_indices = @transform_1, window_bounds = array<i64: 3, 3, 16, 16>}, {transform_indices = @transform_2, window_bounds = array<i64: 1, 8, 32, 16>}]} {
    %c8_i32 = arith.constant 8 : i32
    %0 = arith.muli %arg1, %c8_i32 : i32
    %c0 = arith.constant 0 : index
    %1 = arith.index_cast %0 : i32 to index
    %c0_0 = arith.constant 0 : index
    %c0_1 = arith.constant 0 : index
    %2 = vector.load %arg2[%c0, %1, %c0_0, %c0_1] : memref<1x34x34x16xf32, #tpu.memory_space<vmem>>, vector<1x10x34x16xf32>
    %3 = vector.shape_cast %2 : vector<1x10x34x16xf32> to vector<10x34x16xf32>
    %cst = arith.constant 0.000000e+00 : f32
    %4 = vector.broadcast %cst : f32 to vector<256x16xf32>
    %5 = vector.extract_strided_slice %3 {offsets = [0, 0, 0], sizes = [10, 32, 16], strides = [1, 1, 1]} : vector<10x34x16xf32> to vector<10x32x16xf32>
    %6 = vector.shape_cast %5 : vector<10x32x16xf32> to vector<320x16xf32>
    %7 = vector.extract_strided_slice %6 {offsets = [0, 0], sizes = [256, 16], strides = [1, 1]} : vector<320x16xf32> to vector<256x16xf32>
    %c0_2 = arith.constant 0 : index
    %c0_3 = arith.constant 0 : index
    %c0_4 = arith.constant 0 : index
    %c0_5 = arith.constant 0 : index
    %8 = vector.load %arg3[%c0_2, %c0_3, %c0_4, %c0_5] : memref<3x3x16x16xf32, #tpu.memory_space<vmem>>, vector<1x1x16x16xf32>
    %9 = vector.shape_cast %8 : vector<1x1x16x16xf32> to vector<16x16xf32>
    %cst_6 = arith.constant dense<0.000000e+00> : vector<256x16xf32>
    %10 = tpu.matmul %7, %9, %cst_6 {dimension_numbers = #tpu.dot_dimension_numbers<[1], [0], [0], [1], [0, 0, 1, 1], [], []>} : vector<256x16xf32>, vector<16x16xf32>, vector<256x16xf32> -> vector<256x16xf32>
    %11 = arith.addf %4, %10 : vector<256x16xf32>
    %12 = vector.extract_strided_slice %6 {offsets = [32, 0], sizes = [256, 16], strides = [1, 1]} : vector<320x16xf32> to vector<256x16xf32>
    %c1 = arith.constant 1 : index
    %c0_7 = arith.constant 0 : index
    %c0_8 = arith.constant 0 : index
    %c0_9 = arith.constant 0 : index
    %13 = vector.load %arg3[%c1, %c0_7, %c0_8, %c0_9] : memref<3x3x16x16xf32, #tpu.memory_space<vmem>>, vector<1x1x16x16xf32>
    %14 = vector.shape_cast %13 : vector<1x1x16x16xf32> to vector<16x16xf32>
    %cst_10 = arith.constant dense<0.000000e+00> : vector<256x16xf32>
    %15 = tpu.matmul %12, %14, %cst_10 {dimension_numbers = #tpu.dot_dimension_numbers<[1], [0], [0], [1], [0, 0, 1, 1], [], []>} : vector<256x16xf32>, vector<16x16xf32>, vector<256x16xf32> -> vector<256x16xf32>
    %16 = arith.addf %11, %15 : vector<256x16xf32>
    %17 = vector.extract_strided_slice %6 {offsets = [64, 0], sizes = [256, 16], strides = [1, 1]} : vector<320x16xf32> to vector<256x16xf32>
    %c2 = arith.constant 2 : index
    %c0_11 = arith.constant 0 : index
    %c0_12 = arith.constant 0 : index
    %c0_13 = arith.constant 0 : index
    %18 = vector.load %arg3[%c2, %c0_11, %c0_12, %c0_13] : memref<3x3x16x16xf32, #tpu.memory_space<vmem>>, vector<1x1x16x16xf32>
    %19 = vector.shape_cast %18 : vector<1x1x16x16xf32> to vector<16x16xf32>
    %cst_14 = arith.constant dense<0.000000e+00> : vector<256x16xf32>
    %20 = tpu.matmul %17, %19, %cst_14 {dimension_numbers = #tpu.dot_dimension_numbers<[1], [0], [0], [1], [0, 0, 1, 1], [], []>} : vector<256x16xf32>, vector<16x16xf32>, vector<256x16xf32> -> vector<256x16xf32>
    %21 = arith.addf %16, %20 : vector<256x16xf32>
    %22 = vector.extract_strided_slice %3 {offsets = [0, 1, 0], sizes = [10, 32, 16], strides = [1, 1, 1]} : vector<10x34x16xf32> to vector<10x32x16xf32>
    %23 = vector.shape_cast %22 : vector<10x32x16xf32> to vector<320x16xf32>
    %24 = vector.extract_strided_slice %23 {offsets = [0, 0], sizes = [256, 16], strides = [1, 1]} : vector<320x16xf32> to vector<256x16xf32>
    %c0_15 = arith.constant 0 : index
    %c1_16 = arith.constant 1 : index
    %c0_17 = arith.constant 0 : index
    %c0_18 = arith.constant 0 : index
    %25 = vector.load %arg3[%c0_15, %c1_16, %c0_17, %c0_18] : memref<3x3x16x16xf32, #tpu.memory_space<vmem>>, vector<1x1x16x16xf32>
    %26 = vector.shape_cast %25 : vector<1x1x16x16xf32> to vector<16x16xf32>
    %cst_19 = arith.constant dense<0.000000e+00> : vector<256x16xf32>
    %27 = tpu.matmul %24, %26, %cst_19 {dimension_numbers = #tpu.dot_dimension_numbers<[1], [0], [0], [1], [0, 0, 1, 1], [], []>} : vector<256x16xf32>, vector<16x16xf32>, vector<256x16xf32> -> vector<256x16xf32>
    %28 = arith.addf %21, %27 : vector<256x16xf32>
    %29 = vector.extract_strided_slice %23 {offsets = [32, 0], sizes = [256, 16], strides = [1, 1]} : vector<320x16xf32> to vector<256x16xf32>
    %c1_20 = arith.constant 1 : index
    %c1_21 = arith.constant 1 : index
    %c0_22 = arith.constant 0 : index
    %c0_23 = arith.constant 0 : index
    %30 = vector.load %arg3[%c1_20, %c1_21, %c0_22, %c0_23] : memref<3x3x16x16xf32, #tpu.memory_space<vmem>>, vector<1x1x16x16xf32>
    %31 = vector.shape_cast %30 : vector<1x1x16x16xf32> to vector<16x16xf32>
    %cst_24 = arith.constant dense<0.000000e+00> : vector<256x16xf32>
    %32 = tpu.matmul %29, %31, %cst_24 {dimension_numbers = #tpu.dot_dimension_numbers<[1], [0], [0], [1], [0, 0, 1, 1], [], []>} : vector<256x16xf32>, vector<16x16xf32>, vector<256x16xf32> -> vector<256x16xf32>
    %33 = arith.addf %28, %32 : vector<256x16xf32>
    %34 = vector.extract_strided_slice %23 {offsets = [64, 0], sizes = [256, 16], strides = [1, 1]} : vector<320x16xf32> to vector<256x16xf32>
    %c2_25 = arith.constant 2 : index
    %c1_26 = arith.constant 1 : index
    %c0_27 = arith.constant 0 : index
    %c0_28 = arith.constant 0 : index
    %35 = vector.load %arg3[%c2_25, %c1_26, %c0_27, %c0_28] : memref<3x3x16x16xf32, #tpu.memory_space<vmem>>, vector<1x1x16x16xf32>
    %36 = vector.shape_cast %35 : vector<1x1x16x16xf32> to vector<16x16xf32>
    %cst_29 = arith.constant dense<0.000000e+00> : vector<256x16xf32>
    %37 = tpu.matmul %34, %36, %cst_29 {dimension_numbers = #tpu.dot_dimension_numbers<[1], [0], [0], [1], [0, 0, 1, 1], [], []>} : vector<256x16xf32>, vector<16x16xf32>, vector<256x16xf32> -> vector<256x16xf32>
    %38 = arith.addf %33, %37 : vector<256x16xf32>
    %39 = vector.extract_strided_slice %3 {offsets = [0, 2, 0], sizes = [10, 32, 16], strides = [1, 1, 1]} : vector<10x34x16xf32> to vector<10x32x16xf32>
    %40 = vector.shape_cast %39 : vector<10x32x16xf32> to vector<320x16xf32>
    %41 = vector.extract_strided_slice %40 {offsets = [0, 0], sizes = [256, 16], strides = [1, 1]} : vector<320x16xf32> to vector<256x16xf32>
    %c0_30 = arith.constant 0 : index
    %c2_31 = arith.constant 2 : index
    %c0_32 = arith.constant 0 : index
    %c0_33 = arith.constant 0 : index
    %42 = vector.load %arg3[%c0_30, %c2_31, %c0_32, %c0_33] : memref<3x3x16x16xf32, #tpu.memory_space<vmem>>, vector<1x1x16x16xf32>
    %43 = vector.shape_cast %42 : vector<1x1x16x16xf32> to vector<16x16xf32>
    %cst_34 = arith.constant dense<0.000000e+00> : vector<256x16xf32>
    %44 = tpu.matmul %41, %43, %cst_34 {dimension_numbers = #tpu.dot_dimension_numbers<[1], [0], [0], [1], [0, 0, 1, 1], [], []>} : vector<256x16xf32>, vector<16x16xf32>, vector<256x16xf32> -> vector<256x16xf32>
    %45 = arith.addf %38, %44 : vector<256x16xf32>
    %46 = vector.extract_strided_slice %40 {offsets = [32, 0], sizes = [256, 16], strides = [1, 1]} : vector<320x16xf32> to vector<256x16xf32>
    %c1_35 = arith.constant 1 : index
    %c2_36 = arith.constant 2 : index
    %c0_37 = arith.constant 0 : index
    %c0_38 = arith.constant 0 : index
    %47 = vector.load %arg3[%c1_35, %c2_36, %c0_37, %c0_38] : memref<3x3x16x16xf32, #tpu.memory_space<vmem>>, vector<1x1x16x16xf32>
    %48 = vector.shape_cast %47 : vector<1x1x16x16xf32> to vector<16x16xf32>
    %cst_39 = arith.constant dense<0.000000e+00> : vector<256x16xf32>
    %49 = tpu.matmul %46, %48, %cst_39 {dimension_numbers = #tpu.dot_dimension_numbers<[1], [0], [0], [1], [0, 0, 1, 1], [], []>} : vector<256x16xf32>, vector<16x16xf32>, vector<256x16xf32> -> vector<256x16xf32>
    %50 = arith.addf %45, %49 : vector<256x16xf32>
    %51 = vector.extract_strided_slice %40 {offsets = [64, 0], sizes = [256, 16], strides = [1, 1]} : vector<320x16xf32> to vector<256x16xf32>
    %c2_40 = arith.constant 2 : index
    %c2_41 = arith.constant 2 : index
    %c0_42 = arith.constant 0 : index
    %c0_43 = arith.constant 0 : index
    %52 = vector.load %arg3[%c2_40, %c2_41, %c0_42, %c0_43] : memref<3x3x16x16xf32, #tpu.memory_space<vmem>>, vector<1x1x16x16xf32>
    %53 = vector.shape_cast %52 : vector<1x1x16x16xf32> to vector<16x16xf32>
    %cst_44 = arith.constant dense<0.000000e+00> : vector<256x16xf32>
    %54 = tpu.matmul %51, %53, %cst_44 {dimension_numbers = #tpu.dot_dimension_numbers<[1], [0], [0], [1], [0, 0, 1, 1], [], []>} : vector<256x16xf32>, vector<16x16xf32>, vector<256x16xf32> -> vector<256x16xf32>
    %55 = arith.addf %50, %54 : vector<256x16xf32>
    %56 = vector.shape_cast %55 : vector<256x16xf32> to vector<1x8x32x16xf32>
    %c0_45 = arith.constant 0 : index
    %c0_46 = arith.constant 0 : index
    %c0_47 = arith.constant 0 : index
    %c0_48 = arith.constant 0 : index
    %57 = vector.load %arg4[%c0_45, %c0_46, %c0_47, %c0_48] : memref<1x8x32x16xf32, #tpu.memory_space<vmem>>, vector<1x8x32x16xf32>
    tpu.vector_store %arg4[%c0_45, %c0_46, %c0_47, %c0_48], %56 {strides = array<i32>} : memref<1x8x32x16xf32, #tpu.memory_space<vmem>>, vector<1x8x32x16xf32>,
    return
  }
  func.func @transform_0(%arg0: i32, %arg1: i32) -> (i32, i32, i32, i32) {
    %c0_i32 = arith.constant 0 : i32
    %c0_i32_0 = arith.constant 0 : i32
    %c0_i32_1 = arith.constant 0 : i32
    %c0_i32_2 = arith.constant 0 : i32
    return %arg0, %c0_i32, %c0_i32_0, %c0_i32_1 : i32, i32, i32, i32
  }
  func.func @transform_1(%arg0: i32, %arg1: i32) -> (i32, i32, i32, i32) {
    %c0_i32 = arith.constant 0 : i32
    %c0_i32_0 = arith.constant 0 : i32
    %c0_i32_1 = arith.constant 0 : i32
    %c0_i32_2 = arith.constant 0 : i32
    %c0_i32_3 = arith.constant 0 : i32
    return %c0_i32, %c0_i32_0, %c0_i32_1, %c0_i32_2 : i32, i32, i32, i32
  }
  func.func @transform_2(%arg0: i32, %arg1: i32) -> (i32, i32, i32, i32) {
    %c0_i32 = arith.constant 0 : i32
    %c0_i32_0 = arith.constant 0 : i32
    %c0_i32_1 = arith.constant 0 : i32
    return %arg0, %arg1, %c0_i32, %c0_i32_0 : i32, i32, i32, i32
  }
}

module attributes {stable_mosaic.version = 11 : i64} {
  func.func @_final_kernel(%arg0: i32, %arg1: memref<512x16xf32, #tpu.memory_space<vmem>>, %arg2: memref<512x8xf32, #tpu.memory_space<vmem>>, %arg3: memref<512x64xf32, #tpu.memory_space<vmem>>, %arg4: memref<1x16xf32, #tpu.memory_space<vmem>>, %arg5: memref<1x16xf32, #tpu.memory_space<vmem>>, %arg6: memref<1x8xf32, #tpu.memory_space<vmem>>, %arg7: memref<1x8xf32, #tpu.memory_space<vmem>>, %arg8: memref<16x64xf32, #tpu.memory_space<vmem>>, %arg9: memref<8x64xf32, #tpu.memory_space<vmem>>, %arg10: memref<1x64xf32, #tpu.memory_space<vmem>>, %arg11: memref<1x64xf32, #tpu.memory_space<vmem>>, %arg12: memref<512x64xf32, #tpu.memory_space<vmem>>) attributes {dimension_semantics = [#tpu.dimension_semantics<parallel>], iteration_bounds = array<i64: 4>, scalar_prefetch = 0 : i64, scratch_operands = 0 : i64, tpu.core_type = #tpu.core_type<tc>, window_params = [{transform_indices = @transform_0, window_bounds = array<i64: 512, 16>}, {transform_indices = @transform_1, window_bounds = array<i64: 512, 8>}, {transform_indices = @transform_2, window_bounds = array<i64: 512, 64>}, {pipeline_mode = #tpu.pipeline_mode<synchronous>, transform_indices = @transform_3, window_bounds = array<i64: 1, 16>}, {pipeline_mode = #tpu.pipeline_mode<synchronous>, transform_indices = @transform_4, window_bounds = array<i64: 1, 16>}, {pipeline_mode = #tpu.pipeline_mode<synchronous>, transform_indices = @transform_5, window_bounds = array<i64: 1, 8>}, {pipeline_mode = #tpu.pipeline_mode<synchronous>, transform_indices = @transform_6, window_bounds = array<i64: 1, 8>}, {pipeline_mode = #tpu.pipeline_mode<synchronous>, transform_indices = @transform_7, window_bounds = array<i64: 16, 64>}, {pipeline_mode = #tpu.pipeline_mode<synchronous>, transform_indices = @transform_8, window_bounds = array<i64: 8, 64>}, {pipeline_mode = #tpu.pipeline_mode<synchronous>, transform_indices = @transform_9, window_bounds = array<i64: 1, 64>}, {pipeline_mode = #tpu.pipeline_mode<synchronous>, transform_indices = @transform_10, window_bounds = array<i64: 1, 64>}, {transform_indices = @transform_11, window_bounds = array<i64: 512, 64>}]} {
    %c0 = arith.constant 0 : index
    %c0_0 = arith.constant 0 : index
    %0 = vector.load %arg1[%c0, %c0_0] : memref<512x16xf32, #tpu.memory_space<vmem>>, vector<512x16xf32>
    %c0_1 = arith.constant 0 : index
    %c0_2 = arith.constant 0 : index
    %1 = vector.load %arg4[%c0_1, %c0_2] : memref<1x16xf32, #tpu.memory_space<vmem>>, vector<1x16xf32>
    %2 = vector.broadcast %1 : vector<1x16xf32> to vector<512x16xf32>
    %3 = arith.mulf %0, %2 : vector<512x16xf32>
    %c0_3 = arith.constant 0 : index
    %c0_4 = arith.constant 0 : index
    %4 = vector.load %arg5[%c0_3, %c0_4] : memref<1x16xf32, #tpu.memory_space<vmem>>, vector<1x16xf32>
    %5 = vector.broadcast %4 : vector<1x16xf32> to vector<512x16xf32>
    %6 = arith.addf %3, %5 : vector<512x16xf32>
    %cst = arith.constant 0.000000e+00 : f32
    %7 = vector.broadcast %cst : f32 to vector<512x16xf32>
    %8 = arith.maximumf %6, %7 : vector<512x16xf32>
    %c0_5 = arith.constant 0 : index
    %c0_6 = arith.constant 0 : index
    %9 = vector.load %arg2[%c0_5, %c0_6] : memref<512x8xf32, #tpu.memory_space<vmem>>, vector<512x8xf32>
    %c0_7 = arith.constant 0 : index
    %c0_8 = arith.constant 0 : index
    %10 = vector.load %arg6[%c0_7, %c0_8] : memref<1x8xf32, #tpu.memory_space<vmem>>, vector<1x8xf32>
    %11 = vector.broadcast %10 : vector<1x8xf32> to vector<512x8xf32>
    %12 = arith.mulf %9, %11 : vector<512x8xf32>
    %c0_9 = arith.constant 0 : index
    %c0_10 = arith.constant 0 : index
    %13 = vector.load %arg7[%c0_9, %c0_10] : memref<1x8xf32, #tpu.memory_space<vmem>>, vector<1x8xf32>
    %14 = vector.broadcast %13 : vector<1x8xf32> to vector<512x8xf32>
    %15 = arith.addf %12, %14 : vector<512x8xf32>
    %cst_11 = arith.constant 0.000000e+00 : f32
    %16 = vector.broadcast %cst_11 : f32 to vector<512x8xf32>
    %17 = arith.maximumf %15, %16 : vector<512x8xf32>
    %c0_12 = arith.constant 0 : index
    %c0_13 = arith.constant 0 : index
    %18 = vector.load %arg8[%c0_12, %c0_13] : memref<16x64xf32, #tpu.memory_space<vmem>>, vector<16x64xf32>
    %cst_14 = arith.constant dense<0.000000e+00> : vector<512x64xf32>
    %19 = tpu.matmul %8, %18, %cst_14 {dimension_numbers = #tpu.dot_dimension_numbers<[1], [0], [0], [1], [0, 0, 1, 1], [], []>} : vector<512x16xf32>, vector<16x64xf32>, vector<512x64xf32> -> vector<512x64xf32>
    %c0_15 = arith.constant 0 : index
    %c0_16 = arith.constant 0 : index
    %20 = vector.load %arg9[%c0_15, %c0_16] : memref<8x64xf32, #tpu.memory_space<vmem>>, vector<8x64xf32>
    %cst_17 = arith.constant dense<0.000000e+00> : vector<512x64xf32>
    %21 = tpu.matmul %17, %20, %cst_17 {dimension_numbers = #tpu.dot_dimension_numbers<[1], [0], [0], [1], [0, 0, 1, 1], [], []>} : vector<512x8xf32>, vector<8x64xf32>, vector<512x64xf32> -> vector<512x64xf32>
    %22 = arith.addf %19, %21 : vector<512x64xf32>
    %c0_18 = arith.constant 0 : index
    %c0_19 = arith.constant 0 : index
    %23 = vector.load %arg10[%c0_18, %c0_19] : memref<1x64xf32, #tpu.memory_space<vmem>>, vector<1x64xf32>
    %24 = vector.broadcast %23 : vector<1x64xf32> to vector<512x64xf32>
    %25 = arith.mulf %22, %24 : vector<512x64xf32>
    %c0_20 = arith.constant 0 : index
    %c0_21 = arith.constant 0 : index
    %26 = vector.load %arg11[%c0_20, %c0_21] : memref<1x64xf32, #tpu.memory_space<vmem>>, vector<1x64xf32>
    %27 = vector.broadcast %26 : vector<1x64xf32> to vector<512x64xf32>
    %28 = arith.addf %25, %27 : vector<512x64xf32>
    %c0_22 = arith.constant 0 : index
    %c0_23 = arith.constant 0 : index
    %29 = vector.load %arg3[%c0_22, %c0_23] : memref<512x64xf32, #tpu.memory_space<vmem>>, vector<512x64xf32>
    %30 = arith.addf %28, %29 : vector<512x64xf32>
    %cst_24 = arith.constant 0.000000e+00 : f32
    %31 = vector.broadcast %cst_24 : f32 to vector<512x64xf32>
    %32 = arith.maximumf %30, %31 : vector<512x64xf32>
    %c0_25 = arith.constant 0 : index
    %c0_26 = arith.constant 0 : index
    %33 = vector.load %arg12[%c0_25, %c0_26] : memref<512x64xf32, #tpu.memory_space<vmem>>, vector<512x64xf32>
    tpu.vector_store %arg12[%c0_25, %c0_26], %32 {strides = array<i32>} : memref<512x64xf32, #tpu.memory_space<vmem>>, vector<512x64xf32>,
    return
  }
  func.func @transform_0(%arg0: i32) -> (i32, i32) {
    %c0_i32 = arith.constant 0 : i32
    %c0_i32_0 = arith.constant 0 : i32
    return %arg0, %c0_i32 : i32, i32
  }
  func.func @transform_1(%arg0: i32) -> (i32, i32) {
    %c0_i32 = arith.constant 0 : i32
    %c0_i32_0 = arith.constant 0 : i32
    return %arg0, %c0_i32 : i32, i32
  }
  func.func @transform_2(%arg0: i32) -> (i32, i32) {
    %c0_i32 = arith.constant 0 : i32
    %c0_i32_0 = arith.constant 0 : i32
    return %arg0, %c0_i32 : i32, i32
  }
  func.func @transform_3(%arg0: i32) -> (i32, i32) {
    %c0_i32 = arith.constant 0 : i32
    %c0_i32_0 = arith.constant 0 : i32
    %c0_i32_1 = arith.constant 0 : i32
    return %c0_i32, %c0_i32_0 : i32, i32
  }
  func.func @transform_4(%arg0: i32) -> (i32, i32) {
    %c0_i32 = arith.constant 0 : i32
    %c0_i32_0 = arith.constant 0 : i32
    %c0_i32_1 = arith.constant 0 : i32
    return %c0_i32, %c0_i32_0 : i32, i32
  }
  func.func @transform_5(%arg0: i32) -> (i32, i32) {
    %c0_i32 = arith.constant 0 : i32
    %c0_i32_0 = arith.constant 0 : i32
    %c0_i32_1 = arith.constant 0 : i32
    return %c0_i32, %c0_i32_0 : i32, i32
  }
  func.func @transform_6(%arg0: i32) -> (i32, i32) {
    %c0_i32 = arith.constant 0 : i32
    %c0_i32_0 = arith.constant 0 : i32
    %c0_i32_1 = arith.constant 0 : i32
    return %c0_i32, %c0_i32_0 : i32, i32
  }
  func.func @transform_7(%arg0: i32) -> (i32, i32) {
    %c0_i32 = arith.constant 0 : i32
    %c0_i32_0 = arith.constant 0 : i32
    %c0_i32_1 = arith.constant 0 : i32
    return %c0_i32, %c0_i32_0 : i32, i32
  }
  func.func @transform_8(%arg0: i32) -> (i32, i32) {
    %c0_i32 = arith.constant 0 : i32
    %c0_i32_0 = arith.constant 0 : i32
    %c0_i32_1 = arith.constant 0 : i32
    return %c0_i32, %c0_i32_0 : i32, i32
  }
  func.func @transform_9(%arg0: i32) -> (i32, i32) {
    %c0_i32 = arith.constant 0 : i32
    %c0_i32_0 = arith.constant 0 : i32
    %c0_i32_1 = arith.constant 0 : i32
    return %c0_i32, %c0_i32_0 : i32, i32
  }
  func.func @transform_10(%arg0: i32) -> (i32, i32) {
    %c0_i32 = arith.constant 0 : i32
    %c0_i32_0 = arith.constant 0 : i32
    %c0_i32_1 = arith.constant 0 : i32
    return %c0_i32, %c0_i32_0 : i32, i32
  }
  func.func @transform_11(%arg0: i32) -> (i32, i32) {
    %c0_i32 = arith.constant 0 : i32
    %c0_i32_0 = arith.constant 0 : i32
    return %arg0, %c0_i32 : i32, i32
  }
}

</mosaic_0001>

<bundles_post_ra>
// kernel: aligned_bottleneck_pallas.5
= control target key start
LH: loop header
LB: loop body
LE: loop exit
PB: predicated region body
PF: predicated region fallthrough
CT: control target
= control target key end

     0   :  { %9 = vsyncpa [#allocation3], 0  ;;  %s2160_s0 = inlined_call_operand.hbm [shape: f32[2048,64], index: 0, kind: input, shape index: {}]   ;;  %s2161_s1 = inlined_call_operand.vmem [shape: f32[64,24], index: 1, kind: input, shape index: {}]   ;;  %s2162_s2 = inlined_call_operand.vmem [shape: f32[1,24], index: 2, kind: input, shape index: {}]   ;;  %s2163_s3 = inlined_call_operand.vmem [shape: f32[1,24], index: 3, kind: input, shape index: {}]   ;;  %s2164_s4 = inlined_call_operand.vmem [shape: f32[2048,24], index: 4, kind: output, shape index: {}]  }
   0x1   :  { %11 = vsyncpa [#allocation3 + $0x1], 0  ;;  %s1631_s15 = smov 0   ;;  %s1633_s16 = smov 0  }
   0x2   :  { %s1635_s17 = smov 0   ;;  %s1637_s18 = smov 0  }
   0x3 LB: > { %s1208_s19 = sadd.s32 4294967295, %s1601_s18   ;;  %s1651_s20 = sadd.s32 1, %s1601_s18   ;;  %s1601_s18 = sphi %s1637_s18, %s2171_s18   ;;  %s1597_s17 = sphi %s1635_s17, %s2170_s17   ;;  %s1593_s16 = sphi %s1633_s16, %s2169_s16   ;;  %s1589_s15 = sphi %s1631_s15, %s2168_s15  }
   0x4   : > { %s21_s21 = ssub.s32 %s1601_s18, %s1651_s20  ;;  %s24_s22 = sadd.s32 1, %s1597_s17 }
   0x5   : > { %p22_p0 = scmp.eq.s32.totalorder %s21_s21, 0  ;;  %p31_p1 = scmp.ne.s32.totalorder %s1597_s17, %s1593_s16 }
   0x6   : > { %p32_p2 = scmp.eq.s32.totalorder %s1601_s18, 0  ;;  %p37_p3 = scmp.ne.s32.totalorder %s1593_s16, %s1589_s15 }
   0x7   : > { %s1661_s23 = scalar_select %p22_p0, %s1597_s17, %s24_s22  }
   0x8   : > { %p33_p4 = por %p32_p2, %p31_p1  ;;  %p38_p5 = scmp.eq.s32.totalorder %s1208_s19, 0 }
   0x9   : > { %p1502_p6 = scmp.lt.s32.totalorder %s1601_s18, 4  ;;  %s159_s25 = sand.u32 1, %s1597_s17  }
   0xa   : > { %p1666_p7 = por %p38_p5, %p37_p3  ;;  %s1212_s26 = sshll.u32 %s159_s25, 9 }
   0xb   : > { %s1287_s27 = sshll.u32 %s1601_s18, 13  ;;  %s163_s5 = scalar_lea.vmem [#allocation2], %s1212_s26 }
   0xc   : > { %s1675_s30 = scalar_lea.hbm %s2160_s0, %s1287_s27  ;;  %s170_s6 = sshll.u32 %s163_s5, 4  ;;  %s1677_s6 = int_to_ptr.vmem [resolvable:$true] %s170_s6 }
   0xd   : > { %p1679_p8 = pnand %p1502_p6, %p33_p4  ;;  %s1684_s8 = scalar_lea.sflag [#allocation3], %s159_s25 }
   0xe   : > { %s1537_s9 = scalar_lea.hbm %s1675_s30, 8192  ;;  %s1542_s12 = scalar_lea.hbm %s2160_s0, 32768 }
   0xf   : > { %p1538_p10 = scmp.ne.s32.totalorder %s1675_s30, %s1537_s9  ;;  %p1539_p11 = pneg %p1679_p8 }
  0x10   : > { %p1543_p0 = scmp.lt.u32.totalorder %s1675_s30, %s2160_s0  ;;  %p1544_p1 = scmp.lt.u32.totalorder %s1542_s12, %s1537_s9 }
  0x11   : > { %p1540_p12 = pnand %p1539_p11, %p1538_p10  ;;  %p1546_p3 = scmp.lt.u32.totalorder %s1537_s9, %s1675_s30 }
  0x12   : > { %p1545_p2 = por %p1544_p1, %p1543_p0 }
  0x13   : > { %p1541_p13 = pneg %p1540_p12 }
  0x14   : > { %p1547_p4 = por %p1546_p3, %p1545_p2 }
  0x16   : > { %p1548_p5 = pnand %p1547_p4, %p1541_p13 }
  0x18   : > { %1551 = shalt.err (!%p1548_p5)
}
  0x19   : > { %s1552_s15 = scalar_lea.vmem %s1677_s6, 8192  ;;  %s1603_s21 = smov [#allocation2]  }
  0x1a   : > { %p1553_p6 = scmp.ne.s32.totalorder %s1677_s6, %s1552_s15  ;;  %s1557_s22 = sshll.u32 %s1603_s21, 4  ;;  %s1558_s22 = int_to_ptr.vmem [resolvable:$false] %s1557_s22 }
  0x1b   : > { %s1559_s25 = scalar_lea.vmem %s1558_s22, 16384  ;;  %p1560_p9 = scmp.lt.s32.totalorder %s1677_s6, %s1558_s22 }
  0x1c   : > { %p1555_p10 = pnand %p1553_p6, %p1539_p11  ;;  %p1561_p0 = scmp.lt.s32.totalorder %s1559_s25, %s1552_s15 }
  0x1e   : > { %p1556_p12 = pneg %p1555_p10  ;;  %p1562_p1 = por %p1561_p0, %p1560_p9 }
  0x20   : > { %p1563_p2 = pnand %p1562_p1, %p1556_p12 }
  0x22   : > { %1566 = shalt.err (!%p1563_p2)
}
  0x23   : > { %s1604_s26 = smov 128   ;;  %s1605_s27 = smov 8  }
  0x24   : > { %1501 = dma.hbm_to_vmem [thread:$0]  (!%p1679_p8), %s1675_s30, 8192, %s1677_s6, %s1684_s8, %s1604_s26, %s1604_s26, %s1605_s27  }
  0x25   : > { %p178_p11 = scmp.lt.s32.totalorder %s1601_s18, 5  ;;  %p2167_p13 = scmp.ge.s32.totalorder %s1601_s18, 1 }
  0x27   : > { %p179_p3 = pnand %p2167_p13, %p178_p11 }
  0x28   : > { %s184_s28 = sand.u32 (!%p179_p3), 1, %s1593_s16  }
  0x29   : > { %182 = sbr.rel (%p179_p3) target bundleno = 348 (0x15c), region = 36  ;;  %s1216_s29 = sshll.u32 (!%p179_p3), %s184_s28, 9 }
  0x2a   : > { %s185_s5 = scalar_lea.sflag (!%p179_p3), [#allocation3], %s184_s28  ;;  %s1716_s9 = scalar_lea.vmem (!%p179_p3), [#allocation2], %s1216_s29 }
  0x30   : > { %1584 = dma.done.wait (%p1666_p7), %s185_s5, 8192  }
  0x31   : > { %1586 = vsyncadd (%p1666_p7), %s185_s5, 4294959104  ;;  %v284_v0 = vld [vmem:[%s2161_s1] sm:$0xff]  ;;  %v285_v1 = vld [vmem:[%s2161_s1 + $0x8] sm:$0xff]  ;;  %vm292_vm0 = vcmask 523264   ;;  %s1217_s28 = sshll.u32 %s1208_s19, 6  ;;  %vm1076_vm1 = vcmask 195584  }
  0x32   : > { %v286_v2 = vld [vmem:[%s2161_s1 + $0x10] sm:$0xff]  ;;  %v1472_v3 = vpack.c.bf16 %v285_v1, %v284_v0  ;;  %v287_v4 = vld [vmem:[%s2161_s1 + $0x18] sm:$0xff]  ;;  %v288_v6 = vld [vmem:[%s2161_s1 + $0x20] sm:$0xff]  ;;  %p215_p7 = scmp.lt.s32.totalorder %s1217_s28, 255 }
  0x33   : > { %v1476_v5 = vpack.c.bf16 %v287_v4, %v286_v2  ;;  %v289_v7 = vld [vmem:[%s2161_s1 + $0x28] sm:$0xff]  ;;  %v220_v8 = vld [vmem:[%s1716_s9] sm:$0xff]  ;;  %v290_v11 = vld [vmem:[%s2161_s1 + $0x30] sm:$0xff] }
  0x34   : > { %1473 = vmatprep.subr.bf16.mxu0 %v1472_v3  ;;  %1488 = vmatprep.subr.bf16.mxu1 %v1472_v3  ;;  %v252_v9 = vld [vmem:[%s1716_s9 + $0x100] sm:$0xff]  ;;  %v1480_v10 = vpack.c.bf16 %v289_v7, %v288_v6  ;;  %v291_v12 = vld [vmem:[%s2161_s1 + $0x38] sm:$0xff]  ;;  %v221_v14 = vld [vmem:[%s1716_s9 + $0x8] sm:$0xff]  ;;  %s2173_s28 = smov (!%p215_p7, %s1217_s28), 255 }
  0x35   : > { %1475 = vmatpush3.bf16.msra.mxu0 %v1472_v3  ;;  %1492 = vmatpush3.bf16.msra.mxu1 %v1472_v3  ;;  %v1484_v13 = vpack.c.bf16 %v291_v12, %v290_v11  ;;  %v253_v15 = vld [vmem:[%s1716_s9 + $0x108] sm:$0xff]  ;;  %v222_v16 = vld [vmem:[%s1716_s9 + $0x10] sm:$0xff]  ;;  %v223_v18 = vld [vmem:[%s1716_s9 + $0x18] sm:$0xff] }
  0x36   : > { %1477 = vmatprep.subr.bf16.mxu0 %v1476_v5  ;;  %1489 = vmatprep.subr.bf16.mxu1 %v1476_v5  ;;  %v254_v17 = vld [vmem:[%s1716_s9 + $0x110] sm:$0xff]  ;;  %v255_v19 = vld [vmem:[%s1716_s9 + $0x118] sm:$0xff]  ;;  %v224_v20 = vld [vmem:[%s1716_s9 + $0x20] sm:$0xff] }
  0x37   : > { %1376 = vmatprep.mubr.msk.f32.mxu0 %vm292_vm0, %v220_v8  ;;  %1424 = vmatprep.mubr.msk.f32.mxu1 %vm292_vm0, %v252_v9  ;;  %v256_v21 = vld [vmem:[%s1716_s9 + $0x120] sm:$0xff]  ;;  %v225_v22 = vld [vmem:[%s1716_s9 + $0x28] sm:$0xff]  ;;  %v226_v24 = vld [vmem:[%s1716_s9 + $0x30] sm:$0xff] }
  0x38   : > { %v257_v23 = vld [vmem:[%s1716_s9 + $0x128] sm:$0xff]  ;;  %v258_v25 = vld [vmem:[%s1716_s9 + $0x130] sm:$0xff]  ;;  %v227_v26 = vld [vmem:[%s1716_s9 + $0x38] sm:$0xff] }
  0x39   : > { %1479 = vmatpush3.bf16.msra.mxu0 %v1476_v5  ;;  %1493 = vmatpush3.bf16.msra.mxu1 %v1476_v5  ;;  %v259_v27 = vld [vmem:[%s1716_s9 + $0x138] sm:$0xff]  ;;  %v228_v28 = vld [vmem:[%s1716_s9 + $0x40] sm:$0xff]  ;;  %v229_v30 = vld [vmem:[%s1716_s9 + $0x48] sm:$0xff] }
  0x3a   : > { %1481 = vmatprep.subr.bf16.mxu0 %v1480_v10  ;;  %1490 = vmatprep.subr.bf16.mxu1 %v1480_v10  ;;  %v260_v29 = vld [vmem:[%s1716_s9 + $0x140] sm:$0xff]  ;;  %v261_v31 = vld [vmem:[%s1716_s9 + $0x148] sm:$0xff]  ;;  %v230_v32 = vld [vmem:[%s1716_s9 + $0x50] sm:$0xff] }
  0x3b   : > { %v262_v33 = vld [vmem:[%s1716_s9 + $0x150] sm:$0xff]  ;;  %v231_v34 = vld [vmem:[%s1716_s9 + $0x58] sm:$0xff]  ;;  %v232_v36 = vld [vmem:[%s1716_s9 + $0x60] sm:$0xff] }
  0x3c   : > { %v263_v35 = vld [vmem:[%s1716_s9 + $0x158] sm:$0xff]  ;;  %v264_v37 = vld [vmem:[%s1716_s9 + $0x160] sm:$0xff]  ;;  %v233_v38 = vld [vmem:[%s1716_s9 + $0x68] sm:$0xff] }
  0x3d   : > { %1483 = vmatpush3.bf16.msra.mxu0 %v1480_v10  ;;  %1494 = vmatpush3.bf16.msra.mxu1 %v1480_v10  ;;  %v265_v39 = vld [vmem:[%s1716_s9 + $0x168] sm:$0xff]  ;;  %v234_v40 = vld [vmem:[%s1716_s9 + $0x70] sm:$0xff]  ;;  %v235_v42 = vld [vmem:[%s1716_s9 + $0x78] sm:$0xff] }
  0x3e   : > { %1485 = vmatprep.subr.bf16.mxu0 %v1484_v13  ;;  %1491 = vmatprep.subr.bf16.mxu1 %v1484_v13  ;;  %v266_v41 = vld [vmem:[%s1716_s9 + $0x170] sm:$0xff]  ;;  %v267_v43 = vld [vmem:[%s1716_s9 + $0x178] sm:$0xff]  ;;  %v236_v44 = vld [vmem:[%s1716_s9 + $0x80] sm:$0xff] }
  0x3f   : > { %v268_v45 = vld [vmem:[%s1716_s9 + $0x180] sm:$0xff]  ;;  %v237_v46 = vld [vmem:[%s1716_s9 + $0x88] sm:$0xff]  ;;  %v238_v48 = vld [vmem:[%s1716_s9 + $0x90] sm:$0xff] }
  0x40   : > { %v269_v47 = vld [vmem:[%s1716_s9 + $0x188] sm:$0xff]  ;;  %v270_v49 = vld [vmem:[%s1716_s9 + $0x190] sm:$0xff]  ;;  %v239_v50 = vld [vmem:[%s1716_s9 + $0x98] sm:$0xff] }
  0x41   : > { %1487 = vmatpush3.bf16.msra.mxu0 %v1484_v13  ;;  %1495 = vmatpush3.bf16.msra.mxu1 %v1484_v13  ;;  %v271_v51 = vld [vmem:[%s1716_s9 + $0x198] sm:$0xff]  ;;  %v240_v52 = vld [vmem:[%s1716_s9 + $0xa0] sm:$0xff]  ;;  %v241_v54 = vld [vmem:[%s1716_s9 + $0xa8] sm:$0xff] }
  0x42   : > { %v272_v53 = vld [vmem:[%s1716_s9 + $0x1a0] sm:$0xff]  ;;  %v273_v55 = vld [vmem:[%s1716_s9 + $0x1a8] sm:$0xff]  ;;  %v242_v56 = vld [vmem:[%s1716_s9 + $0xb0] sm:$0xff] }
  0x43   : > { %v274_v57 = vld [vmem:[%s1716_s9 + $0x1b0] sm:$0xff]  ;;  %v243_v58 = vld [vmem:[%s1716_s9 + $0xb8] sm:$0xff]  ;;  %v244_v60 = vld [vmem:[%s1716_s9 + $0xc0] sm:$0xff] }
  0x44   : > { %1377 = vmatmul.mubr.msk.f32.vlgmr.msra.gmra.mrb[0].mxu0 %vm292_vm0, %v221_v14  ;;  %1425 = vmatmul.mubr.msk.f32.vlgmr.msra.gmra.mrb[0].mxu1 %vm292_vm0, %v253_v15  ;;  %v275_v59 = vld [vmem:[%s1716_s9 + $0x1b8] sm:$0xff]  ;;  %v276_v61 = vld [vmem:[%s1716_s9 + $0x1c0] sm:$0xff]  ;;  %v245_v62 = vld [vmem:[%s1716_s9 + $0xc8] sm:$0xff] }
  0x45   : > { %1379 = vmatprep.mubr.msk.f32.mxu0 %vm292_vm0, %v222_v16  ;;  %1427 = vmatprep.mubr.msk.f32.mxu1 %vm292_vm0, %v254_v17  ;;  %v277_v63 = vld [vmem:[%s1716_s9 + $0x1c8] sm:$0xff]  ;;  %v246_v0 = vld [vmem:[%s1716_s9 + $0xd0] sm:$0xff]  ;;  %v247_v2 = vld [vmem:[%s1716_s9 + $0xd8] sm:$0xff] }
  0x46   : > { %v278_v1 = vld [vmem:[%s1716_s9 + $0x1d0] sm:$0xff]  ;;  %v279_v3 = vld [vmem:[%s1716_s9 + $0x1d8] sm:$0xff]  ;;  %v248_v4 = vld [vmem:[%s1716_s9 + $0xe0] sm:$0xff] }
  0x47   : > { %v280_v5 = vld [vmem:[%s1716_s9 + $0x1e0] sm:$0xff]  ;;  %v249_v6 = vld [vmem:[%s1716_s9 + $0xe8] sm:$0xff]  ;;  %v250_v8 = vld [vmem:[%s1716_s9 + $0xf0] sm:$0xff] }
  0x48   : > { %1380 = vmatmul.mubr.msk.f32.gmra.mrb[2].mxu0 %vm292_vm0, %v223_v18  ;;  %1428 = vmatmul.mubr.msk.f32.gmra.mrb[2].mxu1 %vm292_vm0, %v255_v19  ;;  %v281_v7 = vld [vmem:[%s1716_s9 + $0x1e8] sm:$0xff]  ;;  %v282_v9 = vld [vmem:[%s1716_s9 + $0x1f0] sm:$0xff]  ;;  %v251_v10 = vld [vmem:[%s1716_s9 + $0xf8] sm:$0xff] }
  0x49   : > { %1382 = vmatprep.mubr.msk.f32.mxu0 %vm292_vm0, %v224_v20  ;;  %1430 = vmatprep.mubr.msk.f32.mxu1 %vm292_vm0, %v256_v21  ;;  %v283_v11 = vld [vmem:[%s1716_s9 + $0x1f8] sm:$0xff]  ;;  %v1879_v12 = vld [vmem:[%s2162_s2] ss:$0 sm:$0xff]  ;;  %s1218_s9 = sshll.u32 %s2173_s28, 3 }
  0x4a   : > { %v1884_v14 = vld [vmem:[%s2163_s3] ss:$0 sm:$0xff]  ;;  %s1895_s30 = scalar_lea.vmem %s2164_s4, %s1218_s9 }
  0x4c   : > { %1383 = vmatmul.mubr.msk.f32.gmra.mrb[4].mxu0 %vm292_vm0, %v225_v22  ;;  %1431 = vmatmul.mubr.msk.f32.gmra.mrb[4].mxu1 %vm292_vm0, %v257_v23 }
  0x4d   : > { %1385 = vmatprep.mubr.msk.f32.mxu0 %vm292_vm0, %v226_v24  ;;  %1433 = vmatprep.mubr.msk.f32.mxu1 %vm292_vm0, %v258_v25 }
  0x50   : > { %1386 = vmatmul.mubr.msk.f32.gmra.mrb[6].mxu0 %vm292_vm0, %v227_v26  ;;  %1434 = vmatmul.mubr.msk.f32.gmra.mrb[6].mxu1 %vm292_vm0, %v259_v27 }
  0x51   : > { %1388 = vmatprep.mubr.msk.f32.mxu0 %vm292_vm0, %v228_v28  ;;  %1436 = vmatprep.mubr.msk.f32.mxu1 %vm292_vm0, %v260_v29 }
  0x54   : > { %1389 = vmatmul.mubr.msk.f32.gmra.mrb[8].mxu0 %vm292_vm0, %v229_v30  ;;  %1437 = vmatmul.mubr.msk.f32.gmra.mrb[8].mxu1 %vm292_vm0, %v261_v31 }
  0x55   : > { %1391 = vmatprep.mubr.msk.f32.mxu0 %vm292_vm0, %v230_v32  ;;  %1439 = vmatprep.mubr.msk.f32.mxu1 %vm292_vm0, %v262_v33 }
  0x58   : > { %1392 = vmatmul.mubr.msk.f32.gmra.mrb[10].mxu0 %vm292_vm0, %v231_v34  ;;  %1440 = vmatmul.mubr.msk.f32.gmra.mrb[10].mxu1 %vm292_vm0, %v263_v35 }
  0x59   : > { %1394 = vmatprep.mubr.msk.f32.mxu0 %vm292_vm0, %v232_v36  ;;  %1442 = vmatprep.mubr.msk.f32.mxu1 %vm292_vm0, %v264_v37 }
  0x5c   : > { %1395 = vmatmul.mubr.msk.f32.gmra.mrb[12].mxu0 %vm292_vm0, %v233_v38  ;;  %1443 = vmatmul.mubr.msk.f32.gmra.mrb[12].mxu1 %vm292_vm0, %v265_v39 }
  0x5d   : > { %1397 = vmatprep.mubr.msk.f32.mxu0 %vm292_vm0, %v234_v40  ;;  %1445 = vmatprep.mubr.msk.f32.mxu1 %vm292_vm0, %v266_v41 }
  0x60   : > { %1398 = vmatmul.mubr.msk.f32.gmra.mrb[14].mxu0 %vm292_vm0, %v235_v42  ;;  %1446 = vmatmul.mubr.msk.f32.gmra.mrb[14].mxu1 %vm292_vm0, %v267_v43 }
  0x61   : > { %1400 = vmatprep.mubr.msk.f32.mxu0 %vm292_vm0, %v236_v44  ;;  %1448 = vmatprep.mubr.msk.f32.mxu1 %vm292_vm0, %v268_v45 }
  0x64   : > { %1401 = vmatmul.mubr.msk.f32.gmra.mrb[16].mxu0 %vm292_vm0, %v237_v46  ;;  %1449 = vmatmul.mubr.msk.f32.gmra.mrb[16].mxu1 %vm292_vm0, %v269_v47 }
  0x65   : > { %1403 = vmatprep.mubr.msk.f32.mxu0 %vm292_vm0, %v238_v48  ;;  %1451 = vmatprep.mubr.msk.f32.mxu1 %vm292_vm0, %v270_v49 }
  0x68   : > { %1404 = vmatmul.mubr.msk.f32.gmra.mrb[18].mxu0 %vm292_vm0, %v239_v50  ;;  %1452 = vmatmul.mubr.msk.f32.gmra.mrb[18].mxu1 %vm292_vm0, %v271_v51 }
  0x69   : > { %1406 = vmatprep.mubr.msk.f32.mxu0 %vm292_vm0, %v240_v52  ;;  %1454 = vmatprep.mubr.msk.f32.mxu1 %vm292_vm0, %v272_v53 }
  0x6c   : > { %1407 = vmatmul.mubr.msk.f32.gmra.mrb[20].mxu0 %vm292_vm0, %v241_v54  ;;  %1455 = vmatmul.mubr.msk.f32.gmra.mrb[20].mxu1 %vm292_vm0, %v273_v55 }
  0x6d   : > { %1409 = vmatprep.mubr.msk.f32.mxu0 %vm292_vm0, %v242_v56  ;;  %1457 = vmatprep.mubr.msk.f32.mxu1 %vm292_vm0, %v274_v57 }
  0x70   : > { %1410 = vmatmul.mubr.msk.f32.gmra.mrb[22].mxu0 %vm292_vm0, %v243_v58  ;;  %1458 = vmatmul.mubr.msk.f32.gmra.mrb[22].mxu1 %vm292_vm0, %v275_v59 }
  0x71   : > { %1412 = vmatprep.mubr.msk.f32.mxu0 %vm292_vm0, %v244_v60  ;;  %1460 = vmatprep.mubr.msk.f32.mxu1 %vm292_vm0, %v276_v61 }
  0x74   : > { %1413 = vmatmul.mubr.msk.f32.gmra.mrb[24].mxu0 %vm292_vm0, %v245_v62  ;;  %1461 = vmatmul.mubr.msk.f32.gmra.mrb[24].mxu1 %vm292_vm0, %v277_v63 }
  0x75   : > { %1415 = vmatprep.mubr.msk.f32.mxu0 %vm292_vm0, %v246_v0  ;;  %1463 = vmatprep.mubr.msk.f32.mxu1 %vm292_vm0, %v278_v1 }
  0x78   : > { %1416 = vmatmul.mubr.msk.f32.gmra.mrb[26].mxu0 %vm292_vm0, %v247_v2  ;;  %1464 = vmatmul.mubr.msk.f32.gmra.mrb[26].mxu1 %vm292_vm0, %v279_v3 }
  0x79   : > { %1418 = vmatprep.mubr.msk.f32.mxu0 %vm292_vm0, %v248_v4  ;;  %1466 = vmatprep.mubr.msk.f32.mxu1 %vm292_vm0, %v280_v5 }
  0x7c   : > { %1419 = vmatmul.mubr.msk.f32.gmra.mrb[28].mxu0 %vm292_vm0, %v249_v6  ;;  %1467 = vmatmul.mubr.msk.f32.gmra.mrb[28].mxu1 %vm292_vm0, %v281_v7 }
  0x7d   : > { %1421 = vmatprep.mubr.msk.f32.mxu0 %vm292_vm0, %v250_v8  ;;  %1469 = vmatprep.mubr.msk.f32.mxu1 %vm292_vm0, %v282_v9 }
  0x80   : > { %1422 = vmatmul.mubr.msk.f32.gmra.mrb[30].mxu0 %vm292_vm0, %v251_v10  ;;  %1470 = vmatmul.mubr.msk.f32.gmra.mrb[30].mxu1 %vm292_vm0, %v283_v11 }
 0x117   : > { %v1378_v13 = vpop.f32.mrb[0].mxu0  ;;  %v1426_v15 = vpop.f32.mrb[0].mxu1 }
 0x118   : > { %v878_v16 = vmul.f32 %v1378_v13, %v1879_v12  ;;  %v910_v17 = vmul.f32 %v1426_v15, %v1879_v12  ;;  %v551_v18 = vpop.f32.mrb[1].mxu0  ;;  %v711_v19 = vpop.f32.mrb[1].mxu1 }
 0x119   : > { %v877_v20 = vmul.f32 %v1879_v12, %v551_v18  ;;  %v909_v21 = vmul.f32 %v1879_v12, %v711_v19 }
 0x11a   : > { %v949_v22 = vadd.f32 %v1884_v14, %v878_v16  ;;  %v981_v23 = vadd.f32 %v1884_v14, %v910_v17 }
 0x11b   : > { %v948_v24 = vadd.f32 %v1884_v14, %v877_v20  ;;  %v980_v25 = vadd.f32 %v1884_v14, %v909_v21  ;;  %v1381_v26 = vpop.f32.mrb[2].mxu0  ;;  %v1429_v27 = vpop.f32.mrb[2].mxu1 }
 0x11c   : > { %v1013_v28 = vmax.f32 %v949_v22, 0.0  ;;  %v1045_v29 = vmax.f32 %v981_v23, 0.0  ;;  %v880_v30 = vmul.f32 %v1381_v26, %v1879_v12  ;;  %v912_v31 = vmul.f32 %v1429_v27, %v1879_v12  ;;  %v561_v32 = vpop.f32.mrb[3].mxu0  ;;  %v721_v33 = vpop.f32.mrb[3].mxu1 }
 0x11d   : > { %v1012_v34 = vmax.f32 %v948_v24, 0.0  ;;  %v1044_v35 = vmax.f32 %v980_v25, 0.0  ;;  %v879_v36 = vmul.f32 %v1879_v12, %v561_v32  ;;  %v911_v37 = vmul.f32 %v1879_v12, %v721_v33 }
 0x11e   : > { %1078 = vst.msk [vmem:[%s1895_s30 + $0x8] sm:$0xff] %vm1076_vm1, %v1013_v28  ;;  %1110 = vst.msk [vmem:[%s1895_s30 + $0x108] sm:$0xff] %vm1076_vm1, %v1045_v29  ;;  %v951_v38 = vadd.f32 %v1884_v14, %v880_v30  ;;  %v983_v39 = vadd.f32 %v1884_v14, %v912_v31 }
 0x11f   : > { %1077 = vst.msk [vmem:[%s1895_s30] sm:$0xff] %vm1076_vm1, %v1012_v34  ;;  %1109 = vst.msk [vmem:[%s1895_s30 + $0x100] sm:$0xff] %vm1076_vm1, %v1044_v35  ;;  %v950_v40 = vadd.f32 %v1884_v14, %v879_v36  ;;  %v982_v41 = vadd.f32 %v1884_v14, %v911_v37  ;;  %v1384_v42 = vpop.f32.mrb[4].mxu0  ;;  %v1432_v43 = vpop.f32.mrb[4].mxu1 }
 0x120   : > { %v1015_v44 = vmax.f32 %v951_v38, 0.0  ;;  %v1047_v45 = vmax.f32 %v983_v39, 0.0  ;;  %v882_v46 = vmul.f32 %v1384_v42, %v1879_v12  ;;  %v914_v47 = vmul.f32 %v1432_v43, %v1879_v12  ;;  %v571_v48 = vpop.f32.mrb[5].mxu0  ;;  %v731_v49 = vpop.f32.mrb[5].mxu1 }
 0x121   : > { %v1014_v50 = vmax.f32 %v950_v40, 0.0  ;;  %v1046_v51 = vmax.f32 %v982_v41, 0.0  ;;  %v881_v52 = vmul.f32 %v1879_v12, %v571_v48  ;;  %v913_v53 = vmul.f32 %v1879_v12, %v731_v49 }
 0x122   : > { %1080 = vst.msk [vmem:[%s1895_s30 + $0x18] sm:$0xff] %vm1076_vm1, %v1015_v44  ;;  %1112 = vst.msk [vmem:[%s1895_s30 + $0x118] sm:$0xff] %vm1076_vm1, %v1047_v45  ;;  %v953_v54 = vadd.f32 %v1884_v14, %v882_v46  ;;  %v985_v55 = vadd.f32 %v1884_v14, %v914_v47 }
 0x123   : > { %1079 = vst.msk [vmem:[%s1895_s30 + $0x10] sm:$0xff] %vm1076_vm1, %v1014_v50  ;;  %1111 = vst.msk [vmem:[%s1895_s30 + $0x110] sm:$0xff] %vm1076_vm1, %v1046_v51  ;;  %v952_v56 = vadd.f32 %v1884_v14, %v881_v52  ;;  %v984_v57 = vadd.f32 %v1884_v14, %v913_v53  ;;  %v1387_v58 = vpop.f32.mrb[6].mxu0  ;;  %v1435_v59 = vpop.f32.mrb[6].mxu1 }
 0x124   : > { %v1017_v60 = vmax.f32 %v953_v54, 0.0  ;;  %v1049_v61 = vmax.f32 %v985_v55, 0.0  ;;  %v884_v62 = vmul.f32 %v1387_v58, %v1879_v12  ;;  %v916_v63 = vmul.f32 %v1435_v59, %v1879_v12  ;;  %v581_v0 = vpop.f32.mrb[7].mxu0  ;;  %v741_v1 = vpop.f32.mrb[7].mxu1 }
 0x125   : > { %v1016_v2 = vmax.f32 %v952_v56, 0.0  ;;  %v1048_v3 = vmax.f32 %v984_v57, 0.0  ;;  %v883_v4 = vmul.f32 %v1879_v12, %v581_v0  ;;  %v915_v5 = vmul.f32 %v1879_v12, %v741_v1 }
 0x126   : > { %1082 = vst.msk [vmem:[%s1895_s30 + $0x28] sm:$0xff] %vm1076_vm1, %v1017_v60  ;;  %1114 = vst.msk [vmem:[%s1895_s30 + $0x128] sm:$0xff] %vm1076_vm1, %v1049_v61  ;;  %v955_v6 = vadd.f32 %v1884_v14, %v884_v62  ;;  %v987_v7 = vadd.f32 %v1884_v14, %v916_v63 }
 0x127   : > { %1081 = vst.msk [vmem:[%s1895_s30 + $0x20] sm:$0xff] %vm1076_vm1, %v1016_v2  ;;  %1113 = vst.msk [vmem:[%s1895_s30 + $0x120] sm:$0xff] %vm1076_vm1, %v1048_v3  ;;  %v954_v8 = vadd.f32 %v1884_v14, %v883_v4  ;;  %v986_v9 = vadd.f32 %v1884_v14, %v915_v5  ;;  %v1390_v10 = vpop.f32.mrb[8].mxu0  ;;  %v1438_v11 = vpop.f32.mrb[8].mxu1 }
 0x128   : > { %v1019_v13 = vmax.f32 %v955_v6, 0.0  ;;  %v1051_v15 = vmax.f32 %v987_v7, 0.0  ;;  %v886_v16 = vmul.f32 %v1390_v10, %v1879_v12  ;;  %v918_v17 = vmul.f32 %v1438_v11, %v1879_v12  ;;  %v591_v18 = vpop.f32.mrb[9].mxu0  ;;  %v751_v19 = vpop.f32.mrb[9].mxu1 }
 0x129   : > { %v1018_v20 = vmax.f32 %v954_v8, 0.0  ;;  %v1050_v21 = vmax.f32 %v986_v9, 0.0  ;;  %v885_v22 = vmul.f32 %v1879_v12, %v591_v18  ;;  %v917_v23 = vmul.f32 %v1879_v12, %v751_v19 }
 0x12a   : > { %1084 = vst.msk [vmem:[%s1895_s30 + $0x38] sm:$0xff] %vm1076_vm1, %v1019_v13  ;;  %1116 = vst.msk [vmem:[%s1895_s30 + $0x138] sm:$0xff] %vm1076_vm1, %v1051_v15  ;;  %v957_v24 = vadd.f32 %v1884_v14, %v886_v16  ;;  %v989_v25 = vadd.f32 %v1884_v14, %v918_v17 }
 0x12b   : > { %1083 = vst.msk [vmem:[%s1895_s30 + $0x30] sm:$0xff] %vm1076_vm1, %v1018_v20  ;;  %1115 = vst.msk [vmem:[%s1895_s30 + $0x130] sm:$0xff] %vm1076_vm1, %v1050_v21  ;;  %v956_v26 = vadd.f32 %v1884_v14, %v885_v22  ;;  %v988_v27 = vadd.f32 %v1884_v14, %v917_v23  ;;  %v1393_v28 = vpop.f32.mrb[10].mxu0  ;;  %v1441_v29 = vpop.f32.mrb[10].mxu1 }
 0x12c   : > { %v1021_v30 = vmax.f32 %v957_v24, 0.0  ;;  %v1053_v31 = vmax.f32 %v989_v25, 0.0  ;;  %v888_v32 = vmul.f32 %v1393_v28, %v1879_v12  ;;  %v920_v33 = vmul.f32 %v1441_v29, %v1879_v12  ;;  %v601_v34 = vpop.f32.mrb[11].mxu0  ;;  %v761_v35 = vpop.f32.mrb[11].mxu1 }
 0x12d   : > { %v1020_v36 = vmax.f32 %v956_v26, 0.0  ;;  %v1052_v37 = vmax.f32 %v988_v27, 0.0  ;;  %v887_v38 = vmul.f32 %v1879_v12, %v601_v34  ;;  %v919_v39 = vmul.f32 %v1879_v12, %v761_v35 }
 0x12e   : > { %1086 = vst.msk [vmem:[%s1895_s30 + $0x48] sm:$0xff] %vm1076_vm1, %v1021_v30  ;;  %1118 = vst.msk [vmem:[%s1895_s30 + $0x148] sm:$0xff] %vm1076_vm1, %v1053_v31  ;;  %v959_v40 = vadd.f32 %v1884_v14, %v888_v32  ;;  %v991_v41 = vadd.f32 %v1884_v14, %v920_v33 }
 0x12f   : > { %1085 = vst.msk [vmem:[%s1895_s30 + $0x40] sm:$0xff] %vm1076_vm1, %v1020_v36  ;;  %1117 = vst.msk [vmem:[%s1895_s30 + $0x140] sm:$0xff] %vm1076_vm1, %v1052_v37  ;;  %v958_v42 = vadd.f32 %v1884_v14, %v887_v38  ;;  %v990_v43 = vadd.f32 %v1884_v14, %v919_v39  ;;  %v1396_v44 = vpop.f32.mrb[12].mxu0  ;;  %v1444_v45 = vpop.f32.mrb[12].mxu1 }
 0x130   : > { %v1023_v46 = vmax.f32 %v959_v40, 0.0  ;;  %v1055_v47 = vmax.f32 %v991_v41, 0.0  ;;  %v890_v48 = vmul.f32 %v1396_v44, %v1879_v12  ;;  %v922_v49 = vmul.f32 %v1444_v45, %v1879_v12  ;;  %v611_v50 = vpop.f32.mrb[13].mxu0  ;;  %v771_v51 = vpop.f32.mrb[13].mxu1 }
 0x131   : > { %v1022_v52 = vmax.f32 %v958_v42, 0.0  ;;  %v1054_v53 = vmax.f32 %v990_v43, 0.0  ;;  %v889_v54 = vmul.f32 %v1879_v12, %v611_v50  ;;  %v921_v55 = vmul.f32 %v1879_v12, %v771_v51 }
 0x132   : > { %1088 = vst.msk [vmem:[%s1895_s30 + $0x58] sm:$0xff] %vm1076_vm1, %v1023_v46  ;;  %1120 = vst.msk [vmem:[%s1895_s30 + $0x158] sm:$0xff] %vm1076_vm1, %v1055_v47  ;;  %v961_v56 = vadd.f32 %v1884_v14, %v890_v48  ;;  %v993_v57 = vadd.f32 %v1884_v14, %v922_v49 }
 0x133   : > { %1087 = vst.msk [vmem:[%s1895_s30 + $0x50] sm:$0xff] %vm1076_vm1, %v1022_v52  ;;  %1119 = vst.msk [vmem:[%s1895_s30 + $0x150] sm:$0xff] %vm1076_vm1, %v1054_v53  ;;  %v960_v58 = vadd.f32 %v1884_v14, %v889_v54  ;;  %v992_v59 = vadd.f32 %v1884_v14, %v921_v55  ;;  %v1399_v60 = vpop.f32.mrb[14].mxu0  ;;  %v1447_v61 = vpop.f32.mrb[14].mxu1 }
 0x134   : > { %v1025_v62 = vmax.f32 %v961_v56, 0.0  ;;  %v1057_v63 = vmax.f32 %v993_v57, 0.0  ;;  %v892_v0 = vmul.f32 %v1399_v60, %v1879_v12  ;;  %v924_v1 = vmul.f32 %v1447_v61, %v1879_v12  ;;  %v621_v2 = vpop.f32.mrb[15].mxu0  ;;  %v781_v3 = vpop.f32.mrb[15].mxu1 }
 0x135   : > { %v1024_v4 = vmax.f32 %v960_v58, 0.0  ;;  %v1056_v5 = vmax.f32 %v992_v59, 0.0  ;;  %v891_v6 = vmul.f32 %v1879_v12, %v621_v2  ;;  %v923_v7 = vmul.f32 %v1879_v12, %v781_v3 }
 0x136   : > { %1090 = vst.msk [vmem:[%s1895_s30 + $0x68] sm:$0xff] %vm1076_vm1, %v1025_v62  ;;  %1122 = vst.msk [vmem:[%s1895_s30 + $0x168] sm:$0xff] %vm1076_vm1, %v1057_v63  ;;  %v963_v8 = vadd.f32 %v1884_v14, %v892_v0  ;;  %v995_v9 = vadd.f32 %v1884_v14, %v924_v1 }
 0x137   : > { %1089 = vst.msk [vmem:[%s1895_s30 + $0x60] sm:$0xff] %vm1076_vm1, %v1024_v4  ;;  %1121 = vst.msk [vmem:[%s1895_s30 + $0x160] sm:$0xff] %vm1076_vm1, %v1056_v5  ;;  %v962_v10 = vadd.f32 %v1884_v14, %v891_v6  ;;  %v994_v11 = vadd.f32 %v1884_v14, %v923_v7  ;;  %v1402_v13 = vpop.f32.mrb[16].mxu0  ;;  %v1450_v15 = vpop.f32.mrb[16].mxu1 }
 0x138   : > { %v1027_v16 = vmax.f32 %v963_v8, 0.0  ;;  %v1059_v17 = vmax.f32 %v995_v9, 0.0  ;;  %v894_v18 = vmul.f32 %v1402_v13, %v1879_v12  ;;  %v926_v19 = vmul.f32 %v1450_v15, %v1879_v12  ;;  %v631_v20 = vpop.f32.mrb[17].mxu0  ;;  %v791_v21 = vpop.f32.mrb[17].mxu1 }
 0x139   : > { %v1026_v22 = vmax.f32 %v962_v10, 0.0  ;;  %v1058_v23 = vmax.f32 %v994_v11, 0.0  ;;  %v893_v24 = vmul.f32 %v1879_v12, %v631_v20  ;;  %v925_v25 = vmul.f32 %v1879_v12, %v791_v21 }
 0x13a   : > { %1092 = vst.msk [vmem:[%s1895_s30 + $0x78] sm:$0xff] %vm1076_vm1, %v1027_v16  ;;  %1124 = vst.msk [vmem:[%s1895_s30 + $0x178] sm:$0xff] %vm1076_vm1, %v1059_v17  ;;  %v965_v26 = vadd.f32 %v1884_v14, %v894_v18  ;;  %v997_v27 = vadd.f32 %v1884_v14, %v926_v19 }
 0x13b   : > { %1091 = vst.msk [vmem:[%s1895_s30 + $0x70] sm:$0xff] %vm1076_vm1, %v1026_v22  ;;  %1123 = vst.msk [vmem:[%s1895_s30 + $0x170] sm:$0xff] %vm1076_vm1, %v1058_v23  ;;  %v964_v28 = vadd.f32 %v1884_v14, %v893_v24  ;;  %v996_v29 = vadd.f32 %v1884_v14, %v925_v25  ;;  %v1405_v30 = vpop.f32.mrb[18].mxu0  ;;  %v1453_v31 = vpop.f32.mrb[18].mxu1 }
 0x13c   : > { %v1029_v32 = vmax.f32 %v965_v26, 0.0  ;;  %v1061_v33 = vmax.f32 %v997_v27, 0.0  ;;  %v896_v34 = vmul.f32 %v1405_v30, %v1879_v12  ;;  %v928_v35 = vmul.f32 %v1453_v31, %v1879_v12  ;;  %v641_v36 = vpop.f32.mrb[19].mxu0  ;;  %v801_v37 = vpop.f32.mrb[19].mxu1 }
 0x13d   : > { %v1028_v38 = vmax.f32 %v964_v28, 0.0  ;;  %v1060_v39 = vmax.f32 %v996_v29, 0.0  ;;  %v895_v40 = vmul.f32 %v1879_v12, %v641_v36  ;;  %v927_v41 = vmul.f32 %v1879_v12, %v801_v37 }
 0x13e   : > { %1094 = vst.msk [vmem:[%s1895_s30 + $0x88] sm:$0xff] %vm1076_vm1, %v1029_v32  ;;  %1126 = vst.msk [vmem:[%s1895_s30 + $0x188] sm:$0xff] %vm1076_vm1, %v1061_v33  ;;  %v967_v42 = vadd.f32 %v1884_v14, %v896_v34  ;;  %v999_v43 = vadd.f32 %v1884_v14, %v928_v35 }
 0x13f   : > { %1093 = vst.msk [vmem:[%s1895_s30 + $0x80] sm:$0xff] %vm1076_vm1, %v1028_v38  ;;  %1125 = vst.msk [vmem:[%s1895_s30 + $0x180] sm:$0xff] %vm1076_vm1, %v1060_v39  ;;  %v966_v44 = vadd.f32 %v1884_v14, %v895_v40  ;;  %v998_v45 = vadd.f32 %v1884_v14, %v927_v41  ;;  %v1408_v46 = vpop.f32.mrb[20].mxu0  ;;  %v1456_v47 = vpop.f32.mrb[20].mxu1 }
 0x140   : > { %v1031_v48 = vmax.f32 %v967_v42, 0.0  ;;  %v1063_v49 = vmax.f32 %v999_v43, 0.0  ;;  %v898_v50 = vmul.f32 %v1408_v46, %v1879_v12  ;;  %v930_v51 = vmul.f32 %v1456_v47, %v1879_v12  ;;  %v651_v52 = vpop.f32.mrb[21].mxu0  ;;  %v811_v53 = vpop.f32.mrb[21].mxu1 }
 0x141   : > { %v1030_v54 = vmax.f32 %v966_v44, 0.0  ;;  %v1062_v55 = vmax.f32 %v998_v45, 0.0  ;;  %v897_v56 = vmul.f32 %v1879_v12, %v651_v52  ;;  %v929_v57 = vmul.f32 %v1879_v12, %v811_v53 }
 0x142   : > { %1096 = vst.msk [vmem:[%s1895_s30 + $0x98] sm:$0xff] %vm1076_vm1, %v1031_v48  ;;  %1128 = vst.msk [vmem:[%s1895_s30 + $0x198] sm:$0xff] %vm1076_vm1, %v1063_v49  ;;  %v969_v58 = vadd.f32 %v1884_v14, %v898_v50  ;;  %v1001_v59 = vadd.f32 %v1884_v14, %v930_v51 }
 0x143   : > { %1095 = vst.msk [vmem:[%s1895_s30 + $0x90] sm:$0xff] %vm1076_vm1, %v1030_v54  ;;  %1127 = vst.msk [vmem:[%s1895_s30 + $0x190] sm:$0xff] %vm1076_vm1, %v1062_v55  ;;  %v968_v60 = vadd.f32 %v1884_v14, %v897_v56  ;;  %v1000_v61 = vadd.f32 %v1884_v14, %v929_v57  ;;  %v1411_v62 = vpop.f32.mrb[22].mxu0  ;;  %v1459_v63 = vpop.f32.mrb[22].mxu1 }
 0x144   : > { %v1033_v0 = vmax.f32 %v969_v58, 0.0  ;;  %v1065_v1 = vmax.f32 %v1001_v59, 0.0  ;;  %v900_v2 = vmul.f32 %v1411_v62, %v1879_v12  ;;  %v932_v3 = vmul.f32 %v1459_v63, %v1879_v12  ;;  %v661_v4 = vpop.f32.mrb[23].mxu0  ;;  %v821_v5 = vpop.f32.mrb[23].mxu1 }
 0x145   : > { %v1032_v6 = vmax.f32 %v968_v60, 0.0  ;;  %v1064_v7 = vmax.f32 %v1000_v61, 0.0  ;;  %v899_v8 = vmul.f32 %v1879_v12, %v661_v4  ;;  %v931_v9 = vmul.f32 %v1879_v12, %v821_v5 }
 0x146   : > { %1098 = vst.msk [vmem:[%s1895_s30 + $0xa8] sm:$0xff] %vm1076_vm1, %v1033_v0  ;;  %1130 = vst.msk [vmem:[%s1895_s30 + $0x1a8] sm:$0xff] %vm1076_vm1, %v1065_v1  ;;  %v971_v10 = vadd.f32 %v1884_v14, %v900_v2  ;;  %v1003_v11 = vadd.f32 %v1884_v14, %v932_v3 }
 0x147   : > { %1097 = vst.msk [vmem:[%s1895_s30 + $0xa0] sm:$0xff] %vm1076_vm1, %v1032_v6  ;;  %1129 = vst.msk [vmem:[%s1895_s30 + $0x1a0] sm:$0xff] %vm1076_vm1, %v1064_v7  ;;  %v970_v13 = vadd.f32 %v1884_v14, %v899_v8  ;;  %v1002_v15 = vadd.f32 %v1884_v14, %v931_v9  ;;  %v1414_v16 = vpop.f32.mrb[24].mxu0  ;;  %v1462_v17 = vpop.f32.mrb[24].mxu1 }
 0x148   : > { %v1035_v18 = vmax.f32 %v971_v10, 0.0  ;;  %v1067_v19 = vmax.f32 %v1003_v11, 0.0  ;;  %v902_v20 = vmul.f32 %v1414_v16, %v1879_v12  ;;  %v934_v21 = vmul.f32 %v1462_v17, %v1879_v12  ;;  %v671_v22 = vpop.f32.mrb[25].mxu0  ;;  %v831_v23 = vpop.f32.mrb[25].mxu1 }
 0x149   : > { %v1034_v24 = vmax.f32 %v970_v13, 0.0  ;;  %v1066_v25 = vmax.f32 %v1002_v15, 0.0  ;;  %v901_v26 = vmul.f32 %v1879_v12, %v671_v22  ;;  %v933_v27 = vmul.f32 %v1879_v12, %v831_v23 }
 0x14a   : > { %1100 = vst.msk [vmem:[%s1895_s30 + $0xb8] sm:$0xff] %vm1076_vm1, %v1035_v18  ;;  %1132 = vst.msk [vmem:[%s1895_s30 + $0x1b8] sm:$0xff] %vm1076_vm1, %v1067_v19  ;;  %v973_v28 = vadd.f32 %v1884_v14, %v902_v20  ;;  %v1005_v29 = vadd.f32 %v1884_v14, %v934_v21 }
 0x14b   : > { %1099 = vst.msk [vmem:[%s1895_s30 + $0xb0] sm:$0xff] %vm1076_vm1, %v1034_v24  ;;  %1131 = vst.msk [vmem:[%s1895_s30 + $0x1b0] sm:$0xff] %vm1076_vm1, %v1066_v25  ;;  %v972_v30 = vadd.f32 %v1884_v14, %v901_v26  ;;  %v1004_v31 = vadd.f32 %v1884_v14, %v933_v27  ;;  %v1417_v32 = vpop.f32.mrb[26].mxu0  ;;  %v1465_v33 = vpop.f32.mrb[26].mxu1 }
 0x14c   : > { %v1037_v34 = vmax.f32 %v973_v28, 0.0  ;;  %v1069_v35 = vmax.f32 %v1005_v29, 0.0  ;;  %v904_v36 = vmul.f32 %v1417_v32, %v1879_v12  ;;  %v936_v37 = vmul.f32 %v1465_v33, %v1879_v12  ;;  %v681_v38 = vpop.f32.mrb[27].mxu0  ;;  %v841_v39 = vpop.f32.mrb[27].mxu1 }
 0x14d   : > { %v1036_v40 = vmax.f32 %v972_v30, 0.0  ;;  %v1068_v41 = vmax.f32 %v1004_v31, 0.0  ;;  %v903_v42 = vmul.f32 %v1879_v12, %v681_v38  ;;  %v935_v43 = vmul.f32 %v1879_v12, %v841_v39 }
 0x14e   : > { %1102 = vst.msk [vmem:[%s1895_s30 + $0xc8] sm:$0xff] %vm1076_vm1, %v1037_v34  ;;  %1134 = vst.msk [vmem:[%s1895_s30 + $0x1c8] sm:$0xff] %vm1076_vm1, %v1069_v35  ;;  %v975_v44 = vadd.f32 %v1884_v14, %v904_v36  ;;  %v1007_v45 = vadd.f32 %v1884_v14, %v936_v37 }
 0x14f   : > { %1101 = vst.msk [vmem:[%s1895_s30 + $0xc0] sm:$0xff] %vm1076_vm1, %v1036_v40  ;;  %1133 = vst.msk [vmem:[%s1895_s30 + $0x1c0] sm:$0xff] %vm1076_vm1, %v1068_v41  ;;  %v974_v46 = vadd.f32 %v1884_v14, %v903_v42  ;;  %v1006_v47 = vadd.f32 %v1884_v14, %v935_v43  ;;  %v1420_v48 = vpop.f32.mrb[28].mxu0  ;;  %v1468_v49 = vpop.f32.mrb[28].mxu1 }
 0x150   : > { %v1039_v50 = vmax.f32 %v975_v44, 0.0  ;;  %v1071_v51 = vmax.f32 %v1007_v45, 0.0  ;;  %v906_v52 = vmul.f32 %v1420_v48, %v1879_v12  ;;  %v938_v53 = vmul.f32 %v1468_v49, %v1879_v12  ;;  %v691_v54 = vpop.f32.mrb[29].mxu0  ;;  %v851_v55 = vpop.f32.mrb[29].mxu1 }
 0x151   : > { %v1038_v56 = vmax.f32 %v974_v46, 0.0  ;;  %v1070_v57 = vmax.f32 %v1006_v47, 0.0  ;;  %v905_v58 = vmul.f32 %v1879_v12, %v691_v54  ;;  %v937_v59 = vmul.f32 %v1879_v12, %v851_v55 }
 0x152   : > { %1104 = vst.msk [vmem:[%s1895_s30 + $0xd8] sm:$0xff] %vm1076_vm1, %v1039_v50  ;;  %1136 = vst.msk [vmem:[%s1895_s30 + $0x1d8] sm:$0xff] %vm1076_vm1, %v1071_v51  ;;  %v977_v60 = vadd.f32 %v1884_v14, %v906_v52  ;;  %v1009_v61 = vadd.f32 %v1884_v14, %v938_v53 }
 0x153   : > { %1103 = vst.msk [vmem:[%s1895_s30 + $0xd0] sm:$0xff] %vm1076_vm1, %v1038_v56  ;;  %1135 = vst.msk [vmem:[%s1895_s30 + $0x1d0] sm:$0xff] %vm1076_vm1, %v1070_v57  ;;  %v976_v62 = vadd.f32 %v1884_v14, %v905_v58  ;;  %v1008_v63 = vadd.f32 %v1884_v14, %v937_v59  ;;  %v1423_v0 = vpop.f32.mrb[30].mxu0  ;;  %v1471_v1 = vpop.f32.mrb[30].mxu1 }
 0x154   : > { %v1041_v2 = vmax.f32 %v977_v60, 0.0  ;;  %v1073_v3 = vmax.f32 %v1009_v61, 0.0  ;;  %v908_v4 = vmul.f32 %v1423_v0, %v1879_v12  ;;  %v940_v5 = vmul.f32 %v1471_v1, %v1879_v12  ;;  %v701_v6 = vpop.f32.mrb[31].mxu0  ;;  %v861_v7 = vpop.f32.mrb[31].mxu1 }
 0x155   : > { %v1040_v8 = vmax.f32 %v976_v62, 0.0  ;;  %v1072_v9 = vmax.f32 %v1008_v63, 0.0  ;;  %v907_v10 = vmul.f32 %v1879_v12, %v701_v6  ;;  %v939_v11 = vmul.f32 %v1879_v12, %v861_v7 }
 0x156   : > { %1106 = vst.msk [vmem:[%s1895_s30 + $0xe8] sm:$0xff] %vm1076_vm1, %v1041_v2  ;;  %1138 = vst.msk [vmem:[%s1895_s30 + $0x1e8] sm:$0xff] %vm1076_vm1, %v1073_v3  ;;  %v979_v13 = vadd.f32 %v1884_v14, %v908_v4  ;;  %v1011_v15 = vadd.f32 %v1884_v14, %v940_v5 }
 0x157   : > { %1105 = vst.msk [vmem:[%s1895_s30 + $0xe0] sm:$0xff] %vm1076_vm1, %v1040_v8  ;;  %1137 = vst.msk [vmem:[%s1895_s30 + $0x1e0] sm:$0xff] %vm1076_vm1, %v1072_v9  ;;  %v978_v16 = vadd.f32 %v1884_v14, %v907_v10  ;;  %v1010_v17 = vadd.f32 %v1884_v14, %v939_v11 }
 0x158   : > { %v1043_v18 = vmax.f32 %v979_v13, 0.0  ;;  %v1075_v19 = vmax.f32 %v1011_v15, 0.0 }
 0x159   : > { %v1042_v12 = vmax.f32 %v978_v16, 0.0  ;;  %v1074_v20 = vmax.f32 %v1010_v17, 0.0 }
 0x15a   : > { %1108 = vst.msk [vmem:[%s1895_s30 + $0xf8] sm:$0xff] %vm1076_vm1, %v1043_v18  ;;  %1140 = vst.msk [vmem:[%s1895_s30 + $0x1f8] sm:$0xff] %vm1076_vm1, %v1075_v19 }
 0x15b   : > { %1107 = vst.msk [vmem:[%s1895_s30 + $0xf0] sm:$0xff] %vm1076_vm1, %v1042_v12  ;;  %1139 = vst.msk [vmem:[%s1895_s30 + $0x1f0] sm:$0xff] %vm1076_vm1, %v1074_v20 }
 0x15c PF: > { %p14_p8 = scmp.ge.s32.totalorder %s1651_s20, 6   ;;  %s2168_s15 = smov %s1593_s16 }
 0x15d   : > { %s2169_s16 = smov %s1597_s17  ;;  %s2170_s17 = smov %s1661_s23 }
 0x15e   : > { %s2171_s18 = smov %s1651_s20  ;;  %16 = sbr.rel (!%p14_p8) target bundleno = 3 (0x3), region = 76 }
 0x165   :  { %1163 = vsyncpa [#allocation3], 1 }
 0x166   :  { %1165 = vsyncpa [#allocation3 + $0x1], 1 }

// kernel: aligned_bottleneck_pallas.7
= control target key start
LH: loop header
LB: loop body
LE: loop exit
PB: predicated region body
PF: predicated region fallthrough
CT: control target
= control target key end

     0   :  { %s4672_s15 = smov 0   ;;  %s4674_s16 = smov 0   ;;  %s5973_s0 = inlined_call_operand.vmem [shape: f32[2,34,34,8], index: 0, kind: input, shape index: {}]   ;;  %s5974_s1 = inlined_call_operand.vmem [shape: f32[3,3,8,8], index: 1, kind: input, shape index: {}]   ;;  %s5975_s2 = inlined_call_operand.vmem [shape: f32[1,8], index: 2, kind: input, shape index: {}]   ;;  %s5976_s3 = inlined_call_operand.vmem [shape: f32[1,8], index: 3, kind: input, shape index: {}]   ;;  %s5977_s4 = inlined_call_operand.vmem [shape: f32[2,32,32,8], index: 4, kind: output, shape index: {}]  }
   0x1   :  { %s4676_s17 = smov 0   ;;  %s4678_s18 = smov 0  }
   0x2   :  { %s4680_s19 = smov 0  }
   0x3 LB: > { %s23_s20 = sadd.s32 1, %s4637_s17  ;;  %s26_s21 = sadd.s32 1, %s4641_s18  ;;  %s4645_s19 = sphi %s4680_s19, %s14_s19   ;;  %s4641_s18 = sphi %s4678_s18, %s6096_s18   ;;  %s4637_s17 = sphi %s4676_s17, %s6095_s17   ;;  %s4633_s16 = sphi %s4674_s16, %s6094_s16   ;;  %s4629_s15 = sphi %s4672_s15, %s6093_s15  }
   0x4   : > { %p24_p0 = scmp.ge.s32.totalorder %s23_s20, 4  ;;  %p3253_p1 = scmp.ge.s32.totalorder %s4645_s19, 1 }
   0x5   : > { %p176_p2 = scmp.lt.s32.totalorder %s4645_s19, 9 }
   0x6   : > { %s6098_s20 = smov (%p24_p0, %s23_s20), 0  ;;  %s6100_s21 = smov (!%p24_p0, %s26_s21), %s4641_s18 }
   0x7   : > { %p177_p3 = pnand %p3253_p1, %p176_p2  ;;  %p28_p4 = scmp.ge.s32.totalorder %s6100_s21, 2 }
   0x9   : > { %s6102_s21 = smov (%p28_p4, %s6100_s21), 0  ;;  %180 = sbr.rel (%p177_p3) target bundleno = 534 (0x216), region = 36 }
  0x10   : > { %v3261_v0 = vld [vmem:[%s5974_s1 + $0x18] sm:$0xff]  ;;  %p207_p5 = scmp.lt.s32.totalorder %s4633_s16, 1  ;;  %v4710_v1 = vld [vmem:[%s5974_s1 + $0x20] sm:$0xff]  ;;  %s3260_s30 = smul.u32 320, %s4629_s15  ;;  %vm279_vm0 = vcmask 64512   ;;  %vm1119_vm1 = vcmask 1046528  }
  0x11   : > { %v276_v2 = vld [vmem:[%s5974_s1] sm:$0xff]  ;;  %3858 = vmatprep.subr.mxu1 %v3261_v0  ;;  %4058 = vmatprep.subr.mxu0 %v4710_v1  ;;  %v3425_v3 = vld [vmem:[%s5974_s1 + $0x38] sm:$0xff]  ;;  %v4751_v11 = vld [vmem:[%s5974_s1 + $0x30] sm:$0xff]  ;;  %vm2067_vm2 = vcmask 1045504   ;;  %s3255_s27 = sshll.u32 %s4629_s15, 3 }
  0x12   : > { %3859 = vmatpush3.msra.mxu1 %v3261_v0  ;;  %s6104_s16 = smov (!%p207_p5, %s4633_s16), 1  ;;  %4059 = vmatpush3.msra.mxu0 %v4710_v1  ;;  %v4791_v24 = vld [vmem:[%s5974_s1 + $0x10] sm:$0xff]  ;;  %p215_p6 = scmp.lt.s32.totalorder %s3255_s27, 31 }
  0x13   : > { %3908 = vmatprep.subr.mxu1 %v276_v2  ;;  %4108 = vmatprep.subr.mxu0 %v3425_v3  ;;  %s4566_s5 = smul.u32 1360, %s6104_s16  ;;  %s3257_s29 = sshll.u32 %s6104_s16, 7 }
  0x14   : > { %s6106_s27 = smov (!%p215_p6, %s3255_s27), 31 }
  0x15   : > { %s211_s8 = scalar_lea.vmem %s5973_s0, %s4566_s5  ;;  %s3256_s28 = sshll.u32 %s6106_s27, 2 }
  0x16   : > { %s4727_s9 = scalar_lea.vmem %s211_s8, %s3260_s30  ;;  %s219_s30 = sadd.s32 %s3257_s29, %s3256_s28 }
  0x17   : > { %v4730_v4 = vld [vmem:[%s4727_s9 + $0x28] sm:$0xff]  ;;  %v4733_v5 = vld [vmem:[%s4727_s9 + $0x30] sm:$0xff]  ;;  %v4736_v6 = vld [vmem:[%s4727_s9 + $0x38] sm:$0xff]  ;;  %s3258_s8 = sshll.u32 %s219_s30, 3 }
  0x18   : > { %3860 = vmatprep.mubr.msk.f32.mxu1 %vm279_vm0, %v4730_v4  ;;  %v1129_v7 = vrot.slane %v4730_v4, 1  ;;  %v1130_v8 = vrot.slane %v4733_v5, 1  ;;  %v4743_v9 = vld [vmem:[%s4727_s9 + $0x40] sm:$0xff]  ;;  %v4746_v10 = vld [vmem:[%s4727_s9 + $0x50] sm:$0xff]  ;;  %v1132_v12 = vrot.slane %v4736_v6, 1  ;;  %v4767_v17 = vld [vmem:[%s4727_s9 + $0x58] sm:$0xff]  ;;  %s5824_s10 = scalar_lea.vmem %s5977_s4, %s3258_s8 }
  0x19   : > { %3861 = vmatmul.mubr.msk.f32.vlgmr.msra.gmra.mrb[0].mxu1 %vm279_vm0, %v4733_v5  ;;  %v1134_v13 = vrot.slane %v4743_v9, 1  ;;  %v4758_v14 = vld [vmem:[%s4727_s9 + $0x48] sm:$0x3]  ;;  %v1138_v18 = vrot.slane %v4746_v10, 1  ;;  %v4771_v19 = vld [vmem:[%s4727_s9 + $0x60] sm:$0xff]  ;;  %v1139_v22 = vrot.slane %v4767_v17, 1 }
  0x1a   : > { %v4761_v15 = vsel %vm1119_vm1, %v1129_v7, %v1130_v8  ;;  %3863 = vmatprep.mubr.msk.f32.mxu1 %vm279_vm0, %v4736_v6  ;;  %3909 = vmatpush3.msra.mxu1 %v276_v2  ;;  %v1136_v16 = vrot.slane %v4758_v14, 1  ;;  %v4776_v20 = vsel %vm1119_vm1, %v1130_v8, %v1132_v12  ;;  %v4783_v23 = vld [vmem:[%s4727_s9 + $0x68] sm:$0xff]  ;;  %v1141_v26 = vrot.slane %v4771_v19, 1  ;;  %v4808_v29 = vld [vmem:[%s4727_s9 + $0x70] sm:$0x3]  ;;  %v4811_v30 = vld [vmem:[%s4727_s9 + $0x78] sm:$0xff] }
  0x1b   : > { %6023 = vst [vmem:[#allocation2_spill] sm:$0xff] %v4761_v15  ;;  %4060 = vmatprep.mubr.msk.f32.mxu0 %vm279_vm0, %v4761_v15  ;;  %6024 = vst [vmem:[#allocation3_spill] sm:$0xff] %v4776_v20  ;;  %v4779_v21 = vsel %vm1119_vm1, %v1132_v12, %v1134_v13  ;;  %3958 = vmatprep.subr.mxu1 %v4751_v11  ;;  %v4804_v27 = vsel %vm1119_vm1, %v1138_v18, %v1139_v22  ;;  %v1143_v28 = vrot.slane %v4783_v23, 1  ;;  %v4814_v31 = vld [vmem:[%s4727_s9 + $0x80] sm:$0xff]  ;;  %v4835_v37 = vld [vmem:[%s4727_s9 + $0x88] sm:$0xff] }
  0x1c   : > { %6025 = vst [vmem:[#allocation4_spill] sm:$0xff] %v4779_v21  ;;  %4061 = vmatmul.mubr.msk.f32.vlgmr.msra.gmra.mrb[0].mxu0 %vm279_vm0, %v4776_v20  ;;  %v4796_v25 = vsel %vm1119_vm1, %v1134_v13, %v1136_v16  ;;  %6027 = vst [vmem:[#allocation6_spill] sm:$0xff] %v4804_v27  ;;  %v4824_v32 = vsel %vm1119_vm1, %v1139_v22, %v1141_v26  ;;  %v1145_v33 = vrot.slane %v4808_v29, 1  ;;  %v1147_v35 = vrot.slane %v4811_v30, 1  ;;  %v4838_v38 = vld [vmem:[%s4727_s9 + $0x90] sm:$0xff]  ;;  %v4860_v44 = vld [vmem:[%s4727_s9 + $0xa0] sm:$0xff] }
  0x1d   : > { %4109 = vmatpush3.msra.mxu0 %v3425_v3  ;;  %3864 = vmatmul.mubr.msk.f32.gmra.mrb[2].mxu1 %vm279_vm0, %v4743_v9  ;;  %6026 = vst [vmem:[#allocation5_spill] sm:$0xff] %v4796_v25  ;;  %6028 = vst [vmem:[#allocation7_spill] sm:$0xff] %v4824_v32  ;;  %v4830_v34 = vsel %vm1119_vm1, %v1141_v26, %v1143_v28  ;;  %v1148_v36 = vrot.slane %v4814_v31, 1  ;;  %v1150_v40 = vrot.slane %v4835_v37, 1  ;;  %v1152_v42 = vrot.slane %v4838_v38, 1  ;;  %v4863_v45 = vld [vmem:[%s4727_s9 + $0xa8] sm:$0xff] }
  0x1e   : > { %4063 = vmatprep.mubr.msk.f32.mxu0 %vm279_vm0, %v4779_v21  ;;  %3866 = vmatprep.mubr.msk.f32.mxu1 %vm279_vm0, %v4746_v10  ;;  %6029 = vst [vmem:[#allocation8_spill] sm:$0xff] %v4830_v34  ;;  %v4847_v39 = vsel %vm1119_vm1, %v1143_v28, %v1145_v33  ;;  %v4857_v43 = vld [vmem:[%s4727_s9 + $0x98] sm:$0x3]  ;;  %v1156_v49 = vrot.slane %v4860_v44, 1  ;;  %v1157_v50 = vrot.slane %v4863_v45, 1  ;;  %v4883_v51 = vld [vmem:[%s4727_s9 + $0xb0] sm:$0xff] }
  0x1f   : > { %4158 = vmatprep.subr.mxu0 %v4791_v24  ;;  %6030 = vst [vmem:[#allocation9_spill] sm:$0xff] %v4847_v39  ;;  %v4853_v41 = vsel %vm1119_vm1, %v1147_v35, %v1148_v36  ;;  %v4872_v46 = vsel %vm1119_vm1, %v1148_v36, %v1150_v40  ;;  %v1154_v47 = vrot.slane %v4857_v43, 1  ;;  %v4878_v48 = vsel %vm1119_vm1, %v1150_v40, %v1152_v42  ;;  %v4886_v52 = vld [vmem:[%s4727_s9 + $0xb8] sm:$0xff]  ;;  %v4905_v57 = vld [vmem:[%s4727_s9 + $0xc0] sm:$0x3]  ;;  %v4923_v61 = vld [vmem:[%s4727_s9 + $0xc8] sm:$0xff] }
  0x20   : > { %4064 = vmatmul.mubr.msk.f32.gmra.mrb[2].mxu0 %vm279_vm0, %v4796_v25  ;;  %6031 = vst [vmem:[#allocation10_spill] sm:$0xff] %v4853_v41  ;;  %6032 = vst [vmem:[#allocation11_spill] sm:$0xff] %v4872_v46  ;;  %v1159_v54 = vrot.slane %v4883_v51, 1  ;;  %v4901_v55 = vsel %vm1119_vm1, %v1156_v49, %v1157_v50  ;;  %v1161_v56 = vrot.slane %v4886_v52, 1  ;;  %v1163_v59 = vrot.slane %v4905_v57, 1  ;;  %v4937_v63 = vld [vmem:[%s4727_s9 + $0xd0] sm:$0xff] }
  0x21   : > { %3867 = vmatmul.mubr.msk.f32.gmra.mrb[4].mxu1 %vm279_vm0, %v4767_v17  ;;  %4066 = vmatprep.mubr.msk.f32.mxu0 %vm279_vm0, %v4804_v27  ;;  %6033 = vst [vmem:[#allocation12_spill] sm:$0xff] %v4878_v48  ;;  %v4895_v53 = vsel %vm1119_vm1, %v1152_v42, %v1154_v47  ;;  %6035 = vst [vmem:[#allocation14_spill] sm:$0xff] %v4901_v55  ;;  %v4940_v0 = vld [vmem:[%s4727_s9 + $0xd8] sm:$0xff]  ;;  %v4951_v2 = vld [vmem:[%s4727_s9 + $0xe0] sm:$0xff]  ;;  %v1165_v26 = vrot.slane %v4923_v61, 1  ;;  %v1166_v28 = vrot.slane %v4937_v63, 1 }
  0x22   : > { %3869 = vmatprep.mubr.msk.f32.mxu1 %vm279_vm0, %v4771_v19  ;;  %6034 = vst [vmem:[#allocation13_spill] sm:$0xff] %v4895_v53  ;;  %v4914_v58 = vsel %vm1119_vm1, %v1157_v50, %v1159_v54  ;;  %v4920_v60 = vsel %vm1119_vm1, %v1159_v54, %v1161_v56  ;;  %v4932_v62 = vsel %vm1119_vm1, %v1161_v56, %v1163_v59  ;;  %v4954_v3 = vld [vmem:[%s4727_s9 + $0xf0] sm:$0xff]  ;;  %v4961_v7 = vld [vmem:[%s5974_s1 + $0x28] sm:$0xff]  ;;  %v4971_v8 = vld [vmem:[%s4727_s9 + $0xf8] sm:$0xff]  ;;  %v1168_v35 = vrot.slane %v4940_v0, 1 }
  0x23   : > { %6036 = vst [vmem:[#allocation15_spill] sm:$0xff] %v4914_v58  ;;  %6037 = vst [vmem:[#allocation16_spill] sm:$0xff] %v4920_v60  ;;  %v4974_v12 = vld [vmem:[%s4727_s9 + $0x100] sm:$0xff]  ;;  %v4986_v13 = vld [vmem:[%s4727_s9 + $0x108] sm:$0xff]  ;;  %v5034_v40 = vsel %vm1119_vm1, %v1165_v26, %v1166_v28  ;;  %v1170_v42 = vrot.slane %v4951_v2, 1 }
  0x24   : > { %4067 = vmatmul.mubr.msk.f32.gmra.mrb[4].mxu0 %vm279_vm0, %v4824_v32  ;;  %6038 = vst [vmem:[#allocation17_spill] sm:$0xff] %v4932_v62  ;;  %v4989_v16 = vld [vmem:[%s4727_s9 + $0x118] sm:$0xff]  ;;  %v5000_v18 = vld [vmem:[%s4727_s9 + $0x120] sm:$0xff]  ;;  %v5003_v22 = vld [vmem:[%s4727_s9 + $0x128] sm:$0xff]  ;;  %v5050_v50 = vsel %vm1119_vm1, %v1166_v28, %v1168_v35 }
  0x25   : > { %3870 = vmatmul.mubr.msk.f32.gmra.mrb[6].mxu1 %vm279_vm0, %v4783_v23  ;;  %4069 = vmatprep.mubr.msk.f32.mxu0 %vm279_vm0, %v4830_v34  ;;  %v5019_v33 = vld [vmem:[%s4727_s9 + $0x140] sm:$0xff]  ;;  %v5031_v36 = vld [vmem:[%s4727_s9 + $0x148] sm:$0xff]  ;;  %6039 = vst [vmem:[#allocation18_spill] sm:$0xff] %v5034_v40  ;;  %v5041_v49 = vld [vmem:[%s4727_s9 + $0x150] sm:$0xff]  ;;  %v5059_v59 = vsel %vm1119_vm1, %v1168_v35, %v1170_v42 }
  0x26   : > { %3872 = vmatprep.mubr.msk.f32.mxu1 %vm279_vm0, %v4811_v30  ;;  %v5038_v47 = vld [vmem:[%s4727_s9 + $0xe8] sm:$0x3]  ;;  %6040 = vst [vmem:[#allocation19_spill] sm:$0xff] %v5050_v50  ;;  %v5056_v56 = vld [vmem:[%s4727_s9 + $0x158] sm:$0xff]  ;;  %6041 = vst [vmem:[#allocation20_spill] sm:$0xff] %v5059_v59 }
  0x27   : > { %v1172_v54 = vrot.slane %v5038_v47, 1  ;;  %v5062_v26 = vld [vmem:[%s4727_s9] sm:$0xff]  ;;  %v5077_v35 = vld [vmem:[%s4727_s9 + $0x18] sm:$0xff]  ;;  %v5194_v21 = vld [vmem:[%s4727_s9 + $0x168] sm:$0xff] }
  0x28   : > { %4070 = vmatmul.mubr.msk.f32.gmra.mrb[6].mxu0 %vm279_vm0, %v4847_v39  ;;  %v1120_v28 = vrot.slane %v5062_v26, 1  ;;  %v5197_v20 = vld [vmem:[%s4727_s9 + $0x170] sm:$0xff]  ;;  %v5217_v15 = vld [vmem:[%s4727_s9 + $0x178] sm:$0xff] }
  0x29   : > { %3873 = vmatmul.mubr.msk.f32.gmra.mrb[8].mxu1 %vm279_vm0, %v4814_v31  ;;  %4072 = vmatprep.mubr.msk.f32.mxu0 %vm279_vm0, %v4853_v41 }
  0x2a   : > { %3875 = vmatprep.mubr.msk.f32.mxu1 %vm279_vm0, %v4835_v37 }
  0x2c   : > { %4073 = vmatmul.mubr.msk.f32.gmra.mrb[8].mxu0 %vm279_vm0, %v4872_v46 }
  0x2d   : > { %3876 = vmatmul.mubr.msk.f32.gmra.mrb[10].mxu1 %vm279_vm0, %v4838_v38  ;;  %4075 = vmatprep.mubr.msk.f32.mxu0 %vm279_vm0, %v4878_v48 }
  0x2e   : > { %3878 = vmatprep.mubr.msk.f32.mxu1 %vm279_vm0, %v4860_v44 }
  0x30   : > { %4076 = vmatmul.mubr.msk.f32.gmra.mrb[10].mxu0 %vm279_vm0, %v4895_v53 }
  0x31   : > { %3879 = vmatmul.mubr.msk.f32.gmra.mrb[12].mxu1 %vm279_vm0, %v4863_v45  ;;  %4078 = vmatprep.mubr.msk.f32.mxu0 %vm279_vm0, %v4901_v55 }
  0x32   : > { %3881 = vmatprep.mubr.msk.f32.mxu1 %vm279_vm0, %v4883_v51 }
  0x34   : > { %4079 = vmatmul.mubr.msk.f32.gmra.mrb[12].mxu0 %vm279_vm0, %v4914_v58 }
  0x35   : > { %3882 = vmatmul.mubr.msk.f32.gmra.mrb[14].mxu1 %vm279_vm0, %v4886_v52  ;;  %4081 = vmatprep.mubr.msk.f32.mxu0 %vm279_vm0, %v4920_v60 }
  0x36   : > { %3884 = vmatprep.mubr.msk.f32.mxu1 %vm279_vm0, %v4923_v61 }
  0x38   : > { %4082 = vmatmul.mubr.msk.f32.gmra.mrb[14].mxu0 %vm279_vm0, %v4932_v62 }
  0x39   : > { %3885 = vmatmul.mubr.msk.f32.gmra.mrb[16].mxu1 %vm279_vm0, %v4937_v63  ;;  %4110 = vmatprep.mubr.msk.f32.mxu0 %vm279_vm0, %v4804_v27 }
  0x3a   : > { %3887 = vmatprep.mubr.msk.f32.mxu1 %vm279_vm0, %v4940_v0 }
  0x3c   : > { %4111 = vmatmul.mubr.msk.f32.vlgmr.msra.gmra.mrb[0].mxu0 %vm279_vm0, %v4824_v32 }
  0x3d   : > { %4159 = vmatpush3.msra.mxu0 %v4791_v24  ;;  %3888 = vmatmul.mubr.msk.f32.gmra.mrb[18].mxu1 %vm279_vm0, %v4951_v2  ;;  %v5014_v24 = vld [vmem:[%s4727_s9 + $0x130] sm:$0xff] }
  0x3e   : > { %4113 = vmatprep.mubr.msk.f32.mxu0 %vm279_vm0, %v4830_v34  ;;  %3890 = vmatprep.mubr.msk.f32.mxu1 %vm279_vm0, %v4954_v3  ;;  %v5096_v34 = vld [vmem:[%s4727_s9 + $0x110] sm:$0x3] }
  0x3f   : > { %4208 = vmatprep.subr.mxu0 %v4961_v7 }
  0x40   : > { %4114 = vmatmul.mubr.msk.f32.gmra.mrb[2].mxu0 %vm279_vm0, %v4847_v39  ;;  %v1179_v39 = vrot.slane %v4986_v13, 1 }
  0x41   : > { %3891 = vmatmul.mubr.msk.f32.gmra.mrb[20].mxu1 %vm279_vm0, %v4971_v8  ;;  %4116 = vmatprep.mubr.msk.f32.mxu0 %vm279_vm0, %v4853_v41 }
  0x42   : > { %3893 = vmatprep.mubr.msk.f32.mxu1 %vm279_vm0, %v4974_v12 }
  0x44   : > { %4117 = vmatmul.mubr.msk.f32.gmra.mrb[4].mxu0 %vm279_vm0, %v4872_v46 }
  0x45   : > { %3894 = vmatmul.mubr.msk.f32.gmra.mrb[22].mxu1 %vm279_vm0, %v4986_v13  ;;  %4119 = vmatprep.mubr.msk.f32.mxu0 %vm279_vm0, %v4878_v48  ;;  %v1177_v48 = vrot.slane %v4974_v12, 1 }
  0x46   : > { %3896 = vmatprep.mubr.msk.f32.mxu1 %vm279_vm0, %v4989_v16 }
  0x48   : > { %4120 = vmatmul.mubr.msk.f32.gmra.mrb[6].mxu0 %vm279_vm0, %v4895_v53  ;;  %v5084_v53 = vsel %vm1119_vm1, %v1170_v42, %v1172_v54  ;;  %v5106_v54 = vld [vmem:[%s5974_s1 + $0x8] sm:$0xff] }
  0x49   : > { %3897 = vmatmul.mubr.msk.f32.gmra.mrb[24].mxu1 %vm279_vm0, %v5000_v18  ;;  %4122 = vmatprep.mubr.msk.f32.mxu0 %vm279_vm0, %v4901_v55  ;;  %6042 = vst [vmem:[#allocation21_spill] sm:$0xff] %v5084_v53 }
  0x4a   : > { %3899 = vmatprep.mubr.msk.f32.mxu1 %vm279_vm0, %v5003_v22 }
  0x4c   : > { %4123 = vmatmul.mubr.msk.f32.gmra.mrb[8].mxu0 %vm279_vm0, %v4914_v58  ;;  %v5073_v58 = vld [vmem:[%s4727_s9 + $0x8] sm:$0xff] }
  0x4d   : > { %3900 = vmatmul.mubr.msk.f32.gmra.mrb[26].mxu1 %vm279_vm0, %v5014_v24  ;;  %4125 = vmatprep.mubr.msk.f32.mxu0 %vm279_vm0, %v4920_v60  ;;  %v1175_v60 = vrot.slane %v4971_v8, 1  ;;  %v1121_v46 = vrot.slane %v5073_v58, 1 }
  0x4e   : > { %3902 = vmatprep.mubr.msk.f32.mxu1 %vm279_vm0, %v5019_v33 }
  0x4f   : > { %v5099_v42 = vsel %vm1119_vm1, %v1120_v28, %v1121_v46  ;;  %v1181_v28 = vrot.slane %v5096_v34, 1 }
  0x50   : > { %4126 = vmatmul.mubr.msk.f32.gmra.mrb[10].mxu0 %vm279_vm0, %v4932_v62  ;;  %v1174_v62 = vrot.slane %v4954_v3, 1 }
  0x51   : > { %3903 = vmatmul.mubr.msk.f32.gmra.mrb[28].mxu1 %vm279_vm0, %v5031_v36  ;;  %4128 = vmatprep.mubr.msk.f32.mxu0 %vm279_vm0, %v5034_v40  ;;  %v5068_v40 = vld [vmem:[%s4727_s9 + $0x10] sm:$0xff] }
  0x52   : > { %3905 = vmatprep.mubr.msk.f32.mxu1 %vm279_vm0, %v5041_v49  ;;  %v1123_v55 = vrot.slane %v5068_v40, 1  ;;  %v5092_v41 = vsel %vm1119_vm1, %v1174_v62, %v1175_v60  ;;  %v5116_v62 = vsel %vm1119_vm1, %v1175_v60, %v1177_v48  ;;  %v1184_v60 = vrot.slane %v5000_v18, 1 }
  0x53   : > { %6043 = vst [vmem:[#allocation22_spill] sm:$0xff] %v5092_v41  ;;  %6044 = vst [vmem:[#allocation23_spill] sm:$0xff] %v5116_v62 }
  0x54   : > { %4129 = vmatmul.mubr.msk.f32.gmra.mrb[12].mxu0 %vm279_vm0, %v5050_v50  ;;  %v1125_v50 = vrot.slane %v5077_v35, 1 }
  0x55   : > { %3906 = vmatmul.mubr.msk.f32.gmra.mrb[30].mxu1 %vm279_vm0, %v5056_v56  ;;  %4131 = vmatprep.mubr.msk.f32.mxu0 %vm279_vm0, %v5059_v59  ;;  %v5109_v59 = vsel %vm1119_vm1, %v1121_v46, %v1123_v55  ;;  %v5129_v46 = vsel %vm1119_vm1, %v1177_v48, %v1179_v39  ;;  %v1186_v48 = vrot.slane %v5003_v22, 1 }
  0x56   : > { %3910 = vmatprep.mubr.msk.f32.mxu1 %vm279_vm0, %v5062_v26  ;;  %v5123_v32 = vsel %vm1119_vm1, %v1123_v55, %v1125_v50  ;;  %6046 = vst [vmem:[#allocation25_spill] sm:$0xff] %v5129_v46 }
  0x57   : > { %6045 = vst [vmem:[#allocation24_spill] sm:$0xff] %v5123_v32  ;;  %v5237_v32 = vld [vmem:[%s4727_s9 + $0x188] sm:$0x3] }
  0x58   : > { %4132 = vmatmul.mubr.msk.f32.gmra.mrb[14].mxu0 %vm279_vm0, %v5084_v53  ;;  %v5120_v53 = vld [vmem:[%s4727_s9 + $0x20] sm:$0x3] }
  0x59   : > { %3911 = vmatmul.mubr.msk.f32.vlgmr.msra.gmra.mrb[0].mxu1 %vm279_vm0, %v5073_v58  ;;  %4134 = vmatprep.mubr.msk.f32.mxu0 %vm279_vm0, %v5092_v41  ;;  %v1183_v41 = vrot.slane %v4989_v16, 1  ;;  %v1127_v27 = vrot.slane %v5120_v53, 1 }
  0x5a   : > { %3913 = vmatprep.mubr.msk.f32.mxu1 %vm279_vm0, %v5068_v40  ;;  %3959 = vmatpush3.msra.mxu1 %v4751_v11  ;;  %v5145_v11 = vsel %vm1119_vm1, %v1179_v39, %v1181_v28  ;;  %v5164_v39 = vsel %vm1119_vm1, %v1184_v60, %v1186_v48  ;;  %v1192_v28 = vrot.slane %v5019_v33, 1 }
  0x5b   : > { %4008 = vmatprep.subr.mxu1 %v5106_v54  ;;  %v5138_v55 = vsel %vm1119_vm1, %v1125_v50, %v1127_v27  ;;  %6048 = vst [vmem:[#allocation27_spill] sm:$0xff] %v5145_v11  ;;  %v5151_v25 = vsel %vm1119_vm1, %v1183_v41, %v1184_v60  ;;  %v1188_v27 = vrot.slane %v5014_v24, 1  ;;  %v5155_v50 = vld [vmem:[%s4727_s9 + $0x138] sm:$0x3]  ;;  %6050 = vst [vmem:[#allocation29_spill] sm:$0xff] %v5164_v39 }
  0x5c   : > { %4135 = vmatmul.mubr.msk.f32.gmra.mrb[16].mxu0 %vm279_vm0, %v5116_v62  ;;  %6047 = vst [vmem:[#allocation26_spill] sm:$0xff] %v5138_v55  ;;  %6049 = vst [vmem:[#allocation28_spill] sm:$0xff] %v5151_v25  ;;  %v1190_v41 = vrot.slane %v5155_v50, 1  ;;  %v1197_v62 = vrot.slane %v5056_v56, 1  ;;  %v5220_v55 = vld [vmem:[%s4727_s9 + $0x180] sm:$0xff] }
  0x5d   : > { %3914 = vmatmul.mubr.msk.f32.gmra.mrb[2].mxu1 %vm279_vm0, %v5077_v35  ;;  %4137 = vmatprep.mubr.msk.f32.mxu0 %vm279_vm0, %v5129_v46  ;;  %v1193_v46 = vrot.slane %v5031_v36, 1 }
  0x5e   : > { %3916 = vmatprep.mubr.msk.f32.mxu1 %vm279_vm0, %v4730_v4  ;;  %v5182_v60 = vsel %vm1119_vm1, %v1188_v27, %v1190_v41 }
  0x5f   : > { %6052 = vst [vmem:[#allocation31_spill] sm:$0xff] %v5182_v60 }
  0x60   : > { %4138 = vmatmul.mubr.msk.f32.gmra.mrb[18].mxu0 %vm279_vm0, %v5145_v11  ;;  %v5172_v11 = vsel %vm1119_vm1, %v1186_v48, %v1188_v27  ;;  %v5188_v48 = vsel %vm1119_vm1, %v1192_v28, %v1193_v46 }
  0x61   : > { %3917 = vmatmul.mubr.msk.f32.gmra.mrb[4].mxu1 %vm279_vm0, %v4733_v5  ;;  %4140 = vmatprep.mubr.msk.f32.mxu0 %vm279_vm0, %v5151_v25  ;;  %6051 = vst [vmem:[#allocation30_spill] sm:$0xff] %v5172_v11  ;;  %v1195_v25 = vrot.slane %v5041_v49, 1  ;;  %6053 = vst [vmem:[#allocation32_spill] sm:$0xff] %v5188_v48 }
  0x62   : > { %3919 = vmatprep.mubr.msk.f32.mxu1 %vm279_vm0, %v4736_v6 }
  0x63   : > { %v5206_v27 = vsel %vm1119_vm1, %v1193_v46, %v1195_v25  ;;  %v5212_v28 = vsel %vm1119_vm1, %v1195_v25, %v1197_v62  ;;  %v1204_v46 = vrot.slane %v5217_v15, 1 }
  0x64   : > { %4141 = vmatmul.mubr.msk.f32.gmra.mrb[20].mxu0 %vm279_vm0, %v5164_v39  ;;  %v5191_v39 = vld [vmem:[%s4727_s9 + $0x160] sm:$0x3]  ;;  %6055 = vst [vmem:[#allocation34_spill] sm:$0xff] %v5206_v27  ;;  %6056 = vst [vmem:[#allocation35_spill] sm:$0xff] %v5212_v28 }
  0x65   : > { %3920 = vmatmul.mubr.msk.f32.gmra.mrb[6].mxu1 %vm279_vm0, %v4743_v9  ;;  %4143 = vmatprep.mubr.msk.f32.mxu0 %vm279_vm0, %v5172_v11  ;;  %6054 = vst [vmem:[#allocation33_spill] sm:$0xff] %v5191_v39  ;;  %v1199_v41 = vrot.slane %v5191_v39, 1  ;;  %v1202_v11 = vrot.slane %v5197_v20, 1  ;;  %v1206_v39 = vrot.slane %v5220_v55, 1 }
  0x66   : > { %3922 = vmatprep.mubr.msk.f32.mxu1 %vm279_vm0, %v4746_v10 }
  0x67   : > { %v5229_v25 = vsel %vm1119_vm1, %v1197_v62, %v1199_v41  ;;  %v1205_v62 = vsel %vm1119_vm1, %v1202_v11, %v1204_v46  ;;  %v1208_v41 = vrot.slane %v5237_v32, 1 }
  0x68   : > { %4144 = vmatmul.mubr.msk.f32.gmra.mrb[22].mxu0 %vm279_vm0, %v5182_v60  ;;  %v1201_v60 = vrot.slane %v5194_v21, 1  ;;  %6057 = vst [vmem:[#allocation36_spill] sm:$0xff] %v5229_v25 }
  0x69   : > { %3923 = vmatmul.mubr.msk.f32.gmra.mrb[8].mxu1 %vm279_vm0, %v4767_v17  ;;  %4146 = vmatprep.mubr.msk.f32.mxu0 %vm279_vm0, %v5188_v48 }
  0x6a   : > { %3925 = vmatprep.mubr.msk.f32.mxu1 %vm279_vm0, %v4771_v19  ;;  %v1203_v48 = vsel %vm1119_vm1, %v1201_v60, %v1202_v11  ;;  %v1207_v60 = vsel %vm1119_vm1, %v1204_v46, %v1206_v39  ;;  %v1209_v11 = vsel %vm1119_vm1, %v1206_v39, %v1208_v41  ;;  %v2077_v39 = vrot.slane %v4730_v4, 2 }
  0x6b   : > { %v2078_v46 = vrot.slane %v4733_v5, 2  ;;  %v2082_v5 = vrot.slane %v4743_v9, 2  ;;  %v2084_v9 = vrot.slane %v4758_v14, 2  ;;  %v2089_v41 = vrot.slane %v4771_v19, 2 }
  0x6c   : > { %4147 = vmatmul.mubr.msk.f32.gmra.mrb[24].mxu0 %vm279_vm0, %v5206_v27  ;;  %v2069_v27 = vrot.slane %v5073_v58, 2 }
  0x6d   : > { %3926 = vmatmul.mubr.msk.f32.gmra.mrb[10].mxu1 %vm279_vm0, %v4783_v23  ;;  %4149 = vmatprep.mubr.msk.f32.mxu0 %vm279_vm0, %v5212_v28  ;;  %v2068_v28 = vrot.slane %v5062_v26, 2  ;;  %v5314_v14 = vsel %vm2067_vm2, %v2082_v5, %v2084_v9 }
  0x6e   : > { %3928 = vmatprep.mubr.msk.f32.mxu1 %vm279_vm0, %v4811_v30 }
  0x6f   : > { %v2070_v26 = vsel %vm2067_vm2, %v2068_v28, %v2069_v27  ;;  %v5276_v28 = vld [vmem:[%s5974_s1 + $0x40] sm:$0xff] }
  0x70   : > { %4150 = vmatmul.mubr.msk.f32.gmra.mrb[26].mxu0 %vm279_vm0, %v5229_v25  ;;  %v2071_v25 = vrot.slane %v5068_v40, 2  ;;  %v2075_v40 = vrot.slane %v5120_v53, 2  ;;  %v5288_v53 = vsel %vm2067_vm2, %v2077_v39, %v2078_v46  ;;  %v2096_v39 = vrot.slane %v4814_v31, 2 }
  0x71   : > { %3929 = vmatmul.mubr.msk.f32.gmra.mrb[12].mxu1 %vm279_vm0, %v4814_v31  ;;  %4152 = vmatprep.mubr.msk.f32.mxu0 %vm279_vm0, %v1203_v48  ;;  %v2073_v48 = vrot.slane %v5077_v35, 2 }
  0x72   : > { %3931 = vmatprep.mubr.msk.f32.mxu1 %vm279_vm0, %v4835_v37  ;;  %v2072_v58 = vsel %vm2067_vm2, %v2069_v27, %v2071_v25  ;;  %v2080_v27 = vrot.slane %v4736_v6, 2 }
  0x73   : > { %v2074_v35 = vsel %vm2067_vm2, %v2071_v25, %v2073_v48  ;;  %v2076_v4 = vsel %vm2067_vm2, %v2073_v48, %v2075_v40  ;;  %v2086_v25 = vrot.slane %v4746_v10, 2  ;;  %v2093_v48 = vrot.slane %v4808_v29, 2 }
  0x74   : > { %4153 = vmatmul.mubr.msk.f32.gmra.mrb[28].mxu0 %vm279_vm0, %v1205_v62  ;;  %v5297_v6 = vsel %vm2067_vm2, %v2078_v46, %v2080_v27  ;;  %v2087_v62 = vrot.slane %v4767_v17, 2  ;;  %v2095_v40 = vrot.slane %v4811_v30, 2  ;;  %v2098_v46 = vrot.slane %v4835_v37, 2 }
  0x75   : > { %3932 = vmatmul.mubr.msk.f32.gmra.mrb[14].mxu1 %vm279_vm0, %v4838_v38  ;;  %4155 = vmatprep.mubr.msk.f32.mxu0 %vm279_vm0, %v1207_v60 }
  0x76   : > { %3934 = vmatprep.mubr.msk.f32.mxu1 %vm279_vm0, %v4860_v44  ;;  %v5320_v60 = vsel %vm2067_vm2, %v2086_v25, %v2087_v62  ;;  %v2104_v25 = vrot.slane %v4860_v44, 2 }
  0x78   : > { %4156 = vmatmul.mubr.msk.f32.gmra.mrb[30].mxu0 %vm279_vm0, %v1209_v11  ;;  %v2091_v11 = vrot.slane %v4783_v23, 2 }
  0x79   : > { %3935 = vmatmul.mubr.msk.f32.gmra.mrb[16].mxu1 %vm279_vm0, %v4863_v45  ;;  %4160 = vmatprep.mubr.msk.f32.mxu0 %vm279_vm0, %v2070_v26  ;;  %v5330_v26 = vsel %vm2067_vm2, %v2087_v62, %v2089_v41  ;;  %v2105_v62 = vrot.slane %v4863_v45, 2 }
  0x7a   : > { %3937 = vmatprep.mubr.msk.f32.mxu1 %vm279_vm0, %v4883_v51  ;;  %v5347_v29 = vsel %vm2067_vm2, %v2091_v11, %v2093_v48  ;;  %v2109_v48 = vrot.slane %v4886_v52, 2 }
  0x7c   : > { %4161 = vmatmul.mubr.msk.f32.vlgmr.msra.gmra.mrb[0].mxu0 %vm279_vm0, %v2072_v58  ;;  %v5336_v58 = vsel %vm2067_vm2, %v2089_v41, %v2091_v11  ;;  %v2107_v41 = vrot.slane %v4883_v51, 2  ;;  %v5386_v11 = vsel %vm2067_vm2, %v2104_v25, %v2105_v62  ;;  %v2122_v25 = vrot.slane %v4954_v3, 2 }
  0x7d   : > { %4209 = vmatpush3.msra.mxu0 %v4961_v7  ;;  %3938 = vmatmul.mubr.msk.f32.gmra.mrb[18].mxu1 %vm279_vm0, %v4886_v52  ;;  %v5303_v7 = vsel %vm2067_vm2, %v2080_v27, %v2082_v5  ;;  %v2100_v27 = vrot.slane %v4838_v38, 2  ;;  %v2102_v5 = vrot.slane %v4857_v43, 2 }
  0x7e   : > { %4163 = vmatprep.mubr.msk.f32.mxu0 %vm279_vm0, %v2074_v35  ;;  %3940 = vmatprep.mubr.msk.f32.mxu1 %vm279_vm0, %v4923_v61  ;;  %v5353_v35 = vsel %vm2067_vm2, %v2095_v40, %v2096_v39  ;;  %v5396_v40 = vsel %vm2067_vm2, %v2105_v62, %v2107_v41  ;;  %v2123_v62 = vrot.slane %v4971_v8, 2 }
  0x7f   : > { %4258 = vmatprep.subr.mxu0 %v5276_v28  ;;  %v5369_v9 = vsel %vm2067_vm2, %v2098_v46, %v2100_v27  ;;  %v5380_v43 = vsel %vm2067_vm2, %v2100_v27, %v2102_v5  ;;  %v2118_v27 = vrot.slane %v4951_v2, 2  ;;  %v2120_v5 = vrot.slane %v5038_v47, 2 }
  0x80   : > { %4164 = vmatmul.mubr.msk.f32.gmra.mrb[2].mxu0 %vm279_vm0, %v2076_v4  ;;  %v5363_v4 = vsel %vm2067_vm2, %v2096_v39, %v2098_v46  ;;  %v2111_v39 = vrot.slane %v4905_v57, 2  ;;  %v2113_v46 = vrot.slane %v4923_v61, 2  ;;  %v2116_v57 = vrot.slane %v4940_v0, 2 }
  0x81   : > { %3941 = vmatmul.mubr.msk.f32.gmra.mrb[20].mxu1 %vm279_vm0, %v4937_v63  ;;  %4166 = vmatprep.mubr.msk.f32.mxu0 %vm279_vm0, %v5288_v53  ;;  %v5454_v47 = vsel %vm2067_vm2, %v2122_v25, %v2123_v62  ;;  %v6074_v25 = vld [vmem:[#allocation15_spill] sm:$0xff] }
  0x82   : > { %3943 = vmatprep.mubr.msk.f32.mxu1 %vm279_vm0, %v4940_v0 }
  0x84   : > { %4167 = vmatmul.mubr.msk.f32.gmra.mrb[4].mxu0 %vm279_vm0, %v5297_v6 }
  0x85   : > { %3944 = vmatmul.mubr.msk.f32.gmra.mrb[22].mxu1 %vm279_vm0, %v4951_v2  ;;  %4169 = vmatprep.mubr.msk.f32.mxu0 %vm279_vm0, %v5303_v7 }
  0x86   : > { %3946 = vmatprep.mubr.msk.f32.mxu1 %vm279_vm0, %v4954_v3 }
  0x88   : > { %4170 = vmatmul.mubr.msk.f32.gmra.mrb[6].mxu0 %vm279_vm0, %v5314_v14 }
  0x89   : > { %3947 = vmatmul.mubr.msk.f32.gmra.mrb[24].mxu1 %vm279_vm0, %v4971_v8  ;;  %4172 = vmatprep.mubr.msk.f32.mxu0 %vm279_vm0, %v5320_v60 }
  0x8a   : > { %3949 = vmatprep.mubr.msk.f32.mxu1 %vm279_vm0, %v4974_v12 }
  0x8c   : > { %4173 = vmatmul.mubr.msk.f32.gmra.mrb[8].mxu0 %vm279_vm0, %v5330_v26 }
  0x8d   : > { %3950 = vmatmul.mubr.msk.f32.gmra.mrb[26].mxu1 %vm279_vm0, %v4986_v13  ;;  %4175 = vmatprep.mubr.msk.f32.mxu0 %vm279_vm0, %v5336_v58 }
  0x8e   : > { %3952 = vmatprep.mubr.msk.f32.mxu1 %vm279_vm0, %v4989_v16 }
  0x90   : > { %4176 = vmatmul.mubr.msk.f32.gmra.mrb[10].mxu0 %vm279_vm0, %v5347_v29 }
  0x91   : > { %3953 = vmatmul.mubr.msk.f32.gmra.mrb[28].mxu1 %vm279_vm0, %v5000_v18  ;;  %4178 = vmatprep.mubr.msk.f32.mxu0 %vm279_vm0, %v5353_v35 }
  0x92   : > { %3955 = vmatprep.mubr.msk.f32.mxu1 %vm279_vm0, %v5003_v22 }
  0x94   : > { %4179 = vmatmul.mubr.msk.f32.gmra.mrb[12].mxu0 %vm279_vm0, %v5363_v4 }
  0x95   : > { %3956 = vmatmul.mubr.msk.f32.gmra.mrb[30].mxu1 %vm279_vm0, %v5014_v24  ;;  %4181 = vmatprep.mubr.msk.f32.mxu0 %vm279_vm0, %v5369_v9 }
  0x96   : > { %3960 = vmatprep.mubr.msk.f32.mxu1 %vm279_vm0, %v4746_v10  ;;  %v5403_v10 = vsel %vm2067_vm2, %v2107_v41, %v2109_v48  ;;  %v2127_v41 = vrot.slane %v4986_v13, 2 }
  0x98   : > { %4182 = vmatmul.mubr.msk.f32.gmra.mrb[14].mxu0 %vm279_vm0, %v5380_v43 }
  0x99   : > { %3961 = vmatmul.mubr.msk.f32.vlgmr.msra.gmra.mrb[0].mxu1 %vm279_vm0, %v4767_v17  ;;  %4184 = vmatprep.mubr.msk.f32.mxu0 %vm279_vm0, %v5386_v11  ;;  %v2114_v17 = vrot.slane %v4937_v63, 2 }
  0x9a   : > { %3963 = vmatprep.mubr.msk.f32.mxu1 %vm279_vm0, %v4771_v19  ;;  %4009 = vmatpush3.msra.mxu1 %v5106_v54  ;;  %v5415_v19 = vsel %vm2067_vm2, %v2109_v48, %v2111_v39  ;;  %v2129_v48 = vrot.slane %v5096_v34, 2  ;;  %v2131_v39 = vrot.slane %v4989_v16, 2 }
  0x9b   : > { %4308 = vmatprep.subr.mxu1 %v4710_v1  ;;  %v5421_v54 = vsel %vm2067_vm2, %v2113_v46, %v2114_v17  ;;  %v2132_v46 = vrot.slane %v5000_v18, 2 }
  0x9c   : > { %4185 = vmatmul.mubr.msk.f32.gmra.mrb[16].mxu0 %vm279_vm0, %v5396_v40  ;;  %v5481_v34 = vsel %vm2067_vm2, %v2127_v41, %v2129_v48  ;;  %v6078_v48 = vld [vmem:[#allocation19_spill] sm:$0xff] }
  0x9d   : > { %3964 = vmatmul.mubr.msk.f32.gmra.mrb[2].mxu1 %vm279_vm0, %v4783_v23  ;;  %4187 = vmatprep.mubr.msk.f32.mxu0 %vm279_vm0, %v5403_v10  ;;  %v5431_v23 = vsel %vm2067_vm2, %v2114_v17, %v2116_v57  ;;  %v2136_v17 = vrot.slane %v5014_v24, 2 }
  0x9e   : > { %3966 = vmatprep.mubr.msk.f32.mxu1 %vm279_vm0, %v4811_v30  ;;  %v5437_v30 = vsel %vm2067_vm2, %v2116_v57, %v2118_v27  ;;  %v2138_v57 = vrot.slane %v5155_v50, 2  ;;  %v2145_v50 = vrot.slane %v5056_v56, 2 }
  0xa0   : > { %4188 = vmatmul.mubr.msk.f32.gmra.mrb[18].mxu0 %vm279_vm0, %v5415_v19 }
  0xa1   : > { %3967 = vmatmul.mubr.msk.f32.gmra.mrb[4].mxu1 %vm279_vm0, %v4814_v31  ;;  %4190 = vmatprep.mubr.msk.f32.mxu0 %vm279_vm0, %v5421_v54  ;;  %v5448_v31 = vsel %vm2067_vm2, %v2118_v27, %v2120_v5  ;;  %v6073_v5 = vld [vmem:[#allocation14_spill] sm:$0xff] }
  0xa2   : > { %3969 = vmatprep.mubr.msk.f32.mxu1 %vm279_vm0, %v4835_v37  ;;  %v2125_v37 = vrot.slane %v4974_v12, 2 }
  0xa4   : > { %4191 = vmatmul.mubr.msk.f32.gmra.mrb[20].mxu0 %vm279_vm0, %v5431_v23 }
  0xa5   : > { %3970 = vmatmul.mubr.msk.f32.gmra.mrb[6].mxu1 %vm279_vm0, %v4838_v38  ;;  %4193 = vmatprep.mubr.msk.f32.mxu0 %vm279_vm0, %v5437_v30  ;;  %v5464_v38 = vsel %vm2067_vm2, %v2123_v62, %v2125_v37  ;;  %v6075_v62 = vld [vmem:[#allocation16_spill] sm:$0xff] }
  0xa6   : > { %3972 = vmatprep.mubr.msk.f32.mxu1 %vm279_vm0, %v4860_v44  ;;  %v5470_v44 = vsel %vm2067_vm2, %v2125_v37, %v2127_v41  ;;  %v6076_v37 = vld [vmem:[#allocation17_spill] sm:$0xff]  ;;  %v6077_v41 = vld [vmem:[#allocation18_spill] sm:$0xff] }
  0xa8   : > { %4194 = vmatmul.mubr.msk.f32.gmra.mrb[22].mxu0 %vm279_vm0, %v5448_v31 }
  0xa9   : > { %3973 = vmatmul.mubr.msk.f32.gmra.mrb[8].mxu1 %vm279_vm0, %v4863_v45  ;;  %4196 = vmatprep.mubr.msk.f32.mxu0 %vm279_vm0, %v5454_v47  ;;  %v2134_v45 = vrot.slane %v5003_v22, 2 }
  0xaa   : > { %3975 = vmatprep.mubr.msk.f32.mxu1 %vm279_vm0, %v4883_v51  ;;  %v5487_v51 = vsel %vm2067_vm2, %v2131_v39, %v2132_v46 }
  0xac   : > { %4197 = vmatmul.mubr.msk.f32.gmra.mrb[24].mxu0 %vm279_vm0, %v5464_v38 }
  0xad   : > { %3976 = vmatmul.mubr.msk.f32.gmra.mrb[10].mxu1 %vm279_vm0, %v4886_v52  ;;  %4199 = vmatprep.mubr.msk.f32.mxu0 %vm279_vm0, %v5470_v44  ;;  %v5497_v52 = vsel %vm2067_vm2, %v2132_v46, %v2134_v45 }
  0xae   : > { %3978 = vmatprep.mubr.msk.f32.mxu1 %vm279_vm0, %v4923_v61  ;;  %v5503_v61 = vsel %vm2067_vm2, %v2134_v45, %v2136_v17 }
  0xb0   : > { %4200 = vmatmul.mubr.msk.f32.gmra.mrb[26].mxu0 %vm279_vm0, %v5481_v34 }
  0xb1   : > { %3979 = vmatmul.mubr.msk.f32.gmra.mrb[12].mxu1 %vm279_vm0, %v4937_v63  ;;  %4202 = vmatprep.mubr.msk.f32.mxu0 %vm279_vm0, %v5487_v51  ;;  %v5512_v63 = vsel %vm2067_vm2, %v2136_v17, %v2138_v57 }
  0xb2   : > { %3981 = vmatprep.mubr.msk.f32.mxu1 %vm279_vm0, %v4940_v0  ;;  %v6058_v0 = vld [vmem:[#allocation24_spill] sm:$0xff] }
  0xb4   : > { %4203 = vmatmul.mubr.msk.f32.gmra.mrb[28].mxu0 %vm279_vm0, %v5497_v52 }
  0xb5   : > { %3982 = vmatmul.mubr.msk.f32.gmra.mrb[14].mxu1 %vm279_vm0, %v4951_v2  ;;  %4205 = vmatprep.mubr.msk.f32.mxu0 %vm279_vm0, %v5503_v61  ;;  %v6059_v2 = vld [vmem:[#allocation26_spill] sm:$0xff] }
  0xb6   : > { %3984 = vmatprep.mubr.msk.f32.mxu1 %vm279_vm0, %v4954_v3  ;;  %v6060_v3 = vld [vmem:[#allocation2_spill] sm:$0xff] }
  0xb8   : > { %4206 = vmatmul.mubr.msk.f32.gmra.mrb[30].mxu0 %vm279_vm0, %v5512_v63 }
  0xb9   : > { %3985 = vmatmul.mubr.msk.f32.gmra.mrb[16].mxu1 %vm279_vm0, %v4971_v8  ;;  %4210 = vmatprep.mubr.msk.f32.mxu0 %vm279_vm0, %v5288_v53  ;;  %v6061_v8 = vld [vmem:[#allocation3_spill] sm:$0xff]  ;;  %v6070_v53 = vld [vmem:[#allocation33_spill] sm:$0xff] }
  0xba   : > { %3987 = vmatprep.mubr.msk.f32.mxu1 %vm279_vm0, %v4974_v12  ;;  %v6063_v12 = vld [vmem:[#allocation5_spill] sm:$0xff] }
  0xbc   : > { %4211 = vmatmul.mubr.msk.f32.vlgmr.msra.gmra.mrb[0].mxu0 %vm279_vm0, %v5297_v6  ;;  %v6071_v6 = vld [vmem:[#allocation12_spill] sm:$0xff] }
  0xbd   : > { %4259 = vmatpush3.msra.mxu0 %v5276_v28  ;;  %3988 = vmatmul.mubr.msk.f32.gmra.mrb[18].mxu1 %vm279_vm0, %v4986_v13  ;;  %v6064_v13 = vld [vmem:[#allocation6_spill] sm:$0xff] }
  0xbe   : > { %4213 = vmatprep.mubr.msk.f32.mxu0 %vm279_vm0, %v5303_v7  ;;  %3990 = vmatprep.mubr.msk.f32.mxu1 %vm279_vm0, %v4989_v16  ;;  %v6065_v16 = vld [vmem:[#allocation7_spill] sm:$0xff]  ;;  %v6068_v28 = vld [vmem:[#allocation10_spill] sm:$0xff] }
  0xc0   : > { %4214 = vmatmul.mubr.msk.f32.gmra.mrb[2].mxu0 %vm279_vm0, %v5314_v14  ;;  %v6072_v14 = vld [vmem:[#allocation13_spill] sm:$0xff] }
  0xc1   : > { %3991 = vmatmul.mubr.msk.f32.gmra.mrb[20].mxu1 %vm279_vm0, %v5000_v18  ;;  %4216 = vmatprep.mubr.msk.f32.mxu0 %vm279_vm0, %v5320_v60  ;;  %v2140_v18 = vrot.slane %v5019_v33, 2 }
  0xc2   : > { %3993 = vmatprep.mubr.msk.f32.mxu1 %vm279_vm0, %v5003_v22  ;;  %v2141_v22 = vrot.slane %v5031_v36, 2 }
  0xc4   : > { %4217 = vmatmul.mubr.msk.f32.gmra.mrb[4].mxu0 %vm279_vm0, %v5330_v26 }
  0xc5   : > { %3994 = vmatmul.mubr.msk.f32.gmra.mrb[22].mxu1 %vm279_vm0, %v5014_v24  ;;  %4219 = vmatprep.mubr.msk.f32.mxu0 %vm279_vm0, %v5336_v58  ;;  %v6066_v24 = vld [vmem:[#allocation8_spill] sm:$0xff] }
  0xc6   : > { %3996 = vmatprep.mubr.msk.f32.mxu1 %vm279_vm0, %v5019_v33  ;;  %v5635_v33 = vsel %vm2067_vm2, %v2140_v18, %v2141_v22 }
  0xc8   : > { %4220 = vmatmul.mubr.msk.f32.gmra.mrb[6].mxu0 %vm279_vm0, %v5347_v29 }
  0xc9   : > { %3997 = vmatmul.mubr.msk.f32.gmra.mrb[24].mxu1 %vm279_vm0, %v5031_v36  ;;  %4222 = vmatprep.mubr.msk.f32.mxu0 %vm279_vm0, %v5353_v35  ;;  %v6069_v36 = vld [vmem:[#allocation11_spill] sm:$0xff] }
  0xca   : > { %3999 = vmatprep.mubr.msk.f32.mxu1 %vm279_vm0, %v5041_v49 }
  0xcc   : > { %4223 = vmatmul.mubr.msk.f32.gmra.mrb[8].mxu0 %vm279_vm0, %v5363_v4 }
  0xcd   : > { %4000 = vmatmul.mubr.msk.f32.gmra.mrb[26].mxu1 %vm279_vm0, %v5056_v56  ;;  %4225 = vmatprep.mubr.msk.f32.mxu0 %vm279_vm0, %v5369_v9  ;;  %v2147_v56 = vrot.slane %v6070_v53, 2 }
  0xce   : > { %4002 = vmatprep.mubr.msk.f32.mxu1 %vm279_vm0, %v5194_v21 }
  0xcf   : > { %v5656_v27 = vsel %vm2067_vm2, %v2145_v50, %v2147_v56 }
  0xd0   : > { %4226 = vmatmul.mubr.msk.f32.gmra.mrb[10].mxu0 %vm279_vm0, %v5380_v43 }
  0xd1   : > { %4003 = vmatmul.mubr.msk.f32.gmra.mrb[28].mxu1 %vm279_vm0, %v5197_v20  ;;  %4228 = vmatprep.mubr.msk.f32.mxu0 %vm279_vm0, %v5386_v11 }
  0xd2   : > { %4005 = vmatprep.mubr.msk.f32.mxu1 %vm279_vm0, %v5217_v15 }
  0xd4   : > { %4229 = vmatmul.mubr.msk.f32.gmra.mrb[12].mxu0 %vm279_vm0, %v5396_v40 }
  0xd5   : > { %4006 = vmatmul.mubr.msk.f32.gmra.mrb[30].mxu1 %vm279_vm0, %v5220_v55  ;;  %4231 = vmatprep.mubr.msk.f32.mxu0 %vm279_vm0, %v5403_v10 }
  0xd6   : > { %4010 = vmatprep.mubr.msk.f32.mxu1 %vm279_vm0, %v5099_v42  ;;  %v6067_v42 = vld [vmem:[#allocation9_spill] sm:$0xff] }
  0xd8   : > { %4232 = vmatmul.mubr.msk.f32.gmra.mrb[14].mxu0 %vm279_vm0, %v5415_v19 }
  0xd9   : > { %4011 = vmatmul.mubr.msk.f32.vlgmr.msra.gmra.mrb[0].mxu1 %vm279_vm0, %v5109_v59  ;;  %4234 = vmatprep.mubr.msk.f32.mxu0 %vm279_vm0, %v5421_v54  ;;  %v2143_v59 = vrot.slane %v5041_v49, 2 }
  0xda   : > { %4013 = vmatprep.mubr.msk.f32.mxu1 %vm279_vm0, %v6058_v0  ;;  %4309 = vmatpush3.msra.mxu1 %v4710_v1  ;;  %v6062_v1 = vld [vmem:[#allocation4_spill] sm:$0xff] }
  0xdb   : > { %v5644_v49 = vsel %vm2067_vm2, %v2141_v22, %v2143_v59  ;;  %v2146_v7 = vsel %vm2067_vm2, %v2143_v59, %v2145_v50  ;;  %v5816_v22 = vld [vmem:[%s5976_s3] ss:$0 sm:$0xff] }
  0xdc   : > { %4235 = vmatmul.mubr.msk.f32.gmra.mrb[16].mxu0 %vm279_vm0, %v5431_v23 }
  0xdd   : > { %4014 = vmatmul.mubr.msk.f32.gmra.mrb[2].mxu1 %vm279_vm0, %v6059_v2  ;;  %4237 = vmatprep.mubr.msk.f32.mxu0 %vm279_vm0, %v5437_v30 }
  0xde   : > { %4016 = vmatprep.mubr.msk.f32.mxu1 %vm279_vm0, %v6060_v3 }
  0xe0   : > { %4238 = vmatmul.mubr.msk.f32.gmra.mrb[18].mxu0 %vm279_vm0, %v5448_v31 }
  0xe1   : > { %4017 = vmatmul.mubr.msk.f32.gmra.mrb[4].mxu1 %vm279_vm0, %v6061_v8  ;;  %4240 = vmatprep.mubr.msk.f32.mxu0 %vm279_vm0, %v5454_v47 }
  0xe2   : > { %4019 = vmatprep.mubr.msk.f32.mxu1 %vm279_vm0, %v6062_v1 }
  0xe4   : > { %4241 = vmatmul.mubr.msk.f32.gmra.mrb[20].mxu0 %vm279_vm0, %v5464_v38 }
  0xe5   : > { %4020 = vmatmul.mubr.msk.f32.gmra.mrb[6].mxu1 %vm279_vm0, %v6063_v12  ;;  %4243 = vmatprep.mubr.msk.f32.mxu0 %vm279_vm0, %v5470_v44 }
  0xe6   : > { %4022 = vmatprep.mubr.msk.f32.mxu1 %vm279_vm0, %v6064_v13  ;;  %v5811_v13 = vld [vmem:[%s5975_s2] ss:$0 sm:$0xff] }
  0xe8   : > { %4244 = vmatmul.mubr.msk.f32.gmra.mrb[22].mxu0 %vm279_vm0, %v5481_v34 }
  0xe9   : > { %4023 = vmatmul.mubr.msk.f32.gmra.mrb[8].mxu1 %vm279_vm0, %v6065_v16  ;;  %4246 = vmatprep.mubr.msk.f32.mxu0 %vm279_vm0, %v5487_v51 }
  0xea   : > { %4025 = vmatprep.mubr.msk.f32.mxu1 %vm279_vm0, %v6066_v24 }
  0xec   : > { %4247 = vmatmul.mubr.msk.f32.gmra.mrb[24].mxu0 %vm279_vm0, %v5497_v52 }
  0xed   : > { %4026 = vmatmul.mubr.msk.f32.gmra.mrb[10].mxu1 %vm279_vm0, %v6067_v42  ;;  %4249 = vmatprep.mubr.msk.f32.mxu0 %vm279_vm0, %v5503_v61 }
  0xee   : > { %4028 = vmatprep.mubr.msk.f32.mxu1 %vm279_vm0, %v6068_v28 }
  0xf0   : > { %4250 = vmatmul.mubr.msk.f32.gmra.mrb[26].mxu0 %vm279_vm0, %v5512_v63 }
  0xf1   : > { %4029 = vmatmul.mubr.msk.f32.gmra.mrb[12].mxu1 %vm279_vm0, %v6069_v36  ;;  %4252 = vmatprep.mubr.msk.f32.mxu0 %vm279_vm0, %v5635_v33 }
  0xf2   : > { %4031 = vmatprep.mubr.msk.f32.mxu1 %vm279_vm0, %v6071_v6 }
  0xf4   : > { %4253 = vmatmul.mubr.msk.f32.gmra.mrb[28].mxu0 %vm279_vm0, %v5644_v49 }
  0xf5   : > { %4032 = vmatmul.mubr.msk.f32.gmra.mrb[14].mxu1 %vm279_vm0, %v6072_v14  ;;  %4255 = vmatprep.mubr.msk.f32.mxu0 %vm279_vm0, %v2146_v7 }
  0xf6   : > { %4034 = vmatprep.mubr.msk.f32.mxu1 %vm279_vm0, %v6073_v5 }
  0xf8   : > { %4256 = vmatmul.mubr.msk.f32.gmra.mrb[30].mxu0 %vm279_vm0, %v5656_v27 }
  0xf9   : > { %4035 = vmatmul.mubr.msk.f32.gmra.mrb[16].mxu1 %vm279_vm0, %v6074_v25  ;;  %4260 = vmatprep.mubr.msk.f32.mxu0 %vm279_vm0, %v5320_v60  ;;  %v6079_v60 = vld [vmem:[#allocation20_spill] sm:$0xff] }
  0xfa   : > { %4037 = vmatprep.mubr.msk.f32.mxu1 %vm279_vm0, %v6075_v62 }
  0xfc   : > { %4261 = vmatmul.mubr.msk.f32.vlgmr.msra.gmra.mrb[0].mxu0 %vm279_vm0, %v5330_v26  ;;  %v6080_v26 = vld [vmem:[#allocation21_spill] sm:$0xff] }
  0xfd   : > { %4038 = vmatmul.mubr.msk.f32.gmra.mrb[18].mxu1 %vm279_vm0, %v6076_v37  ;;  %4263 = vmatprep.mubr.msk.f32.mxu0 %vm279_vm0, %v5336_v58  ;;  %v6081_v58 = vld [vmem:[#allocation22_spill] sm:$0xff] }
  0xfe   : > { %4040 = vmatprep.mubr.msk.f32.mxu1 %vm279_vm0, %v6077_v41 }
 0x100   : > { %4264 = vmatmul.mubr.msk.f32.gmra.mrb[2].mxu0 %vm279_vm0, %v5347_v29  ;;  %v6082_v29 = vld [vmem:[#allocation23_spill] sm:$0xff] }
 0x101   : > { %4041 = vmatmul.mubr.msk.f32.gmra.mrb[20].mxu1 %vm279_vm0, %v6078_v48  ;;  %4266 = vmatprep.mubr.msk.f32.mxu0 %vm279_vm0, %v5353_v35  ;;  %v6083_v35 = vld [vmem:[#allocation25_spill] sm:$0xff] }
 0x102   : > { %4043 = vmatprep.mubr.msk.f32.mxu1 %vm279_vm0, %v6079_v60 }
 0x104   : > { %4267 = vmatmul.mubr.msk.f32.gmra.mrb[4].mxu0 %vm279_vm0, %v5363_v4  ;;  %v6084_v4 = vld [vmem:[#allocation27_spill] sm:$0xff] }
 0x105   : > { %4044 = vmatmul.mubr.msk.f32.gmra.mrb[22].mxu1 %vm279_vm0, %v6080_v26  ;;  %4269 = vmatprep.mubr.msk.f32.mxu0 %vm279_vm0, %v5369_v9  ;;  %v6085_v9 = vld [vmem:[#allocation28_spill] sm:$0xff] }
 0x106   : > { %4046 = vmatprep.mubr.msk.f32.mxu1 %vm279_vm0, %v6081_v58 }
 0x108   : > { %4270 = vmatmul.mubr.msk.f32.gmra.mrb[6].mxu0 %vm279_vm0, %v5380_v43  ;;  %v6086_v43 = vld [vmem:[#allocation29_spill] sm:$0xff] }
 0x109   : > { %4047 = vmatmul.mubr.msk.f32.gmra.mrb[24].mxu1 %vm279_vm0, %v6082_v29  ;;  %4272 = vmatprep.mubr.msk.f32.mxu0 %vm279_vm0, %v5386_v11  ;;  %v6087_v11 = vld [vmem:[#allocation30_spill] sm:$0xff] }
 0x10a   : > { %4049 = vmatprep.mubr.msk.f32.mxu1 %vm279_vm0, %v6083_v35 }
 0x10c   : > { %4273 = vmatmul.mubr.msk.f32.gmra.mrb[8].mxu0 %vm279_vm0, %v5396_v40  ;;  %v6088_v40 = vld [vmem:[#allocation31_spill] sm:$0xff] }
 0x10d   : > { %4050 = vmatmul.mubr.msk.f32.gmra.mrb[26].mxu1 %vm279_vm0, %v6084_v4  ;;  %4275 = vmatprep.mubr.msk.f32.mxu0 %vm279_vm0, %v5403_v10  ;;  %v2149_v10 = vrot.slane %v5194_v21, 2 }
 0x10e   : > { %4052 = vmatprep.mubr.msk.f32.mxu1 %vm279_vm0, %v6085_v9 }
 0x110   : > { %4276 = vmatmul.mubr.msk.f32.gmra.mrb[10].mxu0 %vm279_vm0, %v5415_v19  ;;  %v2150_v19 = vrot.slane %v5197_v20, 2  ;;  %v6090_v20 = vld [vmem:[#allocation34_spill] sm:$0xff] }
 0x111   : > { %4053 = vmatmul.mubr.msk.f32.gmra.mrb[28].mxu1 %vm279_vm0, %v6086_v43  ;;  %4278 = vmatprep.mubr.msk.f32.mxu0 %vm279_vm0, %v5421_v54  ;;  %v2152_v54 = vrot.slane %v5217_v15, 2  ;;  %v6091_v15 = vld [vmem:[#allocation35_spill] sm:$0xff] }
 0x112   : > { %4055 = vmatprep.mubr.msk.f32.mxu1 %vm279_vm0, %v6087_v11 }
 0x113   : > { %v2153_v21 = vsel %vm2067_vm2, %v2150_v19, %v2152_v54 }
 0x114   : > { %4279 = vmatmul.mubr.msk.f32.gmra.mrb[12].mxu0 %vm279_vm0, %v5431_v23  ;;  %v6089_v23 = vld [vmem:[#allocation32_spill] sm:$0xff] }
 0x115   : > { %4056 = vmatmul.mubr.msk.f32.gmra.mrb[30].mxu1 %vm279_vm0, %v6088_v40  ;;  %4281 = vmatprep.mubr.msk.f32.mxu0 %vm279_vm0, %v5437_v30  ;;  %v2151_v30 = vsel %vm2067_vm2, %v2149_v10, %v2150_v19 }
 0x116   : > { %4084 = vmatprep.mubr.msk.f32.mxu1 %vm279_vm0, %v6077_v41 }
 0x118   : > { %4282 = vmatmul.mubr.msk.f32.gmra.mrb[14].mxu0 %vm279_vm0, %v5448_v31  ;;  %v2154_v31 = vrot.slane %v5220_v55, 2  ;;  %v6092_v55 = vld [vmem:[#allocation36_spill] sm:$0xff] }
 0x119   : > { %4085 = vmatmul.mubr.msk.f32.vlgmr.msra.gmra.mrb[16].mxu1 %vm279_vm0, %v6078_v48  ;;  %4284 = vmatprep.mubr.msk.f32.mxu0 %vm279_vm0, %v5454_v47  ;;  %v2156_v47 = vrot.slane %v5237_v32, 2 }
 0x11a   : > { %4087 = vmatprep.mubr.msk.f32.mxu1 %vm279_vm0, %v6079_v60 }
 0x11c   : > { %4285 = vmatmul.mubr.msk.f32.gmra.mrb[16].mxu0 %vm279_vm0, %v5464_v38  ;;  %v2155_v38 = vsel %vm2067_vm2, %v2152_v54, %v2154_v31 }
 0x11d   : > { %4088 = vmatmul.mubr.msk.f32.gmra.mrb[18].mxu1 %vm279_vm0, %v6080_v26  ;;  %4287 = vmatprep.mubr.msk.f32.mxu0 %vm279_vm0, %v5470_v44  ;;  %v2157_v44 = vsel %vm2067_vm2, %v2154_v31, %v2156_v47 }
 0x11e   : > { %4090 = vmatprep.mubr.msk.f32.mxu1 %vm279_vm0, %v6081_v58 }
 0x120   : > { %4288 = vmatmul.mubr.msk.f32.gmra.mrb[18].mxu0 %vm279_vm0, %v5481_v34 }
 0x121   : > { %4091 = vmatmul.mubr.msk.f32.gmra.mrb[20].mxu1 %vm279_vm0, %v6082_v29  ;;  %4290 = vmatprep.mubr.msk.f32.mxu0 %vm279_vm0, %v5487_v51 }
 0x122   : > { %4093 = vmatprep.mubr.msk.f32.mxu1 %vm279_vm0, %v6083_v35 }
 0x124   : > { %4291 = vmatmul.mubr.msk.f32.gmra.mrb[20].mxu0 %vm279_vm0, %v5497_v52 }
 0x125   : > { %4094 = vmatmul.mubr.msk.f32.gmra.mrb[22].mxu1 %vm279_vm0, %v6084_v4  ;;  %4293 = vmatprep.mubr.msk.f32.mxu0 %vm279_vm0, %v5503_v61 }
 0x126   : > { %4096 = vmatprep.mubr.msk.f32.mxu1 %vm279_vm0, %v6085_v9 }
 0x128   : > { %4294 = vmatmul.mubr.msk.f32.gmra.mrb[22].mxu0 %vm279_vm0, %v5512_v63 }
 0x129   : > { %4097 = vmatmul.mubr.msk.f32.gmra.mrb[24].mxu1 %vm279_vm0, %v6086_v43  ;;  %4296 = vmatprep.mubr.msk.f32.mxu0 %vm279_vm0, %v5635_v33 }
 0x12a   : > { %4099 = vmatprep.mubr.msk.f32.mxu1 %vm279_vm0, %v6087_v11 }
 0x12c   : > { %4297 = vmatmul.mubr.msk.f32.gmra.mrb[24].mxu0 %vm279_vm0, %v5644_v49 }
 0x12d   : > { %4100 = vmatmul.mubr.msk.f32.gmra.mrb[26].mxu1 %vm279_vm0, %v6088_v40  ;;  %4299 = vmatprep.mubr.msk.f32.mxu0 %vm279_vm0, %v2146_v7 }
 0x12e   : > { %4102 = vmatprep.mubr.msk.f32.mxu1 %vm279_vm0, %v6089_v23 }
 0x130   : > { %4300 = vmatmul.mubr.msk.f32.gmra.mrb[26].mxu0 %vm279_vm0, %v5656_v27 }
 0x131   : > { %4103 = vmatmul.mubr.msk.f32.gmra.mrb[28].mxu1 %vm279_vm0, %v6090_v20  ;;  %4302 = vmatprep.mubr.msk.f32.mxu0 %vm279_vm0, %v2151_v30 }
 0x132   : > { %4105 = vmatprep.mubr.msk.f32.mxu1 %vm279_vm0, %v6091_v15 }
 0x134   : > { %4303 = vmatmul.mubr.msk.f32.gmra.mrb[28].mxu0 %vm279_vm0, %v2153_v21 }
 0x135   : > { %4106 = vmatmul.mubr.msk.f32.gmra.mrb[30].mxu1 %vm279_vm0, %v6092_v55  ;;  %4305 = vmatprep.mubr.msk.f32.mxu0 %vm279_vm0, %v2155_v38 }
 0x138   : > { %4306 = vmatmul.mubr.msk.f32.gmra.mrb[30].mxu0 %vm279_vm0, %v2157_v44 }
 0x1ac   : > { %v4012_v39 = vpop.f32.mrb[0].mxu1 }
 0x1ad   : > { %v1342_v46 = vpop.f32.mrb[1].mxu1 }
 0x1b0   : > { %v4015_v32 = vpop.f32.mrb[2].mxu1 }
 0x1b1   : > { %v1352_v34 = vpop.f32.mrb[3].mxu1 }
 0x1b4   : > { %v4018_v45 = vpop.f32.mrb[4].mxu1 }
 0x1b5   : > { %v1362_v51 = vpop.f32.mrb[5].mxu1 }
 0x1b8   : > { %v4021_v17 = vpop.f32.mrb[6].mxu1 }
 0x1b9   : > { %v1372_v52 = vpop.f32.mrb[7].mxu1 }
 0x1bc   : > { %v4024_v57 = vpop.f32.mrb[8].mxu1 }
 0x1bd   : > { %v5792_v61 = vpop.f32.mrb[9].mxu1 }
 0x1c0   : > { %v5794_v63 = vpop.f32.mrb[10].mxu1 }
 0x1c1   : > { %v5796_v0 = vpop.f32.mrb[11].mxu1 }
 0x1c4   : > { %v5799_v2 = vpop.f32.mrb[12].mxu1 }
 0x1c5   : > { %v5801_v3 = vpop.f32.mrb[13].mxu1 }
 0x1c8   : > { %v5803_v8 = vpop.f32.mrb[14].mxu1 }
 0x1c9   : > { %v5805_v1 = vpop.f32.mrb[15].mxu1 }
 0x1cf   : > { %v4262_v12 = vpop.f32.mrb[0].mxu0 }
 0x1d0   : > { %v4310_v16 = vadd.f32 %v4262_v12, %v4012_v39  ;;  %v2824_v18 = vpop.f32.mrb[1].mxu0 }
 0x1d1   : > { %v4311_v24 = vadd.f32 %v2824_v18, %v1342_v46 }
 0x1d2   : > { %v3023_v59 = vmul.f32 %v4310_v16, %v5811_v13 }
 0x1d3   : > { %v3022_v42 = vmul.f32 %v4311_v24, %v5811_v13  ;;  %v4265_v50 = vpop.f32.mrb[2].mxu0 }
 0x1d4   : > { %v3062_v28 = vadd.f32 %v5816_v22, %v3023_v59  ;;  %v4312_v33 = vadd.f32 %v4265_v50, %v4015_v32  ;;  %v2834_v36 = vpop.f32.mrb[3].mxu0 }
 0x1d5   : > { %v3061_v49 = vadd.f32 %v5816_v22, %v3022_v42  ;;  %v4313_v53 = vadd.f32 %v2834_v36, %v1352_v34 }
 0x1d6   : > { %v3094_v56 = vmax.f32 %v3062_v28, 0.0  ;;  %v3025_v6 = vmul.f32 %v4312_v33, %v5811_v13 }
 0x1d7   : > { %v3093_v7 = vmax.f32 %v3061_v49, 0.0  ;;  %v3024_v14 = vmul.f32 %v4313_v53, %v5811_v13  ;;  %v4268_v27 = vpop.f32.mrb[4].mxu0 }
 0x1d8   : > { %3126 = vst.msk [vmem:[%s5824_s10 + $0x8] sm:$0xff] %vm279_vm0, %v3094_v56  ;;  %v3064_v5 = vadd.f32 %v5816_v22, %v3025_v6  ;;  %v4314_v25 = vadd.f32 %v4268_v27, %v4018_v45  ;;  %v2844_v62 = vpop.f32.mrb[5].mxu0 }
 0x1d9   : > { %3125 = vst.msk [vmem:[%s5824_s10] sm:$0xff] %vm279_vm0, %v3093_v7  ;;  %v3063_v37 = vadd.f32 %v5816_v22, %v3024_v14  ;;  %v4315_v41 = vadd.f32 %v2844_v62, %v1362_v51 }
 0x1da   : > { %v3096_v48 = vmax.f32 %v3064_v5, 0.0  ;;  %v3027_v60 = vmul.f32 %v4314_v25, %v5811_v13 }
 0x1db   : > { %v3095_v26 = vmax.f32 %v3063_v37, 0.0  ;;  %v3026_v58 = vmul.f32 %v4315_v41, %v5811_v13  ;;  %v4271_v29 = vpop.f32.mrb[6].mxu0 }
 0x1dc   : > { %3128 = vst.msk [vmem:[%s5824_s10 + $0x18] sm:$0xff] %vm279_vm0, %v3096_v48  ;;  %v3066_v35 = vadd.f32 %v5816_v22, %v3027_v60  ;;  %v4316_v4 = vadd.f32 %v4271_v29, %v4021_v17  ;;  %v2854_v9 = vpop.f32.mrb[7].mxu0 }
 0x1dd   : > { %3127 = vst.msk [vmem:[%s5824_s10 + $0x10] sm:$0xff] %vm279_vm0, %v3095_v26  ;;  %v3065_v43 = vadd.f32 %v5816_v22, %v3026_v58  ;;  %v4317_v11 = vadd.f32 %v2854_v9, %v1372_v52 }
 0x1de   : > { %v3098_v40 = vmax.f32 %v3066_v35, 0.0  ;;  %v3029_v10 = vmul.f32 %v4316_v4, %v5811_v13 }
 0x1df   : > { %v3097_v19 = vmax.f32 %v3065_v43, 0.0  ;;  %v3028_v54 = vmul.f32 %v4317_v11, %v5811_v13  ;;  %v4274_v23 = vpop.f32.mrb[8].mxu0 }
 0x1e0   : > { %3130 = vst.msk [vmem:[%s5824_s10 + $0x28] sm:$0xff] %vm279_vm0, %v3098_v40  ;;  %v3068_v30 = vadd.f32 %v5816_v22, %v3029_v10  ;;  %v4318_v31 = vadd.f32 %v4274_v23, %v4024_v57  ;;  %v2864_v20 = vpop.f32.mrb[9].mxu0 }
 0x1e1   : > { %3129 = vst.msk [vmem:[%s5824_s10 + $0x20] sm:$0xff] %vm279_vm0, %v3097_v19  ;;  %v3067_v21 = vadd.f32 %v5816_v22, %v3028_v54  ;;  %v4319_v47 = vadd.f32 %v2864_v20, %v5792_v61 }
 0x1e2   : > { %v3100_v15 = vmax.f32 %v3068_v30, 0.0  ;;  %v3031_v38 = vmul.f32 %v4318_v31, %v5811_v13 }
 0x1e3   : > { %v3099_v55 = vmax.f32 %v3067_v21, 0.0  ;;  %v3030_v44 = vmul.f32 %v4319_v47, %v5811_v13  ;;  %v4277_v39 = vpop.f32.mrb[10].mxu0 }
 0x1e4   : > { %3132 = vst.msk [vmem:[%s5824_s10 + $0x38] sm:$0xff] %vm279_vm0, %v3100_v15  ;;  %v3070_v46 = vadd.f32 %v5816_v22, %v3031_v38  ;;  %v4320_v32 = vadd.f32 %v4277_v39, %v5794_v63  ;;  %v2874_v34 = vpop.f32.mrb[11].mxu0 }
 0x1e5   : > { %3131 = vst.msk [vmem:[%s5824_s10 + $0x30] sm:$0xff] %vm279_vm0, %v3099_v55  ;;  %v3069_v45 = vadd.f32 %v5816_v22, %v3030_v44  ;;  %v4321_v51 = vadd.f32 %v2874_v34, %v5796_v0 }
 0x1e6   : > { %v3102_v17 = vmax.f32 %v3070_v46, 0.0  ;;  %v3033_v52 = vmul.f32 %v4320_v32, %v5811_v13 }
 0x1e7   : > { %v3101_v57 = vmax.f32 %v3069_v45, 0.0  ;;  %v3032_v61 = vmul.f32 %v4321_v51, %v5811_v13  ;;  %v4280_v12 = vpop.f32.mrb[12].mxu0 }
 0x1e8   : > { %3134 = vst.msk [vmem:[%s5824_s10 + $0x48] sm:$0xff] %vm279_vm0, %v3102_v17  ;;  %v3072_v16 = vadd.f32 %v5816_v22, %v3033_v52  ;;  %v4322_v63 = vadd.f32 %v4280_v12, %v5799_v2  ;;  %v2884_v18 = vpop.f32.mrb[13].mxu0 }
 0x1e9   : > { %3133 = vst.msk [vmem:[%s5824_s10 + $0x40] sm:$0xff] %vm279_vm0, %v3101_v57  ;;  %v3071_v0 = vadd.f32 %v5816_v22, %v3032_v61  ;;  %v4323_v24 = vadd.f32 %v2884_v18, %v5801_v3 }
 0x1ea   : > { %v3104_v59 = vmax.f32 %v3072_v16, 0.0  ;;  %v3035_v42 = vmul.f32 %v4322_v63, %v5811_v13 }
 0x1eb   : > { %v3103_v50 = vmax.f32 %v3071_v0, 0.0  ;;  %v3034_v28 = vmul.f32 %v4323_v24, %v5811_v13  ;;  %v4283_v33 = vpop.f32.mrb[14].mxu0 }
 0x1ec   : > { %3136 = vst.msk [vmem:[%s5824_s10 + $0x58] sm:$0xff] %vm279_vm0, %v3104_v59  ;;  %v3074_v36 = vadd.f32 %v5816_v22, %v3035_v42  ;;  %v4324_v2 = vadd.f32 %v4283_v33, %v5803_v8  ;;  %v4086_v49 = vpop.f32.mrb[16].mxu1  ;;  %v2894_v53 = vpop.f32.mrb[15].mxu0 }
 0x1ed   : > { %3135 = vst.msk [vmem:[%s5824_s10 + $0x50] sm:$0xff] %vm279_vm0, %v3103_v50  ;;  %v3073_v3 = vadd.f32 %v5816_v22, %v3034_v28  ;;  %v4325_v56 = vadd.f32 %v2894_v53, %v5805_v1  ;;  %v1689_v6 = vpop.f32.mrb[17].mxu1 }
 0x1ee   : > { %v3106_v7 = vmax.f32 %v3074_v36, 0.0  ;;  %v3037_v14 = vmul.f32 %v4324_v2, %v5811_v13 }
 0x1ef   : > { %v3105_v27 = vmax.f32 %v3073_v3, 0.0  ;;  %v3036_v5 = vmul.f32 %v4325_v56, %v5811_v13  ;;  %v4286_v25 = vpop.f32.mrb[16].mxu0 }
 0x1f0   : > { %3138 = vst.msk [vmem:[%s5824_s10 + $0x68] sm:$0xff] %vm279_vm0, %v3106_v7  ;;  %v3076_v8 = vadd.f32 %v5816_v22, %v3037_v14  ;;  %v4326_v62 = vadd.f32 %v4286_v25, %v4086_v49  ;;  %v4089_v37 = vpop.f32.mrb[18].mxu1  ;;  %v2904_v41 = vpop.f32.mrb[17].mxu0 }
 0x1f1   : > { %3137 = vst.msk [vmem:[%s5824_s10 + $0x60] sm:$0xff] %vm279_vm0, %v3105_v27  ;;  %v3075_v1 = vadd.f32 %v5816_v22, %v3036_v5  ;;  %v4327_v48 = vadd.f32 %v2904_v41, %v1689_v6  ;;  %v1699_v60 = vpop.f32.mrb[19].mxu1 }
 0x1f2   : > { %v3108_v26 = vmax.f32 %v3076_v8, 0.0  ;;  %v3039_v58 = vmul.f32 %v4326_v62, %v5811_v13 }
 0x1f3   : > { %v3107_v29 = vmax.f32 %v3075_v1, 0.0  ;;  %v3038_v35 = vmul.f32 %v4327_v48, %v5811_v13  ;;  %v4289_v4 = vpop.f32.mrb[18].mxu0 }
 0x1f4   : > { %3140 = vst.msk [vmem:[%s5824_s10 + $0x78] sm:$0xff] %vm279_vm0, %v3108_v26  ;;  %v3078_v9 = vadd.f32 %v5816_v22, %v3039_v58  ;;  %v4328_v43 = vadd.f32 %v4289_v4, %v4089_v37  ;;  %v4092_v11 = vpop.f32.mrb[20].mxu1  ;;  %v2914_v40 = vpop.f32.mrb[19].mxu0 }
 0x1f5   : > { %3139 = vst.msk [vmem:[%s5824_s10 + $0x70] sm:$0xff] %vm279_vm0, %v3107_v29  ;;  %v3077_v10 = vadd.f32 %v5816_v22, %v3038_v35  ;;  %v4329_v19 = vadd.f32 %v2914_v40, %v1699_v60  ;;  %v1709_v54 = vpop.f32.mrb[21].mxu1 }
 0x1f6   : > { %v3110_v23 = vmax.f32 %v3078_v9, 0.0  ;;  %v3041_v30 = vmul.f32 %v4328_v43, %v5811_v13 }
 0x1f7   : > { %v3109_v31 = vmax.f32 %v3077_v10, 0.0  ;;  %v3040_v20 = vmul.f32 %v4329_v19, %v5811_v13  ;;  %v4292_v21 = vpop.f32.mrb[20].mxu0 }
 0x1f8   : > { %3142 = vst.msk [vmem:[%s5824_s10 + $0x88] sm:$0xff] %vm279_vm0, %v3110_v23  ;;  %v3080_v47 = vadd.f32 %v5816_v22, %v3041_v30  ;;  %v4330_v15 = vadd.f32 %v4292_v21, %v4092_v11  ;;  %v4095_v38 = vpop.f32.mrb[22].mxu1  ;;  %v2924_v55 = vpop.f32.mrb[21].mxu0 }
 0x1f9   : > { %3141 = vst.msk [vmem:[%s5824_s10 + $0x80] sm:$0xff] %vm279_vm0, %v3109_v31  ;;  %v3079_v44 = vadd.f32 %v5816_v22, %v3040_v20  ;;  %v4331_v39 = vadd.f32 %v2924_v55, %v1709_v54  ;;  %v1719_v46 = vpop.f32.mrb[23].mxu1 }
 0x1fa   : > { %v3112_v32 = vmax.f32 %v3080_v47, 0.0  ;;  %v3043_v34 = vmul.f32 %v4330_v15, %v5811_v13 }
 0x1fb   : > { %v3111_v45 = vmax.f32 %v3079_v44, 0.0  ;;  %v3042_v51 = vmul.f32 %v4331_v39, %v5811_v13  ;;  %v4295_v17 = vpop.f32.mrb[22].mxu0 }
 0x1fc   : > { %3144 = vst.msk [vmem:[%s5824_s10 + $0x98] sm:$0xff] %vm279_vm0, %v3112_v32  ;;  %v3082_v52 = vadd.f32 %v5816_v22, %v3043_v34  ;;  %v4332_v57 = vadd.f32 %v4295_v17, %v4095_v38  ;;  %v4098_v61 = vpop.f32.mrb[24].mxu1  ;;  %v2934_v12 = vpop.f32.mrb[23].mxu0 }
 0x1fd   : > { %3143 = vst.msk [vmem:[%s5824_s10 + $0x90] sm:$0xff] %vm279_vm0, %v3111_v45  ;;  %v3081_v16 = vadd.f32 %v5816_v22, %v3042_v51  ;;  %v4333_v63 = vadd.f32 %v2934_v12, %v1719_v46  ;;  %v1729_v18 = vpop.f32.mrb[25].mxu1 }
 0x1fe   : > { %v3114_v0 = vmax.f32 %v3082_v52, 0.0  ;;  %v3045_v24 = vmul.f32 %v4332_v57, %v5811_v13 }
 0x1ff   : > { %v3113_v59 = vmax.f32 %v3081_v16, 0.0  ;;  %v3044_v42 = vmul.f32 %v4333_v63, %v5811_v13  ;;  %v4298_v50 = vpop.f32.mrb[24].mxu0 }
 0x200   : > { %3146 = vst.msk [vmem:[%s5824_s10 + $0xa8] sm:$0xff] %vm279_vm0, %v3114_v0  ;;  %v3084_v28 = vadd.f32 %v5816_v22, %v3045_v24  ;;  %v4334_v33 = vadd.f32 %v4298_v50, %v4098_v61  ;;  %v4101_v36 = vpop.f32.mrb[26].mxu1  ;;  %v2944_v2 = vpop.f32.mrb[25].mxu0 }
 0x201   : > { %3145 = vst.msk [vmem:[%s5824_s10 + $0xa0] sm:$0xff] %vm279_vm0, %v3113_v59  ;;  %v3083_v49 = vadd.f32 %v5816_v22, %v3044_v42  ;;  %v4335_v53 = vadd.f32 %v2944_v2, %v1729_v18  ;;  %v1739_v3 = vpop.f32.mrb[27].mxu1 }
 0x202   : > { %v3116_v56 = vmax.f32 %v3084_v28, 0.0  ;;  %v3047_v6 = vmul.f32 %v4334_v33, %v5811_v13 }
 0x203   : > { %v3115_v7 = vmax.f32 %v3083_v49, 0.0  ;;  %v3046_v14 = vmul.f32 %v4335_v53, %v5811_v13  ;;  %v4301_v27 = vpop.f32.mrb[26].mxu0 }
 0x204   : > { %3148 = vst.msk [vmem:[%s5824_s10 + $0xb8] sm:$0xff] %vm279_vm0, %v3116_v56  ;;  %v3086_v5 = vadd.f32 %v5816_v22, %v3047_v6  ;;  %v4336_v25 = vadd.f32 %v4301_v27, %v4101_v36  ;;  %v4104_v8 = vpop.f32.mrb[28].mxu1  ;;  %v2954_v62 = vpop.f32.mrb[27].mxu0 }
 0x205   : > { %3147 = vst.msk [vmem:[%s5824_s10 + $0xb0] sm:$0xff] %vm279_vm0, %v3115_v7  ;;  %v3085_v37 = vadd.f32 %v5816_v22, %v3046_v14  ;;  %v4337_v41 = vadd.f32 %v2954_v62, %v1739_v3  ;;  %v1749_v1 = vpop.f32.mrb[29].mxu1 }
 0x206   : > { %v3118_v48 = vmax.f32 %v3086_v5, 0.0  ;;  %v3049_v60 = vmul.f32 %v4336_v25, %v5811_v13 }
 0x207   : > { %v3117_v26 = vmax.f32 %v3085_v37, 0.0  ;;  %v3048_v58 = vmul.f32 %v4337_v41, %v5811_v13  ;;  %v4304_v29 = vpop.f32.mrb[28].mxu0 }
 0x208   : > { %3150 = vst.msk [vmem:[%s5824_s10 + $0xc8] sm:$0xff] %vm279_vm0, %v3118_v48  ;;  %v3088_v35 = vadd.f32 %v5816_v22, %v3049_v60  ;;  %v4338_v4 = vadd.f32 %v4304_v29, %v4104_v8  ;;  %v4107_v9 = vpop.f32.mrb[30].mxu1  ;;  %v2964_v43 = vpop.f32.mrb[29].mxu0 }
 0x209   : > { %3149 = vst.msk [vmem:[%s5824_s10 + $0xc0] sm:$0xff] %vm279_vm0, %v3117_v26  ;;  %v3087_v11 = vadd.f32 %v5816_v22, %v3048_v58  ;;  %v4339_v40 = vadd.f32 %v2964_v43, %v1749_v1  ;;  %v1759_v10 = vpop.f32.mrb[31].mxu1 }
 0x20a   : > { %v3120_v19 = vmax.f32 %v3088_v35, 0.0  ;;  %v3051_v54 = vmul.f32 %v4338_v4, %v5811_v13 }
 0x20b   : > { %v3119_v23 = vmax.f32 %v3087_v11, 0.0  ;;  %v3050_v30 = vmul.f32 %v4339_v40, %v5811_v13  ;;  %v4307_v31 = vpop.f32.mrb[30].mxu0 }
 0x20c   : > { %3152 = vst.msk [vmem:[%s5824_s10 + $0xd8] sm:$0xff] %vm279_vm0, %v3120_v19  ;;  %v3090_v20 = vadd.f32 %v5816_v22, %v3051_v54  ;;  %v4340_v21 = vadd.f32 %v4307_v31, %v4107_v9  ;;  %v2974_v47 = vpop.f32.mrb[31].mxu0 }
 0x20d   : > { %3151 = vst.msk [vmem:[%s5824_s10 + $0xd0] sm:$0xff] %vm279_vm0, %v3119_v23  ;;  %v3089_v15 = vadd.f32 %v5816_v22, %v3050_v30  ;;  %v4341_v38 = vadd.f32 %v2974_v47, %v1759_v10 }
 0x20e   : > { %v3122_v55 = vmax.f32 %v3090_v20, 0.0  ;;  %v3053_v44 = vmul.f32 %v4340_v21, %v5811_v13 }
 0x20f   : > { %v3121_v39 = vmax.f32 %v3089_v15, 0.0  ;;  %v3052_v46 = vmul.f32 %v4341_v38, %v5811_v13 }
 0x210   : > { %3154 = vst.msk [vmem:[%s5824_s10 + $0xe8] sm:$0xff] %vm279_vm0, %v3122_v55  ;;  %v3092_v32 = vadd.f32 %v5816_v22, %v3053_v44 }
 0x211   : > { %3153 = vst.msk [vmem:[%s5824_s10 + $0xe0] sm:$0xff] %vm279_vm0, %v3121_v39  ;;  %v3091_v34 = vadd.f32 %v5816_v22, %v3052_v46 }
 0x212   : > { %v3124_v45 = vmax.f32 %v3092_v32, 0.0 }
 0x213   : > { %v3123_v51 = vmax.f32 %v3091_v34, 0.0 }
 0x214   : > { %3156 = vst.msk [vmem:[%s5824_s10 + $0xf8] sm:$0xff] %vm279_vm0, %v3124_v45 }
 0x215   : > { %3155 = vst.msk [vmem:[%s5824_s10 + $0xf0] sm:$0xff] %vm279_vm0, %v3123_v51 }
 0x216 PF: > { %s14_s19 = sadd.s32 1, %s4645_s19   ;;  %s6093_s15 = smov %s4637_s17 }
 0x217   : > { %p11_p7 = scmp.ge.s32.totalorder %s14_s19, 10   ;;  %s6094_s16 = smov %s4641_s18 }
 0x218   : > { %s6095_s17 = smov %s6098_s20  ;;  %s6096_s18 = smov %s6102_s21 }
 0x219   :  { %13 = sbr.rel (!%p11_p7) target bundleno = 3 (0x3), region = 75 }

// kernel: aligned_bottleneck_pallas.8
= control target key start
LH: loop header
LB: loop body
LE: loop exit
PB: predicated region body
PF: predicated region fallthrough
CT: control target
= control target key end

     0   :  { %s4496_s9 = smov 0   ;;  %s4498_s10 = smov 0   ;;  %s5702_s0 = inlined_call_operand.vmem [shape: f32[2,34,34,8], index: 0, kind: input, shape index: {}]   ;;  %s5703_s1 = inlined_call_operand.vmem [shape: f32[3,3,8,8], index: 1, kind: input, shape index: {}]   ;;  %s5704_s2 = inlined_call_operand.vmem [shape: f32[2,32,32,8], index: 2, kind: output, shape index: {}]  }
   0x1   :  { %s4500_s11 = smov 0   ;;  %s4502_s12 = smov 0  }
   0x2   :  { %s4504_s13 = smov 0  }
   0x3 LB: > { %s21_s14 = sadd.s32 1, %s4471_s11  ;;  %s24_s15 = sadd.s32 1, %s4475_s12  ;;  %s4479_s13 = sphi %s4504_s13, %s12_s13   ;;  %s4475_s12 = sphi %s4502_s12, %s5823_s12   ;;  %s4471_s11 = sphi %s4500_s11, %s5822_s11   ;;  %s4467_s10 = sphi %s4498_s10, %s5821_s10   ;;  %s4463_s9 = sphi %s4496_s9, %s5820_s9  }
   0x4   : > { %p22_p0 = scmp.ge.s32.totalorder %s21_s14, 4  ;;  %p3089_p1 = scmp.ge.s32.totalorder %s4479_s13, 1 }
   0x5   : > { %p126_p2 = scmp.lt.s32.totalorder %s4479_s13, 9 }
   0x6   : > { %s5825_s14 = smov (%p22_p0, %s21_s14), 0  ;;  %s5827_s15 = smov (!%p22_p0, %s24_s15), %s4475_s12 }
   0x7   : > { %p127_p3 = pnand %p3089_p1, %p126_p2  ;;  %p26_p4 = scmp.ge.s32.totalorder %s5827_s15, 2 }
   0x9   : > { %s5829_s15 = smov (%p26_p4, %s5827_s15), 0  ;;  %130 = sbr.rel (%p127_p3) target bundleno = 528 (0x210), region = 28 }
  0x10   : > { %v3097_v0 = vld [vmem:[%s5703_s1 + $0x18] sm:$0xff]  ;;  %p153_p5 = scmp.lt.s32.totalorder %s4467_s10, 1  ;;  %v4534_v1 = vld [vmem:[%s5703_s1 + $0x20] sm:$0xff]  ;;  %s3096_s24 = smul.u32 320, %s4463_s9  ;;  %vm225_vm0 = vcmask 64512   ;;  %vm1065_vm1 = vcmask 1046528  }
  0x11   : > { %v222_v2 = vld [vmem:[%s5703_s1] sm:$0xff]  ;;  %3692 = vmatprep.subr.mxu1 %v3097_v0  ;;  %3892 = vmatprep.subr.mxu0 %v4534_v1  ;;  %v3261_v3 = vld [vmem:[%s5703_s1 + $0x38] sm:$0xff]  ;;  %v4575_v11 = vld [vmem:[%s5703_s1 + $0x30] sm:$0xff]  ;;  %vm2013_vm2 = vcmask 1045504   ;;  %s3091_s19 = sshll.u32 %s4463_s9, 3 }
  0x12   : > { %3693 = vmatpush3.msra.mxu1 %v3097_v0  ;;  %s5831_s10 = smov (!%p153_p5, %s4467_s10), 1  ;;  %3893 = vmatpush3.msra.mxu0 %v4534_v1  ;;  %v4615_v24 = vld [vmem:[%s5703_s1 + $0x10] sm:$0xff]  ;;  %p161_p6 = scmp.lt.s32.totalorder %s3091_s19, 31 }
  0x13   : > { %3742 = vmatprep.subr.mxu1 %v222_v2  ;;  %3942 = vmatprep.subr.mxu0 %v3261_v3  ;;  %s4400_s25 = smul.u32 1360, %s5831_s10  ;;  %s3093_s21 = sshll.u32 %s5831_s10, 7 }
  0x14   : > { %s5833_s19 = smov (!%p161_p6, %s3091_s19), 31 }
  0x15   : > { %s157_s28 = scalar_lea.vmem %s5702_s0, %s4400_s25  ;;  %s3092_s20 = sshll.u32 %s5833_s19, 2 }
  0x16   : > { %s4551_s29 = scalar_lea.vmem %s157_s28, %s3096_s24  ;;  %s165_s22 = sadd.s32 %s3093_s21, %s3092_s20 }
  0x17   : > { %v4554_v4 = vld [vmem:[%s4551_s29 + $0x28] sm:$0xff]  ;;  %v4557_v5 = vld [vmem:[%s4551_s29 + $0x30] sm:$0xff]  ;;  %v4560_v6 = vld [vmem:[%s4551_s29 + $0x38] sm:$0xff]  ;;  %s3094_s23 = sshll.u32 %s165_s22, 3 }
  0x18   : > { %3694 = vmatprep.mubr.msk.f32.mxu1 %vm225_vm0, %v4554_v4  ;;  %v1075_v7 = vrot.slane %v4554_v4, 1  ;;  %v1076_v8 = vrot.slane %v4557_v5, 1  ;;  %v4567_v9 = vld [vmem:[%s4551_s29 + $0x40] sm:$0xff]  ;;  %v4570_v10 = vld [vmem:[%s4551_s29 + $0x50] sm:$0xff]  ;;  %v1078_v12 = vrot.slane %v4560_v6, 1  ;;  %v4591_v17 = vld [vmem:[%s4551_s29 + $0x58] sm:$0xff]  ;;  %s5621_s26 = scalar_lea.vmem %s5704_s2, %s3094_s23 }
  0x19   : > { %3695 = vmatmul.mubr.msk.f32.vlgmr.msra.gmra.mrb[0].mxu1 %vm225_vm0, %v4557_v5  ;;  %v1080_v13 = vrot.slane %v4567_v9, 1  ;;  %v4582_v14 = vld [vmem:[%s4551_s29 + $0x48] sm:$0x3]  ;;  %v1084_v18 = vrot.slane %v4570_v10, 1  ;;  %v4595_v19 = vld [vmem:[%s4551_s29 + $0x60] sm:$0xff]  ;;  %v1085_v22 = vrot.slane %v4591_v17, 1 }
  0x1a   : > { %v4585_v15 = vsel %vm1065_vm1, %v1075_v7, %v1076_v8  ;;  %3697 = vmatprep.mubr.msk.f32.mxu1 %vm225_vm0, %v4560_v6  ;;  %3743 = vmatpush3.msra.mxu1 %v222_v2  ;;  %v1082_v16 = vrot.slane %v4582_v14, 1  ;;  %v4600_v20 = vsel %vm1065_vm1, %v1076_v8, %v1078_v12  ;;  %v4607_v23 = vld [vmem:[%s4551_s29 + $0x68] sm:$0xff]  ;;  %v1087_v26 = vrot.slane %v4595_v19, 1  ;;  %v4632_v29 = vld [vmem:[%s4551_s29 + $0x70] sm:$0x3]  ;;  %v4635_v30 = vld [vmem:[%s4551_s29 + $0x78] sm:$0xff] }
  0x1b   : > { %5750 = vst [vmem:[#allocation2_spill] sm:$0xff] %v4585_v15  ;;  %3894 = vmatprep.mubr.msk.f32.mxu0 %vm225_vm0, %v4585_v15  ;;  %5751 = vst [vmem:[#allocation3_spill] sm:$0xff] %v4600_v20  ;;  %v4603_v21 = vsel %vm1065_vm1, %v1078_v12, %v1080_v13  ;;  %3792 = vmatprep.subr.mxu1 %v4575_v11  ;;  %v4628_v27 = vsel %vm1065_vm1, %v1084_v18, %v1085_v22  ;;  %v1089_v28 = vrot.slane %v4607_v23, 1  ;;  %v4638_v31 = vld [vmem:[%s4551_s29 + $0x80] sm:$0xff]  ;;  %v4659_v37 = vld [vmem:[%s4551_s29 + $0x88] sm:$0xff] }
  0x1c   : > { %5752 = vst [vmem:[#allocation4_spill] sm:$0xff] %v4603_v21  ;;  %3895 = vmatmul.mubr.msk.f32.vlgmr.msra.gmra.mrb[0].mxu0 %vm225_vm0, %v4600_v20  ;;  %v4620_v25 = vsel %vm1065_vm1, %v1080_v13, %v1082_v16  ;;  %5754 = vst [vmem:[#allocation6_spill] sm:$0xff] %v4628_v27  ;;  %v4648_v32 = vsel %vm1065_vm1, %v1085_v22, %v1087_v26  ;;  %v1091_v33 = vrot.slane %v4632_v29, 1  ;;  %v1093_v35 = vrot.slane %v4635_v30, 1  ;;  %v4662_v38 = vld [vmem:[%s4551_s29 + $0x90] sm:$0xff]  ;;  %v4684_v44 = vld [vmem:[%s4551_s29 + $0xa0] sm:$0xff] }
  0x1d   : > { %3943 = vmatpush3.msra.mxu0 %v3261_v3  ;;  %3698 = vmatmul.mubr.msk.f32.gmra.mrb[2].mxu1 %vm225_vm0, %v4567_v9  ;;  %5753 = vst [vmem:[#allocation5_spill] sm:$0xff] %v4620_v25  ;;  %5755 = vst [vmem:[#allocation7_spill] sm:$0xff] %v4648_v32  ;;  %v4654_v34 = vsel %vm1065_vm1, %v1087_v26, %v1089_v28  ;;  %v1094_v36 = vrot.slane %v4638_v31, 1  ;;  %v1096_v40 = vrot.slane %v4659_v37, 1  ;;  %v1098_v42 = vrot.slane %v4662_v38, 1  ;;  %v4687_v45 = vld [vmem:[%s4551_s29 + $0xa8] sm:$0xff] }
  0x1e   : > { %3897 = vmatprep.mubr.msk.f32.mxu0 %vm225_vm0, %v4603_v21  ;;  %3700 = vmatprep.mubr.msk.f32.mxu1 %vm225_vm0, %v4570_v10  ;;  %5756 = vst [vmem:[#allocation8_spill] sm:$0xff] %v4654_v34  ;;  %v4671_v39 = vsel %vm1065_vm1, %v1089_v28, %v1091_v33  ;;  %v4681_v43 = vld [vmem:[%s4551_s29 + $0x98] sm:$0x3]  ;;  %v1102_v49 = vrot.slane %v4684_v44, 1  ;;  %v1103_v50 = vrot.slane %v4687_v45, 1  ;;  %v4707_v51 = vld [vmem:[%s4551_s29 + $0xb0] sm:$0xff] }
  0x1f   : > { %3992 = vmatprep.subr.mxu0 %v4615_v24  ;;  %5757 = vst [vmem:[#allocation9_spill] sm:$0xff] %v4671_v39  ;;  %v4677_v41 = vsel %vm1065_vm1, %v1093_v35, %v1094_v36  ;;  %v4696_v46 = vsel %vm1065_vm1, %v1094_v36, %v1096_v40  ;;  %v1100_v47 = vrot.slane %v4681_v43, 1  ;;  %v4702_v48 = vsel %vm1065_vm1, %v1096_v40, %v1098_v42  ;;  %v4710_v52 = vld [vmem:[%s4551_s29 + $0xb8] sm:$0xff]  ;;  %v4729_v57 = vld [vmem:[%s4551_s29 + $0xc0] sm:$0x3]  ;;  %v4747_v61 = vld [vmem:[%s4551_s29 + $0xc8] sm:$0xff] }
  0x20   : > { %3898 = vmatmul.mubr.msk.f32.gmra.mrb[2].mxu0 %vm225_vm0, %v4620_v25  ;;  %5758 = vst [vmem:[#allocation10_spill] sm:$0xff] %v4677_v41  ;;  %5759 = vst [vmem:[#allocation11_spill] sm:$0xff] %v4696_v46  ;;  %v1105_v54 = vrot.slane %v4707_v51, 1  ;;  %v4725_v55 = vsel %vm1065_vm1, %v1102_v49, %v1103_v50  ;;  %v1107_v56 = vrot.slane %v4710_v52, 1  ;;  %v1109_v59 = vrot.slane %v4729_v57, 1  ;;  %v4761_v63 = vld [vmem:[%s4551_s29 + $0xd0] sm:$0xff] }
  0x21   : > { %3701 = vmatmul.mubr.msk.f32.gmra.mrb[4].mxu1 %vm225_vm0, %v4591_v17  ;;  %3900 = vmatprep.mubr.msk.f32.mxu0 %vm225_vm0, %v4628_v27  ;;  %5760 = vst [vmem:[#allocation12_spill] sm:$0xff] %v4702_v48  ;;  %v4719_v53 = vsel %vm1065_vm1, %v1098_v42, %v1100_v47  ;;  %5762 = vst [vmem:[#allocation14_spill] sm:$0xff] %v4725_v55  ;;  %v4764_v0 = vld [vmem:[%s4551_s29 + $0xd8] sm:$0xff]  ;;  %v4775_v2 = vld [vmem:[%s4551_s29 + $0xe0] sm:$0xff]  ;;  %v1111_v26 = vrot.slane %v4747_v61, 1  ;;  %v1112_v28 = vrot.slane %v4761_v63, 1 }
  0x22   : > { %3703 = vmatprep.mubr.msk.f32.mxu1 %vm225_vm0, %v4595_v19  ;;  %5761 = vst [vmem:[#allocation13_spill] sm:$0xff] %v4719_v53  ;;  %v4738_v58 = vsel %vm1065_vm1, %v1103_v50, %v1105_v54  ;;  %v4744_v60 = vsel %vm1065_vm1, %v1105_v54, %v1107_v56  ;;  %v4756_v62 = vsel %vm1065_vm1, %v1107_v56, %v1109_v59  ;;  %v4778_v3 = vld [vmem:[%s4551_s29 + $0xf0] sm:$0xff]  ;;  %v4785_v7 = vld [vmem:[%s5703_s1 + $0x28] sm:$0xff]  ;;  %v4795_v8 = vld [vmem:[%s4551_s29 + $0xf8] sm:$0xff]  ;;  %v1114_v35 = vrot.slane %v4764_v0, 1 }
  0x23   : > { %5763 = vst [vmem:[#allocation15_spill] sm:$0xff] %v4738_v58  ;;  %5764 = vst [vmem:[#allocation16_spill] sm:$0xff] %v4744_v60  ;;  %v4798_v12 = vld [vmem:[%s4551_s29 + $0x100] sm:$0xff]  ;;  %v4810_v13 = vld [vmem:[%s4551_s29 + $0x108] sm:$0xff]  ;;  %v4858_v40 = vsel %vm1065_vm1, %v1111_v26, %v1112_v28  ;;  %v1116_v42 = vrot.slane %v4775_v2, 1 }
  0x24   : > { %3901 = vmatmul.mubr.msk.f32.gmra.mrb[4].mxu0 %vm225_vm0, %v4648_v32  ;;  %5765 = vst [vmem:[#allocation17_spill] sm:$0xff] %v4756_v62  ;;  %v4813_v16 = vld [vmem:[%s4551_s29 + $0x118] sm:$0xff]  ;;  %v4824_v18 = vld [vmem:[%s4551_s29 + $0x120] sm:$0xff]  ;;  %v4827_v22 = vld [vmem:[%s4551_s29 + $0x128] sm:$0xff]  ;;  %v4874_v50 = vsel %vm1065_vm1, %v1112_v28, %v1114_v35 }
  0x25   : > { %3704 = vmatmul.mubr.msk.f32.gmra.mrb[6].mxu1 %vm225_vm0, %v4607_v23  ;;  %3903 = vmatprep.mubr.msk.f32.mxu0 %vm225_vm0, %v4654_v34  ;;  %v4843_v33 = vld [vmem:[%s4551_s29 + $0x140] sm:$0xff]  ;;  %v4855_v36 = vld [vmem:[%s4551_s29 + $0x148] sm:$0xff]  ;;  %5766 = vst [vmem:[#allocation18_spill] sm:$0xff] %v4858_v40  ;;  %v4865_v49 = vld [vmem:[%s4551_s29 + $0x150] sm:$0xff]  ;;  %v4883_v59 = vsel %vm1065_vm1, %v1114_v35, %v1116_v42 }
  0x26   : > { %3706 = vmatprep.mubr.msk.f32.mxu1 %vm225_vm0, %v4635_v30  ;;  %v4862_v47 = vld [vmem:[%s4551_s29 + $0xe8] sm:$0x3]  ;;  %5767 = vst [vmem:[#allocation19_spill] sm:$0xff] %v4874_v50  ;;  %v4880_v56 = vld [vmem:[%s4551_s29 + $0x158] sm:$0xff]  ;;  %5768 = vst [vmem:[#allocation20_spill] sm:$0xff] %v4883_v59 }
  0x27   : > { %v1118_v54 = vrot.slane %v4862_v47, 1  ;;  %v4886_v26 = vld [vmem:[%s4551_s29] sm:$0xff]  ;;  %v4901_v35 = vld [vmem:[%s4551_s29 + $0x18] sm:$0xff]  ;;  %v5018_v21 = vld [vmem:[%s4551_s29 + $0x168] sm:$0xff] }
  0x28   : > { %3904 = vmatmul.mubr.msk.f32.gmra.mrb[6].mxu0 %vm225_vm0, %v4671_v39  ;;  %v1066_v28 = vrot.slane %v4886_v26, 1  ;;  %v5021_v20 = vld [vmem:[%s4551_s29 + $0x170] sm:$0xff]  ;;  %v5041_v15 = vld [vmem:[%s4551_s29 + $0x178] sm:$0xff] }
  0x29   : > { %3707 = vmatmul.mubr.msk.f32.gmra.mrb[8].mxu1 %vm225_vm0, %v4638_v31  ;;  %3906 = vmatprep.mubr.msk.f32.mxu0 %vm225_vm0, %v4677_v41 }
  0x2a   : > { %3709 = vmatprep.mubr.msk.f32.mxu1 %vm225_vm0, %v4659_v37 }
  0x2c   : > { %3907 = vmatmul.mubr.msk.f32.gmra.mrb[8].mxu0 %vm225_vm0, %v4696_v46 }
  0x2d   : > { %3710 = vmatmul.mubr.msk.f32.gmra.mrb[10].mxu1 %vm225_vm0, %v4662_v38  ;;  %3909 = vmatprep.mubr.msk.f32.mxu0 %vm225_vm0, %v4702_v48 }
  0x2e   : > { %3712 = vmatprep.mubr.msk.f32.mxu1 %vm225_vm0, %v4684_v44 }
  0x30   : > { %3910 = vmatmul.mubr.msk.f32.gmra.mrb[10].mxu0 %vm225_vm0, %v4719_v53 }
  0x31   : > { %3713 = vmatmul.mubr.msk.f32.gmra.mrb[12].mxu1 %vm225_vm0, %v4687_v45  ;;  %3912 = vmatprep.mubr.msk.f32.mxu0 %vm225_vm0, %v4725_v55 }
  0x32   : > { %3715 = vmatprep.mubr.msk.f32.mxu1 %vm225_vm0, %v4707_v51 }
  0x34   : > { %3913 = vmatmul.mubr.msk.f32.gmra.mrb[12].mxu0 %vm225_vm0, %v4738_v58 }
  0x35   : > { %3716 = vmatmul.mubr.msk.f32.gmra.mrb[14].mxu1 %vm225_vm0, %v4710_v52  ;;  %3915 = vmatprep.mubr.msk.f32.mxu0 %vm225_vm0, %v4744_v60 }
  0x36   : > { %3718 = vmatprep.mubr.msk.f32.mxu1 %vm225_vm0, %v4747_v61 }
  0x38   : > { %3916 = vmatmul.mubr.msk.f32.gmra.mrb[14].mxu0 %vm225_vm0, %v4756_v62 }
  0x39   : > { %3719 = vmatmul.mubr.msk.f32.gmra.mrb[16].mxu1 %vm225_vm0, %v4761_v63  ;;  %3944 = vmatprep.mubr.msk.f32.mxu0 %vm225_vm0, %v4628_v27 }
  0x3a   : > { %3721 = vmatprep.mubr.msk.f32.mxu1 %vm225_vm0, %v4764_v0 }
  0x3c   : > { %3945 = vmatmul.mubr.msk.f32.vlgmr.msra.gmra.mrb[0].mxu0 %vm225_vm0, %v4648_v32 }
  0x3d   : > { %3993 = vmatpush3.msra.mxu0 %v4615_v24  ;;  %3722 = vmatmul.mubr.msk.f32.gmra.mrb[18].mxu1 %vm225_vm0, %v4775_v2  ;;  %v4838_v24 = vld [vmem:[%s4551_s29 + $0x130] sm:$0xff] }
  0x3e   : > { %3947 = vmatprep.mubr.msk.f32.mxu0 %vm225_vm0, %v4654_v34  ;;  %3724 = vmatprep.mubr.msk.f32.mxu1 %vm225_vm0, %v4778_v3  ;;  %v4920_v34 = vld [vmem:[%s4551_s29 + $0x110] sm:$0x3] }
  0x3f   : > { %4042 = vmatprep.subr.mxu0 %v4785_v7 }
  0x40   : > { %3948 = vmatmul.mubr.msk.f32.gmra.mrb[2].mxu0 %vm225_vm0, %v4671_v39  ;;  %v1125_v39 = vrot.slane %v4810_v13, 1 }
  0x41   : > { %3725 = vmatmul.mubr.msk.f32.gmra.mrb[20].mxu1 %vm225_vm0, %v4795_v8  ;;  %3950 = vmatprep.mubr.msk.f32.mxu0 %vm225_vm0, %v4677_v41 }
  0x42   : > { %3727 = vmatprep.mubr.msk.f32.mxu1 %vm225_vm0, %v4798_v12 }
  0x44   : > { %3951 = vmatmul.mubr.msk.f32.gmra.mrb[4].mxu0 %vm225_vm0, %v4696_v46 }
  0x45   : > { %3728 = vmatmul.mubr.msk.f32.gmra.mrb[22].mxu1 %vm225_vm0, %v4810_v13  ;;  %3953 = vmatprep.mubr.msk.f32.mxu0 %vm225_vm0, %v4702_v48  ;;  %v1123_v48 = vrot.slane %v4798_v12, 1 }
  0x46   : > { %3730 = vmatprep.mubr.msk.f32.mxu1 %vm225_vm0, %v4813_v16 }
  0x48   : > { %3954 = vmatmul.mubr.msk.f32.gmra.mrb[6].mxu0 %vm225_vm0, %v4719_v53  ;;  %v4908_v53 = vsel %vm1065_vm1, %v1116_v42, %v1118_v54  ;;  %v4930_v54 = vld [vmem:[%s5703_s1 + $0x8] sm:$0xff] }
  0x49   : > { %3731 = vmatmul.mubr.msk.f32.gmra.mrb[24].mxu1 %vm225_vm0, %v4824_v18  ;;  %3956 = vmatprep.mubr.msk.f32.mxu0 %vm225_vm0, %v4725_v55  ;;  %5769 = vst [vmem:[#allocation21_spill] sm:$0xff] %v4908_v53 }
  0x4a   : > { %3733 = vmatprep.mubr.msk.f32.mxu1 %vm225_vm0, %v4827_v22 }
  0x4c   : > { %3957 = vmatmul.mubr.msk.f32.gmra.mrb[8].mxu0 %vm225_vm0, %v4738_v58  ;;  %v4897_v58 = vld [vmem:[%s4551_s29 + $0x8] sm:$0xff] }
  0x4d   : > { %3734 = vmatmul.mubr.msk.f32.gmra.mrb[26].mxu1 %vm225_vm0, %v4838_v24  ;;  %3959 = vmatprep.mubr.msk.f32.mxu0 %vm225_vm0, %v4744_v60  ;;  %v1121_v60 = vrot.slane %v4795_v8, 1  ;;  %v1067_v46 = vrot.slane %v4897_v58, 1 }
  0x4e   : > { %3736 = vmatprep.mubr.msk.f32.mxu1 %vm225_vm0, %v4843_v33 }
  0x4f   : > { %v4923_v42 = vsel %vm1065_vm1, %v1066_v28, %v1067_v46  ;;  %v1127_v28 = vrot.slane %v4920_v34, 1 }
  0x50   : > { %3960 = vmatmul.mubr.msk.f32.gmra.mrb[10].mxu0 %vm225_vm0, %v4756_v62  ;;  %v1120_v62 = vrot.slane %v4778_v3, 1 }
  0x51   : > { %3737 = vmatmul.mubr.msk.f32.gmra.mrb[28].mxu1 %vm225_vm0, %v4855_v36  ;;  %3962 = vmatprep.mubr.msk.f32.mxu0 %vm225_vm0, %v4858_v40  ;;  %v4892_v40 = vld [vmem:[%s4551_s29 + $0x10] sm:$0xff] }
  0x52   : > { %3739 = vmatprep.mubr.msk.f32.mxu1 %vm225_vm0, %v4865_v49  ;;  %v1069_v55 = vrot.slane %v4892_v40, 1  ;;  %v4916_v41 = vsel %vm1065_vm1, %v1120_v62, %v1121_v60  ;;  %v4940_v62 = vsel %vm1065_vm1, %v1121_v60, %v1123_v48  ;;  %v1130_v60 = vrot.slane %v4824_v18, 1 }
  0x53   : > { %5770 = vst [vmem:[#allocation22_spill] sm:$0xff] %v4916_v41  ;;  %5771 = vst [vmem:[#allocation23_spill] sm:$0xff] %v4940_v62 }
  0x54   : > { %3963 = vmatmul.mubr.msk.f32.gmra.mrb[12].mxu0 %vm225_vm0, %v4874_v50  ;;  %v1071_v50 = vrot.slane %v4901_v35, 1 }
  0x55   : > { %3740 = vmatmul.mubr.msk.f32.gmra.mrb[30].mxu1 %vm225_vm0, %v4880_v56  ;;  %3965 = vmatprep.mubr.msk.f32.mxu0 %vm225_vm0, %v4883_v59  ;;  %v4933_v59 = vsel %vm1065_vm1, %v1067_v46, %v1069_v55  ;;  %v4953_v46 = vsel %vm1065_vm1, %v1123_v48, %v1125_v39  ;;  %v1132_v48 = vrot.slane %v4827_v22, 1 }
  0x56   : > { %3744 = vmatprep.mubr.msk.f32.mxu1 %vm225_vm0, %v4886_v26  ;;  %v4947_v32 = vsel %vm1065_vm1, %v1069_v55, %v1071_v50  ;;  %5773 = vst [vmem:[#allocation25_spill] sm:$0xff] %v4953_v46 }
  0x57   : > { %5772 = vst [vmem:[#allocation24_spill] sm:$0xff] %v4947_v32  ;;  %v5061_v32 = vld [vmem:[%s4551_s29 + $0x188] sm:$0x3] }
  0x58   : > { %3966 = vmatmul.mubr.msk.f32.gmra.mrb[14].mxu0 %vm225_vm0, %v4908_v53  ;;  %v4944_v53 = vld [vmem:[%s4551_s29 + $0x20] sm:$0x3] }
  0x59   : > { %3745 = vmatmul.mubr.msk.f32.vlgmr.msra.gmra.mrb[0].mxu1 %vm225_vm0, %v4897_v58  ;;  %3968 = vmatprep.mubr.msk.f32.mxu0 %vm225_vm0, %v4916_v41  ;;  %v1129_v41 = vrot.slane %v4813_v16, 1  ;;  %v1073_v27 = vrot.slane %v4944_v53, 1 }
  0x5a   : > { %3747 = vmatprep.mubr.msk.f32.mxu1 %vm225_vm0, %v4892_v40  ;;  %3793 = vmatpush3.msra.mxu1 %v4575_v11  ;;  %v4969_v11 = vsel %vm1065_vm1, %v1125_v39, %v1127_v28  ;;  %v4988_v39 = vsel %vm1065_vm1, %v1130_v60, %v1132_v48  ;;  %v1138_v28 = vrot.slane %v4843_v33, 1 }
  0x5b   : > { %3842 = vmatprep.subr.mxu1 %v4930_v54  ;;  %v4962_v55 = vsel %vm1065_vm1, %v1071_v50, %v1073_v27  ;;  %5775 = vst [vmem:[#allocation27_spill] sm:$0xff] %v4969_v11  ;;  %v4975_v25 = vsel %vm1065_vm1, %v1129_v41, %v1130_v60  ;;  %v1134_v27 = vrot.slane %v4838_v24, 1  ;;  %v4979_v50 = vld [vmem:[%s4551_s29 + $0x138] sm:$0x3]  ;;  %5777 = vst [vmem:[#allocation29_spill] sm:$0xff] %v4988_v39 }
  0x5c   : > { %3969 = vmatmul.mubr.msk.f32.gmra.mrb[16].mxu0 %vm225_vm0, %v4940_v62  ;;  %5774 = vst [vmem:[#allocation26_spill] sm:$0xff] %v4962_v55  ;;  %5776 = vst [vmem:[#allocation28_spill] sm:$0xff] %v4975_v25  ;;  %v1136_v41 = vrot.slane %v4979_v50, 1  ;;  %v1143_v62 = vrot.slane %v4880_v56, 1  ;;  %v5044_v55 = vld [vmem:[%s4551_s29 + $0x180] sm:$0xff] }
  0x5d   : > { %3748 = vmatmul.mubr.msk.f32.gmra.mrb[2].mxu1 %vm225_vm0, %v4901_v35  ;;  %3971 = vmatprep.mubr.msk.f32.mxu0 %vm225_vm0, %v4953_v46  ;;  %v1139_v46 = vrot.slane %v4855_v36, 1 }
  0x5e   : > { %3750 = vmatprep.mubr.msk.f32.mxu1 %vm225_vm0, %v4554_v4  ;;  %v5006_v60 = vsel %vm1065_vm1, %v1134_v27, %v1136_v41 }
  0x5f   : > { %5779 = vst [vmem:[#allocation31_spill] sm:$0xff] %v5006_v60 }
  0x60   : > { %3972 = vmatmul.mubr.msk.f32.gmra.mrb[18].mxu0 %vm225_vm0, %v4969_v11  ;;  %v4996_v11 = vsel %vm1065_vm1, %v1132_v48, %v1134_v27  ;;  %v5012_v48 = vsel %vm1065_vm1, %v1138_v28, %v1139_v46 }
  0x61   : > { %3751 = vmatmul.mubr.msk.f32.gmra.mrb[4].mxu1 %vm225_vm0, %v4557_v5  ;;  %3974 = vmatprep.mubr.msk.f32.mxu0 %vm225_vm0, %v4975_v25  ;;  %5778 = vst [vmem:[#allocation30_spill] sm:$0xff] %v4996_v11  ;;  %v1141_v25 = vrot.slane %v4865_v49, 1  ;;  %5780 = vst [vmem:[#allocation32_spill] sm:$0xff] %v5012_v48 }
  0x62   : > { %3753 = vmatprep.mubr.msk.f32.mxu1 %vm225_vm0, %v4560_v6 }
  0x63   : > { %v5030_v27 = vsel %vm1065_vm1, %v1139_v46, %v1141_v25  ;;  %v5036_v28 = vsel %vm1065_vm1, %v1141_v25, %v1143_v62  ;;  %v1150_v46 = vrot.slane %v5041_v15, 1 }
  0x64   : > { %3975 = vmatmul.mubr.msk.f32.gmra.mrb[20].mxu0 %vm225_vm0, %v4988_v39  ;;  %v5015_v39 = vld [vmem:[%s4551_s29 + $0x160] sm:$0x3]  ;;  %5782 = vst [vmem:[#allocation34_spill] sm:$0xff] %v5030_v27  ;;  %5783 = vst [vmem:[#allocation35_spill] sm:$0xff] %v5036_v28 }
  0x65   : > { %3754 = vmatmul.mubr.msk.f32.gmra.mrb[6].mxu1 %vm225_vm0, %v4567_v9  ;;  %3977 = vmatprep.mubr.msk.f32.mxu0 %vm225_vm0, %v4996_v11  ;;  %5781 = vst [vmem:[#allocation33_spill] sm:$0xff] %v5015_v39  ;;  %v1145_v41 = vrot.slane %v5015_v39, 1  ;;  %v1148_v11 = vrot.slane %v5021_v20, 1  ;;  %v1152_v39 = vrot.slane %v5044_v55, 1 }
  0x66   : > { %3756 = vmatprep.mubr.msk.f32.mxu1 %vm225_vm0, %v4570_v10 }
  0x67   : > { %v5053_v25 = vsel %vm1065_vm1, %v1143_v62, %v1145_v41  ;;  %v1151_v62 = vsel %vm1065_vm1, %v1148_v11, %v1150_v46  ;;  %v1154_v41 = vrot.slane %v5061_v32, 1 }
  0x68   : > { %3978 = vmatmul.mubr.msk.f32.gmra.mrb[22].mxu0 %vm225_vm0, %v5006_v60  ;;  %v1147_v60 = vrot.slane %v5018_v21, 1  ;;  %5784 = vst [vmem:[#allocation36_spill] sm:$0xff] %v5053_v25 }
  0x69   : > { %3757 = vmatmul.mubr.msk.f32.gmra.mrb[8].mxu1 %vm225_vm0, %v4591_v17  ;;  %3980 = vmatprep.mubr.msk.f32.mxu0 %vm225_vm0, %v5012_v48 }
  0x6a   : > { %3759 = vmatprep.mubr.msk.f32.mxu1 %vm225_vm0, %v4595_v19  ;;  %v1149_v48 = vsel %vm1065_vm1, %v1147_v60, %v1148_v11  ;;  %v1153_v60 = vsel %vm1065_vm1, %v1150_v46, %v1152_v39  ;;  %v1155_v11 = vsel %vm1065_vm1, %v1152_v39, %v1154_v41  ;;  %v2023_v39 = vrot.slane %v4554_v4, 2 }
  0x6b   : > { %v2024_v46 = vrot.slane %v4557_v5, 2  ;;  %v2028_v5 = vrot.slane %v4567_v9, 2  ;;  %v2030_v9 = vrot.slane %v4582_v14, 2  ;;  %v2035_v41 = vrot.slane %v4595_v19, 2 }
  0x6c   : > { %3981 = vmatmul.mubr.msk.f32.gmra.mrb[24].mxu0 %vm225_vm0, %v5030_v27  ;;  %v2015_v27 = vrot.slane %v4897_v58, 2 }
  0x6d   : > { %3760 = vmatmul.mubr.msk.f32.gmra.mrb[10].mxu1 %vm225_vm0, %v4607_v23  ;;  %3983 = vmatprep.mubr.msk.f32.mxu0 %vm225_vm0, %v5036_v28  ;;  %v2014_v28 = vrot.slane %v4886_v26, 2  ;;  %v5138_v14 = vsel %vm2013_vm2, %v2028_v5, %v2030_v9 }
  0x6e   : > { %3762 = vmatprep.mubr.msk.f32.mxu1 %vm225_vm0, %v4635_v30 }
  0x6f   : > { %v2016_v26 = vsel %vm2013_vm2, %v2014_v28, %v2015_v27  ;;  %v5100_v28 = vld [vmem:[%s5703_s1 + $0x40] sm:$0xff] }
  0x70   : > { %3984 = vmatmul.mubr.msk.f32.gmra.mrb[26].mxu0 %vm225_vm0, %v5053_v25  ;;  %v2017_v25 = vrot.slane %v4892_v40, 2  ;;  %v2021_v40 = vrot.slane %v4944_v53, 2  ;;  %v5112_v53 = vsel %vm2013_vm2, %v2023_v39, %v2024_v46  ;;  %v2042_v39 = vrot.slane %v4638_v31, 2 }
  0x71   : > { %3763 = vmatmul.mubr.msk.f32.gmra.mrb[12].mxu1 %vm225_vm0, %v4638_v31  ;;  %3986 = vmatprep.mubr.msk.f32.mxu0 %vm225_vm0, %v1149_v48  ;;  %v2019_v48 = vrot.slane %v4901_v35, 2 }
  0x72   : > { %3765 = vmatprep.mubr.msk.f32.mxu1 %vm225_vm0, %v4659_v37  ;;  %v2018_v58 = vsel %vm2013_vm2, %v2015_v27, %v2017_v25  ;;  %v2026_v27 = vrot.slane %v4560_v6, 2 }
  0x73   : > { %v2020_v35 = vsel %vm2013_vm2, %v2017_v25, %v2019_v48  ;;  %v2022_v4 = vsel %vm2013_vm2, %v2019_v48, %v2021_v40  ;;  %v2032_v25 = vrot.slane %v4570_v10, 2  ;;  %v2039_v48 = vrot.slane %v4632_v29, 2 }
  0x74   : > { %3987 = vmatmul.mubr.msk.f32.gmra.mrb[28].mxu0 %vm225_vm0, %v1151_v62  ;;  %v5121_v6 = vsel %vm2013_vm2, %v2024_v46, %v2026_v27  ;;  %v2033_v62 = vrot.slane %v4591_v17, 2  ;;  %v2041_v40 = vrot.slane %v4635_v30, 2  ;;  %v2044_v46 = vrot.slane %v4659_v37, 2 }
  0x75   : > { %3766 = vmatmul.mubr.msk.f32.gmra.mrb[14].mxu1 %vm225_vm0, %v4662_v38  ;;  %3989 = vmatprep.mubr.msk.f32.mxu0 %vm225_vm0, %v1153_v60 }
  0x76   : > { %3768 = vmatprep.mubr.msk.f32.mxu1 %vm225_vm0, %v4684_v44  ;;  %v5144_v60 = vsel %vm2013_vm2, %v2032_v25, %v2033_v62  ;;  %v2050_v25 = vrot.slane %v4684_v44, 2 }
  0x78   : > { %3990 = vmatmul.mubr.msk.f32.gmra.mrb[30].mxu0 %vm225_vm0, %v1155_v11  ;;  %v2037_v11 = vrot.slane %v4607_v23, 2 }
  0x79   : > { %3769 = vmatmul.mubr.msk.f32.gmra.mrb[16].mxu1 %vm225_vm0, %v4687_v45  ;;  %3994 = vmatprep.mubr.msk.f32.mxu0 %vm225_vm0, %v2016_v26  ;;  %v5154_v26 = vsel %vm2013_vm2, %v2033_v62, %v2035_v41  ;;  %v2051_v62 = vrot.slane %v4687_v45, 2 }
  0x7a   : > { %3771 = vmatprep.mubr.msk.f32.mxu1 %vm225_vm0, %v4707_v51  ;;  %v5171_v29 = vsel %vm2013_vm2, %v2037_v11, %v2039_v48  ;;  %v2055_v48 = vrot.slane %v4710_v52, 2 }
  0x7c   : > { %3995 = vmatmul.mubr.msk.f32.vlgmr.msra.gmra.mrb[0].mxu0 %vm225_vm0, %v2018_v58  ;;  %v5160_v58 = vsel %vm2013_vm2, %v2035_v41, %v2037_v11  ;;  %v2053_v41 = vrot.slane %v4707_v51, 2  ;;  %v5210_v11 = vsel %vm2013_vm2, %v2050_v25, %v2051_v62  ;;  %v2068_v25 = vrot.slane %v4778_v3, 2 }
  0x7d   : > { %4043 = vmatpush3.msra.mxu0 %v4785_v7  ;;  %3772 = vmatmul.mubr.msk.f32.gmra.mrb[18].mxu1 %vm225_vm0, %v4710_v52  ;;  %v5127_v7 = vsel %vm2013_vm2, %v2026_v27, %v2028_v5  ;;  %v2046_v27 = vrot.slane %v4662_v38, 2  ;;  %v2048_v5 = vrot.slane %v4681_v43, 2 }
  0x7e   : > { %3997 = vmatprep.mubr.msk.f32.mxu0 %vm225_vm0, %v2020_v35  ;;  %3774 = vmatprep.mubr.msk.f32.mxu1 %vm225_vm0, %v4747_v61  ;;  %v5177_v35 = vsel %vm2013_vm2, %v2041_v40, %v2042_v39  ;;  %v5220_v40 = vsel %vm2013_vm2, %v2051_v62, %v2053_v41  ;;  %v2069_v62 = vrot.slane %v4795_v8, 2 }
  0x7f   : > { %4092 = vmatprep.subr.mxu0 %v5100_v28  ;;  %v5193_v9 = vsel %vm2013_vm2, %v2044_v46, %v2046_v27  ;;  %v5204_v43 = vsel %vm2013_vm2, %v2046_v27, %v2048_v5  ;;  %v2064_v27 = vrot.slane %v4775_v2, 2  ;;  %v2066_v5 = vrot.slane %v4862_v47, 2 }
  0x80   : > { %3998 = vmatmul.mubr.msk.f32.gmra.mrb[2].mxu0 %vm225_vm0, %v2022_v4  ;;  %v5187_v4 = vsel %vm2013_vm2, %v2042_v39, %v2044_v46  ;;  %v2057_v39 = vrot.slane %v4729_v57, 2  ;;  %v2059_v46 = vrot.slane %v4747_v61, 2  ;;  %v2062_v57 = vrot.slane %v4764_v0, 2 }
  0x81   : > { %3775 = vmatmul.mubr.msk.f32.gmra.mrb[20].mxu1 %vm225_vm0, %v4761_v63  ;;  %4000 = vmatprep.mubr.msk.f32.mxu0 %vm225_vm0, %v5112_v53  ;;  %v5278_v47 = vsel %vm2013_vm2, %v2068_v25, %v2069_v62  ;;  %v5801_v25 = vld [vmem:[#allocation15_spill] sm:$0xff] }
  0x82   : > { %3777 = vmatprep.mubr.msk.f32.mxu1 %vm225_vm0, %v4764_v0 }
  0x84   : > { %4001 = vmatmul.mubr.msk.f32.gmra.mrb[4].mxu0 %vm225_vm0, %v5121_v6 }
  0x85   : > { %3778 = vmatmul.mubr.msk.f32.gmra.mrb[22].mxu1 %vm225_vm0, %v4775_v2  ;;  %4003 = vmatprep.mubr.msk.f32.mxu0 %vm225_vm0, %v5127_v7 }
  0x86   : > { %3780 = vmatprep.mubr.msk.f32.mxu1 %vm225_vm0, %v4778_v3 }
  0x88   : > { %4004 = vmatmul.mubr.msk.f32.gmra.mrb[6].mxu0 %vm225_vm0, %v5138_v14 }
  0x89   : > { %3781 = vmatmul.mubr.msk.f32.gmra.mrb[24].mxu1 %vm225_vm0, %v4795_v8  ;;  %4006 = vmatprep.mubr.msk.f32.mxu0 %vm225_vm0, %v5144_v60 }
  0x8a   : > { %3783 = vmatprep.mubr.msk.f32.mxu1 %vm225_vm0, %v4798_v12 }
  0x8c   : > { %4007 = vmatmul.mubr.msk.f32.gmra.mrb[8].mxu0 %vm225_vm0, %v5154_v26 }
  0x8d   : > { %3784 = vmatmul.mubr.msk.f32.gmra.mrb[26].mxu1 %vm225_vm0, %v4810_v13  ;;  %4009 = vmatprep.mubr.msk.f32.mxu0 %vm225_vm0, %v5160_v58 }
  0x8e   : > { %3786 = vmatprep.mubr.msk.f32.mxu1 %vm225_vm0, %v4813_v16 }
  0x90   : > { %4010 = vmatmul.mubr.msk.f32.gmra.mrb[10].mxu0 %vm225_vm0, %v5171_v29 }
  0x91   : > { %3787 = vmatmul.mubr.msk.f32.gmra.mrb[28].mxu1 %vm225_vm0, %v4824_v18  ;;  %4012 = vmatprep.mubr.msk.f32.mxu0 %vm225_vm0, %v5177_v35 }
  0x92   : > { %3789 = vmatprep.mubr.msk.f32.mxu1 %vm225_vm0, %v4827_v22 }
  0x94   : > { %4013 = vmatmul.mubr.msk.f32.gmra.mrb[12].mxu0 %vm225_vm0, %v5187_v4 }
  0x95   : > { %3790 = vmatmul.mubr.msk.f32.gmra.mrb[30].mxu1 %vm225_vm0, %v4838_v24  ;;  %4015 = vmatprep.mubr.msk.f32.mxu0 %vm225_vm0, %v5193_v9 }
  0x96   : > { %3794 = vmatprep.mubr.msk.f32.mxu1 %vm225_vm0, %v4570_v10  ;;  %v5227_v10 = vsel %vm2013_vm2, %v2053_v41, %v2055_v48  ;;  %v2073_v41 = vrot.slane %v4810_v13, 2 }
  0x98   : > { %4016 = vmatmul.mubr.msk.f32.gmra.mrb[14].mxu0 %vm225_vm0, %v5204_v43 }
  0x99   : > { %3795 = vmatmul.mubr.msk.f32.vlgmr.msra.gmra.mrb[0].mxu1 %vm225_vm0, %v4591_v17  ;;  %4018 = vmatprep.mubr.msk.f32.mxu0 %vm225_vm0, %v5210_v11  ;;  %v2060_v17 = vrot.slane %v4761_v63, 2 }
  0x9a   : > { %3797 = vmatprep.mubr.msk.f32.mxu1 %vm225_vm0, %v4595_v19  ;;  %3843 = vmatpush3.msra.mxu1 %v4930_v54  ;;  %v5239_v19 = vsel %vm2013_vm2, %v2055_v48, %v2057_v39  ;;  %v2075_v48 = vrot.slane %v4920_v34, 2  ;;  %v2077_v39 = vrot.slane %v4813_v16, 2 }
  0x9b   : > { %4142 = vmatprep.subr.mxu1 %v4534_v1  ;;  %v5245_v54 = vsel %vm2013_vm2, %v2059_v46, %v2060_v17  ;;  %v2078_v46 = vrot.slane %v4824_v18, 2 }
  0x9c   : > { %4019 = vmatmul.mubr.msk.f32.gmra.mrb[16].mxu0 %vm225_vm0, %v5220_v40  ;;  %v5305_v34 = vsel %vm2013_vm2, %v2073_v41, %v2075_v48  ;;  %v5805_v48 = vld [vmem:[#allocation19_spill] sm:$0xff] }
  0x9d   : > { %3798 = vmatmul.mubr.msk.f32.gmra.mrb[2].mxu1 %vm225_vm0, %v4607_v23  ;;  %4021 = vmatprep.mubr.msk.f32.mxu0 %vm225_vm0, %v5227_v10  ;;  %v5255_v23 = vsel %vm2013_vm2, %v2060_v17, %v2062_v57  ;;  %v2082_v17 = vrot.slane %v4838_v24, 2 }
  0x9e   : > { %3800 = vmatprep.mubr.msk.f32.mxu1 %vm225_vm0, %v4635_v30  ;;  %v5261_v30 = vsel %vm2013_vm2, %v2062_v57, %v2064_v27  ;;  %v2084_v57 = vrot.slane %v4979_v50, 2  ;;  %v2091_v50 = vrot.slane %v4880_v56, 2 }
  0xa0   : > { %4022 = vmatmul.mubr.msk.f32.gmra.mrb[18].mxu0 %vm225_vm0, %v5239_v19 }
  0xa1   : > { %3801 = vmatmul.mubr.msk.f32.gmra.mrb[4].mxu1 %vm225_vm0, %v4638_v31  ;;  %4024 = vmatprep.mubr.msk.f32.mxu0 %vm225_vm0, %v5245_v54  ;;  %v5272_v31 = vsel %vm2013_vm2, %v2064_v27, %v2066_v5  ;;  %v5800_v5 = vld [vmem:[#allocation14_spill] sm:$0xff] }
  0xa2   : > { %3803 = vmatprep.mubr.msk.f32.mxu1 %vm225_vm0, %v4659_v37  ;;  %v2071_v37 = vrot.slane %v4798_v12, 2 }
  0xa4   : > { %4025 = vmatmul.mubr.msk.f32.gmra.mrb[20].mxu0 %vm225_vm0, %v5255_v23 }
  0xa5   : > { %3804 = vmatmul.mubr.msk.f32.gmra.mrb[6].mxu1 %vm225_vm0, %v4662_v38  ;;  %4027 = vmatprep.mubr.msk.f32.mxu0 %vm225_vm0, %v5261_v30  ;;  %v5288_v38 = vsel %vm2013_vm2, %v2069_v62, %v2071_v37  ;;  %v5802_v62 = vld [vmem:[#allocation16_spill] sm:$0xff] }
  0xa6   : > { %3806 = vmatprep.mubr.msk.f32.mxu1 %vm225_vm0, %v4684_v44  ;;  %v5294_v44 = vsel %vm2013_vm2, %v2071_v37, %v2073_v41  ;;  %v5803_v37 = vld [vmem:[#allocation17_spill] sm:$0xff]  ;;  %v5804_v41 = vld [vmem:[#allocation18_spill] sm:$0xff] }
  0xa8   : > { %4028 = vmatmul.mubr.msk.f32.gmra.mrb[22].mxu0 %vm225_vm0, %v5272_v31 }
  0xa9   : > { %3807 = vmatmul.mubr.msk.f32.gmra.mrb[8].mxu1 %vm225_vm0, %v4687_v45  ;;  %4030 = vmatprep.mubr.msk.f32.mxu0 %vm225_vm0, %v5278_v47  ;;  %v2080_v45 = vrot.slane %v4827_v22, 2 }
  0xaa   : > { %3809 = vmatprep.mubr.msk.f32.mxu1 %vm225_vm0, %v4707_v51  ;;  %v5311_v51 = vsel %vm2013_vm2, %v2077_v39, %v2078_v46 }
  0xac   : > { %4031 = vmatmul.mubr.msk.f32.gmra.mrb[24].mxu0 %vm225_vm0, %v5288_v38 }
  0xad   : > { %3810 = vmatmul.mubr.msk.f32.gmra.mrb[10].mxu1 %vm225_vm0, %v4710_v52  ;;  %4033 = vmatprep.mubr.msk.f32.mxu0 %vm225_vm0, %v5294_v44  ;;  %v5321_v52 = vsel %vm2013_vm2, %v2078_v46, %v2080_v45 }
  0xae   : > { %3812 = vmatprep.mubr.msk.f32.mxu1 %vm225_vm0, %v4747_v61  ;;  %v5327_v61 = vsel %vm2013_vm2, %v2080_v45, %v2082_v17 }
  0xb0   : > { %4034 = vmatmul.mubr.msk.f32.gmra.mrb[26].mxu0 %vm225_vm0, %v5305_v34 }
  0xb1   : > { %3813 = vmatmul.mubr.msk.f32.gmra.mrb[12].mxu1 %vm225_vm0, %v4761_v63  ;;  %4036 = vmatprep.mubr.msk.f32.mxu0 %vm225_vm0, %v5311_v51  ;;  %v5336_v63 = vsel %vm2013_vm2, %v2082_v17, %v2084_v57 }
  0xb2   : > { %3815 = vmatprep.mubr.msk.f32.mxu1 %vm225_vm0, %v4764_v0  ;;  %v5785_v0 = vld [vmem:[#allocation24_spill] sm:$0xff] }
  0xb4   : > { %4037 = vmatmul.mubr.msk.f32.gmra.mrb[28].mxu0 %vm225_vm0, %v5321_v52 }
  0xb5   : > { %3816 = vmatmul.mubr.msk.f32.gmra.mrb[14].mxu1 %vm225_vm0, %v4775_v2  ;;  %4039 = vmatprep.mubr.msk.f32.mxu0 %vm225_vm0, %v5327_v61  ;;  %v5786_v2 = vld [vmem:[#allocation26_spill] sm:$0xff] }
  0xb6   : > { %3818 = vmatprep.mubr.msk.f32.mxu1 %vm225_vm0, %v4778_v3  ;;  %v5787_v3 = vld [vmem:[#allocation2_spill] sm:$0xff] }
  0xb8   : > { %4040 = vmatmul.mubr.msk.f32.gmra.mrb[30].mxu0 %vm225_vm0, %v5336_v63 }
  0xb9   : > { %3819 = vmatmul.mubr.msk.f32.gmra.mrb[16].mxu1 %vm225_vm0, %v4795_v8  ;;  %4044 = vmatprep.mubr.msk.f32.mxu0 %vm225_vm0, %v5112_v53  ;;  %v5788_v8 = vld [vmem:[#allocation3_spill] sm:$0xff]  ;;  %v5797_v53 = vld [vmem:[#allocation33_spill] sm:$0xff] }
  0xba   : > { %3821 = vmatprep.mubr.msk.f32.mxu1 %vm225_vm0, %v4798_v12  ;;  %v5790_v12 = vld [vmem:[#allocation5_spill] sm:$0xff] }
  0xbc   : > { %4045 = vmatmul.mubr.msk.f32.vlgmr.msra.gmra.mrb[0].mxu0 %vm225_vm0, %v5121_v6  ;;  %v5798_v6 = vld [vmem:[#allocation12_spill] sm:$0xff] }
  0xbd   : > { %4093 = vmatpush3.msra.mxu0 %v5100_v28  ;;  %3822 = vmatmul.mubr.msk.f32.gmra.mrb[18].mxu1 %vm225_vm0, %v4810_v13  ;;  %v5791_v13 = vld [vmem:[#allocation6_spill] sm:$0xff] }
  0xbe   : > { %4047 = vmatprep.mubr.msk.f32.mxu0 %vm225_vm0, %v5127_v7  ;;  %3824 = vmatprep.mubr.msk.f32.mxu1 %vm225_vm0, %v4813_v16  ;;  %v5792_v16 = vld [vmem:[#allocation7_spill] sm:$0xff]  ;;  %v5795_v28 = vld [vmem:[#allocation10_spill] sm:$0xff] }
  0xc0   : > { %4048 = vmatmul.mubr.msk.f32.gmra.mrb[2].mxu0 %vm225_vm0, %v5138_v14  ;;  %v5799_v14 = vld [vmem:[#allocation13_spill] sm:$0xff] }
  0xc1   : > { %3825 = vmatmul.mubr.msk.f32.gmra.mrb[20].mxu1 %vm225_vm0, %v4824_v18  ;;  %4050 = vmatprep.mubr.msk.f32.mxu0 %vm225_vm0, %v5144_v60  ;;  %v2086_v18 = vrot.slane %v4843_v33, 2 }
  0xc2   : > { %3827 = vmatprep.mubr.msk.f32.mxu1 %vm225_vm0, %v4827_v22  ;;  %v2087_v22 = vrot.slane %v4855_v36, 2 }
  0xc4   : > { %4051 = vmatmul.mubr.msk.f32.gmra.mrb[4].mxu0 %vm225_vm0, %v5154_v26 }
  0xc5   : > { %3828 = vmatmul.mubr.msk.f32.gmra.mrb[22].mxu1 %vm225_vm0, %v4838_v24  ;;  %4053 = vmatprep.mubr.msk.f32.mxu0 %vm225_vm0, %v5160_v58  ;;  %v5793_v24 = vld [vmem:[#allocation8_spill] sm:$0xff] }
  0xc6   : > { %3830 = vmatprep.mubr.msk.f32.mxu1 %vm225_vm0, %v4843_v33  ;;  %v5459_v33 = vsel %vm2013_vm2, %v2086_v18, %v2087_v22 }
  0xc8   : > { %4054 = vmatmul.mubr.msk.f32.gmra.mrb[6].mxu0 %vm225_vm0, %v5171_v29 }
  0xc9   : > { %3831 = vmatmul.mubr.msk.f32.gmra.mrb[24].mxu1 %vm225_vm0, %v4855_v36  ;;  %4056 = vmatprep.mubr.msk.f32.mxu0 %vm225_vm0, %v5177_v35  ;;  %v5796_v36 = vld [vmem:[#allocation11_spill] sm:$0xff] }
  0xca   : > { %3833 = vmatprep.mubr.msk.f32.mxu1 %vm225_vm0, %v4865_v49 }
  0xcc   : > { %4057 = vmatmul.mubr.msk.f32.gmra.mrb[8].mxu0 %vm225_vm0, %v5187_v4 }
  0xcd   : > { %3834 = vmatmul.mubr.msk.f32.gmra.mrb[26].mxu1 %vm225_vm0, %v4880_v56  ;;  %4059 = vmatprep.mubr.msk.f32.mxu0 %vm225_vm0, %v5193_v9  ;;  %v2093_v56 = vrot.slane %v5797_v53, 2 }
  0xce   : > { %3836 = vmatprep.mubr.msk.f32.mxu1 %vm225_vm0, %v5018_v21 }
  0xcf   : > { %v5480_v27 = vsel %vm2013_vm2, %v2091_v50, %v2093_v56 }
  0xd0   : > { %4060 = vmatmul.mubr.msk.f32.gmra.mrb[10].mxu0 %vm225_vm0, %v5204_v43 }
  0xd1   : > { %3837 = vmatmul.mubr.msk.f32.gmra.mrb[28].mxu1 %vm225_vm0, %v5021_v20  ;;  %4062 = vmatprep.mubr.msk.f32.mxu0 %vm225_vm0, %v5210_v11 }
  0xd2   : > { %3839 = vmatprep.mubr.msk.f32.mxu1 %vm225_vm0, %v5041_v15 }
  0xd4   : > { %4063 = vmatmul.mubr.msk.f32.gmra.mrb[12].mxu0 %vm225_vm0, %v5220_v40 }
  0xd5   : > { %3840 = vmatmul.mubr.msk.f32.gmra.mrb[30].mxu1 %vm225_vm0, %v5044_v55  ;;  %4065 = vmatprep.mubr.msk.f32.mxu0 %vm225_vm0, %v5227_v10 }
  0xd6   : > { %3844 = vmatprep.mubr.msk.f32.mxu1 %vm225_vm0, %v4923_v42  ;;  %v5794_v42 = vld [vmem:[#allocation9_spill] sm:$0xff] }
  0xd8   : > { %4066 = vmatmul.mubr.msk.f32.gmra.mrb[14].mxu0 %vm225_vm0, %v5239_v19 }
  0xd9   : > { %3845 = vmatmul.mubr.msk.f32.vlgmr.msra.gmra.mrb[0].mxu1 %vm225_vm0, %v4933_v59  ;;  %4068 = vmatprep.mubr.msk.f32.mxu0 %vm225_vm0, %v5245_v54  ;;  %v2089_v59 = vrot.slane %v4865_v49, 2 }
  0xda   : > { %3847 = vmatprep.mubr.msk.f32.mxu1 %vm225_vm0, %v5785_v0  ;;  %4143 = vmatpush3.msra.mxu1 %v4534_v1  ;;  %v5789_v1 = vld [vmem:[#allocation4_spill] sm:$0xff] }
  0xdb   : > { %v5468_v49 = vsel %vm2013_vm2, %v2087_v22, %v2089_v59  ;;  %v2092_v7 = vsel %vm2013_vm2, %v2089_v59, %v2091_v50 }
  0xdc   : > { %4069 = vmatmul.mubr.msk.f32.gmra.mrb[16].mxu0 %vm225_vm0, %v5255_v23 }
  0xdd   : > { %3848 = vmatmul.mubr.msk.f32.gmra.mrb[2].mxu1 %vm225_vm0, %v5786_v2  ;;  %4071 = vmatprep.mubr.msk.f32.mxu0 %vm225_vm0, %v5261_v30 }
  0xde   : > { %3850 = vmatprep.mubr.msk.f32.mxu1 %vm225_vm0, %v5787_v3 }
  0xe0   : > { %4072 = vmatmul.mubr.msk.f32.gmra.mrb[18].mxu0 %vm225_vm0, %v5272_v31 }
  0xe1   : > { %3851 = vmatmul.mubr.msk.f32.gmra.mrb[4].mxu1 %vm225_vm0, %v5788_v8  ;;  %4074 = vmatprep.mubr.msk.f32.mxu0 %vm225_vm0, %v5278_v47 }
  0xe2   : > { %3853 = vmatprep.mubr.msk.f32.mxu1 %vm225_vm0, %v5789_v1 }
  0xe4   : > { %4075 = vmatmul.mubr.msk.f32.gmra.mrb[20].mxu0 %vm225_vm0, %v5288_v38 }
  0xe5   : > { %3854 = vmatmul.mubr.msk.f32.gmra.mrb[6].mxu1 %vm225_vm0, %v5790_v12  ;;  %4077 = vmatprep.mubr.msk.f32.mxu0 %vm225_vm0, %v5294_v44 }
  0xe6   : > { %3856 = vmatprep.mubr.msk.f32.mxu1 %vm225_vm0, %v5791_v13 }
  0xe8   : > { %4078 = vmatmul.mubr.msk.f32.gmra.mrb[22].mxu0 %vm225_vm0, %v5305_v34 }
  0xe9   : > { %3857 = vmatmul.mubr.msk.f32.gmra.mrb[8].mxu1 %vm225_vm0, %v5792_v16  ;;  %4080 = vmatprep.mubr.msk.f32.mxu0 %vm225_vm0, %v5311_v51 }
  0xea   : > { %3859 = vmatprep.mubr.msk.f32.mxu1 %vm225_vm0, %v5793_v24 }
  0xec   : > { %4081 = vmatmul.mubr.msk.f32.gmra.mrb[24].mxu0 %vm225_vm0, %v5321_v52 }
  0xed   : > { %3860 = vmatmul.mubr.msk.f32.gmra.mrb[10].mxu1 %vm225_vm0, %v5794_v42  ;;  %4083 = vmatprep.mubr.msk.f32.mxu0 %vm225_vm0, %v5327_v61 }
  0xee   : > { %3862 = vmatprep.mubr.msk.f32.mxu1 %vm225_vm0, %v5795_v28 }
  0xf0   : > { %4084 = vmatmul.mubr.msk.f32.gmra.mrb[26].mxu0 %vm225_vm0, %v5336_v63 }
  0xf1   : > { %3863 = vmatmul.mubr.msk.f32.gmra.mrb[12].mxu1 %vm225_vm0, %v5796_v36  ;;  %4086 = vmatprep.mubr.msk.f32.mxu0 %vm225_vm0, %v5459_v33 }
  0xf2   : > { %3865 = vmatprep.mubr.msk.f32.mxu1 %vm225_vm0, %v5798_v6 }
  0xf4   : > { %4087 = vmatmul.mubr.msk.f32.gmra.mrb[28].mxu0 %vm225_vm0, %v5468_v49 }
  0xf5   : > { %3866 = vmatmul.mubr.msk.f32.gmra.mrb[14].mxu1 %vm225_vm0, %v5799_v14  ;;  %4089 = vmatprep.mubr.msk.f32.mxu0 %vm225_vm0, %v2092_v7 }
  0xf6   : > { %3868 = vmatprep.mubr.msk.f32.mxu1 %vm225_vm0, %v5800_v5 }
  0xf8   : > { %4090 = vmatmul.mubr.msk.f32.gmra.mrb[30].mxu0 %vm225_vm0, %v5480_v27 }
  0xf9   : > { %3869 = vmatmul.mubr.msk.f32.gmra.mrb[16].mxu1 %vm225_vm0, %v5801_v25  ;;  %4094 = vmatprep.mubr.msk.f32.mxu0 %vm225_vm0, %v5144_v60  ;;  %v5806_v60 = vld [vmem:[#allocation20_spill] sm:$0xff] }
  0xfa   : > { %3871 = vmatprep.mubr.msk.f32.mxu1 %vm225_vm0, %v5802_v62 }
  0xfc   : > { %4095 = vmatmul.mubr.msk.f32.vlgmr.msra.gmra.mrb[0].mxu0 %vm225_vm0, %v5154_v26  ;;  %v5807_v26 = vld [vmem:[#allocation21_spill] sm:$0xff] }
  0xfd   : > { %3872 = vmatmul.mubr.msk.f32.gmra.mrb[18].mxu1 %vm225_vm0, %v5803_v37  ;;  %4097 = vmatprep.mubr.msk.f32.mxu0 %vm225_vm0, %v5160_v58  ;;  %v5808_v58 = vld [vmem:[#allocation22_spill] sm:$0xff] }
  0xfe   : > { %3874 = vmatprep.mubr.msk.f32.mxu1 %vm225_vm0, %v5804_v41 }
 0x100   : > { %4098 = vmatmul.mubr.msk.f32.gmra.mrb[2].mxu0 %vm225_vm0, %v5171_v29  ;;  %v5809_v29 = vld [vmem:[#allocation23_spill] sm:$0xff] }
 0x101   : > { %3875 = vmatmul.mubr.msk.f32.gmra.mrb[20].mxu1 %vm225_vm0, %v5805_v48  ;;  %4100 = vmatprep.mubr.msk.f32.mxu0 %vm225_vm0, %v5177_v35  ;;  %v5810_v35 = vld [vmem:[#allocation25_spill] sm:$0xff] }
 0x102   : > { %3877 = vmatprep.mubr.msk.f32.mxu1 %vm225_vm0, %v5806_v60 }
 0x104   : > { %4101 = vmatmul.mubr.msk.f32.gmra.mrb[4].mxu0 %vm225_vm0, %v5187_v4  ;;  %v5811_v4 = vld [vmem:[#allocation27_spill] sm:$0xff] }
 0x105   : > { %3878 = vmatmul.mubr.msk.f32.gmra.mrb[22].mxu1 %vm225_vm0, %v5807_v26  ;;  %4103 = vmatprep.mubr.msk.f32.mxu0 %vm225_vm0, %v5193_v9  ;;  %v5812_v9 = vld [vmem:[#allocation28_spill] sm:$0xff] }
 0x106   : > { %3880 = vmatprep.mubr.msk.f32.mxu1 %vm225_vm0, %v5808_v58 }
 0x108   : > { %4104 = vmatmul.mubr.msk.f32.gmra.mrb[6].mxu0 %vm225_vm0, %v5204_v43  ;;  %v5813_v43 = vld [vmem:[#allocation29_spill] sm:$0xff] }
 0x109   : > { %3881 = vmatmul.mubr.msk.f32.gmra.mrb[24].mxu1 %vm225_vm0, %v5809_v29  ;;  %4106 = vmatprep.mubr.msk.f32.mxu0 %vm225_vm0, %v5210_v11  ;;  %v5814_v11 = vld [vmem:[#allocation30_spill] sm:$0xff] }
 0x10a   : > { %3883 = vmatprep.mubr.msk.f32.mxu1 %vm225_vm0, %v5810_v35 }
 0x10c   : > { %4107 = vmatmul.mubr.msk.f32.gmra.mrb[8].mxu0 %vm225_vm0, %v5220_v40  ;;  %v5815_v40 = vld [vmem:[#allocation31_spill] sm:$0xff] }
 0x10d   : > { %3884 = vmatmul.mubr.msk.f32.gmra.mrb[26].mxu1 %vm225_vm0, %v5811_v4  ;;  %4109 = vmatprep.mubr.msk.f32.mxu0 %vm225_vm0, %v5227_v10  ;;  %v2095_v10 = vrot.slane %v5018_v21, 2 }
 0x10e   : > { %3886 = vmatprep.mubr.msk.f32.mxu1 %vm225_vm0, %v5812_v9 }
 0x110   : > { %4110 = vmatmul.mubr.msk.f32.gmra.mrb[10].mxu0 %vm225_vm0, %v5239_v19  ;;  %v2096_v19 = vrot.slane %v5021_v20, 2  ;;  %v5817_v20 = vld [vmem:[#allocation34_spill] sm:$0xff] }
 0x111   : > { %3887 = vmatmul.mubr.msk.f32.gmra.mrb[28].mxu1 %vm225_vm0, %v5813_v43  ;;  %4112 = vmatprep.mubr.msk.f32.mxu0 %vm225_vm0, %v5245_v54  ;;  %v2098_v54 = vrot.slane %v5041_v15, 2  ;;  %v5818_v15 = vld [vmem:[#allocation35_spill] sm:$0xff] }
 0x112   : > { %3889 = vmatprep.mubr.msk.f32.mxu1 %vm225_vm0, %v5814_v11 }
 0x113   : > { %v2099_v21 = vsel %vm2013_vm2, %v2096_v19, %v2098_v54 }
 0x114   : > { %4113 = vmatmul.mubr.msk.f32.gmra.mrb[12].mxu0 %vm225_vm0, %v5255_v23  ;;  %v5816_v23 = vld [vmem:[#allocation32_spill] sm:$0xff] }
 0x115   : > { %3890 = vmatmul.mubr.msk.f32.gmra.mrb[30].mxu1 %vm225_vm0, %v5815_v40  ;;  %4115 = vmatprep.mubr.msk.f32.mxu0 %vm225_vm0, %v5261_v30  ;;  %v2097_v30 = vsel %vm2013_vm2, %v2095_v10, %v2096_v19 }
 0x116   : > { %3918 = vmatprep.mubr.msk.f32.mxu1 %vm225_vm0, %v5804_v41 }
 0x118   : > { %4116 = vmatmul.mubr.msk.f32.gmra.mrb[14].mxu0 %vm225_vm0, %v5272_v31  ;;  %v2100_v31 = vrot.slane %v5044_v55, 2  ;;  %v5819_v55 = vld [vmem:[#allocation36_spill] sm:$0xff] }
 0x119   : > { %3919 = vmatmul.mubr.msk.f32.vlgmr.msra.gmra.mrb[16].mxu1 %vm225_vm0, %v5805_v48  ;;  %4118 = vmatprep.mubr.msk.f32.mxu0 %vm225_vm0, %v5278_v47  ;;  %v2102_v47 = vrot.slane %v5061_v32, 2 }
 0x11a   : > { %3921 = vmatprep.mubr.msk.f32.mxu1 %vm225_vm0, %v5806_v60 }
 0x11c   : > { %4119 = vmatmul.mubr.msk.f32.gmra.mrb[16].mxu0 %vm225_vm0, %v5288_v38  ;;  %v2101_v38 = vsel %vm2013_vm2, %v2098_v54, %v2100_v31 }
 0x11d   : > { %3922 = vmatmul.mubr.msk.f32.gmra.mrb[18].mxu1 %vm225_vm0, %v5807_v26  ;;  %4121 = vmatprep.mubr.msk.f32.mxu0 %vm225_vm0, %v5294_v44  ;;  %v2103_v44 = vsel %vm2013_vm2, %v2100_v31, %v2102_v47 }
 0x11e   : > { %3924 = vmatprep.mubr.msk.f32.mxu1 %vm225_vm0, %v5808_v58 }
 0x120   : > { %4122 = vmatmul.mubr.msk.f32.gmra.mrb[18].mxu0 %vm225_vm0, %v5305_v34 }
 0x121   : > { %3925 = vmatmul.mubr.msk.f32.gmra.mrb[20].mxu1 %vm225_vm0, %v5809_v29  ;;  %4124 = vmatprep.mubr.msk.f32.mxu0 %vm225_vm0, %v5311_v51 }
 0x122   : > { %3927 = vmatprep.mubr.msk.f32.mxu1 %vm225_vm0, %v5810_v35 }
 0x124   : > { %4125 = vmatmul.mubr.msk.f32.gmra.mrb[20].mxu0 %vm225_vm0, %v5321_v52 }
 0x125   : > { %3928 = vmatmul.mubr.msk.f32.gmra.mrb[22].mxu1 %vm225_vm0, %v5811_v4  ;;  %4127 = vmatprep.mubr.msk.f32.mxu0 %vm225_vm0, %v5327_v61 }
 0x126   : > { %3930 = vmatprep.mubr.msk.f32.mxu1 %vm225_vm0, %v5812_v9 }
 0x128   : > { %4128 = vmatmul.mubr.msk.f32.gmra.mrb[22].mxu0 %vm225_vm0, %v5336_v63 }
 0x129   : > { %3931 = vmatmul.mubr.msk.f32.gmra.mrb[24].mxu1 %vm225_vm0, %v5813_v43  ;;  %4130 = vmatprep.mubr.msk.f32.mxu0 %vm225_vm0, %v5459_v33 }
 0x12a   : > { %3933 = vmatprep.mubr.msk.f32.mxu1 %vm225_vm0, %v5814_v11 }
 0x12c   : > { %4131 = vmatmul.mubr.msk.f32.gmra.mrb[24].mxu0 %vm225_vm0, %v5468_v49 }
 0x12d   : > { %3934 = vmatmul.mubr.msk.f32.gmra.mrb[26].mxu1 %vm225_vm0, %v5815_v40  ;;  %4133 = vmatprep.mubr.msk.f32.mxu0 %vm225_vm0, %v2092_v7 }
 0x12e   : > { %3936 = vmatprep.mubr.msk.f32.mxu1 %vm225_vm0, %v5816_v23 }
 0x130   : > { %4134 = vmatmul.mubr.msk.f32.gmra.mrb[26].mxu0 %vm225_vm0, %v5480_v27 }
 0x131   : > { %3937 = vmatmul.mubr.msk.f32.gmra.mrb[28].mxu1 %vm225_vm0, %v5817_v20  ;;  %4136 = vmatprep.mubr.msk.f32.mxu0 %vm225_vm0, %v2097_v30 }
 0x132   : > { %3939 = vmatprep.mubr.msk.f32.mxu1 %vm225_vm0, %v5818_v15 }
 0x134   : > { %4137 = vmatmul.mubr.msk.f32.gmra.mrb[28].mxu0 %vm225_vm0, %v2099_v21 }
 0x135   : > { %3940 = vmatmul.mubr.msk.f32.gmra.mrb[30].mxu1 %vm225_vm0, %v5819_v55  ;;  %4139 = vmatprep.mubr.msk.f32.mxu0 %vm225_vm0, %v2101_v38 }
 0x138   : > { %4140 = vmatmul.mubr.msk.f32.gmra.mrb[30].mxu0 %vm225_vm0, %v2103_v44 }
 0x1ac   : > { %v3846_v39 = vpop.f32.mrb[0].mxu1 }
 0x1ad   : > { %v1288_v46 = vpop.f32.mrb[1].mxu1 }
 0x1b0   : > { %v3849_v32 = vpop.f32.mrb[2].mxu1 }
 0x1b1   : > { %v1298_v34 = vpop.f32.mrb[3].mxu1 }
 0x1b4   : > { %v3852_v45 = vpop.f32.mrb[4].mxu1 }
 0x1b5   : > { %v1308_v51 = vpop.f32.mrb[5].mxu1 }
 0x1b8   : > { %v3855_v17 = vpop.f32.mrb[6].mxu1 }
 0x1b9   : > { %v1318_v52 = vpop.f32.mrb[7].mxu1 }
 0x1bc   : > { %v3858_v57 = vpop.f32.mrb[8].mxu1 }
 0x1bd   : > { %v1328_v61 = vpop.f32.mrb[9].mxu1 }
 0x1c0   : > { %v3861_v63 = vpop.f32.mrb[10].mxu1 }
 0x1c1   : > { %v1338_v0 = vpop.f32.mrb[11].mxu1 }
 0x1c4   : > { %v3864_v2 = vpop.f32.mrb[12].mxu1 }
 0x1c5   : > { %v1348_v3 = vpop.f32.mrb[13].mxu1 }
 0x1c8   : > { %v3867_v8 = vpop.f32.mrb[14].mxu1 }
 0x1c9   : > { %v1358_v1 = vpop.f32.mrb[15].mxu1 }
 0x1cf   : > { %v4096_v12 = vpop.f32.mrb[0].mxu0 }
 0x1d0   : > { %v4144_v13 = vadd.f32 %v4096_v12, %v3846_v39  ;;  %v2770_v16 = vpop.f32.mrb[1].mxu0 }
 0x1d1   : > { %v4145_v18 = vadd.f32 %v2770_v16, %v1288_v46 }
 0x1d2   : > { %2962 = vst.msk [vmem:[%s5621_s26 + $0x8] sm:$0xff] %vm225_vm0, %v4144_v13 }
 0x1d3   : > { %2961 = vst.msk [vmem:[%s5621_s26] sm:$0xff] %vm225_vm0, %v4145_v18  ;;  %v4099_v22 = vpop.f32.mrb[2].mxu0 }
 0x1d4   : > { %v4146_v24 = vadd.f32 %v4099_v22, %v3849_v32  ;;  %v2780_v59 = vpop.f32.mrb[3].mxu0 }
 0x1d5   : > { %v4147_v42 = vadd.f32 %v2780_v59, %v1298_v34 }
 0x1d6   : > { %2964 = vst.msk [vmem:[%s5621_s26 + $0x18] sm:$0xff] %vm225_vm0, %v4146_v24 }
 0x1d7   : > { %2963 = vst.msk [vmem:[%s5621_s26 + $0x10] sm:$0xff] %vm225_vm0, %v4147_v42  ;;  %v4102_v50 = vpop.f32.mrb[4].mxu0 }
 0x1d8   : > { %v4148_v28 = vadd.f32 %v4102_v50, %v3852_v45  ;;  %v2790_v33 = vpop.f32.mrb[5].mxu0 }
 0x1d9   : > { %v4149_v36 = vadd.f32 %v2790_v33, %v1308_v51 }
 0x1da   : > { %2966 = vst.msk [vmem:[%s5621_s26 + $0x28] sm:$0xff] %vm225_vm0, %v4148_v28 }
 0x1db   : > { %2965 = vst.msk [vmem:[%s5621_s26 + $0x20] sm:$0xff] %vm225_vm0, %v4149_v36  ;;  %v4105_v49 = vpop.f32.mrb[6].mxu0 }
 0x1dc   : > { %v4150_v53 = vadd.f32 %v4105_v49, %v3855_v17  ;;  %v2800_v56 = vpop.f32.mrb[7].mxu0 }
 0x1dd   : > { %v4151_v6 = vadd.f32 %v2800_v56, %v1318_v52 }
 0x1de   : > { %2968 = vst.msk [vmem:[%s5621_s26 + $0x38] sm:$0xff] %vm225_vm0, %v4150_v53 }
 0x1df   : > { %2967 = vst.msk [vmem:[%s5621_s26 + $0x30] sm:$0xff] %vm225_vm0, %v4151_v6  ;;  %v4108_v7 = vpop.f32.mrb[8].mxu0 }
 0x1e0   : > { %v4152_v14 = vadd.f32 %v4108_v7, %v3858_v57  ;;  %v2810_v27 = vpop.f32.mrb[9].mxu0 }
 0x1e1   : > { %v4153_v5 = vadd.f32 %v2810_v27, %v1328_v61 }
 0x1e2   : > { %2970 = vst.msk [vmem:[%s5621_s26 + $0x48] sm:$0xff] %vm225_vm0, %v4152_v14 }
 0x1e3   : > { %2969 = vst.msk [vmem:[%s5621_s26 + $0x40] sm:$0xff] %vm225_vm0, %v4153_v5  ;;  %v4111_v25 = vpop.f32.mrb[10].mxu0 }
 0x1e4   : > { %v4154_v62 = vadd.f32 %v4111_v25, %v3861_v63  ;;  %v2820_v37 = vpop.f32.mrb[11].mxu0 }
 0x1e5   : > { %v4155_v41 = vadd.f32 %v2820_v37, %v1338_v0 }
 0x1e6   : > { %2972 = vst.msk [vmem:[%s5621_s26 + $0x58] sm:$0xff] %vm225_vm0, %v4154_v62 }
 0x1e7   : > { %2971 = vst.msk [vmem:[%s5621_s26 + $0x50] sm:$0xff] %vm225_vm0, %v4155_v41  ;;  %v4114_v48 = vpop.f32.mrb[12].mxu0 }
 0x1e8   : > { %v4156_v60 = vadd.f32 %v4114_v48, %v3864_v2  ;;  %v2830_v26 = vpop.f32.mrb[13].mxu0 }
 0x1e9   : > { %v4157_v58 = vadd.f32 %v2830_v26, %v1348_v3 }
 0x1ea   : > { %2974 = vst.msk [vmem:[%s5621_s26 + $0x68] sm:$0xff] %vm225_vm0, %v4156_v60 }
 0x1eb   : > { %2973 = vst.msk [vmem:[%s5621_s26 + $0x60] sm:$0xff] %vm225_vm0, %v4157_v58  ;;  %v4117_v29 = vpop.f32.mrb[14].mxu0 }
 0x1ec   : > { %v4158_v35 = vadd.f32 %v4117_v29, %v3867_v8  ;;  %v3920_v4 = vpop.f32.mrb[16].mxu1  ;;  %v2840_v9 = vpop.f32.mrb[15].mxu0 }
 0x1ed   : > { %v4159_v43 = vadd.f32 %v2840_v9, %v1358_v1  ;;  %v1635_v11 = vpop.f32.mrb[17].mxu1 }
 0x1ee   : > { %2976 = vst.msk [vmem:[%s5621_s26 + $0x78] sm:$0xff] %vm225_vm0, %v4158_v35 }
 0x1ef   : > { %2975 = vst.msk [vmem:[%s5621_s26 + $0x70] sm:$0xff] %vm225_vm0, %v4159_v43  ;;  %v4120_v40 = vpop.f32.mrb[16].mxu0 }
 0x1f0   : > { %v4160_v10 = vadd.f32 %v4120_v40, %v3920_v4  ;;  %v3923_v19 = vpop.f32.mrb[18].mxu1  ;;  %v2850_v54 = vpop.f32.mrb[17].mxu0 }
 0x1f1   : > { %v4161_v23 = vadd.f32 %v2850_v54, %v1635_v11  ;;  %v1645_v30 = vpop.f32.mrb[19].mxu1 }
 0x1f2   : > { %2978 = vst.msk [vmem:[%s5621_s26 + $0x88] sm:$0xff] %vm225_vm0, %v4160_v10 }
 0x1f3   : > { %2977 = vst.msk [vmem:[%s5621_s26 + $0x80] sm:$0xff] %vm225_vm0, %v4161_v23  ;;  %v4123_v31 = vpop.f32.mrb[18].mxu0 }
 0x1f4   : > { %v4162_v20 = vadd.f32 %v4123_v31, %v3923_v19  ;;  %v3926_v21 = vpop.f32.mrb[20].mxu1  ;;  %v2860_v47 = vpop.f32.mrb[19].mxu0 }
 0x1f5   : > { %v4163_v15 = vadd.f32 %v2860_v47, %v1645_v30  ;;  %v1655_v38 = vpop.f32.mrb[21].mxu1 }
 0x1f6   : > { %2980 = vst.msk [vmem:[%s5621_s26 + $0x98] sm:$0xff] %vm225_vm0, %v4162_v20 }
 0x1f7   : > { %2979 = vst.msk [vmem:[%s5621_s26 + $0x90] sm:$0xff] %vm225_vm0, %v4163_v15  ;;  %v4126_v55 = vpop.f32.mrb[20].mxu0 }
 0x1f8   : > { %v4164_v44 = vadd.f32 %v4126_v55, %v3926_v21  ;;  %v3929_v39 = vpop.f32.mrb[22].mxu1  ;;  %v2870_v46 = vpop.f32.mrb[21].mxu0 }
 0x1f9   : > { %v4165_v32 = vadd.f32 %v2870_v46, %v1655_v38  ;;  %v1665_v34 = vpop.f32.mrb[23].mxu1 }
 0x1fa   : > { %2982 = vst.msk [vmem:[%s5621_s26 + $0xa8] sm:$0xff] %vm225_vm0, %v4164_v44 }
 0x1fb   : > { %2981 = vst.msk [vmem:[%s5621_s26 + $0xa0] sm:$0xff] %vm225_vm0, %v4165_v32  ;;  %v4129_v45 = vpop.f32.mrb[22].mxu0 }
 0x1fc   : > { %v4166_v51 = vadd.f32 %v4129_v45, %v3929_v39  ;;  %v3932_v17 = vpop.f32.mrb[24].mxu1  ;;  %v2880_v52 = vpop.f32.mrb[23].mxu0 }
 0x1fd   : > { %v4167_v57 = vadd.f32 %v2880_v52, %v1665_v34  ;;  %v1675_v61 = vpop.f32.mrb[25].mxu1 }
 0x1fe   : > { %2984 = vst.msk [vmem:[%s5621_s26 + $0xb8] sm:$0xff] %vm225_vm0, %v4166_v51 }
 0x1ff   : > { %2983 = vst.msk [vmem:[%s5621_s26 + $0xb0] sm:$0xff] %vm225_vm0, %v4167_v57  ;;  %v4132_v63 = vpop.f32.mrb[24].mxu0 }
 0x200   : > { %v4168_v0 = vadd.f32 %v4132_v63, %v3932_v17  ;;  %v3935_v2 = vpop.f32.mrb[26].mxu1  ;;  %v2890_v3 = vpop.f32.mrb[25].mxu0 }
 0x201   : > { %v4169_v8 = vadd.f32 %v2890_v3, %v1675_v61  ;;  %v1685_v1 = vpop.f32.mrb[27].mxu1 }
 0x202   : > { %2986 = vst.msk [vmem:[%s5621_s26 + $0xc8] sm:$0xff] %vm225_vm0, %v4168_v0 }
 0x203   : > { %2985 = vst.msk [vmem:[%s5621_s26 + $0xc0] sm:$0xff] %vm225_vm0, %v4169_v8  ;;  %v4135_v12 = vpop.f32.mrb[26].mxu0 }
 0x204   : > { %v4170_v13 = vadd.f32 %v4135_v12, %v3935_v2  ;;  %v3938_v16 = vpop.f32.mrb[28].mxu1  ;;  %v2900_v18 = vpop.f32.mrb[27].mxu0 }
 0x205   : > { %v4171_v22 = vadd.f32 %v2900_v18, %v1685_v1  ;;  %v1695_v24 = vpop.f32.mrb[29].mxu1 }
 0x206   : > { %2988 = vst.msk [vmem:[%s5621_s26 + $0xd8] sm:$0xff] %vm225_vm0, %v4170_v13 }
 0x207   : > { %2987 = vst.msk [vmem:[%s5621_s26 + $0xd0] sm:$0xff] %vm225_vm0, %v4171_v22  ;;  %v4138_v59 = vpop.f32.mrb[28].mxu0 }
 0x208   : > { %v4172_v42 = vadd.f32 %v4138_v59, %v3938_v16  ;;  %v3941_v50 = vpop.f32.mrb[30].mxu1  ;;  %v2910_v28 = vpop.f32.mrb[29].mxu0 }
 0x209   : > { %v4173_v33 = vadd.f32 %v2910_v28, %v1695_v24  ;;  %v1705_v36 = vpop.f32.mrb[31].mxu1 }
 0x20a   : > { %2990 = vst.msk [vmem:[%s5621_s26 + $0xe8] sm:$0xff] %vm225_vm0, %v4172_v42 }
 0x20b   : > { %2989 = vst.msk [vmem:[%s5621_s26 + $0xe0] sm:$0xff] %vm225_vm0, %v4173_v33  ;;  %v4141_v49 = vpop.f32.mrb[30].mxu0 }
 0x20c   : > { %v4174_v53 = vadd.f32 %v4141_v49, %v3941_v50  ;;  %v2920_v56 = vpop.f32.mrb[31].mxu0 }
 0x20d   : > { %v4175_v6 = vadd.f32 %v2920_v56, %v1705_v36 }
 0x20e   : > { %2992 = vst.msk [vmem:[%s5621_s26 + $0xf8] sm:$0xff] %vm225_vm0, %v4174_v53 }
 0x20f   : > { %2991 = vst.msk [vmem:[%s5621_s26 + $0xf0] sm:$0xff] %vm225_vm0, %v4175_v6 }
 0x210 PF: > { %s12_s13 = sadd.s32 1, %s4479_s13   ;;  %s5820_s9 = smov %s4471_s11 }
 0x211   : > { %p9_p7 = scmp.ge.s32.totalorder %s12_s13, 10   ;;  %s5821_s10 = smov %s4475_s12 }
 0x212   : > { %s5822_s11 = smov %s5825_s14  ;;  %s5823_s12 = smov %s5829_s15 }
 0x213   :  { %11 = sbr.rel (!%p9_p7) target bundleno = 3 (0x3), region = 67 }

// kernel: aligned_bottleneck_pallas.6
= control target key start
LH: loop header
LB: loop body
LE: loop exit
PB: predicated region body
PF: predicated region fallthrough
CT: control target
= control target key end

     0   :  { %s4576_s9 = smov 0   ;;  %s4578_s10 = smov 0   ;;  %s5809_s0 = inlined_call_operand.vmem [shape: f32[2,34,34,16], index: 0, kind: input, shape index: {}]   ;;  %s5810_s1 = inlined_call_operand.vmem [shape: f32[3,3,16,16], index: 1, kind: input, shape index: {}]   ;;  %s5811_s2 = inlined_call_operand.vmem [shape: f32[2,32,32,16], index: 2, kind: output, shape index: {}]  }
   0x1   :  { %s4580_s11 = smov 0   ;;  %s4582_s12 = smov 0  }
   0x2   :  { %s4584_s13 = smov 0  }
   0x3 LB: > { %s21_s14 = sadd.s32 1, %s4551_s11  ;;  %s24_s15 = sadd.s32 1, %s4555_s12  ;;  %s4559_s13 = sphi %s4584_s13, %s12_s13   ;;  %s4555_s12 = sphi %s4582_s12, %s5930_s12   ;;  %s4551_s11 = sphi %s4580_s11, %s5929_s11   ;;  %s4547_s10 = sphi %s4578_s10, %s5928_s10   ;;  %s4543_s9 = sphi %s4576_s9, %s5927_s9  }
   0x4   : > { %p22_p0 = scmp.ge.s32.totalorder %s21_s14, 4  ;;  %p3098_p1 = scmp.ge.s32.totalorder %s4559_s13, 1 }
   0x5   : > { %p126_p2 = scmp.lt.s32.totalorder %s4559_s13, 9 }
   0x6   : > { %s5932_s14 = smov (%p22_p0, %s21_s14), 0  ;;  %s5934_s15 = smov (!%p22_p0, %s24_s15), %s4555_s12 }
   0x7   : > { %p127_p3 = pnand %p3098_p1, %p126_p2  ;;  %p26_p4 = scmp.ge.s32.totalorder %s5934_s15, 2 }
   0x9   : > { %s5936_s15 = smov (%p26_p4, %s5934_s15), 0  ;;  %130 = sbr.rel (%p127_p3) target bundleno = 528 (0x210), region = 28 }
  0x10   : > { %v3106_v0 = vld [vmem:[%s5810_s1 + $0x30] sm:$0xff]  ;;  %v3107_v1 = vld [vmem:[%s5810_s1 + $0x38] sm:$0xff]  ;;  %v3240_v2 = vld [vmem:[%s5810_s1 + $0x40] sm:$0xff]  ;;  %p153_p5 = scmp.lt.s32.totalorder %s4547_s10, 1  ;;  %s3105_s4 = smul.u32 320, %s4543_s9  ;;  %vm227_vm0 = vcmask 130048  }
  0x11   : > { %v4186_v3 = vpack.c.bf16 %v3107_v1, %v3106_v0  ;;  %v3241_v4 = vld [vmem:[%s5810_s1 + $0x48] sm:$0xff]  ;;  %v222_v5 = vld [vmem:[%s5810_s1] sm:$0xff]  ;;  %v3274_v9 = vld [vmem:[%s5810_s1 + $0x70] sm:$0xff]  ;;  %vm1068_vm1 = vcmask 1046528   ;;  %vm2019_vm2 = vcmask 1045504   ;;  %s3100_s16 = sshll.u32 %s4543_s9, 3 }
  0x12   : > { %v223_v6 = vld [vmem:[%s5810_s1 + $0x8] sm:$0xff]  ;;  %v4626_v7 = vpack.c.bf16 %v3241_v4, %v3240_v2  ;;  %s5938_s10 = smov (!%p153_p5, %s4547_s10), 1  ;;  %v3275_v10 = vld [vmem:[%s5810_s1 + $0x78] sm:$0xff]  ;;  %v3172_v12 = vld [vmem:[%s5810_s1 + $0x60] sm:$0xff]  ;;  %p161_p6 = scmp.lt.s32.totalorder %s3100_s16, 31 }
  0x13   : > { %v4190_v8 = vpack.c.bf16 %v223_v6, %v222_v5  ;;  %4187 = vmatprep.subr.bf16.mxu1 %v4186_v3  ;;  %v4206_v11 = vpack.c.bf16 %v3275_v10, %v3274_v9  ;;  %s4480_s5 = smul.u32 1360, %s5938_s10  ;;  %v3173_v13 = vld [vmem:[%s5810_s1 + $0x68] sm:$0xff]  ;;  %v3308_v14 = vld [vmem:[%s5810_s1 + $0x20] sm:$0xff]  ;;  %s3102_s18 = sshll.u32 %s5938_s10, 7 }
  0x14   : > { %4189 = vmatpush3.bf16.msra.mxu1 %v4186_v3  ;;  %4203 = vmatprep.subr.bf16.mxu0 %v4626_v7  ;;  %v4663_v18 = vpack.c.bf16 %v3173_v13, %v3172_v12  ;;  %v3309_v23 = vld [vmem:[%s5810_s1 + $0x28] sm:$0xff]  ;;  %s5940_s16 = smov (!%p161_p6, %s3100_s16), 31 }
  0x15   : > { %4205 = vmatpush3.bf16.msra.mxu0 %v4626_v7  ;;  %4191 = vmatprep.subr.bf16.mxu1 %v4190_v8  ;;  %s157_s19 = scalar_lea.vmem %s5809_s0, %s4480_s5  ;;  %v4710_v36 = vpack.c.bf16 %v3309_v23, %v3308_v14  ;;  %v3342_v14 = vld [vmem:[%s5810_s1 + $0x50] sm:$0xff]  ;;  %s3101_s17 = sshll.u32 %s5940_s16, 2 }
  0x16   : > { %4207 = vmatprep.subr.bf16.mxu0 %v4206_v11  ;;  %s4649_s20 = scalar_lea.vmem %s157_s19, %s3105_s4  ;;  %s165_s19 = sadd.s32 %s3102_s18, %s3101_s17 }
  0x17   : > { %v4655_v15 = vld [vmem:[%s4649_s20 + $0x28] sm:$0xff]  ;;  %v4658_v16 = vld [vmem:[%s4649_s20 + $0x30] sm:$0xff]  ;;  %v4661_v17 = vld [vmem:[%s4649_s20 + $0x38] sm:$0xff] }
  0x18   : > { %3722 = vmatprep.mubr.msk.f32.mxu1 %vm227_vm0, %v4655_v15  ;;  %v1078_v19 = vrot.slane %v4655_v15, 1  ;;  %v1079_v20 = vrot.slane %v4658_v16, 1  ;;  %v4670_v21 = vld [vmem:[%s4649_s20 + $0x40] sm:$0xff]  ;;  %v4673_v22 = vld [vmem:[%s4649_s20 + $0x50] sm:$0xff]  ;;  %v1081_v24 = vrot.slane %v4661_v17, 1  ;;  %v4692_v29 = vld [vmem:[%s4649_s20 + $0x58] sm:$0xff] }
  0x19   : > { %3723 = vmatmul.mubr.msk.f32.vlgmr.msra.gmra.mrb[0].mxu1 %vm227_vm0, %v4658_v16  ;;  %v1083_v25 = vrot.slane %v4670_v21, 1  ;;  %v4683_v26 = vld [vmem:[%s4649_s20 + $0x48] sm:$0x3]  ;;  %v1087_v30 = vrot.slane %v4673_v22, 1  ;;  %v4696_v31 = vld [vmem:[%s4649_s20 + $0x60] sm:$0xff]  ;;  %v1088_v34 = vrot.slane %v4692_v29, 1 }
  0x1a   : > { %v4686_v27 = vsel %vm1068_vm1, %v1078_v19, %v1079_v20  ;;  %3725 = vmatprep.mubr.msk.f32.mxu1 %vm227_vm0, %v4661_v17  ;;  %4193 = vmatpush3.bf16.msra.mxu1 %v4190_v8  ;;  %v1085_v28 = vrot.slane %v4683_v26, 1  ;;  %v4701_v32 = vsel %vm1068_vm1, %v1079_v20, %v1081_v24  ;;  %v4708_v35 = vld [vmem:[%s4649_s20 + $0x68] sm:$0xff]  ;;  %v1090_v38 = vrot.slane %v4696_v31, 1  ;;  %v4730_v41 = vld [vmem:[%s4649_s20 + $0x70] sm:$0x3]  ;;  %v4733_v42 = vld [vmem:[%s4649_s20 + $0x78] sm:$0xff] }
  0x1b   : > { %5857 = vst [vmem:[#allocation2_spill] sm:$0xff] %v4686_v27  ;;  %3930 = vmatprep.mubr.msk.f32.mxu0 %vm227_vm0, %v4686_v27  ;;  %5858 = vst [vmem:[#allocation3_spill] sm:$0xff] %v4701_v32  ;;  %v4704_v33 = vsel %vm1068_vm1, %v1081_v24, %v1083_v25  ;;  %4195 = vmatprep.subr.bf16.mxu1 %v4663_v18  ;;  %v4726_v39 = vsel %vm1068_vm1, %v1087_v30, %v1088_v34  ;;  %v1092_v40 = vrot.slane %v4708_v35, 1  ;;  %v4736_v43 = vld [vmem:[%s4649_s20 + $0x80] sm:$0xff]  ;;  %v4757_v49 = vld [vmem:[%s4649_s20 + $0x88] sm:$0xff] }
  0x1c   : > { %5859 = vst [vmem:[#allocation4_spill] sm:$0xff] %v4704_v33  ;;  %3931 = vmatmul.mubr.msk.f32.vlgmr.msra.gmra.mrb[0].mxu0 %vm227_vm0, %v4701_v32  ;;  %v4718_v37 = vsel %vm1068_vm1, %v1083_v25, %v1085_v28  ;;  %5861 = vst [vmem:[#allocation6_spill] sm:$0xff] %v4726_v39  ;;  %v4746_v44 = vsel %vm1068_vm1, %v1088_v34, %v1090_v38  ;;  %v1094_v45 = vrot.slane %v4730_v41, 1  ;;  %v1096_v47 = vrot.slane %v4733_v42, 1  ;;  %v4760_v50 = vld [vmem:[%s4649_s20 + $0x90] sm:$0xff]  ;;  %v4782_v56 = vld [vmem:[%s4649_s20 + $0xa0] sm:$0xff] }
  0x1d   : > { %4209 = vmatpush3.bf16.msra.mxu0 %v4206_v11  ;;  %3726 = vmatmul.mubr.msk.f32.gmra.mrb[2].mxu1 %vm227_vm0, %v4670_v21  ;;  %5860 = vst [vmem:[#allocation5_spill] sm:$0xff] %v4718_v37  ;;  %5862 = vst [vmem:[#allocation7_spill] sm:$0xff] %v4746_v44  ;;  %v4752_v46 = vsel %vm1068_vm1, %v1090_v38, %v1092_v40  ;;  %v1097_v48 = vrot.slane %v4736_v43, 1  ;;  %v1099_v52 = vrot.slane %v4757_v49, 1  ;;  %v1101_v54 = vrot.slane %v4760_v50, 1  ;;  %v4785_v57 = vld [vmem:[%s4649_s20 + $0xa8] sm:$0xff] }
  0x1e   : > { %3933 = vmatprep.mubr.msk.f32.mxu0 %vm227_vm0, %v4704_v33  ;;  %3728 = vmatprep.mubr.msk.f32.mxu1 %vm227_vm0, %v4673_v22  ;;  %5863 = vst [vmem:[#allocation8_spill] sm:$0xff] %v4752_v46  ;;  %v4769_v51 = vsel %vm1068_vm1, %v1092_v40, %v1094_v45  ;;  %v4779_v55 = vld [vmem:[%s4649_s20 + $0x98] sm:$0x3]  ;;  %v1105_v61 = vrot.slane %v4782_v56, 1  ;;  %v1106_v62 = vrot.slane %v4785_v57, 1  ;;  %v4805_v63 = vld [vmem:[%s4649_s20 + $0xb0] sm:$0xff] }
  0x1f   : > { %4211 = vmatprep.subr.bf16.mxu0 %v4710_v36  ;;  %5864 = vst [vmem:[#allocation9_spill] sm:$0xff] %v4769_v51  ;;  %v4775_v53 = vsel %vm1068_vm1, %v1096_v47, %v1097_v48  ;;  %v4794_v58 = vsel %vm1068_vm1, %v1097_v48, %v1099_v52  ;;  %v1103_v59 = vrot.slane %v4779_v55, 1  ;;  %v4800_v60 = vsel %vm1068_vm1, %v1099_v52, %v1101_v54  ;;  %v4808_v0 = vld [vmem:[%s4649_s20 + $0xb8] sm:$0xff]  ;;  %v4827_v5 = vld [vmem:[%s4649_s20 + $0xc0] sm:$0x3]  ;;  %v4845_v10 = vld [vmem:[%s4649_s20 + $0xc8] sm:$0xff] }
  0x20   : > { %3934 = vmatmul.mubr.msk.f32.gmra.mrb[2].mxu0 %vm227_vm0, %v4718_v37  ;;  %5865 = vst [vmem:[#allocation10_spill] sm:$0xff] %v4775_v53  ;;  %5866 = vst [vmem:[#allocation11_spill] sm:$0xff] %v4794_v58  ;;  %v1108_v2 = vrot.slane %v4805_v63, 1  ;;  %v4823_v3 = vsel %vm1068_vm1, %v1105_v61, %v1106_v62  ;;  %v1110_v4 = vrot.slane %v4808_v0, 1  ;;  %v1112_v8 = vrot.slane %v4827_v5, 1  ;;  %v4859_v12 = vld [vmem:[%s4649_s20 + $0xd0] sm:$0xff] }
  0x21   : > { %3729 = vmatmul.mubr.msk.f32.gmra.mrb[4].mxu1 %vm227_vm0, %v4692_v29  ;;  %3936 = vmatprep.mubr.msk.f32.mxu0 %vm227_vm0, %v4726_v39  ;;  %5867 = vst [vmem:[#allocation12_spill] sm:$0xff] %v4800_v60  ;;  %v4817_v1 = vsel %vm1068_vm1, %v1101_v54, %v1103_v59  ;;  %5869 = vst [vmem:[#allocation14_spill] sm:$0xff] %v4823_v3  ;;  %v4862_v13 = vld [vmem:[%s4649_s20 + $0xd8] sm:$0xff]  ;;  %v4879_v20 = vld [vmem:[%s4649_s20 + $0xe0] sm:$0xff]  ;;  %v1114_v45 = vrot.slane %v4845_v10, 1  ;;  %v1115_v47 = vrot.slane %v4859_v12, 1 }
  0x22   : > { %3731 = vmatprep.mubr.msk.f32.mxu1 %vm227_vm0, %v4696_v31  ;;  %5868 = vst [vmem:[#allocation13_spill] sm:$0xff] %v4817_v1  ;;  %v4836_v6 = vsel %vm1068_vm1, %v1106_v62, %v1108_v2  ;;  %v4842_v9 = vsel %vm1068_vm1, %v1108_v2, %v1110_v4  ;;  %v4854_v11 = vsel %vm1068_vm1, %v1110_v4, %v1112_v8  ;;  %v3343_v19 = vld [vmem:[%s5810_s1 + $0x58] sm:$0xff]  ;;  %v4882_v23 = vld [vmem:[%s4649_s20 + $0xf0] sm:$0xff]  ;;  %v4899_v28 = vld [vmem:[%s4649_s20 + $0x100] sm:$0xff]  ;;  %v1117_v52 = vrot.slane %v4862_v13, 1 }
  0x23   : > { %5870 = vst [vmem:[#allocation15_spill] sm:$0xff] %v4836_v6  ;;  %5871 = vst [vmem:[#allocation16_spill] sm:$0xff] %v4842_v9  ;;  %v4884_v24 = vpack.c.bf16 %v3343_v19, %v3342_v14  ;;  %v4896_v25 = vld [vmem:[%s4649_s20 + $0xf8] sm:$0xff]  ;;  %v4911_v30 = vld [vmem:[%s4649_s20 + $0x108] sm:$0xff]  ;;  %v4959_v59 = vsel %vm1068_vm1, %v1114_v45, %v1115_v47  ;;  %v1119_v61 = vrot.slane %v4879_v20, 1 }
  0x24   : > { %3937 = vmatmul.mubr.msk.f32.gmra.mrb[4].mxu0 %vm227_vm0, %v4746_v44  ;;  %5872 = vst [vmem:[#allocation17_spill] sm:$0xff] %v4854_v11  ;;  %v4914_v34 = vld [vmem:[%s4649_s20 + $0x118] sm:$0xff]  ;;  %v4928_v38 = vld [vmem:[%s4649_s20 + $0x128] sm:$0xff]  ;;  %v4939_v40 = vld [vmem:[%s4649_s20 + $0x130] sm:$0xff]  ;;  %v4975_v4 = vsel %vm1068_vm1, %v1115_v47, %v1117_v52 }
  0x25   : > { %3732 = vmatmul.mubr.msk.f32.gmra.mrb[6].mxu1 %vm227_vm0, %v4708_v35  ;;  %3939 = vmatprep.mubr.msk.f32.mxu0 %vm227_vm0, %v4752_v46  ;;  %v4944_v48 = vld [vmem:[%s4649_s20 + $0x140] sm:$0xff]  ;;  %v4956_v54 = vld [vmem:[%s4649_s20 + $0x148] sm:$0xff]  ;;  %5873 = vst [vmem:[#allocation18_spill] sm:$0xff] %v4959_v59  ;;  %v4966_v2 = vld [vmem:[%s4649_s20 + $0x150] sm:$0xff]  ;;  %v4984_v19 = vsel %vm1068_vm1, %v1117_v52, %v1119_v61 }
  0x26   : > { %3734 = vmatprep.mubr.msk.f32.mxu1 %vm227_vm0, %v4733_v42  ;;  %v4963_v62 = vld [vmem:[%s4649_s20 + $0xe8] sm:$0x3]  ;;  %5874 = vst [vmem:[#allocation19_spill] sm:$0xff] %v4975_v4  ;;  %v4981_v14 = vld [vmem:[%s4649_s20 + $0x158] sm:$0xff]  ;;  %5875 = vst [vmem:[#allocation20_spill] sm:$0xff] %v4984_v19 }
  0x27   : > { %v1121_v8 = vrot.slane %v4963_v62, 1  ;;  %v4987_v45 = vld [vmem:[%s4649_s20] sm:$0xff]  ;;  %v4993_v47 = vld [vmem:[%s4649_s20 + $0x8] sm:$0xff]  ;;  %v5002_v52 = vld [vmem:[%s4649_s20 + $0x18] sm:$0xff] }
  0x28   : > { %3940 = vmatmul.mubr.msk.f32.gmra.mrb[6].mxu0 %vm227_vm0, %v4769_v51  ;;  %v5122_v33 = vld [vmem:[%s4649_s20 + $0x168] sm:$0xff]  ;;  %v5125_v32 = vld [vmem:[%s4649_s20 + $0x170] sm:$0xff]  ;;  %v5145_v27 = vld [vmem:[%s4649_s20 + $0x178] sm:$0xff] }
  0x29   : > { %3735 = vmatmul.mubr.msk.f32.gmra.mrb[8].mxu1 %vm227_vm0, %v4736_v43  ;;  %3942 = vmatprep.mubr.msk.f32.mxu0 %vm227_vm0, %v4775_v53 }
  0x2a   : > { %3737 = vmatprep.mubr.msk.f32.mxu1 %vm227_vm0, %v4757_v49 }
  0x2c   : > { %3943 = vmatmul.mubr.msk.f32.gmra.mrb[8].mxu0 %vm227_vm0, %v4794_v58 }
  0x2d   : > { %3738 = vmatmul.mubr.msk.f32.gmra.mrb[10].mxu1 %vm227_vm0, %v4760_v50  ;;  %3945 = vmatprep.mubr.msk.f32.mxu0 %vm227_vm0, %v4800_v60 }
  0x2e   : > { %3740 = vmatprep.mubr.msk.f32.mxu1 %vm227_vm0, %v4782_v56 }
  0x30   : > { %3946 = vmatmul.mubr.msk.f32.gmra.mrb[10].mxu0 %vm227_vm0, %v4817_v1 }
  0x31   : > { %3741 = vmatmul.mubr.msk.f32.gmra.mrb[12].mxu1 %vm227_vm0, %v4785_v57  ;;  %3948 = vmatprep.mubr.msk.f32.mxu0 %vm227_vm0, %v4823_v3 }
  0x32   : > { %3743 = vmatprep.mubr.msk.f32.mxu1 %vm227_vm0, %v4805_v63 }
  0x34   : > { %3949 = vmatmul.mubr.msk.f32.gmra.mrb[12].mxu0 %vm227_vm0, %v4836_v6 }
  0x35   : > { %3744 = vmatmul.mubr.msk.f32.gmra.mrb[14].mxu1 %vm227_vm0, %v4808_v0  ;;  %3951 = vmatprep.mubr.msk.f32.mxu0 %vm227_vm0, %v4842_v9 }
  0x36   : > { %3746 = vmatprep.mubr.msk.f32.mxu1 %vm227_vm0, %v4845_v10 }
  0x38   : > { %3952 = vmatmul.mubr.msk.f32.gmra.mrb[14].mxu0 %vm227_vm0, %v4854_v11 }
  0x39   : > { %3747 = vmatmul.mubr.msk.f32.gmra.mrb[16].mxu1 %vm227_vm0, %v4859_v12  ;;  %3982 = vmatprep.mubr.msk.f32.mxu0 %vm227_vm0, %v4726_v39  ;;  %v5027_v39 = vld [vmem:[%s4649_s20 + $0x110] sm:$0x3] }
  0x3a   : > { %3749 = vmatprep.mubr.msk.f32.mxu1 %vm227_vm0, %v4862_v13 }
  0x3c   : > { %3983 = vmatmul.mubr.msk.f32.vlgmr.msra.gmra.mrb[0].mxu0 %vm227_vm0, %v4746_v44  ;;  %v1128_v44 = vrot.slane %v4911_v30, 1 }
  0x3d   : > { %4213 = vmatpush3.bf16.msra.mxu0 %v4710_v36  ;;  %3750 = vmatmul.mubr.msk.f32.gmra.mrb[18].mxu1 %vm227_vm0, %v4879_v20  ;;  %v4925_v36 = vld [vmem:[%s4649_s20 + $0x120] sm:$0xff] }
  0x3e   : > { %3985 = vmatprep.mubr.msk.f32.mxu0 %vm227_vm0, %v4752_v46  ;;  %3752 = vmatprep.mubr.msk.f32.mxu1 %vm227_vm0, %v4882_v23 }
  0x3f   : > { %4215 = vmatprep.subr.bf16.mxu0 %v4884_v24 }
  0x40   : > { %3986 = vmatmul.mubr.msk.f32.gmra.mrb[2].mxu0 %vm227_vm0, %v4769_v51  ;;  %v1070_v51 = vrot.slane %v4993_v47, 1 }
  0x41   : > { %3753 = vmatmul.mubr.msk.f32.gmra.mrb[20].mxu1 %vm227_vm0, %v4896_v25  ;;  %3988 = vmatprep.mubr.msk.f32.mxu0 %vm227_vm0, %v4775_v53  ;;  %v1074_v53 = vrot.slane %v5002_v52, 1 }
  0x42   : > { %3755 = vmatprep.mubr.msk.f32.mxu1 %vm227_vm0, %v4899_v28 }
  0x44   : > { %3989 = vmatmul.mubr.msk.f32.gmra.mrb[4].mxu0 %vm227_vm0, %v4794_v58  ;;  %v1126_v58 = vrot.slane %v4899_v28, 1 }
  0x45   : > { %3756 = vmatmul.mubr.msk.f32.gmra.mrb[22].mxu1 %vm227_vm0, %v4911_v30  ;;  %3991 = vmatprep.mubr.msk.f32.mxu0 %vm227_vm0, %v4800_v60  ;;  %v3207_v60 = vld [vmem:[%s5810_s1 + $0x18] sm:$0xff] }
  0x46   : > { %3758 = vmatprep.mubr.msk.f32.mxu1 %vm227_vm0, %v4914_v34 }
  0x48   : > { %3992 = vmatmul.mubr.msk.f32.gmra.mrb[6].mxu0 %vm227_vm0, %v4817_v1  ;;  %v3206_v1 = vld [vmem:[%s5810_s1 + $0x10] sm:$0xff] }
  0x49   : > { %3759 = vmatmul.mubr.msk.f32.gmra.mrb[24].mxu1 %vm227_vm0, %v4925_v36  ;;  %3994 = vmatprep.mubr.msk.f32.mxu0 %vm227_vm0, %v4823_v3 }
  0x4a   : > { %3761 = vmatprep.mubr.msk.f32.mxu1 %vm227_vm0, %v4928_v38 }
  0x4c   : > { %3995 = vmatmul.mubr.msk.f32.gmra.mrb[8].mxu0 %vm227_vm0, %v4836_v6  ;;  %v4996_v6 = vld [vmem:[%s4649_s20 + $0x10] sm:$0xff] }
  0x4d   : > { %3762 = vmatmul.mubr.msk.f32.gmra.mrb[26].mxu1 %vm227_vm0, %v4939_v40  ;;  %3997 = vmatprep.mubr.msk.f32.mxu0 %vm227_vm0, %v4842_v9  ;;  %v1124_v9 = vrot.slane %v4896_v25, 1  ;;  %v1072_v3 = vrot.slane %v4996_v6, 1 }
  0x4e   : > { %3764 = vmatprep.mubr.msk.f32.mxu1 %vm227_vm0, %v4944_v48 }
  0x50   : > { %3998 = vmatmul.mubr.msk.f32.gmra.mrb[10].mxu0 %vm227_vm0, %v4854_v11  ;;  %v1123_v11 = vrot.slane %v4882_v23, 1 }
  0x51   : > { %3765 = vmatmul.mubr.msk.f32.gmra.mrb[28].mxu1 %vm227_vm0, %v4956_v54  ;;  %4000 = vmatprep.mubr.msk.f32.mxu0 %vm227_vm0, %v4959_v59  ;;  %v1069_v59 = vrot.slane %v4987_v45, 1 }
  0x52   : > { %3767 = vmatprep.mubr.msk.f32.mxu1 %vm227_vm0, %v4966_v2  ;;  %v5023_v46 = vsel %vm1068_vm1, %v1123_v11, %v1124_v9  ;;  %v5044_v11 = vsel %vm1068_vm1, %v1124_v9, %v1126_v58  ;;  %v1133_v9 = vrot.slane %v4925_v36, 1 }
  0x53   : > { %5877 = vst [vmem:[#allocation22_spill] sm:$0xff] %v5023_v46  ;;  %5878 = vst [vmem:[#allocation23_spill] sm:$0xff] %v5044_v11 }
  0x54   : > { %4001 = vmatmul.mubr.msk.f32.gmra.mrb[12].mxu0 %vm227_vm0, %v4975_v4  ;;  %v5015_v4 = vsel %vm1068_vm1, %v1119_v61, %v1121_v8  ;;  %v5032_v61 = vsel %vm1068_vm1, %v1069_v59, %v1070_v51  ;;  %v5037_v8 = vsel %vm1068_vm1, %v1070_v51, %v1072_v3  ;;  %v5051_v59 = vsel %vm1068_vm1, %v1072_v3, %v1074_v53 }
  0x55   : > { %3768 = vmatmul.mubr.msk.f32.gmra.mrb[30].mxu1 %vm227_vm0, %v4981_v14  ;;  %4003 = vmatprep.mubr.msk.f32.mxu0 %vm227_vm0, %v4984_v19  ;;  %5876 = vst [vmem:[#allocation21_spill] sm:$0xff] %v5015_v4  ;;  %v5029_v19 = vpack.c.bf16 %v3207_v60, %v3206_v1  ;;  %v1130_v60 = vrot.slane %v5027_v39, 1  ;;  %v5048_v1 = vld [vmem:[%s4649_s20 + $0x20] sm:$0x3]  ;;  %5879 = vst [vmem:[#allocation24_spill] sm:$0xff] %v5051_v59  ;;  %v5057_v51 = vsel %vm1068_vm1, %v1126_v58, %v1128_v44 }
  0x56   : > { %3774 = vmatprep.mubr.msk.f32.mxu1 %vm227_vm0, %v4987_v45  ;;  %5880 = vst [vmem:[#allocation25_spill] sm:$0xff] %v5057_v51  ;;  %v1135_v58 = vrot.slane %v4928_v38, 1  ;;  %v5165_v59 = vld [vmem:[%s4649_s20 + $0x188] sm:$0x3] }
  0x58   : > { %4004 = vmatmul.mubr.msk.f32.gmra.mrb[14].mxu0 %vm227_vm0, %v5015_v4  ;;  %v1076_v4 = vrot.slane %v5048_v1, 1 }
  0x59   : > { %3775 = vmatmul.mubr.msk.f32.vlgmr.msra.gmra.mrb[0].mxu1 %vm227_vm0, %v4993_v47  ;;  %4006 = vmatprep.mubr.msk.f32.mxu0 %vm227_vm0, %v5023_v46  ;;  %v1132_v46 = vrot.slane %v4914_v34, 1 }
  0x5a   : > { %3777 = vmatprep.mubr.msk.f32.mxu1 %vm227_vm0, %v4996_v6  ;;  %4197 = vmatpush3.bf16.msra.mxu1 %v4663_v18  ;;  %v5066_v3 = vsel %vm1068_vm1, %v1074_v53, %v1076_v4  ;;  %v5073_v18 = vsel %vm1068_vm1, %v1128_v44, %v1130_v60  ;;  %v1137_v53 = vrot.slane %v4939_v40, 1  ;;  %v5083_v4 = vld [vmem:[%s4649_s20 + $0x138] sm:$0x3]  ;;  %v5092_v44 = vsel %vm1068_vm1, %v1133_v9, %v1135_v58 }
  0x5b   : > { %4199 = vmatprep.subr.bf16.mxu1 %v5029_v19  ;;  %5881 = vst [vmem:[#allocation26_spill] sm:$0xff] %v5066_v3  ;;  %5882 = vst [vmem:[#allocation27_spill] sm:$0xff] %v5073_v18  ;;  %v5079_v37 = vsel %vm1068_vm1, %v1132_v46, %v1133_v9  ;;  %v1139_v46 = vrot.slane %v5083_v4, 1  ;;  %v1141_v60 = vrot.slane %v4944_v48, 1  ;;  %v5148_v3 = vld [vmem:[%s4649_s20 + $0x180] sm:$0xff] }
  0x5c   : > { %4007 = vmatmul.mubr.msk.f32.gmra.mrb[16].mxu0 %vm227_vm0, %v5044_v11  ;;  %5883 = vst [vmem:[#allocation28_spill] sm:$0xff] %v5079_v37  ;;  %5884 = vst [vmem:[#allocation29_spill] sm:$0xff] %v5092_v44  ;;  %v1146_v11 = vrot.slane %v4981_v14, 1 }
  0x5d   : > { %3778 = vmatmul.mubr.msk.f32.gmra.mrb[2].mxu1 %vm227_vm0, %v5002_v52  ;;  %4009 = vmatprep.mubr.msk.f32.mxu0 %vm227_vm0, %v5057_v51  ;;  %v1142_v51 = vrot.slane %v4956_v54, 1  ;;  %v5110_v9 = vsel %vm1068_vm1, %v1137_v53, %v1139_v46 }
  0x5e   : > { %3780 = vmatprep.mubr.msk.f32.mxu1 %vm227_vm0, %v4655_v15  ;;  %5886 = vst [vmem:[#allocation31_spill] sm:$0xff] %v5110_v9 }
  0x60   : > { %4010 = vmatmul.mubr.msk.f32.gmra.mrb[18].mxu0 %vm227_vm0, %v5073_v18  ;;  %v5100_v18 = vsel %vm1068_vm1, %v1135_v58, %v1137_v53  ;;  %v5116_v58 = vsel %vm1068_vm1, %v1141_v60, %v1142_v51 }
  0x61   : > { %3781 = vmatmul.mubr.msk.f32.gmra.mrb[4].mxu1 %vm227_vm0, %v4658_v16  ;;  %4012 = vmatprep.mubr.msk.f32.mxu0 %vm227_vm0, %v5079_v37  ;;  %5885 = vst [vmem:[#allocation30_spill] sm:$0xff] %v5100_v18  ;;  %v1144_v37 = vrot.slane %v4966_v2, 1  ;;  %5887 = vst [vmem:[#allocation32_spill] sm:$0xff] %v5116_v58 }
  0x62   : > { %3783 = vmatprep.mubr.msk.f32.mxu1 %vm227_vm0, %v4661_v17 }
  0x63   : > { %v5134_v53 = vsel %vm1068_vm1, %v1142_v51, %v1144_v37  ;;  %v5140_v60 = vsel %vm1068_vm1, %v1144_v37, %v1146_v11  ;;  %v1153_v51 = vrot.slane %v5145_v27, 1 }
  0x64   : > { %4013 = vmatmul.mubr.msk.f32.gmra.mrb[20].mxu0 %vm227_vm0, %v5092_v44  ;;  %v5119_v44 = vld [vmem:[%s4649_s20 + $0x160] sm:$0x3]  ;;  %5889 = vst [vmem:[#allocation34_spill] sm:$0xff] %v5134_v53  ;;  %5890 = vst [vmem:[#allocation35_spill] sm:$0xff] %v5140_v60  ;;  %s3103_s20 = sshll.u32 %s165_s19, 3 }
  0x65   : > { %3784 = vmatmul.mubr.msk.f32.gmra.mrb[6].mxu1 %vm227_vm0, %v4670_v21  ;;  %4015 = vmatprep.mubr.msk.f32.mxu0 %vm227_vm0, %v5100_v18  ;;  %5888 = vst [vmem:[#allocation33_spill] sm:$0xff] %v5119_v44  ;;  %v1148_v46 = vrot.slane %v5119_v44, 1  ;;  %v1151_v18 = vrot.slane %v5125_v32, 1  ;;  %v1155_v44 = vrot.slane %v5148_v3, 1  ;;  %s5728_s23 = scalar_lea.vmem %s5811_s2, %s3103_s20 }
  0x66   : > { %3786 = vmatprep.mubr.msk.f32.mxu1 %vm227_vm0, %v4673_v22 }
  0x67   : > { %v5157_v37 = vsel %vm1068_vm1, %v1146_v11, %v1148_v46  ;;  %v1154_v11 = vsel %vm1068_vm1, %v1151_v18, %v1153_v51  ;;  %v1157_v46 = vrot.slane %v5165_v59, 1 }
  0x68   : > { %4016 = vmatmul.mubr.msk.f32.gmra.mrb[22].mxu0 %vm227_vm0, %v5110_v9  ;;  %v1150_v9 = vrot.slane %v5122_v33, 1  ;;  %5891 = vst [vmem:[#allocation36_spill] sm:$0xff] %v5157_v37 }
  0x69   : > { %3787 = vmatmul.mubr.msk.f32.gmra.mrb[8].mxu1 %vm227_vm0, %v4692_v29  ;;  %4018 = vmatprep.mubr.msk.f32.mxu0 %vm227_vm0, %v5116_v58 }
  0x6a   : > { %3789 = vmatprep.mubr.msk.f32.mxu1 %vm227_vm0, %v4696_v31  ;;  %v1152_v58 = vsel %vm1068_vm1, %v1150_v9, %v1151_v18  ;;  %v1156_v9 = vsel %vm1068_vm1, %v1153_v51, %v1155_v44  ;;  %v1158_v18 = vsel %vm1068_vm1, %v1155_v44, %v1157_v46  ;;  %v2030_v51 = vrot.slane %v4658_v16, 2 }
  0x6b   : > { %v2034_v16 = vrot.slane %v4670_v21, 2  ;;  %v2036_v21 = vrot.slane %v4683_v26, 2 }
  0x6c   : > { %4019 = vmatmul.mubr.msk.f32.gmra.mrb[24].mxu0 %vm227_vm0, %v5134_v53  ;;  %v2021_v53 = vrot.slane %v4993_v47, 2  ;;  %v3377_v47 = vld [vmem:[%s5810_s1 + $0x88] sm:$0xff] }
  0x6d   : > { %3790 = vmatmul.mubr.msk.f32.gmra.mrb[10].mxu1 %vm227_vm0, %v4708_v35  ;;  %4021 = vmatprep.mubr.msk.f32.mxu0 %vm227_vm0, %v5140_v60  ;;  %v2020_v60 = vrot.slane %v4987_v45, 2  ;;  %v5245_v26 = vsel %vm2019_vm2, %v2034_v16, %v2036_v21 }
  0x6e   : > { %3792 = vmatprep.mubr.msk.f32.mxu1 %vm227_vm0, %v4733_v42 }
  0x6f   : > { %v2022_v45 = vsel %vm2019_vm2, %v2020_v60, %v2021_v53  ;;  %v2027_v60 = vrot.slane %v5048_v1, 2 }
  0x70   : > { %4022 = vmatmul.mubr.msk.f32.gmra.mrb[26].mxu0 %vm227_vm0, %v5157_v37  ;;  %v2023_v37 = vrot.slane %v4996_v6, 2  ;;  %v3376_v6 = vld [vmem:[%s5810_s1 + $0x80] sm:$0xff] }
  0x71   : > { %3793 = vmatmul.mubr.msk.f32.gmra.mrb[12].mxu1 %vm227_vm0, %v4736_v43  ;;  %4024 = vmatprep.mubr.msk.f32.mxu0 %vm227_vm0, %v1152_v58  ;;  %v2025_v58 = vrot.slane %v5002_v52, 2  ;;  %v2029_v52 = vrot.slane %v4655_v15, 2  ;;  %v5206_v46 = vpack.c.bf16 %v3377_v47, %v3376_v6  ;;  %v2045_v47 = vrot.slane %v4730_v41, 2 }
  0x72   : > { %3795 = vmatprep.mubr.msk.f32.mxu1 %vm227_vm0, %v4757_v49  ;;  %v2024_v44 = vsel %vm2019_vm2, %v2021_v53, %v2023_v37  ;;  %v2038_v53 = vrot.slane %v4673_v22, 2 }
  0x73   : > { %v2028_v15 = vsel %vm2019_vm2, %v2025_v58, %v2027_v60  ;;  %v5219_v1 = vsel %vm2019_vm2, %v2029_v52, %v2030_v51  ;;  %v2047_v60 = vrot.slane %v4733_v42, 2  ;;  %v2048_v52 = vrot.slane %v4736_v43, 2 }
  0x74   : > { %4025 = vmatmul.mubr.msk.f32.gmra.mrb[28].mxu0 %vm227_vm0, %v1154_v11  ;;  %v2026_v11 = vsel %vm2019_vm2, %v2023_v37, %v2025_v58  ;;  %v2039_v37 = vrot.slane %v4692_v29, 2  ;;  %v2043_v58 = vrot.slane %v4708_v35, 2 }
  0x75   : > { %3796 = vmatmul.mubr.msk.f32.gmra.mrb[14].mxu1 %vm227_vm0, %v4760_v50  ;;  %4027 = vmatprep.mubr.msk.f32.mxu0 %vm227_vm0, %v1156_v9  ;;  %v2032_v9 = vrot.slane %v4661_v17, 2 }
  0x76   : > { %3798 = vmatprep.mubr.msk.f32.mxu1 %vm227_vm0, %v4782_v56  ;;  %v5278_v41 = vsel %vm2019_vm2, %v2043_v58, %v2045_v47  ;;  %v2061_v47 = vrot.slane %v4808_v0, 2 }
  0x77   : > { %v5228_v17 = vsel %vm2019_vm2, %v2030_v51, %v2032_v9  ;;  %v2050_v51 = vrot.slane %v4757_v49, 2 }
  0x78   : > { %4028 = vmatmul.mubr.msk.f32.gmra.mrb[30].mxu0 %vm227_vm0, %v1158_v18  ;;  %v2041_v18 = vrot.slane %v4696_v31, 2 }
  0x79   : > { %3799 = vmatmul.mubr.msk.f32.gmra.mrb[16].mxu1 %vm227_vm0, %v4785_v57  ;;  %4034 = vmatprep.mubr.msk.f32.mxu0 %vm227_vm0, %v2022_v45  ;;  %v5251_v45 = vsel %vm2019_vm2, %v2038_v53, %v2039_v37  ;;  %v2056_v53 = vrot.slane %v4782_v56, 2 }
  0x7a   : > { %3801 = vmatprep.mubr.msk.f32.mxu1 %vm227_vm0, %v4805_v63  ;;  %v5261_v6 = vsel %vm2019_vm2, %v2039_v37, %v2041_v18  ;;  %v2057_v37 = vrot.slane %v4785_v57, 2 }
  0x7c   : > { %4035 = vmatmul.mubr.msk.f32.vlgmr.msra.gmra.mrb[0].mxu0 %vm227_vm0, %v2024_v44  ;;  %v5267_v44 = vsel %vm2019_vm2, %v2041_v18, %v2043_v58  ;;  %v2059_v18 = vrot.slane %v4805_v63, 2  ;;  %v5317_v58 = vsel %vm2019_vm2, %v2056_v53, %v2057_v37  ;;  %v2074_v53 = vrot.slane %v4882_v23, 2 }
  0x7d   : > { %4217 = vmatpush3.bf16.msra.mxu0 %v4884_v24  ;;  %3802 = vmatmul.mubr.msk.f32.gmra.mrb[18].mxu1 %vm227_vm0, %v4808_v0  ;;  %v5234_v24 = vsel %vm2019_vm2, %v2032_v9, %v2034_v16  ;;  %v2052_v9 = vrot.slane %v4760_v50, 2  ;;  %v2054_v16 = vrot.slane %v4779_v55, 2 }
  0x7e   : > { %4037 = vmatprep.mubr.msk.f32.mxu0 %vm227_vm0, %v2026_v11  ;;  %3804 = vmatprep.mubr.msk.f32.mxu1 %vm227_vm0, %v4845_v10  ;;  %v5284_v11 = vsel %vm2019_vm2, %v2047_v60, %v2048_v52  ;;  %v5327_v60 = vsel %vm2019_vm2, %v2057_v37, %v2059_v18  ;;  %v2075_v37 = vrot.slane %v4896_v25, 2 }
  0x7f   : > { %4219 = vmatprep.subr.bf16.mxu0 %v5206_v46  ;;  %v5300_v21 = vsel %vm2019_vm2, %v2050_v51, %v2052_v9  ;;  %v5311_v55 = vsel %vm2019_vm2, %v2052_v9, %v2054_v16  ;;  %v2070_v9 = vrot.slane %v4879_v20, 2  ;;  %v2072_v16 = vrot.slane %v4963_v62, 2 }
  0x80   : > { %4038 = vmatmul.mubr.msk.f32.gmra.mrb[2].mxu0 %vm227_vm0, %v2028_v15  ;;  %v5294_v15 = vsel %vm2019_vm2, %v2048_v52, %v2050_v51  ;;  %v2063_v52 = vrot.slane %v4827_v5, 2  ;;  %v2065_v51 = vrot.slane %v4845_v10, 2  ;;  %v2068_v5 = vrot.slane %v4862_v13, 2 }
  0x81   : > { %3805 = vmatmul.mubr.msk.f32.gmra.mrb[20].mxu1 %vm227_vm0, %v4859_v12  ;;  %4040 = vmatprep.mubr.msk.f32.mxu0 %vm227_vm0, %v5219_v1  ;;  %v5385_v62 = vsel %vm2019_vm2, %v2074_v53, %v2075_v37  ;;  %v5908_v53 = vld [vmem:[#allocation15_spill] sm:$0xff] }
  0x82   : > { %3807 = vmatprep.mubr.msk.f32.mxu1 %vm227_vm0, %v4862_v13 }
  0x84   : > { %4041 = vmatmul.mubr.msk.f32.gmra.mrb[4].mxu0 %vm227_vm0, %v5228_v17 }
  0x85   : > { %3808 = vmatmul.mubr.msk.f32.gmra.mrb[22].mxu1 %vm227_vm0, %v4879_v20  ;;  %4043 = vmatprep.mubr.msk.f32.mxu0 %vm227_vm0, %v5234_v24 }
  0x86   : > { %3810 = vmatprep.mubr.msk.f32.mxu1 %vm227_vm0, %v4882_v23 }
  0x88   : > { %4044 = vmatmul.mubr.msk.f32.gmra.mrb[6].mxu0 %vm227_vm0, %v5245_v26 }
  0x89   : > { %3811 = vmatmul.mubr.msk.f32.gmra.mrb[24].mxu1 %vm227_vm0, %v4896_v25  ;;  %4046 = vmatprep.mubr.msk.f32.mxu0 %vm227_vm0, %v5251_v45 }
  0x8a   : > { %3813 = vmatprep.mubr.msk.f32.mxu1 %vm227_vm0, %v4899_v28 }
  0x8c   : > { %4047 = vmatmul.mubr.msk.f32.gmra.mrb[8].mxu0 %vm227_vm0, %v5261_v6 }
  0x8d   : > { %3814 = vmatmul.mubr.msk.f32.gmra.mrb[26].mxu1 %vm227_vm0, %v4911_v30  ;;  %4049 = vmatprep.mubr.msk.f32.mxu0 %vm227_vm0, %v5267_v44 }
  0x8e   : > { %3816 = vmatprep.mubr.msk.f32.mxu1 %vm227_vm0, %v4914_v34 }
  0x90   : > { %4050 = vmatmul.mubr.msk.f32.gmra.mrb[10].mxu0 %vm227_vm0, %v5278_v41 }
  0x91   : > { %3817 = vmatmul.mubr.msk.f32.gmra.mrb[28].mxu1 %vm227_vm0, %v4925_v36  ;;  %4052 = vmatprep.mubr.msk.f32.mxu0 %vm227_vm0, %v5284_v11 }
  0x92   : > { %3819 = vmatprep.mubr.msk.f32.mxu1 %vm227_vm0, %v4928_v38 }
  0x94   : > { %4053 = vmatmul.mubr.msk.f32.gmra.mrb[12].mxu0 %vm227_vm0, %v5294_v15 }
  0x95   : > { %3820 = vmatmul.mubr.msk.f32.gmra.mrb[30].mxu1 %vm227_vm0, %v4939_v40  ;;  %4055 = vmatprep.mubr.msk.f32.mxu0 %vm227_vm0, %v5300_v21 }
  0x96   : > { %3826 = vmatprep.mubr.msk.f32.mxu1 %vm227_vm0, %v4673_v22  ;;  %v5334_v22 = vsel %vm2019_vm2, %v2059_v18, %v2061_v47  ;;  %v2079_v18 = vrot.slane %v4911_v30, 2 }
  0x98   : > { %4056 = vmatmul.mubr.msk.f32.gmra.mrb[14].mxu0 %vm227_vm0, %v5311_v55 }
  0x99   : > { %3827 = vmatmul.mubr.msk.f32.vlgmr.msra.gmra.mrb[0].mxu1 %vm227_vm0, %v4692_v29  ;;  %4058 = vmatprep.mubr.msk.f32.mxu0 %vm227_vm0, %v5317_v58  ;;  %v2066_v29 = vrot.slane %v4859_v12, 2 }
  0x9a   : > { %3829 = vmatprep.mubr.msk.f32.mxu1 %vm227_vm0, %v4696_v31  ;;  %4201 = vmatpush3.bf16.msra.mxu1 %v5029_v19  ;;  %v5346_v31 = vsel %vm2019_vm2, %v2061_v47, %v2063_v52  ;;  %v2081_v47 = vrot.slane %v5027_v39, 2  ;;  %v2083_v52 = vrot.slane %v4914_v34, 2 }
  0x9b   : > { %4222 = vmatprep.subr.bf16.mxu1 %v4626_v7  ;;  %v5352_v19 = vsel %vm2019_vm2, %v2065_v51, %v2066_v29  ;;  %v2084_v51 = vrot.slane %v4925_v36, 2 }
  0x9c   : > { %4059 = vmatmul.mubr.msk.f32.gmra.mrb[16].mxu0 %vm227_vm0, %v5327_v60  ;;  %v5412_v39 = vsel %vm2019_vm2, %v2079_v18, %v2081_v47  ;;  %v5912_v47 = vld [vmem:[#allocation19_spill] sm:$0xff] }
  0x9d   : > { %3830 = vmatmul.mubr.msk.f32.gmra.mrb[2].mxu1 %vm227_vm0, %v4708_v35  ;;  %4061 = vmatprep.mubr.msk.f32.mxu0 %vm227_vm0, %v5334_v22  ;;  %v5362_v35 = vsel %vm2019_vm2, %v2066_v29, %v2068_v5  ;;  %v2088_v29 = vrot.slane %v4939_v40, 2 }
  0x9e   : > { %3832 = vmatprep.mubr.msk.f32.mxu1 %vm227_vm0, %v4733_v42  ;;  %v5368_v42 = vsel %vm2019_vm2, %v2068_v5, %v2070_v9  ;;  %v2090_v5 = vrot.slane %v5083_v4, 2  ;;  %v2097_v4 = vrot.slane %v4981_v14, 2 }
  0xa0   : > { %4062 = vmatmul.mubr.msk.f32.gmra.mrb[18].mxu0 %vm227_vm0, %v5346_v31 }
  0xa1   : > { %3833 = vmatmul.mubr.msk.f32.gmra.mrb[4].mxu1 %vm227_vm0, %v4736_v43  ;;  %4064 = vmatprep.mubr.msk.f32.mxu0 %vm227_vm0, %v5352_v19  ;;  %v5379_v43 = vsel %vm2019_vm2, %v2070_v9, %v2072_v16  ;;  %v5907_v16 = vld [vmem:[#allocation14_spill] sm:$0xff] }
  0xa2   : > { %3835 = vmatprep.mubr.msk.f32.mxu1 %vm227_vm0, %v4757_v49  ;;  %v2077_v49 = vrot.slane %v4899_v28, 2 }
  0xa4   : > { %4065 = vmatmul.mubr.msk.f32.gmra.mrb[20].mxu0 %vm227_vm0, %v5362_v35 }
  0xa5   : > { %3836 = vmatmul.mubr.msk.f32.gmra.mrb[6].mxu1 %vm227_vm0, %v4760_v50  ;;  %4067 = vmatprep.mubr.msk.f32.mxu0 %vm227_vm0, %v5368_v42  ;;  %v5395_v50 = vsel %vm2019_vm2, %v2075_v37, %v2077_v49  ;;  %v5909_v37 = vld [vmem:[#allocation16_spill] sm:$0xff] }
  0xa6   : > { %3838 = vmatprep.mubr.msk.f32.mxu1 %vm227_vm0, %v4782_v56  ;;  %v5401_v56 = vsel %vm2019_vm2, %v2077_v49, %v2079_v18  ;;  %v5910_v49 = vld [vmem:[#allocation17_spill] sm:$0xff]  ;;  %v5911_v18 = vld [vmem:[#allocation18_spill] sm:$0xff] }
  0xa8   : > { %4068 = vmatmul.mubr.msk.f32.gmra.mrb[22].mxu0 %vm227_vm0, %v5379_v43 }
  0xa9   : > { %3839 = vmatmul.mubr.msk.f32.gmra.mrb[8].mxu1 %vm227_vm0, %v4785_v57  ;;  %4070 = vmatprep.mubr.msk.f32.mxu0 %vm227_vm0, %v5385_v62  ;;  %v2086_v57 = vrot.slane %v4928_v38, 2 }
  0xaa   : > { %3841 = vmatprep.mubr.msk.f32.mxu1 %vm227_vm0, %v4805_v63  ;;  %v5418_v63 = vsel %vm2019_vm2, %v2083_v52, %v2084_v51 }
  0xac   : > { %4071 = vmatmul.mubr.msk.f32.gmra.mrb[24].mxu0 %vm227_vm0, %v5395_v50 }
  0xad   : > { %3842 = vmatmul.mubr.msk.f32.gmra.mrb[10].mxu1 %vm227_vm0, %v4808_v0  ;;  %4073 = vmatprep.mubr.msk.f32.mxu0 %vm227_vm0, %v5401_v56  ;;  %v5428_v0 = vsel %vm2019_vm2, %v2084_v51, %v2086_v57 }
  0xae   : > { %3844 = vmatprep.mubr.msk.f32.mxu1 %vm227_vm0, %v4845_v10  ;;  %v5434_v10 = vsel %vm2019_vm2, %v2086_v57, %v2088_v29 }
  0xb0   : > { %4074 = vmatmul.mubr.msk.f32.gmra.mrb[26].mxu0 %vm227_vm0, %v5412_v39 }
  0xb1   : > { %3845 = vmatmul.mubr.msk.f32.gmra.mrb[12].mxu1 %vm227_vm0, %v4859_v12  ;;  %4076 = vmatprep.mubr.msk.f32.mxu0 %vm227_vm0, %v5418_v63  ;;  %v5443_v12 = vsel %vm2019_vm2, %v2088_v29, %v2090_v5 }
  0xb2   : > { %3847 = vmatprep.mubr.msk.f32.mxu1 %vm227_vm0, %v4862_v13  ;;  %v5892_v13 = vld [vmem:[#allocation24_spill] sm:$0xff] }
  0xb4   : > { %4077 = vmatmul.mubr.msk.f32.gmra.mrb[28].mxu0 %vm227_vm0, %v5428_v0 }
  0xb5   : > { %3848 = vmatmul.mubr.msk.f32.gmra.mrb[14].mxu1 %vm227_vm0, %v4879_v20  ;;  %4079 = vmatprep.mubr.msk.f32.mxu0 %vm227_vm0, %v5434_v10  ;;  %v5893_v20 = vld [vmem:[#allocation26_spill] sm:$0xff] }
  0xb6   : > { %3850 = vmatprep.mubr.msk.f32.mxu1 %vm227_vm0, %v4882_v23  ;;  %v5894_v23 = vld [vmem:[#allocation2_spill] sm:$0xff] }
  0xb8   : > { %4080 = vmatmul.mubr.msk.f32.gmra.mrb[30].mxu0 %vm227_vm0, %v5443_v12 }
  0xb9   : > { %3851 = vmatmul.mubr.msk.f32.gmra.mrb[16].mxu1 %vm227_vm0, %v4896_v25  ;;  %4086 = vmatprep.mubr.msk.f32.mxu0 %vm227_vm0, %v5219_v1  ;;  %v5895_v25 = vld [vmem:[#allocation3_spill] sm:$0xff]  ;;  %v5904_v1 = vld [vmem:[#allocation33_spill] sm:$0xff] }
  0xba   : > { %3853 = vmatprep.mubr.msk.f32.mxu1 %vm227_vm0, %v4899_v28  ;;  %v5897_v28 = vld [vmem:[#allocation5_spill] sm:$0xff] }
  0xbc   : > { %4087 = vmatmul.mubr.msk.f32.vlgmr.msra.gmra.mrb[0].mxu0 %vm227_vm0, %v5228_v17  ;;  %v5905_v17 = vld [vmem:[#allocation12_spill] sm:$0xff] }
  0xbd   : > { %4221 = vmatpush3.bf16.msra.mxu0 %v5206_v46  ;;  %3854 = vmatmul.mubr.msk.f32.gmra.mrb[18].mxu1 %vm227_vm0, %v4911_v30  ;;  %v5898_v30 = vld [vmem:[#allocation6_spill] sm:$0xff] }
  0xbe   : > { %4089 = vmatprep.mubr.msk.f32.mxu0 %vm227_vm0, %v5234_v24  ;;  %3856 = vmatprep.mubr.msk.f32.mxu1 %vm227_vm0, %v4914_v34  ;;  %v5899_v34 = vld [vmem:[#allocation7_spill] sm:$0xff]  ;;  %v5902_v46 = vld [vmem:[#allocation10_spill] sm:$0xff] }
  0xc0   : > { %4090 = vmatmul.mubr.msk.f32.gmra.mrb[2].mxu0 %vm227_vm0, %v5245_v26  ;;  %v5906_v26 = vld [vmem:[#allocation13_spill] sm:$0xff] }
  0xc1   : > { %3857 = vmatmul.mubr.msk.f32.gmra.mrb[20].mxu1 %vm227_vm0, %v4925_v36  ;;  %4092 = vmatprep.mubr.msk.f32.mxu0 %vm227_vm0, %v5251_v45  ;;  %v2092_v36 = vrot.slane %v4944_v48, 2 }
  0xc2   : > { %3859 = vmatprep.mubr.msk.f32.mxu1 %vm227_vm0, %v4928_v38  ;;  %v2093_v38 = vrot.slane %v4956_v54, 2 }
  0xc4   : > { %4093 = vmatmul.mubr.msk.f32.gmra.mrb[4].mxu0 %vm227_vm0, %v5261_v6 }
  0xc5   : > { %3860 = vmatmul.mubr.msk.f32.gmra.mrb[22].mxu1 %vm227_vm0, %v4939_v40  ;;  %4095 = vmatprep.mubr.msk.f32.mxu0 %vm227_vm0, %v5267_v44  ;;  %v5900_v40 = vld [vmem:[#allocation8_spill] sm:$0xff] }
  0xc6   : > { %3862 = vmatprep.mubr.msk.f32.mxu1 %vm227_vm0, %v4944_v48  ;;  %v5566_v48 = vsel %vm2019_vm2, %v2092_v36, %v2093_v38 }
  0xc8   : > { %4096 = vmatmul.mubr.msk.f32.gmra.mrb[6].mxu0 %vm227_vm0, %v5278_v41 }
  0xc9   : > { %3863 = vmatmul.mubr.msk.f32.gmra.mrb[24].mxu1 %vm227_vm0, %v4956_v54  ;;  %4098 = vmatprep.mubr.msk.f32.mxu0 %vm227_vm0, %v5284_v11  ;;  %v5903_v54 = vld [vmem:[#allocation11_spill] sm:$0xff] }
  0xca   : > { %3865 = vmatprep.mubr.msk.f32.mxu1 %vm227_vm0, %v4966_v2 }
  0xcc   : > { %4099 = vmatmul.mubr.msk.f32.gmra.mrb[8].mxu0 %vm227_vm0, %v5294_v15 }
  0xcd   : > { %3866 = vmatmul.mubr.msk.f32.gmra.mrb[26].mxu1 %vm227_vm0, %v4981_v14  ;;  %4101 = vmatprep.mubr.msk.f32.mxu0 %vm227_vm0, %v5300_v21  ;;  %v2099_v14 = vrot.slane %v5904_v1, 2 }
  0xce   : > { %3868 = vmatprep.mubr.msk.f32.mxu1 %vm227_vm0, %v5122_v33 }
  0xcf   : > { %v5587_v9 = vsel %vm2019_vm2, %v2097_v4, %v2099_v14 }
  0xd0   : > { %4102 = vmatmul.mubr.msk.f32.gmra.mrb[10].mxu0 %vm227_vm0, %v5311_v55 }
  0xd1   : > { %3869 = vmatmul.mubr.msk.f32.gmra.mrb[28].mxu1 %vm227_vm0, %v5125_v32  ;;  %4104 = vmatprep.mubr.msk.f32.mxu0 %vm227_vm0, %v5317_v58 }
  0xd2   : > { %3871 = vmatprep.mubr.msk.f32.mxu1 %vm227_vm0, %v5145_v27 }
  0xd4   : > { %4105 = vmatmul.mubr.msk.f32.gmra.mrb[12].mxu0 %vm227_vm0, %v5327_v60 }
  0xd5   : > { %3872 = vmatmul.mubr.msk.f32.gmra.mrb[30].mxu1 %vm227_vm0, %v5148_v3  ;;  %4107 = vmatprep.mubr.msk.f32.mxu0 %vm227_vm0, %v5334_v22 }
  0xd6   : > { %3878 = vmatprep.mubr.msk.f32.mxu1 %vm227_vm0, %v5032_v61  ;;  %v2095_v61 = vrot.slane %v4966_v2, 2 }
  0xd8   : > { %4108 = vmatmul.mubr.msk.f32.gmra.mrb[14].mxu0 %vm227_vm0, %v5346_v31  ;;  %v5575_v2 = vsel %vm2019_vm2, %v2093_v38, %v2095_v61  ;;  %v2098_v24 = vsel %vm2019_vm2, %v2095_v61, %v2097_v4 }
  0xd9   : > { %3879 = vmatmul.mubr.msk.f32.vlgmr.msra.gmra.mrb[0].mxu1 %vm227_vm0, %v5037_v8  ;;  %4110 = vmatprep.mubr.msk.f32.mxu0 %vm227_vm0, %v5352_v19  ;;  %v5901_v8 = vld [vmem:[#allocation9_spill] sm:$0xff] }
  0xda   : > { %3881 = vmatprep.mubr.msk.f32.mxu1 %vm227_vm0, %v5892_v13  ;;  %4223 = vmatpush3.bf16.msra.mxu1 %v4626_v7  ;;  %v5896_v7 = vld [vmem:[#allocation4_spill] sm:$0xff] }
  0xdc   : > { %4111 = vmatmul.mubr.msk.f32.gmra.mrb[16].mxu0 %vm227_vm0, %v5362_v35 }
  0xdd   : > { %3882 = vmatmul.mubr.msk.f32.gmra.mrb[2].mxu1 %vm227_vm0, %v5893_v20  ;;  %4113 = vmatprep.mubr.msk.f32.mxu0 %vm227_vm0, %v5368_v42 }
  0xde   : > { %3884 = vmatprep.mubr.msk.f32.mxu1 %vm227_vm0, %v5894_v23 }
  0xe0   : > { %4114 = vmatmul.mubr.msk.f32.gmra.mrb[18].mxu0 %vm227_vm0, %v5379_v43 }
  0xe1   : > { %3885 = vmatmul.mubr.msk.f32.gmra.mrb[4].mxu1 %vm227_vm0, %v5895_v25  ;;  %4116 = vmatprep.mubr.msk.f32.mxu0 %vm227_vm0, %v5385_v62 }
  0xe2   : > { %3887 = vmatprep.mubr.msk.f32.mxu1 %vm227_vm0, %v5896_v7 }
  0xe4   : > { %4117 = vmatmul.mubr.msk.f32.gmra.mrb[20].mxu0 %vm227_vm0, %v5395_v50 }
  0xe5   : > { %3888 = vmatmul.mubr.msk.f32.gmra.mrb[6].mxu1 %vm227_vm0, %v5897_v28  ;;  %4119 = vmatprep.mubr.msk.f32.mxu0 %vm227_vm0, %v5401_v56 }
  0xe6   : > { %3890 = vmatprep.mubr.msk.f32.mxu1 %vm227_vm0, %v5898_v30 }
  0xe8   : > { %4120 = vmatmul.mubr.msk.f32.gmra.mrb[22].mxu0 %vm227_vm0, %v5412_v39 }
  0xe9   : > { %3891 = vmatmul.mubr.msk.f32.gmra.mrb[8].mxu1 %vm227_vm0, %v5899_v34  ;;  %4122 = vmatprep.mubr.msk.f32.mxu0 %vm227_vm0, %v5418_v63 }
  0xea   : > { %3893 = vmatprep.mubr.msk.f32.mxu1 %vm227_vm0, %v5900_v40 }
  0xec   : > { %4123 = vmatmul.mubr.msk.f32.gmra.mrb[24].mxu0 %vm227_vm0, %v5428_v0 }
  0xed   : > { %3894 = vmatmul.mubr.msk.f32.gmra.mrb[10].mxu1 %vm227_vm0, %v5901_v8  ;;  %4125 = vmatprep.mubr.msk.f32.mxu0 %vm227_vm0, %v5434_v10 }
  0xee   : > { %3896 = vmatprep.mubr.msk.f32.mxu1 %vm227_vm0, %v5902_v46 }
  0xf0   : > { %4126 = vmatmul.mubr.msk.f32.gmra.mrb[26].mxu0 %vm227_vm0, %v5443_v12 }
  0xf1   : > { %3897 = vmatmul.mubr.msk.f32.gmra.mrb[12].mxu1 %vm227_vm0, %v5903_v54  ;;  %4128 = vmatprep.mubr.msk.f32.mxu0 %vm227_vm0, %v5566_v48 }
  0xf2   : > { %3899 = vmatprep.mubr.msk.f32.mxu1 %vm227_vm0, %v5905_v17 }
  0xf4   : > { %4129 = vmatmul.mubr.msk.f32.gmra.mrb[28].mxu0 %vm227_vm0, %v5575_v2 }
  0xf5   : > { %3900 = vmatmul.mubr.msk.f32.gmra.mrb[14].mxu1 %vm227_vm0, %v5906_v26  ;;  %4131 = vmatprep.mubr.msk.f32.mxu0 %vm227_vm0, %v2098_v24 }
  0xf6   : > { %3902 = vmatprep.mubr.msk.f32.mxu1 %vm227_vm0, %v5907_v16 }
  0xf8   : > { %4132 = vmatmul.mubr.msk.f32.gmra.mrb[30].mxu0 %vm227_vm0, %v5587_v9 }
  0xf9   : > { %3903 = vmatmul.mubr.msk.f32.gmra.mrb[16].mxu1 %vm227_vm0, %v5908_v53  ;;  %4138 = vmatprep.mubr.msk.f32.mxu0 %vm227_vm0, %v5251_v45  ;;  %v5913_v45 = vld [vmem:[#allocation20_spill] sm:$0xff] }
  0xfa   : > { %3905 = vmatprep.mubr.msk.f32.mxu1 %vm227_vm0, %v5909_v37 }
  0xfc   : > { %4139 = vmatmul.mubr.msk.f32.vlgmr.msra.gmra.mrb[0].mxu0 %vm227_vm0, %v5261_v6  ;;  %v5914_v6 = vld [vmem:[#allocation21_spill] sm:$0xff] }
  0xfd   : > { %3906 = vmatmul.mubr.msk.f32.gmra.mrb[18].mxu1 %vm227_vm0, %v5910_v49  ;;  %4141 = vmatprep.mubr.msk.f32.mxu0 %vm227_vm0, %v5267_v44  ;;  %v5915_v44 = vld [vmem:[#allocation22_spill] sm:$0xff] }
  0xfe   : > { %3908 = vmatprep.mubr.msk.f32.mxu1 %vm227_vm0, %v5911_v18 }
 0x100   : > { %4142 = vmatmul.mubr.msk.f32.gmra.mrb[2].mxu0 %vm227_vm0, %v5278_v41  ;;  %v5916_v41 = vld [vmem:[#allocation23_spill] sm:$0xff] }
 0x101   : > { %3909 = vmatmul.mubr.msk.f32.gmra.mrb[20].mxu1 %vm227_vm0, %v5912_v47  ;;  %4144 = vmatprep.mubr.msk.f32.mxu0 %vm227_vm0, %v5284_v11  ;;  %v5917_v11 = vld [vmem:[#allocation25_spill] sm:$0xff] }
 0x102   : > { %3911 = vmatprep.mubr.msk.f32.mxu1 %vm227_vm0, %v5913_v45 }
 0x104   : > { %4145 = vmatmul.mubr.msk.f32.gmra.mrb[4].mxu0 %vm227_vm0, %v5294_v15  ;;  %v5918_v15 = vld [vmem:[#allocation27_spill] sm:$0xff] }
 0x105   : > { %3912 = vmatmul.mubr.msk.f32.gmra.mrb[22].mxu1 %vm227_vm0, %v5914_v6  ;;  %4147 = vmatprep.mubr.msk.f32.mxu0 %vm227_vm0, %v5300_v21  ;;  %v5919_v21 = vld [vmem:[#allocation28_spill] sm:$0xff] }
 0x106   : > { %3914 = vmatprep.mubr.msk.f32.mxu1 %vm227_vm0, %v5915_v44 }
 0x108   : > { %4148 = vmatmul.mubr.msk.f32.gmra.mrb[6].mxu0 %vm227_vm0, %v5311_v55  ;;  %v5920_v55 = vld [vmem:[#allocation29_spill] sm:$0xff] }
 0x109   : > { %3915 = vmatmul.mubr.msk.f32.gmra.mrb[24].mxu1 %vm227_vm0, %v5916_v41  ;;  %4150 = vmatprep.mubr.msk.f32.mxu0 %vm227_vm0, %v5317_v58  ;;  %v5921_v58 = vld [vmem:[#allocation30_spill] sm:$0xff] }
 0x10a   : > { %3917 = vmatprep.mubr.msk.f32.mxu1 %vm227_vm0, %v5917_v11 }
 0x10c   : > { %4151 = vmatmul.mubr.msk.f32.gmra.mrb[8].mxu0 %vm227_vm0, %v5327_v60  ;;  %v5922_v60 = vld [vmem:[#allocation31_spill] sm:$0xff] }
 0x10d   : > { %3918 = vmatmul.mubr.msk.f32.gmra.mrb[26].mxu1 %vm227_vm0, %v5918_v15  ;;  %4153 = vmatprep.mubr.msk.f32.mxu0 %vm227_vm0, %v5334_v22  ;;  %v2101_v22 = vrot.slane %v5122_v33, 2 }
 0x10e   : > { %3920 = vmatprep.mubr.msk.f32.mxu1 %vm227_vm0, %v5919_v21 }
 0x110   : > { %4154 = vmatmul.mubr.msk.f32.gmra.mrb[10].mxu0 %vm227_vm0, %v5346_v31  ;;  %v2102_v31 = vrot.slane %v5125_v32, 2  ;;  %v5924_v32 = vld [vmem:[#allocation34_spill] sm:$0xff] }
 0x111   : > { %3921 = vmatmul.mubr.msk.f32.gmra.mrb[28].mxu1 %vm227_vm0, %v5920_v55  ;;  %4156 = vmatprep.mubr.msk.f32.mxu0 %vm227_vm0, %v5352_v19  ;;  %v2104_v19 = vrot.slane %v5145_v27, 2  ;;  %v5925_v27 = vld [vmem:[#allocation35_spill] sm:$0xff] }
 0x112   : > { %3923 = vmatprep.mubr.msk.f32.mxu1 %vm227_vm0, %v5921_v58 }
 0x113   : > { %v2105_v33 = vsel %vm2019_vm2, %v2102_v31, %v2104_v19 }
 0x114   : > { %4157 = vmatmul.mubr.msk.f32.gmra.mrb[12].mxu0 %vm227_vm0, %v5362_v35  ;;  %v5923_v35 = vld [vmem:[#allocation32_spill] sm:$0xff] }
 0x115   : > { %3924 = vmatmul.mubr.msk.f32.gmra.mrb[30].mxu1 %vm227_vm0, %v5922_v60  ;;  %4159 = vmatprep.mubr.msk.f32.mxu0 %vm227_vm0, %v5368_v42  ;;  %v2103_v42 = vsel %vm2019_vm2, %v2101_v22, %v2102_v31 }
 0x116   : > { %3954 = vmatprep.mubr.msk.f32.mxu1 %vm227_vm0, %v5911_v18 }
 0x118   : > { %4160 = vmatmul.mubr.msk.f32.gmra.mrb[14].mxu0 %vm227_vm0, %v5379_v43  ;;  %v2106_v43 = vrot.slane %v5148_v3, 2  ;;  %v5926_v3 = vld [vmem:[#allocation36_spill] sm:$0xff] }
 0x119   : > { %3955 = vmatmul.mubr.msk.f32.vlgmr.msra.gmra.mrb[16].mxu1 %vm227_vm0, %v5912_v47  ;;  %4162 = vmatprep.mubr.msk.f32.mxu0 %vm227_vm0, %v5385_v62  ;;  %v2108_v62 = vrot.slane %v5165_v59, 2 }
 0x11a   : > { %3957 = vmatprep.mubr.msk.f32.mxu1 %vm227_vm0, %v5913_v45 }
 0x11c   : > { %4163 = vmatmul.mubr.msk.f32.gmra.mrb[16].mxu0 %vm227_vm0, %v5395_v50  ;;  %v2107_v50 = vsel %vm2019_vm2, %v2104_v19, %v2106_v43 }
 0x11d   : > { %3958 = vmatmul.mubr.msk.f32.gmra.mrb[18].mxu1 %vm227_vm0, %v5914_v6  ;;  %4165 = vmatprep.mubr.msk.f32.mxu0 %vm227_vm0, %v5401_v56  ;;  %v2109_v56 = vsel %vm2019_vm2, %v2106_v43, %v2108_v62 }
 0x11e   : > { %3960 = vmatprep.mubr.msk.f32.mxu1 %vm227_vm0, %v5915_v44 }
 0x120   : > { %4166 = vmatmul.mubr.msk.f32.gmra.mrb[18].mxu0 %vm227_vm0, %v5412_v39 }
 0x121   : > { %3961 = vmatmul.mubr.msk.f32.gmra.mrb[20].mxu1 %vm227_vm0, %v5916_v41  ;;  %4168 = vmatprep.mubr.msk.f32.mxu0 %vm227_vm0, %v5418_v63 }
 0x122   : > { %3963 = vmatprep.mubr.msk.f32.mxu1 %vm227_vm0, %v5917_v11 }
 0x124   : > { %4169 = vmatmul.mubr.msk.f32.gmra.mrb[20].mxu0 %vm227_vm0, %v5428_v0 }
 0x125   : > { %3964 = vmatmul.mubr.msk.f32.gmra.mrb[22].mxu1 %vm227_vm0, %v5918_v15  ;;  %4171 = vmatprep.mubr.msk.f32.mxu0 %vm227_vm0, %v5434_v10 }
 0x126   : > { %3966 = vmatprep.mubr.msk.f32.mxu1 %vm227_vm0, %v5919_v21 }
 0x128   : > { %4172 = vmatmul.mubr.msk.f32.gmra.mrb[22].mxu0 %vm227_vm0, %v5443_v12 }
 0x129   : > { %3967 = vmatmul.mubr.msk.f32.gmra.mrb[24].mxu1 %vm227_vm0, %v5920_v55  ;;  %4174 = vmatprep.mubr.msk.f32.mxu0 %vm227_vm0, %v5566_v48 }
 0x12a   : > { %3969 = vmatprep.mubr.msk.f32.mxu1 %vm227_vm0, %v5921_v58 }
 0x12c   : > { %4175 = vmatmul.mubr.msk.f32.gmra.mrb[24].mxu0 %vm227_vm0, %v5575_v2 }
 0x12d   : > { %3970 = vmatmul.mubr.msk.f32.gmra.mrb[26].mxu1 %vm227_vm0, %v5922_v60  ;;  %4177 = vmatprep.mubr.msk.f32.mxu0 %vm227_vm0, %v2098_v24 }
 0x12e   : > { %3972 = vmatprep.mubr.msk.f32.mxu1 %vm227_vm0, %v5923_v35 }
 0x130   : > { %4178 = vmatmul.mubr.msk.f32.gmra.mrb[26].mxu0 %vm227_vm0, %v5587_v9 }
 0x131   : > { %3973 = vmatmul.mubr.msk.f32.gmra.mrb[28].mxu1 %vm227_vm0, %v5924_v32  ;;  %4180 = vmatprep.mubr.msk.f32.mxu0 %vm227_vm0, %v2103_v42 }
 0x132   : > { %3975 = vmatprep.mubr.msk.f32.mxu1 %vm227_vm0, %v5925_v27 }
 0x134   : > { %4181 = vmatmul.mubr.msk.f32.gmra.mrb[28].mxu0 %vm227_vm0, %v2105_v33 }
 0x135   : > { %3976 = vmatmul.mubr.msk.f32.gmra.mrb[30].mxu1 %vm227_vm0, %v5926_v3  ;;  %4183 = vmatprep.mubr.msk.f32.mxu0 %vm227_vm0, %v2107_v50 }
 0x138   : > { %4184 = vmatmul.mubr.msk.f32.gmra.mrb[30].mxu0 %vm227_vm0, %v2109_v56 }
 0x1ac   : > { %v3880_v52 = vpop.f32.mrb[0].mxu1 }
 0x1ad   : > { %v1292_v51 = vpop.f32.mrb[1].mxu1 }
 0x1b0   : > { %v3883_v59 = vpop.f32.mrb[2].mxu1 }
 0x1b1   : > { %v1302_v39 = vpop.f32.mrb[3].mxu1 }
 0x1b4   : > { %v3886_v57 = vpop.f32.mrb[4].mxu1 }
 0x1b5   : > { %v1312_v63 = vpop.f32.mrb[5].mxu1 }
 0x1b8   : > { %v3889_v29 = vpop.f32.mrb[6].mxu1 }
 0x1b9   : > { %v1322_v0 = vpop.f32.mrb[7].mxu1 }
 0x1bc   : > { %v3892_v5 = vpop.f32.mrb[8].mxu1 }
 0x1bd   : > { %v1332_v10 = vpop.f32.mrb[9].mxu1 }
 0x1c0   : > { %v3895_v12 = vpop.f32.mrb[10].mxu1 }
 0x1c1   : > { %v1342_v13 = vpop.f32.mrb[11].mxu1 }
 0x1c4   : > { %v3898_v20 = vpop.f32.mrb[12].mxu1 }
 0x1c5   : > { %v1352_v23 = vpop.f32.mrb[13].mxu1 }
 0x1c8   : > { %v3901_v25 = vpop.f32.mrb[14].mxu1 }
 0x1c9   : > { %v1362_v7 = vpop.f32.mrb[15].mxu1 }
 0x1cf   : > { %v4140_v28 = vpop.f32.mrb[0].mxu0 }
 0x1d0   : > { %v4224_v30 = vadd.f32 %v4140_v28, %v3880_v52  ;;  %v2779_v34 = vpop.f32.mrb[1].mxu0 }
 0x1d1   : > { %v4225_v36 = vadd.f32 %v2779_v34, %v1292_v51 }
 0x1d2   : > { %2971 = vst.msk [vmem:[%s5728_s23 + $0x8] sm:$0xff] %vm227_vm0, %v4224_v30 }
 0x1d3   : > { %2970 = vst.msk [vmem:[%s5728_s23] sm:$0xff] %vm227_vm0, %v4225_v36  ;;  %v4143_v38 = vpop.f32.mrb[2].mxu0 }
 0x1d4   : > { %v4226_v40 = vadd.f32 %v4143_v38, %v3883_v59  ;;  %v2789_v61 = vpop.f32.mrb[3].mxu0 }
 0x1d5   : > { %v4227_v8 = vadd.f32 %v2789_v61, %v1302_v39 }
 0x1d6   : > { %2973 = vst.msk [vmem:[%s5728_s23 + $0x18] sm:$0xff] %vm227_vm0, %v4226_v40 }
 0x1d7   : > { %2972 = vst.msk [vmem:[%s5728_s23 + $0x10] sm:$0xff] %vm227_vm0, %v4227_v8  ;;  %v4146_v4 = vpop.f32.mrb[4].mxu0 }
 0x1d8   : > { %v4228_v46 = vadd.f32 %v4146_v4, %v3886_v57  ;;  %v2799_v48 = vpop.f32.mrb[5].mxu0 }
 0x1d9   : > { %v4229_v54 = vadd.f32 %v2799_v48, %v1312_v63 }
 0x1da   : > { %2975 = vst.msk [vmem:[%s5728_s23 + $0x28] sm:$0xff] %vm227_vm0, %v4228_v46 }
 0x1db   : > { %2974 = vst.msk [vmem:[%s5728_s23 + $0x20] sm:$0xff] %vm227_vm0, %v4229_v54  ;;  %v4149_v2 = vpop.f32.mrb[6].mxu0 }
 0x1dc   : > { %v4230_v1 = vadd.f32 %v4149_v2, %v3889_v29  ;;  %v2809_v14 = vpop.f32.mrb[7].mxu0 }
 0x1dd   : > { %v4231_v17 = vadd.f32 %v2809_v14, %v1322_v0 }
 0x1de   : > { %2977 = vst.msk [vmem:[%s5728_s23 + $0x38] sm:$0xff] %vm227_vm0, %v4230_v1 }
 0x1df   : > { %2976 = vst.msk [vmem:[%s5728_s23 + $0x30] sm:$0xff] %vm227_vm0, %v4231_v17  ;;  %v4152_v24 = vpop.f32.mrb[8].mxu0 }
 0x1e0   : > { %v4232_v26 = vadd.f32 %v4152_v24, %v3892_v5  ;;  %v2819_v9 = vpop.f32.mrb[9].mxu0 }
 0x1e1   : > { %v4233_v16 = vadd.f32 %v2819_v9, %v1332_v10 }
 0x1e2   : > { %2979 = vst.msk [vmem:[%s5728_s23 + $0x48] sm:$0xff] %vm227_vm0, %v4232_v26 }
 0x1e3   : > { %2978 = vst.msk [vmem:[%s5728_s23 + $0x40] sm:$0xff] %vm227_vm0, %v4233_v16  ;;  %v4155_v53 = vpop.f32.mrb[10].mxu0 }
 0x1e4   : > { %v4234_v37 = vadd.f32 %v4155_v53, %v3895_v12  ;;  %v2829_v49 = vpop.f32.mrb[11].mxu0 }
 0x1e5   : > { %v4235_v18 = vadd.f32 %v2829_v49, %v1342_v13 }
 0x1e6   : > { %2981 = vst.msk [vmem:[%s5728_s23 + $0x58] sm:$0xff] %vm227_vm0, %v4234_v37 }
 0x1e7   : > { %2980 = vst.msk [vmem:[%s5728_s23 + $0x50] sm:$0xff] %vm227_vm0, %v4235_v18  ;;  %v4158_v47 = vpop.f32.mrb[12].mxu0 }
 0x1e8   : > { %v4236_v45 = vadd.f32 %v4158_v47, %v3898_v20  ;;  %v2839_v6 = vpop.f32.mrb[13].mxu0 }
 0x1e9   : > { %v4237_v44 = vadd.f32 %v2839_v6, %v1352_v23 }
 0x1ea   : > { %2983 = vst.msk [vmem:[%s5728_s23 + $0x68] sm:$0xff] %vm227_vm0, %v4236_v45 }
 0x1eb   : > { %2982 = vst.msk [vmem:[%s5728_s23 + $0x60] sm:$0xff] %vm227_vm0, %v4237_v44  ;;  %v4161_v41 = vpop.f32.mrb[14].mxu0 }
 0x1ec   : > { %v4238_v11 = vadd.f32 %v4161_v41, %v3901_v25  ;;  %v3956_v15 = vpop.f32.mrb[16].mxu1  ;;  %v2849_v21 = vpop.f32.mrb[15].mxu0 }
 0x1ed   : > { %v4239_v55 = vadd.f32 %v2849_v21, %v1362_v7  ;;  %v1640_v58 = vpop.f32.mrb[17].mxu1 }
 0x1ee   : > { %2985 = vst.msk [vmem:[%s5728_s23 + $0x78] sm:$0xff] %vm227_vm0, %v4238_v11 }
 0x1ef   : > { %2984 = vst.msk [vmem:[%s5728_s23 + $0x70] sm:$0xff] %vm227_vm0, %v4239_v55  ;;  %v4164_v60 = vpop.f32.mrb[16].mxu0 }
 0x1f0   : > { %v4240_v22 = vadd.f32 %v4164_v60, %v3956_v15  ;;  %v3959_v31 = vpop.f32.mrb[18].mxu1  ;;  %v2859_v19 = vpop.f32.mrb[17].mxu0 }
 0x1f1   : > { %v4241_v35 = vadd.f32 %v2859_v19, %v1640_v58  ;;  %v1650_v42 = vpop.f32.mrb[19].mxu1 }
 0x1f2   : > { %2987 = vst.msk [vmem:[%s5728_s23 + $0x88] sm:$0xff] %vm227_vm0, %v4240_v22 }
 0x1f3   : > { %2986 = vst.msk [vmem:[%s5728_s23 + $0x80] sm:$0xff] %vm227_vm0, %v4241_v35  ;;  %v4167_v43 = vpop.f32.mrb[18].mxu0 }
 0x1f4   : > { %v4242_v32 = vadd.f32 %v4167_v43, %v3959_v31  ;;  %v3962_v33 = vpop.f32.mrb[20].mxu1  ;;  %v2869_v62 = vpop.f32.mrb[19].mxu0 }
 0x1f5   : > { %v4243_v27 = vadd.f32 %v2869_v62, %v1650_v42  ;;  %v1660_v50 = vpop.f32.mrb[21].mxu1 }
 0x1f6   : > { %2989 = vst.msk [vmem:[%s5728_s23 + $0x98] sm:$0xff] %vm227_vm0, %v4242_v32 }
 0x1f7   : > { %2988 = vst.msk [vmem:[%s5728_s23 + $0x90] sm:$0xff] %vm227_vm0, %v4243_v27  ;;  %v4170_v3 = vpop.f32.mrb[20].mxu0 }
 0x1f8   : > { %v4244_v56 = vadd.f32 %v4170_v3, %v3962_v33  ;;  %v3965_v52 = vpop.f32.mrb[22].mxu1  ;;  %v2879_v51 = vpop.f32.mrb[21].mxu0 }
 0x1f9   : > { %v4245_v59 = vadd.f32 %v2879_v51, %v1660_v50  ;;  %v1670_v39 = vpop.f32.mrb[23].mxu1 }
 0x1fa   : > { %2991 = vst.msk [vmem:[%s5728_s23 + $0xa8] sm:$0xff] %vm227_vm0, %v4244_v56 }
 0x1fb   : > { %2990 = vst.msk [vmem:[%s5728_s23 + $0xa0] sm:$0xff] %vm227_vm0, %v4245_v59  ;;  %v4173_v57 = vpop.f32.mrb[22].mxu0 }
 0x1fc   : > { %v4246_v63 = vadd.f32 %v4173_v57, %v3965_v52  ;;  %v3968_v29 = vpop.f32.mrb[24].mxu1  ;;  %v2889_v0 = vpop.f32.mrb[23].mxu0 }
 0x1fd   : > { %v4247_v5 = vadd.f32 %v2889_v0, %v1670_v39  ;;  %v1680_v10 = vpop.f32.mrb[25].mxu1 }
 0x1fe   : > { %2993 = vst.msk [vmem:[%s5728_s23 + $0xb8] sm:$0xff] %vm227_vm0, %v4246_v63 }
 0x1ff   : > { %2992 = vst.msk [vmem:[%s5728_s23 + $0xb0] sm:$0xff] %vm227_vm0, %v4247_v5  ;;  %v4176_v12 = vpop.f32.mrb[24].mxu0 }
 0x200   : > { %v4248_v13 = vadd.f32 %v4176_v12, %v3968_v29  ;;  %v3971_v20 = vpop.f32.mrb[26].mxu1  ;;  %v2899_v23 = vpop.f32.mrb[25].mxu0 }
 0x201   : > { %v4249_v25 = vadd.f32 %v2899_v23, %v1680_v10  ;;  %v1690_v7 = vpop.f32.mrb[27].mxu1 }
 0x202   : > { %2995 = vst.msk [vmem:[%s5728_s23 + $0xc8] sm:$0xff] %vm227_vm0, %v4248_v13 }
 0x203   : > { %2994 = vst.msk [vmem:[%s5728_s23 + $0xc0] sm:$0xff] %vm227_vm0, %v4249_v25  ;;  %v4179_v28 = vpop.f32.mrb[26].mxu0 }
 0x204   : > { %v4250_v30 = vadd.f32 %v4179_v28, %v3971_v20  ;;  %v3974_v34 = vpop.f32.mrb[28].mxu1  ;;  %v2909_v36 = vpop.f32.mrb[27].mxu0 }
 0x205   : > { %v4251_v38 = vadd.f32 %v2909_v36, %v1690_v7  ;;  %v1700_v40 = vpop.f32.mrb[29].mxu1 }
 0x206   : > { %2997 = vst.msk [vmem:[%s5728_s23 + $0xd8] sm:$0xff] %vm227_vm0, %v4250_v30 }
 0x207   : > { %2996 = vst.msk [vmem:[%s5728_s23 + $0xd0] sm:$0xff] %vm227_vm0, %v4251_v38  ;;  %v4182_v61 = vpop.f32.mrb[28].mxu0 }
 0x208   : > { %v4252_v8 = vadd.f32 %v4182_v61, %v3974_v34  ;;  %v3977_v4 = vpop.f32.mrb[30].mxu1  ;;  %v2919_v46 = vpop.f32.mrb[29].mxu0 }
 0x209   : > { %v4253_v48 = vadd.f32 %v2919_v46, %v1700_v40  ;;  %v1710_v54 = vpop.f32.mrb[31].mxu1 }
 0x20a   : > { %2999 = vst.msk [vmem:[%s5728_s23 + $0xe8] sm:$0xff] %vm227_vm0, %v4252_v8 }
 0x20b   : > { %2998 = vst.msk [vmem:[%s5728_s23 + $0xe0] sm:$0xff] %vm227_vm0, %v4253_v48  ;;  %v4185_v2 = vpop.f32.mrb[30].mxu0 }
 0x20c   : > { %v4254_v1 = vadd.f32 %v4185_v2, %v3977_v4  ;;  %v2929_v14 = vpop.f32.mrb[31].mxu0 }
 0x20d   : > { %v4255_v17 = vadd.f32 %v2929_v14, %v1710_v54 }
 0x20e   : > { %3001 = vst.msk [vmem:[%s5728_s23 + $0xf8] sm:$0xff] %vm227_vm0, %v4254_v1 }
 0x20f   : > { %3000 = vst.msk [vmem:[%s5728_s23 + $0xf0] sm:$0xff] %vm227_vm0, %v4255_v17 }
 0x210 PF: > { %s12_s13 = sadd.s32 1, %s4559_s13   ;;  %s5927_s9 = smov %s4551_s11 }
 0x211   : > { %p9_p7 = scmp.ge.s32.totalorder %s12_s13, 10   ;;  %s5928_s10 = smov %s4555_s12 }
 0x212   : > { %s5929_s11 = smov %s5932_s14  ;;  %s5930_s12 = smov %s5936_s15 }
 0x213   :  { %11 = sbr.rel (!%p9_p7) target bundleno = 3 (0x3), region = 67 }

// kernel: aligned_bottleneck_pallas.9
= control target key start
LH: loop header
LB: loop body
LE: loop exit
PB: predicated region body
PF: predicated region fallthrough
CT: control target
= control target key end

     0   :  { %s4361_s0 = inlined_call_operand.vmem [shape: f32[2048,16], index: 0, kind: input, shape index: {}]   ;;  %s4362_s1 = inlined_call_operand.vmem [shape: f32[2048,8], index: 1, kind: input, shape index: {}]   ;;  %s4363_s2 = inlined_call_operand.vmem [shape: f32[2048,64], index: 2, kind: input, shape index: {}]   ;;  %s4364_s3 = inlined_call_operand.vmem [shape: f32[1,16], index: 3, kind: input, shape index: {}]   ;;  %s4365_s4 = inlined_call_operand.vmem [shape: f32[1,16], index: 4, kind: input, shape index: {}]   ;;  %s4366_s5 = inlined_call_operand.vmem [shape: f32[1,8], index: 5, kind: input, shape index: {}]   ;;  %s4367_s6 = inlined_call_operand.vmem [shape: f32[1,8], index: 6, kind: input, shape index: {}]   ;;  %s4368_s7 = inlined_call_operand.vmem [shape: f32[16,64], index: 7, kind: input, shape index: {}]   ;;  %s4369_s8 = inlined_call_operand.vmem [shape: f32[8,64], index: 8, kind: input, shape index: {}]   ;;  %s4370_s9 = inlined_call_operand.vmem [shape: f32[1,64], index: 9, kind: input, shape index: {}]   ;;  %s4371_s10 = inlined_call_operand.vmem [shape: f32[1,64], index: 10, kind: input, shape index: {}]   ;;  %s4372_s11 = inlined_call_operand.hbm [shape: f32[2048,64], index: 11, kind: output, shape index: {}]  }
   0x1   :  { %4373 = sst [smem:[#allocation5_spill]] %s4368_s7 }
   0x2   :  { %16 = vsyncpa [#allocation3], 0 }
   0x3   :  { %18 = vsyncpa [#allocation3 + $0x1], 0  ;;  %s3352_s17 = smov 0   ;;  %s3354_s18 = smov 0  }
   0x4   :  { %s3356_s19 = smov 0   ;;  %s3358_s20 = smov 0  }
   0x5 LB: > { %s3373_s21 = sadd.s32 4294967295, %s3287_s20   ;;  %s2630_s22 = sadd.s32 4294967294, %s3287_s20   ;;  %s3287_s20 = sphi %s3358_s20, %s4380_s20   ;;  %s3283_s19 = sphi %s3356_s19, %s4379_s19   ;;  %s3279_s18 = sphi %s3354_s18, %s4378_s18   ;;  %s3275_s17 = sphi %s3352_s17, %s4377_s17  }
   0x6   : > { %s3377_s23 = sadd.s32 1, %s3287_s20   ;;  %s277_s24 = sadd.s32 1, %s3283_s19 }
   0x7   : > { %s274_s25 = ssub.s32 %s3287_s20, %s3377_s23  ;;  %p287_p0 = scmp.ne.s32.totalorder %s3283_s19, %s3279_s18 }
   0x8   : > { %p275_p1 = scmp.eq.s32.totalorder %s274_s25, 0  ;;  %p288_p2 = scmp.eq.s32.totalorder %s3373_s21, 3 }
   0x9   : > { %p293_p3 = scmp.ne.s32.totalorder %s3279_s18, %s3275_s17  ;;  %p294_p4 = scmp.eq.s32.totalorder %s2630_s22, 3 }
   0xa   : > { %s3388_s26 = scalar_select %p275_p1, %s3283_s19, %s277_s24  }
   0xb   : > { %p3390_p5 = por %p288_p2, %p287_p0  ;;  %p3394_p6 = por %p294_p4, %p293_p3 }
   0xc   : > { %p2633_p7 = scmp.ge.s32.totalorder %s3287_s20, 1  ;;  %p363_p8 = scmp.lt.s32.totalorder %s3287_s20, 5 }
   0xe   : > { %p364_p9 = pnand %p2633_p7, %p363_p8 }
   0xf   : > { %s4376_s7 = sld [smem:[#allocation5_spill]] (!%p364_p9)  ;;  %v974_v2 = vld [vmem:[%s4369_s8] sm:$0xff] (!%p364_p9)  ;;  %s2635_s16 = sshll.u32 (!%p364_p9), %s3373_s21, 6  ;;  %vm975_vm0 = vcmask (!%p364_p9), 64512   ;;  %vm1553_vm1 = vcmask (!%p364_p9), 130048   ;;  %vm2465_vm2 = vcmask (!%p364_p9), 523264  }
  0x10   : > { %367 = sbr.rel (%p364_p9) target bundleno = 397 (0x18d), region = 64  ;;  %2912 = vmatprep.subr.mxu1 (!%p364_p9), %v974_v2  ;;  %p414_p10 = scmp.lt.s32.totalorder (!%p364_p9), %s2635_s16, 255  ;;  %v3415_v4 = vld [vmem:[%s4366_s5] ss:$0 sm:$0xff] (!%p364_p9) }
  0x11   : > { %2913 = vmatpush3.msra.mxu1 (!%p364_p9), %v974_v2  ;;  %v3420_v5 = vld [vmem:[%s4364_s3] ss:$0 sm:$0xff] (!%p364_p9)  ;;  %s2780_s13 = sshll.u32 (!%p364_p9), %s3373_s21, 13 }
  0x12   : > { %v3431_v6 = vld [vmem:[%s4367_s6] ss:$0 sm:$0xff] (!%p364_p9)  ;;  %s4310_s30 = scalar_lea.hbm (!%p364_p9), %s4372_s11, %s2780_s13 }
  0x13   : > { %v3442_v7 = vld [vmem:[%s4365_s4] ss:$0 sm:$0xff] (!%p364_p9) }
  0x15   : > { %v972_v0 = vld [vmem:[%s4376_s7] sm:$0xff] (!%p364_p9)  ;;  %v973_v1 = vld [vmem:[%s4376_s7 + $0x8] sm:$0xff] (!%p364_p9) }
  0x16   : > { %v3110_v3 = vpack.c.bf16 (!%p364_p9), %v973_v1, %v972_v0 }
  0x17   : > { %s4382_s16 = smov (!%p414_p10, %s2635_s16), 255 }
  0x18   : > { %3111 = vmatprep.subr.bf16.mxu0 %v3110_v3  ;;  %s3410_s22 = sshll.u32 %s4382_s16, 3  ;;  %s410_s16 = sand.u32 1, %s3279_s18  }
  0x19   : > { %3113 = vmatpush3.bf16.msra.mxu0 %v3110_v3  ;;  %s3426_s14 = scalar_lea.vmem %s4362_s1, %s3410_s22  ;;  %s3437_s7 = scalar_lea.vmem %s4361_s0, %s3410_s22 }
  0x1a   : > { %v702_v8 = vld [vmem:[%s3426_s14] sm:$0xff]  ;;  %v703_v10 = vld [vmem:[%s3426_s14 + $0x8] sm:$0xff]  ;;  %v704_v15 = vld [vmem:[%s3426_s14 + $0x10] sm:$0xff]  ;;  %s3985_s15 = scalar_lea.vmem %s4363_s2, %s3410_s22  ;;  %s2634_s22 = sshll.u32 %s410_s16, 9 }
  0x1b   : > { %v432_v9 = vld [vmem:[%s3437_s7] sm:$0xff]  ;;  %v773_v11 = vmul.f32 %v3415_v4, %v702_v8  ;;  %v774_v13 = vmul.f32 %v3415_v4, %v703_v10  ;;  %v433_v14 = vld [vmem:[%s3437_s7 + $0x8] sm:$0xff]  ;;  %v434_v16 = vld [vmem:[%s3437_s7 + $0x10] sm:$0xff]  ;;  %v775_v18 = vmul.f32 %v3415_v4, %v704_v15  ;;  %s4007_s29 = scalar_lea.vmem [#allocation2], %s2634_s22  ;;  %s4320_s21 = scalar_lea.sflag [#allocation3], %s410_s16 }
  0x1c   : > { %v503_v12 = vmul.f32 %v3420_v5, %v432_v9  ;;  %v504_v17 = vmul.f32 %v3420_v5, %v433_v14  ;;  %v505_v19 = vmul.f32 %v3420_v5, %v434_v16  ;;  %v705_v20 = vld [vmem:[%s3426_s14 + $0x18] sm:$0xff]  ;;  %v706_v30 = vld [vmem:[%s3426_s14 + $0x20] sm:$0xff]  ;;  %v707_v32 = vld [vmem:[%s3426_s14 + $0x28] sm:$0xff]  ;;  %s2544_s24 = sshll.u32 %s4007_s29, 4  ;;  %s4312_s24 = int_to_ptr.vmem [resolvable:$true] %s2544_s24 }
  0x1d   : > { %v435_v21 = vld [vmem:[%s3437_s7 + $0x18] sm:$0xff]  ;;  %v844_v22 = vadd.f32 %v3431_v6, %v773_v11  ;;  %v845_v24 = vadd.f32 %v3431_v6, %v774_v13  ;;  %v776_v25 = vmul.f32 %v3415_v4, %v705_v20  ;;  %v846_v27 = vadd.f32 %v3431_v6, %v775_v18  ;;  %v436_v31 = vld [vmem:[%s3437_s7 + $0x20] sm:$0xff]  ;;  %v437_v37 = vld [vmem:[%s3437_s7 + $0x28] sm:$0xff] }
  0x1e   : > { %v574_v23 = vadd.f32 %v3442_v7, %v503_v12  ;;  %v575_v26 = vadd.f32 %v3442_v7, %v504_v17  ;;  %v576_v28 = vadd.f32 %v3442_v7, %v505_v19  ;;  %v506_v29 = vmul.f32 %v3420_v5, %v435_v21  ;;  %v708_v38 = vld [vmem:[%s3426_s14 + $0x30] sm:$0xff]  ;;  %v709_v48 = vld [vmem:[%s3426_s14 + $0x38] sm:$0xff]  ;;  %v710_v61 = vld [vmem:[%s3426_s14 + $0x40] sm:$0xff] }
  0x1f   : > { %v908_v33 = vmax.f32 %v844_v22, 0.0  ;;  %v909_v35 = vmax.f32 %v845_v24, 0.0  ;;  %v847_v36 = vadd.f32 %v3431_v6, %v776_v25  ;;  %v438_v39 = vld [vmem:[%s3437_s7 + $0x30] sm:$0xff]  ;;  %v910_v41 = vmax.f32 %v846_v27, 0.0  ;;  %v439_v53 = vld [vmem:[%s3437_s7 + $0x38] sm:$0xff]  ;;  %v440_v62 = vld [vmem:[%s3437_s7 + $0x40] sm:$0xff] }
  0x20   : > { %v638_v34 = vmax.f32 %v574_v23, 0.0  ;;  %v639_v40 = vmax.f32 %v575_v26, 0.0  ;;  %v640_v42 = vmax.f32 %v576_v28, 0.0  ;;  %v577_v43 = vadd.f32 %v3442_v7, %v506_v29  ;;  %v711_v2 = vld [vmem:[%s3426_s14 + $0x48] sm:$0xff]  ;;  %v712_v8 = vld [vmem:[%s3426_s14 + $0x50] sm:$0xff]  ;;  %v713_v21 = vld [vmem:[%s3426_s14 + $0x58] sm:$0xff] }
  0x21   : > { %2914 = vmatprep.mubr.msk.f32.mxu1 %vm975_vm0, %v908_v33  ;;  %v911_v44 = vmax.f32 %v847_v36, 0.0  ;;  %v777_v45 = vmul.f32 %v3415_v4, %v706_v30  ;;  %v507_v46 = vmul.f32 %v3420_v5, %v436_v31  ;;  %v778_v47 = vmul.f32 %v3415_v4, %v707_v32  ;;  %v441_v3 = vld [vmem:[%s3437_s7 + $0x48] sm:$0xff]  ;;  %v442_v13 = vld [vmem:[%s3437_s7 + $0x50] sm:$0xff]  ;;  %v443_v26 = vld [vmem:[%s3437_s7 + $0x58] sm:$0xff] }
  0x22   : > { %3014 = vmatprep.mubr.msk.f32.mxu0 %vm1553_vm1, %v638_v34  ;;  %2915 = vmatmul.mubr.msk.f32.vlgmr.msra.gmra.mrb[0].mxu1 %vm975_vm0, %v909_v35  ;;  %v641_v49 = vmax.f32 %v577_v43, 0.0  ;;  %v508_v50 = vmul.f32 %v3420_v5, %v437_v37  ;;  %v779_v51 = vmul.f32 %v3415_v4, %v708_v38  ;;  %v509_v52 = vmul.f32 %v3420_v5, %v438_v39  ;;  %v714_v31 = vld [vmem:[%s3426_s14 + $0x60] sm:$0xff]  ;;  %v715_v37 = vld [vmem:[%s3426_s14 + $0x68] sm:$0xff] }
  0x23   : > { %3015 = vmatmul.mubr.msk.f32.vlgmr.msra.gmra.mrb[0].mxu0 %vm1553_vm1, %v639_v40  ;;  %2917 = vmatprep.mubr.msk.f32.mxu1 %vm975_vm0, %v910_v41  ;;  %v848_v54 = vadd.f32 %v3431_v6, %v777_v45  ;;  %v578_v55 = vadd.f32 %v3442_v7, %v507_v46  ;;  %v849_v56 = vadd.f32 %v3431_v6, %v778_v47  ;;  %v444_v32 = vld [vmem:[%s3437_s7 + $0x60] sm:$0xff]  ;;  %v445_v38 = vld [vmem:[%s3437_s7 + $0x68] sm:$0xff]  ;;  %v716_v41 = vld [vmem:[%s3426_s14 + $0x70] sm:$0xff] }
  0x24   : > { %3017 = vmatprep.mubr.msk.f32.mxu0 %vm1553_vm1, %v640_v42  ;;  %v579_v57 = vadd.f32 %v3442_v7, %v508_v50  ;;  %v850_v58 = vadd.f32 %v3431_v6, %v779_v51  ;;  %v580_v59 = vadd.f32 %v3442_v7, %v509_v52  ;;  %v780_v60 = vmul.f32 %v3415_v4, %v709_v48  ;;  %v446_v46 = vld [vmem:[%s3437_s7 + $0x70] sm:$0xff]  ;;  %v717_v51 = vld [vmem:[%s3426_s14 + $0x78] sm:$0xff] }
  0x25   : > { %v912_v63 = vmax.f32 %v848_v54, 0.0  ;;  %v642_v0 = vmax.f32 %v578_v55, 0.0  ;;  %v510_v1 = vmul.f32 %v3420_v5, %v439_v53  ;;  %v913_v9 = vmax.f32 %v849_v56, 0.0  ;;  %v447_v56 = vld [vmem:[%s3437_s7 + $0x78] sm:$0xff] }
  0x26   : > { %2918 = vmatmul.mubr.msk.f32.gmra.mrb[2].mxu1 %vm975_vm0, %v911_v44  ;;  %v643_v10 = vmax.f32 %v579_v57, 0.0  ;;  %v914_v11 = vmax.f32 %v850_v58, 0.0  ;;  %v851_v12 = vadd.f32 %v3431_v6, %v780_v60  ;;  %v644_v14 = vmax.f32 %v580_v59, 0.0  ;;  %v718_v58 = vld [vmem:[%s3426_s14 + $0x80] sm:$0xff] }
  0x27   : > { %3018 = vmatmul.mubr.msk.f32.gmra.mrb[2].mxu0 %vm1553_vm1, %v641_v49  ;;  %2920 = vmatprep.mubr.msk.f32.mxu1 %vm975_vm0, %v912_v63  ;;  %v581_v15 = vadd.f32 %v3442_v7, %v510_v1  ;;  %v781_v16 = vmul.f32 %v3415_v4, %v710_v61  ;;  %v511_v17 = vmul.f32 %v3420_v5, %v440_v62  ;;  %v448_v59 = vld [vmem:[%s3437_s7 + $0x80] sm:$0xff] }
  0x28   : > { %3020 = vmatprep.mubr.msk.f32.mxu0 %vm1553_vm1, %v642_v0  ;;  %v782_v18 = vmul.f32 %v3415_v4, %v711_v2  ;;  %v512_v19 = vmul.f32 %v3420_v5, %v441_v3  ;;  %v783_v20 = vmul.f32 %v3415_v4, %v712_v8  ;;  %v915_v22 = vmax.f32 %v851_v12, 0.0  ;;  %v719_v8 = vld [vmem:[%s3426_s14 + $0x88] sm:$0xff] }
  0x29   : > { %v852_v23 = vadd.f32 %v3431_v6, %v781_v16  ;;  %v582_v24 = vadd.f32 %v3442_v7, %v511_v17  ;;  %v513_v25 = vmul.f32 %v3420_v5, %v442_v13  ;;  %v645_v27 = vmax.f32 %v581_v15, 0.0  ;;  %v449_v13 = vld [vmem:[%s3437_s7 + $0x88] sm:$0xff]  ;;  %v450_v15 = vld [vmem:[%s3437_s7 + $0x90] sm:$0xff] }
  0x2a   : > { %2921 = vmatmul.mubr.msk.f32.gmra.mrb[4].mxu1 %vm975_vm0, %v913_v9  ;;  %v853_v28 = vadd.f32 %v3431_v6, %v782_v18  ;;  %v583_v29 = vadd.f32 %v3442_v7, %v512_v19  ;;  %v854_v30 = vadd.f32 %v3431_v6, %v783_v20  ;;  %v784_v36 = vmul.f32 %v3415_v4, %v713_v21 }
  0x2b   : > { %3021 = vmatmul.mubr.msk.f32.gmra.mrb[4].mxu0 %vm1553_vm1, %v643_v10  ;;  %2923 = vmatprep.mubr.msk.f32.mxu1 %vm975_vm0, %v914_v11  ;;  %v916_v33 = vmax.f32 %v852_v23, 0.0  ;;  %v646_v34 = vmax.f32 %v582_v24, 0.0  ;;  %v584_v35 = vadd.f32 %v3442_v7, %v513_v25  ;;  %v514_v40 = vmul.f32 %v3420_v5, %v443_v26  ;;  %v721_v24 = vld [vmem:[%s3426_s14 + $0x98] sm:$0xff] }
  0x2c   : > { %3023 = vmatprep.mubr.msk.f32.mxu0 %vm1553_vm1, %v644_v14  ;;  %v917_v39 = vmax.f32 %v853_v28, 0.0  ;;  %v647_v42 = vmax.f32 %v583_v29, 0.0  ;;  %v855_v43 = vadd.f32 %v3431_v6, %v784_v36  ;;  %v785_v44 = vmul.f32 %v3415_v4, %v714_v31  ;;  %v720_v14 = vld [vmem:[%s3426_s14 + $0x90] sm:$0xff]  ;;  %v451_v29 = vld [vmem:[%s3437_s7 + $0x98] sm:$0xff]  ;;  %v452_v31 = vld [vmem:[%s3437_s7 + $0xa0] sm:$0xff] }
  0x2d   : > { %v515_v45 = vmul.f32 %v3420_v5, %v444_v32  ;;  %v918_v47 = vmax.f32 %v854_v30, 0.0  ;;  %v585_v48 = vadd.f32 %v3442_v7, %v514_v40  ;;  %v786_v49 = vmul.f32 %v3415_v4, %v715_v37  ;;  %v722_v30 = vld [vmem:[%s3426_s14 + $0xa0] sm:$0xff]  ;;  %v723_v40 = vld [vmem:[%s3426_s14 + $0xa8] sm:$0xff] }
  0x2e   : > { %2924 = vmatmul.mubr.msk.f32.gmra.mrb[6].mxu1 %vm975_vm0, %v915_v22  ;;  %v516_v50 = vmul.f32 %v3420_v5, %v445_v38  ;;  %v648_v52 = vmax.f32 %v584_v35, 0.0  ;;  %v856_v53 = vadd.f32 %v3431_v6, %v785_v44  ;;  %v787_v55 = vmul.f32 %v3415_v4, %v716_v41  ;;  %v453_v41 = vld [vmem:[%s3437_s7 + $0xa8] sm:$0xff] }
  0x2f   : > { %3024 = vmatmul.mubr.msk.f32.gmra.mrb[6].mxu0 %vm1553_vm1, %v645_v27  ;;  %2926 = vmatprep.mubr.msk.f32.mxu1 %vm975_vm0, %v916_v33  ;;  %v586_v54 = vadd.f32 %v3442_v7, %v515_v45  ;;  %v517_v57 = vmul.f32 %v3420_v5, %v446_v46  ;;  %v919_v60 = vmax.f32 %v855_v43, 0.0  ;;  %v649_v61 = vmax.f32 %v585_v48, 0.0  ;;  %v724_v46 = vld [vmem:[%s3426_s14 + $0xb0] sm:$0xff] }
  0x30   : > { %3026 = vmatprep.mubr.msk.f32.mxu0 %vm1553_vm1, %v646_v34  ;;  %v857_v62 = vadd.f32 %v3431_v6, %v786_v49  ;;  %v788_v63 = vmul.f32 %v3415_v4, %v717_v51  ;;  %v920_v0 = vmax.f32 %v856_v53, 0.0  ;;  %v587_v1 = vadd.f32 %v3442_v7, %v516_v50 }
  0x31   : > { %v858_v2 = vadd.f32 %v3431_v6, %v787_v55  ;;  %v518_v3 = vmul.f32 %v3420_v5, %v447_v56  ;;  %v650_v9 = vmax.f32 %v586_v54, 0.0  ;;  %v588_v10 = vadd.f32 %v3442_v7, %v517_v57  ;;  %v725_v56 = vld [vmem:[%s3426_s14 + $0xb8] sm:$0xff] }
  0x32   : > { %2927 = vmatmul.mubr.msk.f32.gmra.mrb[8].mxu1 %vm975_vm0, %v917_v39  ;;  %v789_v11 = vmul.f32 %v3415_v4, %v718_v58  ;;  %v519_v12 = vmul.f32 %v3420_v5, %v448_v59  ;;  %v921_v16 = vmax.f32 %v857_v62, 0.0  ;;  %v859_v17 = vadd.f32 %v3431_v6, %v788_v63  ;;  %v726_v62 = vld [vmem:[%s3426_s14 + $0xc0] sm:$0xff] }
  0x33   : > { %3027 = vmatmul.mubr.msk.f32.gmra.mrb[8].mxu0 %vm1553_vm1, %v647_v42  ;;  %2929 = vmatprep.mubr.msk.f32.mxu1 %vm975_vm0, %v918_v47  ;;  %v589_v18 = vadd.f32 %v3442_v7, %v518_v3  ;;  %v790_v19 = vmul.f32 %v3415_v4, %v719_v8  ;;  %v651_v20 = vmax.f32 %v587_v1, 0.0  ;;  %v520_v22 = vmul.f32 %v3420_v5, %v449_v13  ;;  %v454_v47 = vld [vmem:[%s3437_s7 + $0xb0] sm:$0xff]  ;;  %v456_v63 = vld [vmem:[%s3437_s7 + $0xc0] sm:$0xff] }
  0x34   : > { %3029 = vmatprep.mubr.msk.f32.mxu0 %vm1553_vm1, %v648_v52  ;;  %v860_v21 = vadd.f32 %v3431_v6, %v789_v11  ;;  %v791_v23 = vmul.f32 %v3415_v4, %v720_v14  ;;  %v922_v25 = vmax.f32 %v858_v2, 0.0  ;;  %v652_v26 = vmax.f32 %v588_v10, 0.0 }
  0x35   : > { %v590_v27 = vadd.f32 %v3442_v7, %v519_v12  ;;  %v521_v28 = vmul.f32 %v3420_v5, %v450_v15  ;;  %v923_v32 = vmax.f32 %v859_v17, 0.0  ;;  %v653_v33 = vmax.f32 %v589_v18, 0.0  ;;  %v727_v12 = vld [vmem:[%s3426_s14 + $0xc8] sm:$0xff]  ;;  %v728_v18 = vld [vmem:[%s3426_s14 + $0xd0] sm:$0xff] }
  0x36   : > { %2930 = vmatmul.mubr.msk.f32.gmra.mrb[10].mxu1 %vm975_vm0, %v919_v60  ;;  %v861_v34 = vadd.f32 %v3431_v6, %v790_v19  ;;  %v792_v35 = vmul.f32 %v3415_v4, %v721_v24  ;;  %v924_v36 = vmax.f32 %v860_v21, 0.0  ;;  %v591_v37 = vadd.f32 %v3442_v7, %v520_v22  ;;  %v457_v17 = vld [vmem:[%s3437_s7 + $0xc8] sm:$0xff]  ;;  %v458_v19 = vld [vmem:[%s3437_s7 + $0xd0] sm:$0xff] }
  0x37   : > { %3030 = vmatmul.mubr.msk.f32.gmra.mrb[10].mxu0 %vm1553_vm1, %v649_v61  ;;  %2932 = vmatprep.mubr.msk.f32.mxu1 %vm975_vm0, %v920_v0  ;;  %v862_v38 = vadd.f32 %v3431_v6, %v791_v23  ;;  %v522_v39 = vmul.f32 %v3420_v5, %v451_v29  ;;  %v654_v42 = vmax.f32 %v590_v27, 0.0  ;;  %v592_v43 = vadd.f32 %v3442_v7, %v521_v28  ;;  %v455_v61 = vld [vmem:[%s3437_s7 + $0xb8] sm:$0xff] }
  0x38   : > { %3032 = vmatprep.mubr.msk.f32.mxu0 %vm1553_vm1, %v650_v9  ;;  %v793_v44 = vmul.f32 %v3415_v4, %v722_v30  ;;  %v523_v45 = vmul.f32 %v3420_v5, %v452_v31  ;;  %v925_v48 = vmax.f32 %v861_v34, 0.0  ;;  %v863_v49 = vadd.f32 %v3431_v6, %v792_v35  ;;  %v729_v28 = vld [vmem:[%s3426_s14 + $0xd8] sm:$0xff]  ;;  %v730_v34 = vld [vmem:[%s3426_s14 + $0xe0] sm:$0xff] }
  0x39   : > { %v794_v50 = vmul.f32 %v3415_v4, %v723_v40  ;;  %v524_v51 = vmul.f32 %v3420_v5, %v453_v41  ;;  %v655_v52 = vmax.f32 %v591_v37, 0.0  ;;  %v926_v53 = vmax.f32 %v862_v38, 0.0  ;;  %v459_v29 = vld [vmem:[%s3437_s7 + $0xd8] sm:$0xff]  ;;  %v460_v35 = vld [vmem:[%s3437_s7 + $0xe0] sm:$0xff] }
  0x3a   : > { %2933 = vmatmul.mubr.msk.f32.gmra.mrb[12].mxu1 %vm975_vm0, %v921_v16  ;;  %v593_v54 = vadd.f32 %v3442_v7, %v522_v39  ;;  %v795_v55 = vmul.f32 %v3415_v4, %v724_v46  ;;  %v656_v57 = vmax.f32 %v592_v43, 0.0  ;;  %v864_v58 = vadd.f32 %v3431_v6, %v793_v44  ;;  %v731_v44 = vld [vmem:[%s3426_s14 + $0xe8] sm:$0xff] }
  0x3b   : > { %3033 = vmatmul.mubr.msk.f32.gmra.mrb[12].mxu0 %vm1553_vm1, %v651_v20  ;;  %2935 = vmatprep.mubr.msk.f32.mxu1 %vm975_vm0, %v922_v25  ;;  %v594_v59 = vadd.f32 %v3442_v7, %v523_v45  ;;  %v525_v60 = vmul.f32 %v3420_v5, %v454_v47  ;;  %v927_v0 = vmax.f32 %v863_v49, 0.0  ;;  %v865_v1 = vadd.f32 %v3431_v6, %v794_v50  ;;  %v461_v49 = vld [vmem:[%s3437_s7 + $0xe8] sm:$0xff]  ;;  %v732_v50 = vld [vmem:[%s3426_s14 + $0xf0] sm:$0xff] }
  0x3c   : > { %3035 = vmatprep.mubr.msk.f32.mxu0 %vm1553_vm1, %v652_v26  ;;  %v595_v2 = vadd.f32 %v3442_v7, %v524_v51  ;;  %v796_v3 = vmul.f32 %v3415_v4, %v725_v56  ;;  %v657_v8 = vmax.f32 %v593_v54, 0.0  ;;  %v866_v9 = vadd.f32 %v3431_v6, %v795_v55  ;;  %v462_v51 = vld [vmem:[%s3437_s7 + $0xf0] sm:$0xff] }
  0x3d   : > { %v526_v10 = vmul.f32 %v3420_v5, %v455_v61  ;;  %v797_v11 = vmul.f32 %v3415_v4, %v726_v62  ;;  %v928_v13 = vmax.f32 %v864_v58, 0.0  ;;  %v658_v14 = vmax.f32 %v594_v59, 0.0 }
  0x3e   : > { %2936 = vmatmul.mubr.msk.f32.gmra.mrb[14].mxu1 %vm975_vm0, %v923_v32  ;;  %v596_v15 = vadd.f32 %v3442_v7, %v525_v60  ;;  %v527_v16 = vmul.f32 %v3420_v5, %v456_v63  ;;  %v929_v20 = vmax.f32 %v865_v1, 0.0  ;;  %v659_v21 = vmax.f32 %v595_v2, 0.0  ;;  %v733_v60 = vld [vmem:[%s3426_s14 + $0xf8] sm:$0xff]  ;;  %v734_v2 = vld [vmem:[%s3426_s14 + $0x100] sm:$0xff] }
  0x3f   : > { %3036 = vmatmul.mubr.msk.f32.gmra.mrb[14].mxu0 %vm1553_vm1, %v653_v33  ;;  %2938 = vmatprep.mubr.msk.f32.mxu1 %vm975_vm0, %v924_v36  ;;  %v867_v22 = vadd.f32 %v3431_v6, %v796_v3  ;;  %v798_v23 = vmul.f32 %v3415_v4, %v727_v12  ;;  %v930_v24 = vmax.f32 %v866_v9, 0.0  ;;  %v597_v25 = vadd.f32 %v3442_v7, %v526_v10  ;;  %v463_v1 = vld [vmem:[%s3437_s7 + $0xf8] sm:$0xff]  ;;  %v464_v3 = vld [vmem:[%s3437_s7 + $0x100] sm:$0xff] }
  0x40   : > { %3038 = vmatprep.mubr.msk.f32.mxu0 %vm1553_vm1, %v654_v42  ;;  %v868_v26 = vadd.f32 %v3431_v6, %v797_v11  ;;  %v528_v27 = vmul.f32 %v3420_v5, %v457_v17  ;;  %v660_v30 = vmax.f32 %v596_v15, 0.0  ;;  %v598_v31 = vadd.f32 %v3442_v7, %v527_v16  ;;  %v735_v16 = vld [vmem:[%s3426_s14 + $0x108] sm:$0xff] }
  0x41   : > { %v799_v32 = vmul.f32 %v3415_v4, %v728_v18  ;;  %v529_v33 = vmul.f32 %v3420_v5, %v458_v19  ;;  %v931_v36 = vmax.f32 %v867_v22, 0.0  ;;  %v869_v37 = vadd.f32 %v3431_v6, %v798_v23  ;;  %v465_v17 = vld [vmem:[%s3437_s7 + $0x108] sm:$0xff]  ;;  %v736_v22 = vld [vmem:[%s3426_s14 + $0x110] sm:$0xff] }
  0x42   : > { %2939 = vmatmul.mubr.msk.f32.gmra.mrb[16].mxu1 %vm975_vm0, %v925_v48  ;;  %v800_v38 = vmul.f32 %v3415_v4, %v729_v28  ;;  %v530_v39 = vmul.f32 %v3420_v5, %v459_v29  ;;  %v661_v40 = vmax.f32 %v597_v25, 0.0  ;;  %v932_v41 = vmax.f32 %v868_v26, 0.0  ;;  %v466_v23 = vld [vmem:[%s3437_s7 + $0x110] sm:$0xff] }
  0x43   : > { %3039 = vmatmul.mubr.msk.f32.gmra.mrb[16].mxu0 %vm1553_vm1, %v655_v52  ;;  %2941 = vmatprep.mubr.msk.f32.mxu1 %vm975_vm0, %v926_v53  ;;  %v599_v42 = vadd.f32 %v3442_v7, %v528_v27  ;;  %v801_v43 = vmul.f32 %v3415_v4, %v730_v34  ;;  %v662_v45 = vmax.f32 %v598_v31, 0.0  ;;  %v870_v46 = vadd.f32 %v3431_v6, %v799_v32  ;;  %v737_v32 = vld [vmem:[%s3426_s14 + $0x118] sm:$0xff] }
  0x44   : > { %3041 = vmatprep.mubr.msk.f32.mxu0 %vm1553_vm1, %v656_v57  ;;  %v600_v47 = vadd.f32 %v3442_v7, %v529_v33  ;;  %v531_v48 = vmul.f32 %v3420_v5, %v460_v35  ;;  %v933_v52 = vmax.f32 %v869_v37, 0.0  ;;  %v871_v53 = vadd.f32 %v3431_v6, %v800_v38  ;;  %v467_v37 = vld [vmem:[%s3437_s7 + $0x118] sm:$0xff]  ;;  %v738_v38 = vld [vmem:[%s3426_s14 + $0x120] sm:$0xff] }
  0x45   : > { %v601_v54 = vadd.f32 %v3442_v7, %v530_v39  ;;  %v802_v55 = vmul.f32 %v3415_v4, %v731_v44  ;;  %v663_v56 = vmax.f32 %v599_v42, 0.0  ;;  %v872_v57 = vadd.f32 %v3431_v6, %v801_v43  ;;  %v468_v39 = vld [vmem:[%s3437_s7 + $0x120] sm:$0xff] }
  0x46   : > { %2942 = vmatmul.mubr.msk.f32.gmra.mrb[18].mxu1 %vm975_vm0, %v927_v0  ;;  %v532_v58 = vmul.f32 %v3420_v5, %v461_v49  ;;  %v803_v59 = vmul.f32 %v3415_v4, %v732_v50  ;;  %v934_v61 = vmax.f32 %v870_v46, 0.0  ;;  %v664_v62 = vmax.f32 %v600_v47, 0.0 }
  0x47   : > { %3042 = vmatmul.mubr.msk.f32.gmra.mrb[18].mxu0 %vm1553_vm1, %v657_v8  ;;  %2944 = vmatprep.mubr.msk.f32.mxu1 %vm975_vm0, %v928_v13  ;;  %v602_v63 = vadd.f32 %v3442_v7, %v531_v48  ;;  %v533_v0 = vmul.f32 %v3420_v5, %v462_v51  ;;  %v935_v8 = vmax.f32 %v871_v53, 0.0  ;;  %v665_v9 = vmax.f32 %v601_v54, 0.0  ;;  %v739_v48 = vld [vmem:[%s3426_s14 + $0x128] sm:$0xff]  ;;  %v740_v54 = vld [vmem:[%s3426_s14 + $0x130] sm:$0xff] }
  0x48   : > { %3044 = vmatprep.mubr.msk.f32.mxu0 %vm1553_vm1, %v658_v14  ;;  %v873_v10 = vadd.f32 %v3431_v6, %v802_v55  ;;  %v804_v11 = vmul.f32 %v3415_v4, %v733_v60  ;;  %v936_v12 = vmax.f32 %v872_v57, 0.0  ;;  %v603_v13 = vadd.f32 %v3442_v7, %v532_v58  ;;  %v469_v53 = vld [vmem:[%s3437_s7 + $0x128] sm:$0xff]  ;;  %v470_v55 = vld [vmem:[%s3437_s7 + $0x130] sm:$0xff] }
  0x49   : > { %v874_v14 = vadd.f32 %v3431_v6, %v803_v59  ;;  %v534_v15 = vmul.f32 %v3420_v5, %v463_v1  ;;  %v666_v18 = vmax.f32 %v602_v63, 0.0  ;;  %v604_v19 = vadd.f32 %v3442_v7, %v533_v0  ;;  %v741_v0 = vld [vmem:[%s3426_s14 + $0x138] sm:$0xff] }
  0x4a   : > { %2945 = vmatmul.mubr.msk.f32.gmra.mrb[20].mxu1 %vm975_vm0, %v929_v20  ;;  %v805_v20 = vmul.f32 %v3415_v4, %v734_v2  ;;  %v875_v25 = vadd.f32 %v3431_v6, %v804_v11  ;;  %v806_v26 = vmul.f32 %v3415_v4, %v735_v16  ;;  %v536_v27 = vmul.f32 %v3420_v5, %v465_v17  ;;  %v471_v1 = vld [vmem:[%s3437_s7 + $0x138] sm:$0xff]  ;;  %v472_v11 = vld [vmem:[%s3437_s7 + $0x140] sm:$0xff] }
  0x4b   : > { %3045 = vmatmul.mubr.msk.f32.gmra.mrb[20].mxu0 %vm1553_vm1, %v659_v21  ;;  %2947 = vmatprep.mubr.msk.f32.mxu1 %vm975_vm0, %v930_v24  ;;  %v535_v21 = vmul.f32 %v3420_v5, %v464_v3  ;;  %v937_v24 = vmax.f32 %v873_v10, 0.0  ;;  %v667_v28 = vmax.f32 %v603_v13, 0.0  ;;  %v938_v29 = vmax.f32 %v874_v14, 0.0  ;;  %v742_v10 = vld [vmem:[%s3426_s14 + $0x140] sm:$0xff] }
  0x4c   : > { %3047 = vmatprep.mubr.msk.f32.mxu0 %vm1553_vm1, %v660_v30  ;;  %v605_v30 = vadd.f32 %v3442_v7, %v534_v15  ;;  %v807_v31 = vmul.f32 %v3415_v4, %v736_v22  ;;  %v668_v33 = vmax.f32 %v604_v19, 0.0  ;;  %v876_v34 = vadd.f32 %v3431_v6, %v805_v20  ;;  %v743_v20 = vld [vmem:[%s3426_s14 + $0x148] sm:$0xff] }
  0x4d   : > { %v606_v35 = vadd.f32 %v3442_v7, %v535_v21  ;;  %v607_v42 = vadd.f32 %v3442_v7, %v536_v27  ;;  %v808_v43 = vmul.f32 %v3415_v4, %v737_v32  ;;  %v538_v46 = vmul.f32 %v3420_v5, %v467_v37  ;;  %v474_v27 = vld [vmem:[%s3437_s7 + $0x150] sm:$0xff] }
  0x4e   : > { %2948 = vmatmul.mubr.msk.f32.gmra.mrb[22].mxu1 %vm975_vm0, %v931_v36  ;;  %v537_v36 = vmul.f32 %v3420_v5, %v466_v23  ;;  %v669_v44 = vmax.f32 %v605_v30, 0.0  ;;  %v809_v47 = vmul.f32 %v3415_v4, %v738_v38  ;;  %v940_v49 = vmax.f32 %v876_v34, 0.0 }
  0x4f   : > { %3048 = vmatmul.mubr.msk.f32.gmra.mrb[22].mxu0 %vm1553_vm1, %v661_v40  ;;  %2950 = vmatprep.mubr.msk.f32.mxu1 %vm975_vm0, %v932_v41  ;;  %v939_v40 = vmax.f32 %v875_v25, 0.0  ;;  %v877_v41 = vadd.f32 %v3431_v6, %v806_v26  ;;  %v670_v50 = vmax.f32 %v606_v35, 0.0  ;;  %v671_v57 = vmax.f32 %v607_v42, 0.0  ;;  %v473_v25 = vld [vmem:[%s3437_s7 + $0x148] sm:$0xff]  ;;  %v744_v26 = vld [vmem:[%s3426_s14 + $0x150] sm:$0xff]  ;;  %v746_v42 = vld [vmem:[%s3426_s14 + $0x160] sm:$0xff] }
  0x50   : > { %3050 = vmatprep.mubr.msk.f32.mxu0 %vm1553_vm1, %v662_v45  ;;  %v878_v45 = vadd.f32 %v3431_v6, %v807_v31  ;;  %v608_v51 = vadd.f32 %v3442_v7, %v537_v36  ;;  %v879_v58 = vadd.f32 %v3431_v6, %v808_v43  ;;  %v810_v59 = vmul.f32 %v3415_v4, %v739_v48  ;;  %v745_v36 = vld [vmem:[%s3426_s14 + $0x158] sm:$0xff]  ;;  %v476_v43 = vld [vmem:[%s3437_s7 + $0x160] sm:$0xff] }
  0x51   : > { %v540_v63 = vmul.f32 %v3420_v5, %v469_v53  ;;  %v812_v14 = vmul.f32 %v3415_v4, %v741_v0  ;;  %v542_v15 = vmul.f32 %v3420_v5, %v471_v1  ;;  %v813_v19 = vmul.f32 %v3415_v4, %v742_v10  ;;  %v477_v53 = vld [vmem:[%s3437_s7 + $0x168] sm:$0xff] }
  0x52   : > { %2951 = vmatmul.mubr.msk.f32.gmra.mrb[24].mxu1 %vm975_vm0, %v933_v52  ;;  %v539_v52 = vmul.f32 %v3420_v5, %v468_v39  ;;  %v942_v60 = vmax.f32 %v878_v45, 0.0  ;;  %v672_v2 = vmax.f32 %v608_v51, 0.0  ;;  %v881_v13 = vadd.f32 %v3431_v6, %v810_v59  ;;  %v478_v59 = vld [vmem:[%s3437_s7 + $0x170] sm:$0xff] }
  0x53   : > { %3051 = vmatmul.mubr.msk.f32.gmra.mrb[24].mxu0 %vm1553_vm1, %v663_v56  ;;  %2953 = vmatprep.mubr.msk.f32.mxu1 %vm975_vm0, %v934_v61  ;;  %v941_v56 = vmax.f32 %v877_v41, 0.0  ;;  %v609_v61 = vadd.f32 %v3442_v7, %v538_v46  ;;  %v613_v30 = vadd.f32 %v3442_v7, %v542_v15  ;;  %v814_v31 = vmul.f32 %v3415_v4, %v743_v20  ;;  %v475_v41 = vld [vmem:[%s3437_s7 + $0x158] sm:$0xff]  ;;  %v480_v15 = vld [vmem:[%s3437_s7 + $0x180] sm:$0xff] }
  0x54   : > { %3053 = vmatprep.mubr.msk.f32.mxu0 %vm1553_vm1, %v664_v62  ;;  %v880_v62 = vadd.f32 %v3431_v6, %v809_v47  ;;  %v610_v3 = vadd.f32 %v3442_v7, %v539_v52  ;;  %v544_v34 = vmul.f32 %v3420_v5, %v473_v25  ;;  %v815_v35 = vmul.f32 %v3415_v4, %v744_v26  ;;  %v747_v52 = vld [vmem:[%s3426_s14 + $0x168] sm:$0xff] }
  0x55   : > { %v673_v16 = vmax.f32 %v609_v61, 0.0  ;;  %v677_v45 = vmax.f32 %v613_v30, 0.0  ;;  %v885_v46 = vadd.f32 %v3431_v6, %v814_v31  ;;  %v816_v47 = vmul.f32 %v3415_v4, %v745_v36  ;;  %v752_v30 = vld [vmem:[%s3426_s14 + $0x190] sm:$0xff] }
  0x56   : > { %2954 = vmatmul.mubr.msk.f32.gmra.mrb[26].mxu1 %vm975_vm0, %v935_v8  ;;  %v811_v8 = vmul.f32 %v3415_v4, %v740_v54  ;;  %v944_v17 = vmax.f32 %v880_v62, 0.0  ;;  %v674_v21 = vmax.f32 %v610_v3, 0.0  ;;  %v546_v51 = vmul.f32 %v3420_v5, %v475_v41  ;;  %v482_v31 = vld [vmem:[%s3437_s7 + $0x190] sm:$0xff]  ;;  %v483_v41 = vld [vmem:[%s3437_s7 + $0x198] sm:$0xff] }
  0x57   : > { %3054 = vmatmul.mubr.msk.f32.gmra.mrb[26].mxu0 %vm1553_vm1, %v665_v9  ;;  %2956 = vmatprep.mubr.msk.f32.mxu1 %vm975_vm0, %v936_v12  ;;  %v541_v9 = vmul.f32 %v3420_v5, %v470_v55  ;;  %v943_v12 = vmax.f32 %v879_v58, 0.0  ;;  %v748_v58 = vld [vmem:[%s3426_s14 + $0x170] sm:$0xff]  ;;  %v887_v61 = vadd.f32 %v3431_v6, %v816_v47  ;;  %v818_v62 = vmul.f32 %v3415_v4, %v747_v52  ;;  %v484_v47 = vld [vmem:[%s3437_s7 + $0x1a0] sm:$0xff] }
  0x58   : > { %3056 = vmatprep.mubr.msk.f32.mxu0 %vm1553_vm1, %v666_v18  ;;  %v611_v18 = vadd.f32 %v3442_v7, %v540_v63  ;;  %v882_v22 = vadd.f32 %v3431_v6, %v811_v8  ;;  %v548_v63 = vmul.f32 %v3420_v5, %v477_v53  ;;  %v819_v3 = vmul.f32 %v3415_v4, %v748_v58  ;;  %v749_v8 = vld [vmem:[%s3426_s14 + $0x178] sm:$0xff] }
  0x59   : > { %v612_v23 = vadd.f32 %v3442_v7, %v541_v9 }
  0x5a   : > { %2957 = vmatmul.mubr.msk.f32.gmra.mrb[28].mxu1 %vm975_vm0, %v937_v24  ;;  %v543_v24 = vmul.f32 %v3420_v5, %v472_v11  ;;  %v675_v32 = vmax.f32 %v611_v18, 0.0  ;;  %v946_v37 = vmax.f32 %v882_v22, 0.0  ;;  %v619_v18 = vadd.f32 %v3442_v7, %v548_v63 }
  0x5b   : > { %3057 = vmatmul.mubr.msk.f32.gmra.mrb[28].mxu0 %vm1553_vm1, %v667_v28  ;;  %2959 = vmatprep.mubr.msk.f32.mxu1 %vm975_vm0, %v938_v29  ;;  %v945_v28 = vmax.f32 %v881_v13, 0.0  ;;  %v883_v29 = vadd.f32 %v3431_v6, %v812_v14  ;;  %v676_v38 = vmax.f32 %v612_v23, 0.0  ;;  %v479_v13 = vld [vmem:[%s3437_s7 + $0x178] sm:$0xff]  ;;  %v750_v14 = vld [vmem:[%s3426_s14 + $0x180] sm:$0xff] }
  0x5c   : > { %3059 = vmatprep.mubr.msk.f32.mxu0 %vm1553_vm1, %v668_v33  ;;  %v884_v33 = vadd.f32 %v3431_v6, %v813_v19  ;;  %v614_v39 = vadd.f32 %v3442_v7, %v543_v24  ;;  %v820_v19 = vmul.f32 %v3415_v4, %v749_v8  ;;  %v550_v22 = vmul.f32 %v3420_v5, %v479_v13  ;;  %v751_v24 = vld [vmem:[%s3426_s14 + $0x188] sm:$0xff] }
  0x5d   : > { %v821_v23 = vmul.f32 %v3415_v4, %v750_v14 }
  0x5e   : > { %2960 = vmatmul.mubr.msk.f32.gmra.mrb[30].mxu1 %vm975_vm0, %v939_v40  ;;  %v545_v40 = vmul.f32 %v3420_v5, %v474_v27  ;;  %v948_v48 = vmax.f32 %v884_v33, 0.0  ;;  %v678_v54 = vmax.f32 %v614_v39, 0.0  ;;  %v683_v33 = vmax.f32 %v619_v18, 0.0  ;;  %v758_v18 = vld [vmem:[%s3426_s14 + $0x1c0] sm:$0xff] }
  0x5f   : > { %3060 = vmatmul.mubr.msk.f32.gmra.mrb[30].mxu0 %vm1553_vm1, %v669_v44  ;;  %2962 = vmatprep.mubr.msk.f32.mxu1 %vm975_vm0, %v940_v49  ;;  %v947_v44 = vmax.f32 %v883_v29, 0.0  ;;  %v615_v49 = vadd.f32 %v3442_v7, %v544_v34  ;;  %v481_v29 = vld [vmem:[%s3437_s7 + $0x188] sm:$0xff]  ;;  %v891_v34 = vadd.f32 %v3431_v6, %v820_v19  ;;  %v488_v19 = vld [vmem:[%s3437_s7 + $0x1c0] sm:$0xff] }
  0x60   : > { %3062 = vmatprep.mubr.msk.f32.mxu0 %vm1553_vm1, %v670_v50  ;;  %v886_v50 = vadd.f32 %v3431_v6, %v815_v35  ;;  %v616_v55 = vadd.f32 %v3442_v7, %v545_v40  ;;  %v822_v35 = vmul.f32 %v3415_v4, %v751_v24  ;;  %v552_v39 = vmul.f32 %v3420_v5, %v481_v29  ;;  %v753_v40 = vld [vmem:[%s3426_s14 + $0x198] sm:$0xff]  ;;  %v489_v29 = vld [vmem:[%s3437_s7 + $0x1c8] sm:$0xff] }
  0x61   : > { %v679_v0 = vmax.f32 %v615_v49, 0.0 }
  0x62   : > { %2963 = vmatmul.mubr.msk.f32.gmra.mrb[32].mxu1 %vm975_vm0, %v941_v56  ;;  %v817_v56 = vmul.f32 %v3415_v4, %v746_v42  ;;  %v950_v1 = vmax.f32 %v886_v50, 0.0  ;;  %v680_v9 = vmax.f32 %v616_v55, 0.0  ;;  %v893_v49 = vadd.f32 %v3431_v6, %v822_v35  ;;  %v490_v35 = vld [vmem:[%s3437_s7 + $0x1d0] sm:$0xff] }
  0x63   : > { %3063 = vmatmul.mubr.msk.f32.gmra.mrb[32].mxu0 %vm1553_vm1, %v671_v57  ;;  %2965 = vmatprep.mubr.msk.f32.mxu1 %vm975_vm0, %v942_v60  ;;  %v547_v57 = vmul.f32 %v3420_v5, %v476_v43  ;;  %v949_v60 = vmax.f32 %v885_v46, 0.0  ;;  %v754_v46 = vld [vmem:[%s3426_s14 + $0x1a0] sm:$0xff]  ;;  %v824_v50 = vmul.f32 %v3415_v4, %v753_v40 }
  0x64   : > { %3065 = vmatprep.mubr.msk.f32.mxu0 %vm1553_vm1, %v672_v2  ;;  %v617_v2 = vadd.f32 %v3442_v7, %v546_v51  ;;  %v888_v10 = vadd.f32 %v3431_v6, %v817_v56  ;;  %v554_v51 = vmul.f32 %v3420_v5, %v483_v41  ;;  %v825_v55 = vmul.f32 %v3415_v4, %v754_v46  ;;  %v755_v56 = vld [vmem:[%s3426_s14 + $0x1a8] sm:$0xff] }
  0x65   : > { %v618_v11 = vadd.f32 %v3442_v7, %v547_v57  ;;  %v957_v63 = vmax.f32 %v893_v49, 0.0  ;;  %v491_v49 = vld [vmem:[%s3437_s7 + $0x1d8] sm:$0xff] }
  0x66   : > { %2966 = vmatmul.mubr.msk.f32.gmra.mrb[34].mxu1 %vm975_vm0, %v943_v12  ;;  %v549_v12 = vmul.f32 %v3420_v5, %v478_v59  ;;  %v681_v20 = vmax.f32 %v617_v2, 0.0  ;;  %v952_v25 = vmax.f32 %v888_v10, 0.0  ;;  %v3855_v59 = vld [vmem:[%s4364_s3] ss:$0 sm:$0xff] }
  0x67   : > { %3066 = vmatmul.mubr.msk.f32.gmra.mrb[34].mxu0 %vm1553_vm1, %v673_v16  ;;  %2968 = vmatprep.mubr.msk.f32.mxu1 %vm975_vm0, %v944_v17  ;;  %v951_v16 = vmax.f32 %v887_v61, 0.0  ;;  %v889_v17 = vadd.f32 %v3431_v6, %v818_v62  ;;  %v682_v26 = vmax.f32 %v618_v11, 0.0  ;;  %v485_v61 = vld [vmem:[%s3437_s7 + $0x1a8] sm:$0xff]  ;;  %v486_v62 = vld [vmem:[%s3437_s7 + $0x1b0] sm:$0xff]  ;;  %v3876_v2 = vld [vmem:[%s4366_s5] ss:$0 sm:$0xff] }
  0x68   : > { %3068 = vmatprep.mubr.msk.f32.mxu0 %vm1553_vm1, %v674_v21  ;;  %v890_v21 = vadd.f32 %v3431_v6, %v819_v3  ;;  %v620_v27 = vadd.f32 %v3442_v7, %v549_v12  ;;  %v826_v3 = vmul.f32 %v3876_v2, %v755_v56  ;;  %v556_v10 = vmul.f32 %v3855_v59, %v485_v61  ;;  %v757_v12 = vld [vmem:[%s3426_s14 + $0x1b8] sm:$0xff] }
  0x6a   : > { %2969 = vmatmul.mubr.msk.f32.gmra.mrb[36].mxu1 %vm975_vm0, %v945_v28  ;;  %v551_v28 = vmul.f32 %v3420_v5, %v480_v15  ;;  %v954_v36 = vmax.f32 %v890_v21, 0.0  ;;  %v684_v42 = vmax.f32 %v620_v27, 0.0 }
  0x6b   : > { %3069 = vmatmul.mubr.msk.f32.gmra.mrb[36].mxu0 %vm1553_vm1, %v675_v32  ;;  %2971 = vmatprep.mubr.msk.f32.mxu1 %vm975_vm0, %v946_v37  ;;  %v953_v32 = vmax.f32 %v889_v17, 0.0  ;;  %v621_v37 = vadd.f32 %v3442_v7, %v550_v22  ;;  %v487_v17 = vld [vmem:[%s3437_s7 + $0x1b8] sm:$0xff] }
  0x6c   : > { %3071 = vmatprep.mubr.msk.f32.mxu0 %vm1553_vm1, %v676_v38  ;;  %v892_v38 = vadd.f32 %v3431_v6, %v821_v23  ;;  %v622_v43 = vadd.f32 %v3442_v7, %v551_v28  ;;  %v828_v23 = vmul.f32 %v3876_v2, %v757_v12  ;;  %v558_v27 = vmul.f32 %v3855_v59, %v487_v17  ;;  %v759_v28 = vld [vmem:[%s3426_s14 + $0x1c8] sm:$0xff] }
  0x6d   : > { %v685_v52 = vmax.f32 %v621_v37, 0.0 }
  0x6e   : > { %2972 = vmatmul.mubr.msk.f32.gmra.mrb[38].mxu1 %vm975_vm0, %v947_v44  ;;  %v823_v44 = vmul.f32 %v3415_v4, %v752_v30  ;;  %v956_v53 = vmax.f32 %v892_v38, 0.0  ;;  %v686_v57 = vmax.f32 %v622_v43, 0.0  ;;  %v756_v4 = vld [vmem:[%s3426_s14 + $0x1b0] sm:$0xff]  ;;  %v830_v38 = vmul.f32 %v3876_v2, %v759_v28 }
  0x6f   : > { %3072 = vmatmul.mubr.msk.f32.gmra.mrb[38].mxu0 %vm1553_vm1, %v677_v45  ;;  %2974 = vmatprep.mubr.msk.f32.mxu1 %vm975_vm0, %v948_v48  ;;  %v553_v45 = vmul.f32 %v3420_v5, %v482_v31  ;;  %v955_v48 = vmax.f32 %v891_v34, 0.0  ;;  %v827_v11 = vmul.f32 %v3876_v2, %v756_v4  ;;  %v760_v34 = vld [vmem:[%s3426_s14 + $0x1d0] sm:$0xff] }
  0x70   : > { %3074 = vmatprep.mubr.msk.f32.mxu0 %vm1553_vm1, %v678_v54  ;;  %v623_v54 = vadd.f32 %v3442_v7, %v552_v39  ;;  %v894_v5 = vadd.f32 %v3431_v6, %v823_v44  ;;  %v560_v39 = vmul.f32 %v3855_v59, %v489_v29  ;;  %v831_v43 = vmul.f32 %v3876_v2, %v760_v34  ;;  %v761_v44 = vld [vmem:[%s3426_s14 + $0x1d8] sm:$0xff] }
  0x71   : > { %v624_v58 = vadd.f32 %v3442_v7, %v553_v45  ;;  %v3870_v7 = vld [vmem:[%s4365_s4] ss:$0 sm:$0xff] }
  0x72   : > { %2975 = vmatmul.mubr.msk.f32.gmra.mrb[40].mxu1 %vm975_vm0, %v949_v60  ;;  %v555_v60 = vmul.f32 %v3855_v59, %v484_v47  ;;  %v687_v8 = vmax.f32 %v623_v54, 0.0  ;;  %v958_v13 = vmax.f32 %v894_v5, 0.0  ;;  %v631_v54 = vadd.f32 %v3870_v7, %v560_v39 }
  0x73   : > { %3075 = vmatmul.mubr.msk.f32.gmra.mrb[40].mxu0 %vm1553_vm1, %v679_v0  ;;  %2977 = vmatprep.mubr.msk.f32.mxu1 %vm975_vm0, %v950_v1  ;;  %v3864_v0 = vld [vmem:[%s4367_s6] ss:$0 sm:$0xff]  ;;  %v625_v1 = vadd.f32 %v3870_v7, %v554_v51  ;;  %v688_v14 = vmax.f32 %v624_v58, 0.0  ;;  %v562_v5 = vmul.f32 %v3855_v59, %v491_v49 }
  0x74   : > { %3077 = vmatprep.mubr.msk.f32.mxu0 %vm1553_vm1, %v680_v9  ;;  %v895_v6 = vadd.f32 %v3864_v0, %v824_v50  ;;  %v896_v9 = vadd.f32 %v3864_v0, %v825_v55  ;;  %v626_v15 = vadd.f32 %v3870_v7, %v555_v60  ;;  %v897_v22 = vadd.f32 %v3864_v0, %v826_v3  ;;  %v762_v50 = vld [vmem:[%s3426_s14 + $0x1e0] sm:$0xff]  ;;  %v763_v60 = vld [vmem:[%s3426_s14 + $0x1e8] sm:$0xff]  ;;  %v494_v3 = vld [vmem:[%s3437_s7 + $0x1f0] sm:$0xff] }
  0x75   : > { %v689_v21 = vmax.f32 %v625_v1, 0.0  ;;  %v899_v37 = vadd.f32 %v3864_v0, %v828_v23  ;;  %v492_v51 = vld [vmem:[%s3437_s7 + $0x1e0] sm:$0xff]  ;;  %v832_v55 = vmul.f32 %v3876_v2, %v761_v44  ;;  %v833_v58 = vmul.f32 %v3876_v2, %v762_v50  ;;  %v764_v1 = vld [vmem:[%s3426_s14 + $0x1f0] sm:$0xff] }
  0x76   : > { %2978 = vmatmul.mubr.msk.f32.gmra.mrb[42].mxu1 %vm975_vm0, %v951_v16  ;;  %v557_v16 = vmul.f32 %v3855_v59, %v486_v62  ;;  %v960_v24 = vmax.f32 %v896_v9, 0.0  ;;  %v690_v30 = vmax.f32 %v626_v15, 0.0  ;;  %v695_v9 = vmax.f32 %v631_v54, 0.0  ;;  %v2273_v50 = vld [vmem:[%s3985_s15] sm:$0xff] }
  0x77   : > { %3078 = vmatmul.mubr.msk.f32.gmra.mrb[42].mxu0 %vm1553_vm1, %v681_v20  ;;  %2980 = vmatprep.mubr.msk.f32.mxu1 %vm975_vm0, %v952_v25  ;;  %v959_v20 = vmax.f32 %v895_v6, 0.0  ;;  %v627_v25 = vadd.f32 %v3870_v7, %v556_v10  ;;  %v493_v6 = vld [vmem:[%s3437_s7 + $0x1e8] sm:$0xff]  ;;  %v903_v10 = vadd.f32 %v3864_v0, %v832_v55 }
  0x78   : > { %3080 = vmatprep.mubr.msk.f32.mxu0 %vm1553_vm1, %v682_v26  ;;  %v898_v26 = vadd.f32 %v3864_v0, %v827_v11  ;;  %v628_v31 = vadd.f32 %v3870_v7, %v557_v16  ;;  %v834_v11 = vmul.f32 %v3876_v2, %v763_v60  ;;  %v564_v15 = vmul.f32 %v3855_v59, %v493_v6  ;;  %v2275_v6 = vld [vmem:[%s3985_s15 + $0x10] sm:$0xff] }
  0x79   : > { %v691_v40 = vmax.f32 %v627_v25, 0.0 }
  0x7a   : > { %2981 = vmatmul.mubr.msk.f32.gmra.mrb[44].mxu1 %vm975_vm0, %v953_v32  ;;  %v829_v32 = vmul.f32 %v3876_v2, %v758_v18  ;;  %v962_v41 = vmax.f32 %v898_v26, 0.0  ;;  %v692_v45 = vmax.f32 %v628_v31, 0.0  ;;  %v835_v18 = vmul.f32 %v3876_v2, %v764_v1 }
  0x7b   : > { %3081 = vmatmul.mubr.msk.f32.gmra.mrb[44].mxu0 %vm1553_vm1, %v683_v33  ;;  %2983 = vmatprep.mubr.msk.f32.mxu1 %vm975_vm0, %v954_v36  ;;  %v559_v33 = vmul.f32 %v3855_v59, %v488_v19  ;;  %v961_v36 = vmax.f32 %v897_v22, 0.0  ;;  %v565_v19 = vmul.f32 %v3855_v59, %v494_v3  ;;  %v967_v22 = vmax.f32 %v903_v10, 0.0 }
  0x7c   : > { %3083 = vmatprep.mubr.msk.f32.mxu0 %vm1553_vm1, %v684_v42  ;;  %v629_v42 = vadd.f32 %v3870_v7, %v558_v27  ;;  %v900_v46 = vadd.f32 %v3864_v0, %v829_v32  ;;  %v905_v23 = vadd.f32 %v3864_v0, %v834_v11  ;;  %v635_v25 = vadd.f32 %v3870_v7, %v564_v15  ;;  %v2278_v15 = vld [vmem:[%s3985_s15 + $0x28] sm:$0xff] }
  0x7d   : > { %v630_v47 = vadd.f32 %v3870_v7, %v559_v33  ;;  %v636_v31 = vadd.f32 %v3870_v7, %v565_v19 }
  0x7e   : > { %2984 = vmatmul.mubr.msk.f32.gmra.mrb[46].mxu1 %vm975_vm0, %v955_v48  ;;  %v561_v48 = vmul.f32 %v3855_v59, %v490_v35  ;;  %v693_v56 = vmax.f32 %v629_v42, 0.0  ;;  %v964_v61 = vmax.f32 %v900_v46, 0.0  ;;  %v969_v32 = vmax.f32 %v905_v23, 0.0  ;;  %v3991_v42 = vld [vmem:[%s4371_s10] ss:$0 sm:$0xff] }
  0x7f   : > { %3084 = vmatmul.mubr.msk.f32.gmra.mrb[46].mxu0 %vm1553_vm1, %v685_v52  ;;  %2986 = vmatprep.mubr.msk.f32.mxu1 %vm975_vm0, %v956_v53  ;;  %v963_v52 = vmax.f32 %v899_v37, 0.0  ;;  %v901_v53 = vadd.f32 %v3864_v0, %v830_v38  ;;  %v694_v4 = vmax.f32 %v630_v47, 0.0  ;;  %v699_v33 = vmax.f32 %v635_v25, 0.0  ;;  %v3979_v38 = vld [vmem:[%s4370_s9] ss:$0 sm:$0xff] }
  0x80   : > { %3086 = vmatprep.mubr.msk.f32.mxu0 %vm1553_vm1, %v686_v57  ;;  %v902_v57 = vadd.f32 %v3864_v0, %v831_v43  ;;  %v632_v62 = vadd.f32 %v3870_v7, %v561_v48  ;;  %v700_v35 = vmax.f32 %v636_v31, 0.0  ;;  %v2280_v31 = vld [vmem:[%s3985_s15 + $0x38] sm:$0xff] }
  0x82   : > { %2987 = vmatmul.mubr.msk.f32.gmra.mrb[48].mxu1 %vm975_vm0, %v957_v63  ;;  %v563_v63 = vmul.f32 %v3855_v59, %v492_v51  ;;  %v966_v12 = vmax.f32 %v902_v57, 0.0  ;;  %v696_v16 = vmax.f32 %v632_v62, 0.0 }
  0x83   : > { %3087 = vmatmul.mubr.msk.f32.gmra.mrb[48].mxu0 %vm1553_vm1, %v687_v8  ;;  %2989 = vmatprep.mubr.msk.f32.mxu1 %vm975_vm0, %v958_v13  ;;  %v965_v8 = vmax.f32 %v901_v53, 0.0  ;;  %v633_v13 = vadd.f32 %v3870_v7, %v562_v5 }
  0x84   : > { %3089 = vmatprep.mubr.msk.f32.mxu0 %vm1553_vm1, %v688_v14  ;;  %v904_v14 = vadd.f32 %v3864_v0, %v833_v58  ;;  %v634_v17 = vadd.f32 %v3870_v7, %v563_v63  ;;  %v2276_v58 = vld [vmem:[%s3985_s15 + $0x18] sm:$0xff] }
  0x86   : > { %2990 = vmatmul.mubr.msk.f32.gmra.mrb[50].mxu1 %vm975_vm0, %v959_v20  ;;  %v765_v20 = vld [vmem:[%s3426_s14 + $0x1f8] sm:$0xff]  ;;  %v968_v28 = vmax.f32 %v904_v14, 0.0  ;;  %v698_v29 = vmax.f32 %v634_v17, 0.0 }
  0x87   : > { %3090 = vmatmul.mubr.msk.f32.gmra.mrb[50].mxu0 %vm1553_vm1, %v689_v21  ;;  %2992 = vmatprep.mubr.msk.f32.mxu1 %vm975_vm0, %v960_v24  ;;  %v495_v21 = vld [vmem:[%s3437_s7 + $0x1f8] sm:$0xff]  ;;  %v697_v24 = vmax.f32 %v633_v13, 0.0  ;;  %v836_v26 = vmul.f32 %v3876_v2, %v765_v20  ;;  %s3289_s7 = smov [#allocation2]  }
  0x88   : > { %3092 = vmatprep.mubr.msk.f32.mxu0 %vm1553_vm1, %v690_v30  ;;  %v566_v27 = vmul.f32 %v3855_v59, %v495_v21  ;;  %v906_v30 = vadd.f32 %v3864_v0, %v835_v18  ;;  %v2277_v21 = vld [vmem:[%s3985_s15 + $0x20] sm:$0xff]  ;;  %s3229_s14 = sshll.u32 %s3289_s7, 4  ;;  %s3230_s14 = int_to_ptr.vmem [resolvable:$false] %s3229_s14 }
  0x89   : > { %v907_v2 = vadd.f32 %v3864_v0, %v836_v26  ;;  %s3231_s12 = scalar_lea.vmem %s3230_s14, 16384  ;;  %p3232_p0 = scmp.lt.s32.totalorder %s4312_s24, %s3230_s14 }
  0x8a   : > { %2993 = vmatmul.mubr.msk.f32.gmra.mrb[52].mxu1 %vm975_vm0, %v961_v36  ;;  %v637_v59 = vadd.f32 %v3870_v7, %v566_v27  ;;  %v970_v34 = vmax.f32 %v906_v30, 0.0 }
  0x8b   : > { %3093 = vmatmul.mubr.msk.f32.gmra.mrb[52].mxu0 %vm1553_vm1, %v691_v40  ;;  %2995 = vmatprep.mubr.msk.f32.mxu1 %vm975_vm0, %v962_v41  ;;  %v971_v36 = vmax.f32 %v907_v2, 0.0 }
  0x8c   : > { %3095 = vmatprep.mubr.msk.f32.mxu0 %vm1553_vm1, %v692_v45  ;;  %v701_v37 = vmax.f32 %v637_v59, 0.0  ;;  %v2274_v45 = vld [vmem:[%s3985_s15 + $0x8] sm:$0xff] }
  0x8e   : > { %2996 = vmatmul.mubr.msk.f32.gmra.mrb[54].mxu1 %vm975_vm0, %v963_v52 }
  0x8f   : > { %3096 = vmatmul.mubr.msk.f32.gmra.mrb[54].mxu0 %vm1553_vm1, %v693_v56  ;;  %2998 = vmatprep.mubr.msk.f32.mxu1 %vm975_vm0, %v964_v61 }
  0x90   : > { %3098 = vmatprep.mubr.msk.f32.mxu0 %vm1553_vm1, %v694_v4 }
  0x92   : > { %2999 = vmatmul.mubr.msk.f32.gmra.mrb[56].mxu1 %vm975_vm0, %v965_v8 }
  0x93   : > { %3099 = vmatmul.mubr.msk.f32.gmra.mrb[56].mxu0 %vm1553_vm1, %v695_v9  ;;  %3001 = vmatprep.mubr.msk.f32.mxu1 %vm975_vm0, %v966_v12 }
  0x94   : > { %3101 = vmatprep.mubr.msk.f32.mxu0 %vm1553_vm1, %v696_v16 }
  0x96   : > { %3002 = vmatmul.mubr.msk.f32.gmra.mrb[58].mxu1 %vm975_vm0, %v967_v22 }
  0x97   : > { %3102 = vmatmul.mubr.msk.f32.gmra.mrb[58].mxu0 %vm1553_vm1, %v697_v24  ;;  %3004 = vmatprep.mubr.msk.f32.mxu1 %vm975_vm0, %v968_v28 }
  0x98   : > { %3104 = vmatprep.mubr.msk.f32.mxu0 %vm1553_vm1, %v698_v29 }
  0x9a   : > { %3005 = vmatmul.mubr.msk.f32.gmra.mrb[60].mxu1 %vm975_vm0, %v969_v32 }
  0x9b   : > { %3105 = vmatmul.mubr.msk.f32.gmra.mrb[60].mxu0 %vm1553_vm1, %v699_v33  ;;  %3007 = vmatprep.mubr.msk.f32.mxu1 %vm975_vm0, %v970_v34 }
  0x9c   : > { %3107 = vmatprep.mubr.msk.f32.mxu0 %vm1553_vm1, %v700_v35  ;;  %v2279_v35 = vld [vmem:[%s3985_s15 + $0x30] sm:$0xff] }
  0x9e   : > { %3008 = vmatmul.mubr.msk.f32.gmra.mrb[62].mxu1 %vm975_vm0, %v971_v36 }
  0x9f   : > { %3108 = vmatmul.mubr.msk.f32.gmra.mrb[62].mxu0 %vm1553_vm1, %v701_v37 }
  0xf5   : > { %v2916_v0 = vpop.f32.mrb[0].mxu1 }
  0xf6   : > { %v3016_v7 = vpop.f32.mrb[0].mxu0  ;;  %v1234_v40 = vpop.f32.mrb[1].mxu1 }
  0xf7   : > { %v1818_v39 = vadd.f32 %v3016_v7, %v2916_v0  ;;  %v1812_v41 = vpop.f32.mrb[1].mxu0 }
  0xf8   : > { %v1813_v43 = vadd.f32 %v1812_v41, %v1234_v40 }
  0xf9   : > { %v2139_v44 = vmul.f32 %v3979_v38, %v1818_v39  ;;  %v2919_v47 = vpop.f32.mrb[2].mxu1 }
  0xfa   : > { %v2138_v46 = vmul.f32 %v3979_v38, %v1813_v43  ;;  %v3019_v48 = vpop.f32.mrb[2].mxu0  ;;  %v1244_v52 = vpop.f32.mrb[3].mxu1 }
  0xfb   : > { %v2210_v49 = vadd.f32 %v3991_v42, %v2139_v44  ;;  %v1828_v51 = vadd.f32 %v3019_v48, %v2919_v47  ;;  %v1822_v53 = vpop.f32.mrb[3].mxu0 }
  0xfc   : > { %v2209_v54 = vadd.f32 %v3991_v42, %v2138_v46  ;;  %v1823_v55 = vadd.f32 %v1822_v53, %v1244_v52 }
  0xfd   : > { %v2338_v56 = vadd.f32 %v2274_v45, %v2210_v49  ;;  %v2141_v57 = vmul.f32 %v3979_v38, %v1828_v51  ;;  %v2922_v61 = vpop.f32.mrb[4].mxu1  ;;  %v2282_v45 = vld [vmem:[%s3985_s15 + $0x48] sm:$0xff]  ;;  %v2281_v51 = vld [vmem:[%s3985_s15 + $0x40] sm:$0xff] }
  0xfe   : > { %v2337_v5 = vadd.f32 %v2273_v50, %v2209_v54  ;;  %v2140_v60 = vmul.f32 %v3979_v38, %v1823_v55  ;;  %v3022_v4 = vpop.f32.mrb[4].mxu0  ;;  %v1254_v3 = vpop.f32.mrb[5].mxu1 }
  0xff   : > { %v2402_v62 = vmax.f32 %v2338_v56, 0.0  ;;  %v2212_v63 = vadd.f32 %v3991_v42, %v2141_v57  ;;  %v1838_v1 = vadd.f32 %v3022_v4, %v2922_v61  ;;  %v1832_v8 = vpop.f32.mrb[5].mxu0  ;;  %v2284_v61 = vld [vmem:[%s3985_s15 + $0x58] sm:$0xff] }
 0x100   : > { %v2401_v9 = vmax.f32 %v2337_v5, 0.0  ;;  %v2211_v10 = vadd.f32 %v3991_v42, %v2140_v60  ;;  %v1833_v11 = vadd.f32 %v1832_v8, %v1254_v3  ;;  %v2283_v3 = vld [vmem:[%s3985_s15 + $0x50] sm:$0xff] }
 0x101   : > { %2467 = vst.msk [vmem:[%s4007_s29 + $0x8] sm:$0xff] %vm2465_vm2, %v2402_v62  ;;  %v2340_v12 = vadd.f32 %v2276_v58, %v2212_v63  ;;  %v2143_v13 = vmul.f32 %v3979_v38, %v1838_v1  ;;  %v2925_v17 = vpop.f32.mrb[6].mxu1 }
 0x102   : > { %2466 = vst.msk [vmem:[%s4007_s29] sm:$0xff] %vm2465_vm2, %v2401_v9  ;;  %v2339_v14 = vadd.f32 %v2275_v6, %v2211_v10  ;;  %v2142_v16 = vmul.f32 %v3979_v38, %v1833_v11  ;;  %v3025_v18 = vpop.f32.mrb[6].mxu0  ;;  %v1264_v23 = vpop.f32.mrb[7].mxu1 }
 0x103   : > { %v2404_v19 = vmax.f32 %v2340_v12, 0.0  ;;  %v2214_v20 = vadd.f32 %v3991_v42, %v2143_v13  ;;  %v1848_v22 = vadd.f32 %v3025_v18, %v2925_v17  ;;  %v1842_v24 = vpop.f32.mrb[7].mxu0  ;;  %v2286_v17 = vld [vmem:[%s3985_s15 + $0x68] sm:$0xff] }
 0x104   : > { %v2403_v25 = vmax.f32 %v2339_v14, 0.0  ;;  %v2213_v26 = vadd.f32 %v3991_v42, %v2142_v16  ;;  %v1843_v27 = vadd.f32 %v1842_v24, %v1264_v23  ;;  %v2285_v23 = vld [vmem:[%s3985_s15 + $0x60] sm:$0xff] }
 0x105   : > { %2469 = vst.msk [vmem:[%s4007_s29 + $0x18] sm:$0xff] %vm2465_vm2, %v2404_v19  ;;  %v2342_v28 = vadd.f32 %v2278_v15, %v2214_v20  ;;  %v2145_v29 = vmul.f32 %v3979_v38, %v1848_v22  ;;  %v2928_v33 = vpop.f32.mrb[8].mxu1 }
 0x106   : > { %2468 = vst.msk [vmem:[%s4007_s29 + $0x10] sm:$0xff] %vm2465_vm2, %v2403_v25  ;;  %v2341_v30 = vadd.f32 %v2277_v21, %v2213_v26  ;;  %v2144_v32 = vmul.f32 %v3979_v38, %v1843_v27  ;;  %v3028_v2 = vpop.f32.mrb[8].mxu0  ;;  %v1274_v37 = vpop.f32.mrb[9].mxu1 }
 0x107   : > { %v2406_v59 = vmax.f32 %v2342_v28, 0.0  ;;  %v2216_v34 = vadd.f32 %v3991_v42, %v2145_v29  ;;  %v1858_v36 = vadd.f32 %v3028_v2, %v2928_v33  ;;  %v1852_v0 = vpop.f32.mrb[9].mxu0  ;;  %v2288_v33 = vld [vmem:[%s3985_s15 + $0x78] sm:$0xff] }
 0x108   : > { %v2405_v7 = vmax.f32 %v2341_v30, 0.0  ;;  %v2215_v39 = vadd.f32 %v3991_v42, %v2144_v32  ;;  %v1853_v40 = vadd.f32 %v1852_v0, %v1274_v37  ;;  %v2287_v37 = vld [vmem:[%s3985_s15 + $0x70] sm:$0xff] }
 0x109   : > { %2471 = vst.msk [vmem:[%s4007_s29 + $0x28] sm:$0xff] %vm2465_vm2, %v2406_v59  ;;  %v2344_v41 = vadd.f32 %v2280_v31, %v2216_v34  ;;  %v2147_v43 = vmul.f32 %v3979_v38, %v1858_v36  ;;  %v2931_v47 = vpop.f32.mrb[10].mxu1 }
 0x10a   : > { %2470 = vst.msk [vmem:[%s4007_s29 + $0x20] sm:$0xff] %vm2465_vm2, %v2405_v7  ;;  %v2343_v44 = vadd.f32 %v2279_v35, %v2215_v39  ;;  %v2146_v46 = vmul.f32 %v3979_v38, %v1853_v40  ;;  %v3031_v48 = vpop.f32.mrb[10].mxu0  ;;  %v1284_v53 = vpop.f32.mrb[11].mxu1 }
 0x10b   : > { %v2408_v49 = vmax.f32 %v2344_v41, 0.0  ;;  %v2218_v50 = vadd.f32 %v3991_v42, %v2147_v43  ;;  %v1868_v52 = vadd.f32 %v3031_v48, %v2931_v47  ;;  %v1862_v54 = vpop.f32.mrb[11].mxu0  ;;  %v2290_v47 = vld [vmem:[%s3985_s15 + $0x88] sm:$0xff] }
 0x10c   : > { %v2407_v55 = vmax.f32 %v2343_v44, 0.0  ;;  %v2217_v56 = vadd.f32 %v3991_v42, %v2146_v46  ;;  %v1863_v57 = vadd.f32 %v1862_v54, %v1284_v53  ;;  %v2289_v53 = vld [vmem:[%s3985_s15 + $0x80] sm:$0xff] }
 0x10d   : > { %2473 = vst.msk [vmem:[%s4007_s29 + $0x38] sm:$0xff] %vm2465_vm2, %v2408_v49  ;;  %v2346_v5 = vadd.f32 %v2282_v45, %v2218_v50  ;;  %v2149_v58 = vmul.f32 %v3979_v38, %v1868_v52  ;;  %v2934_v62 = vpop.f32.mrb[12].mxu1 }
 0x10e   : > { %2472 = vst.msk [vmem:[%s4007_s29 + $0x30] sm:$0xff] %vm2465_vm2, %v2407_v55  ;;  %v2345_v60 = vadd.f32 %v2281_v51, %v2217_v56  ;;  %v2148_v4 = vmul.f32 %v3979_v38, %v1863_v57  ;;  %v3034_v63 = vpop.f32.mrb[12].mxu0  ;;  %v1294_v9 = vpop.f32.mrb[13].mxu1 }
 0x10f   : > { %v2410_v6 = vmax.f32 %v2346_v5, 0.0  ;;  %v2220_v1 = vadd.f32 %v3991_v42, %v2149_v58  ;;  %v1878_v8 = vadd.f32 %v3034_v63, %v2934_v62  ;;  %v1872_v10 = vpop.f32.mrb[13].mxu0  ;;  %v2292_v62 = vld [vmem:[%s3985_s15 + $0x98] sm:$0xff] }
 0x110   : > { %v2409_v11 = vmax.f32 %v2345_v60, 0.0  ;;  %v2219_v12 = vadd.f32 %v3991_v42, %v2148_v4  ;;  %v1873_v13 = vadd.f32 %v1872_v10, %v1294_v9  ;;  %v2291_v9 = vld [vmem:[%s3985_s15 + $0x90] sm:$0xff] }
 0x111   : > { %2475 = vst.msk [vmem:[%s4007_s29 + $0x48] sm:$0xff] %vm2465_vm2, %v2410_v6  ;;  %v2348_v14 = vadd.f32 %v2284_v61, %v2220_v1  ;;  %v2151_v15 = vmul.f32 %v3979_v38, %v1878_v8  ;;  %v2937_v19 = vpop.f32.mrb[14].mxu1 }
 0x112   : > { %2474 = vst.msk [vmem:[%s4007_s29 + $0x40] sm:$0xff] %vm2465_vm2, %v2409_v11  ;;  %v2347_v16 = vadd.f32 %v2283_v3, %v2219_v12  ;;  %v2150_v18 = vmul.f32 %v3979_v38, %v1873_v13  ;;  %v3037_v20 = vpop.f32.mrb[14].mxu0  ;;  %v1304_v25 = vpop.f32.mrb[15].mxu1 }
 0x113   : > { %v2412_v21 = vmax.f32 %v2348_v14, 0.0  ;;  %v2222_v22 = vadd.f32 %v3991_v42, %v2151_v15  ;;  %v1888_v24 = vadd.f32 %v3037_v20, %v2937_v19  ;;  %v1882_v26 = vpop.f32.mrb[15].mxu0  ;;  %v2294_v19 = vld [vmem:[%s3985_s15 + $0xa8] sm:$0xff] }
 0x114   : > { %v2411_v27 = vmax.f32 %v2347_v16, 0.0  ;;  %v2221_v28 = vadd.f32 %v3991_v42, %v2150_v18  ;;  %v1883_v29 = vadd.f32 %v1882_v26, %v1304_v25  ;;  %v2293_v25 = vld [vmem:[%s3985_s15 + $0xa0] sm:$0xff] }
 0x115   : > { %2477 = vst.msk [vmem:[%s4007_s29 + $0x58] sm:$0xff] %vm2465_vm2, %v2412_v21  ;;  %v2350_v30 = vadd.f32 %v2286_v17, %v2222_v22  ;;  %v2153_v31 = vmul.f32 %v3979_v38, %v1888_v24  ;;  %v2940_v59 = vpop.f32.mrb[16].mxu1 }
 0x116   : > { %2476 = vst.msk [vmem:[%s4007_s29 + $0x50] sm:$0xff] %vm2465_vm2, %v2411_v27  ;;  %v2349_v32 = vadd.f32 %v2285_v23, %v2221_v28  ;;  %v2152_v2 = vmul.f32 %v3979_v38, %v1883_v29  ;;  %v3040_v34 = vpop.f32.mrb[16].mxu0  ;;  %v1314_v7 = vpop.f32.mrb[17].mxu1 }
 0x117   : > { %v2414_v35 = vmax.f32 %v2350_v30, 0.0  ;;  %v2224_v36 = vadd.f32 %v3991_v42, %v2153_v31  ;;  %v1898_v0 = vadd.f32 %v3040_v34, %v2940_v59  ;;  %v1892_v39 = vpop.f32.mrb[17].mxu0  ;;  %v2296_v59 = vld [vmem:[%s3985_s15 + $0xb8] sm:$0xff] }
 0x118   : > { %v2413_v40 = vmax.f32 %v2349_v32, 0.0  ;;  %v2223_v41 = vadd.f32 %v3991_v42, %v2152_v2  ;;  %v1893_v43 = vadd.f32 %v1892_v39, %v1314_v7  ;;  %v2295_v7 = vld [vmem:[%s3985_s15 + $0xb0] sm:$0xff] }
 0x119   : > { %2479 = vst.msk [vmem:[%s4007_s29 + $0x68] sm:$0xff] %vm2465_vm2, %v2414_v35  ;;  %v2352_v44 = vadd.f32 %v2288_v33, %v2224_v36  ;;  %v2155_v45 = vmul.f32 %v3979_v38, %v1898_v0  ;;  %v2943_v49 = vpop.f32.mrb[18].mxu1 }
 0x11a   : > { %2478 = vst.msk [vmem:[%s4007_s29 + $0x60] sm:$0xff] %vm2465_vm2, %v2413_v40  ;;  %v2351_v46 = vadd.f32 %v2287_v37, %v2223_v41  ;;  %v2154_v48 = vmul.f32 %v3979_v38, %v1893_v43  ;;  %v3043_v50 = vpop.f32.mrb[18].mxu0  ;;  %v1324_v55 = vpop.f32.mrb[19].mxu1 }
 0x11b   : > { %v2416_v51 = vmax.f32 %v2352_v44, 0.0  ;;  %v2226_v52 = vadd.f32 %v3991_v42, %v2155_v45  ;;  %v1908_v54 = vadd.f32 %v3043_v50, %v2943_v49  ;;  %v1902_v56 = vpop.f32.mrb[19].mxu0  ;;  %v2298_v49 = vld [vmem:[%s3985_s15 + $0xc8] sm:$0xff] }
 0x11c   : > { %v2415_v57 = vmax.f32 %v2351_v46, 0.0  ;;  %v2225_v5 = vadd.f32 %v3991_v42, %v2154_v48  ;;  %v1903_v58 = vadd.f32 %v1902_v56, %v1324_v55  ;;  %v2297_v55 = vld [vmem:[%s3985_s15 + $0xc0] sm:$0xff] }
 0x11d   : > { %2481 = vst.msk [vmem:[%s4007_s29 + $0x78] sm:$0xff] %vm2465_vm2, %v2416_v51  ;;  %v2354_v60 = vadd.f32 %v2290_v47, %v2226_v52  ;;  %v2157_v61 = vmul.f32 %v3979_v38, %v1908_v54  ;;  %v2946_v6 = vpop.f32.mrb[20].mxu1 }
 0x11e   : > { %2480 = vst.msk [vmem:[%s4007_s29 + $0x70] sm:$0xff] %vm2465_vm2, %v2415_v57  ;;  %v2353_v4 = vadd.f32 %v2289_v53, %v2225_v5  ;;  %v2156_v63 = vmul.f32 %v3979_v38, %v1903_v58  ;;  %v3046_v1 = vpop.f32.mrb[20].mxu0  ;;  %v1334_v11 = vpop.f32.mrb[21].mxu1 }
 0x11f   : > { %v2418_v3 = vmax.f32 %v2354_v60, 0.0  ;;  %v2228_v8 = vadd.f32 %v3991_v42, %v2157_v61  ;;  %v1918_v10 = vadd.f32 %v3046_v1, %v2946_v6  ;;  %v1912_v12 = vpop.f32.mrb[21].mxu0  ;;  %v2300_v6 = vld [vmem:[%s3985_s15 + $0xd8] sm:$0xff] }
 0x120   : > { %v2417_v13 = vmax.f32 %v2353_v4, 0.0  ;;  %v2227_v14 = vadd.f32 %v3991_v42, %v2156_v63  ;;  %v1913_v15 = vadd.f32 %v1912_v12, %v1334_v11  ;;  %v2299_v11 = vld [vmem:[%s3985_s15 + $0xd0] sm:$0xff] }
 0x121   : > { %2483 = vst.msk [vmem:[%s4007_s29 + $0x88] sm:$0xff] %vm2465_vm2, %v2418_v3  ;;  %v2356_v16 = vadd.f32 %v2292_v62, %v2228_v8  ;;  %v2159_v17 = vmul.f32 %v3979_v38, %v1918_v10  ;;  %v2949_v21 = vpop.f32.mrb[22].mxu1 }
 0x122   : > { %2482 = vst.msk [vmem:[%s4007_s29 + $0x80] sm:$0xff] %vm2465_vm2, %v2417_v13  ;;  %v2355_v18 = vadd.f32 %v2291_v9, %v2227_v14  ;;  %v2158_v20 = vmul.f32 %v3979_v38, %v1913_v15  ;;  %v3049_v22 = vpop.f32.mrb[22].mxu0  ;;  %v1344_v27 = vpop.f32.mrb[23].mxu1 }
 0x123   : > { %v2420_v23 = vmax.f32 %v2356_v16, 0.0  ;;  %v2230_v24 = vadd.f32 %v3991_v42, %v2159_v17  ;;  %v1928_v26 = vadd.f32 %v3049_v22, %v2949_v21  ;;  %v1922_v28 = vpop.f32.mrb[23].mxu0  ;;  %v2302_v21 = vld [vmem:[%s3985_s15 + $0xe8] sm:$0xff] }
 0x124   : > { %v2419_v29 = vmax.f32 %v2355_v18, 0.0  ;;  %v2229_v30 = vadd.f32 %v3991_v42, %v2158_v20  ;;  %v1923_v31 = vadd.f32 %v1922_v28, %v1344_v27  ;;  %v2301_v27 = vld [vmem:[%s3985_s15 + $0xe0] sm:$0xff] }
 0x125   : > { %2485 = vst.msk [vmem:[%s4007_s29 + $0x98] sm:$0xff] %vm2465_vm2, %v2420_v23  ;;  %v2358_v32 = vadd.f32 %v2294_v19, %v2230_v24  ;;  %v2161_v33 = vmul.f32 %v3979_v38, %v1928_v26  ;;  %v2952_v35 = vpop.f32.mrb[24].mxu1 }
 0x126   : > { %2484 = vst.msk [vmem:[%s4007_s29 + $0x90] sm:$0xff] %vm2465_vm2, %v2419_v29  ;;  %v2357_v2 = vadd.f32 %v2293_v25, %v2229_v30  ;;  %v2160_v34 = vmul.f32 %v3979_v38, %v1923_v31  ;;  %v3052_v36 = vpop.f32.mrb[24].mxu0  ;;  %v1354_v40 = vpop.f32.mrb[25].mxu1 }
 0x127   : > { %v2422_v37 = vmax.f32 %v2358_v32, 0.0  ;;  %v2232_v0 = vadd.f32 %v3991_v42, %v2161_v33  ;;  %v1938_v39 = vadd.f32 %v3052_v36, %v2952_v35  ;;  %v1932_v41 = vpop.f32.mrb[25].mxu0  ;;  %v2304_v35 = vld [vmem:[%s3985_s15 + $0xf8] sm:$0xff] }
 0x128   : > { %v2421_v43 = vmax.f32 %v2357_v2, 0.0  ;;  %v2231_v44 = vadd.f32 %v3991_v42, %v2160_v34  ;;  %v1933_v45 = vadd.f32 %v1932_v41, %v1354_v40  ;;  %v2303_v40 = vld [vmem:[%s3985_s15 + $0xf0] sm:$0xff] }
 0x129   : > { %2487 = vst.msk [vmem:[%s4007_s29 + $0xa8] sm:$0xff] %vm2465_vm2, %v2422_v37  ;;  %v2360_v46 = vadd.f32 %v2296_v59, %v2232_v0  ;;  %v2163_v47 = vmul.f32 %v3979_v38, %v1938_v39  ;;  %v2955_v51 = vpop.f32.mrb[26].mxu1 }
 0x12a   : > { %2486 = vst.msk [vmem:[%s4007_s29 + $0xa0] sm:$0xff] %vm2465_vm2, %v2421_v43  ;;  %v2359_v48 = vadd.f32 %v2295_v7, %v2231_v44  ;;  %v2162_v50 = vmul.f32 %v3979_v38, %v1933_v45  ;;  %v3055_v52 = vpop.f32.mrb[26].mxu0  ;;  %v1364_v57 = vpop.f32.mrb[27].mxu1 }
 0x12b   : > { %v2424_v53 = vmax.f32 %v2360_v46, 0.0  ;;  %v2234_v54 = vadd.f32 %v3991_v42, %v2163_v47  ;;  %v1948_v56 = vadd.f32 %v3055_v52, %v2955_v51  ;;  %v1942_v5 = vpop.f32.mrb[27].mxu0  ;;  %v2306_v51 = vld [vmem:[%s3985_s15 + $0x108] sm:$0xff] }
 0x12c   : > { %v2423_v58 = vmax.f32 %v2359_v48, 0.0  ;;  %v2233_v60 = vadd.f32 %v3991_v42, %v2162_v50  ;;  %v1943_v61 = vadd.f32 %v1942_v5, %v1364_v57  ;;  %v2305_v57 = vld [vmem:[%s3985_s15 + $0x100] sm:$0xff] }
 0x12d   : > { %2489 = vst.msk [vmem:[%s4007_s29 + $0xb8] sm:$0xff] %vm2465_vm2, %v2424_v53  ;;  %v2362_v4 = vadd.f32 %v2298_v49, %v2234_v54  ;;  %v2165_v62 = vmul.f32 %v3979_v38, %v1948_v56  ;;  %v2958_v3 = vpop.f32.mrb[28].mxu1 }
 0x12e   : > { %2488 = vst.msk [vmem:[%s4007_s29 + $0xb0] sm:$0xff] %vm2465_vm2, %v2423_v58  ;;  %v2361_v63 = vadd.f32 %v2297_v55, %v2233_v60  ;;  %v2164_v1 = vmul.f32 %v3979_v38, %v1943_v61  ;;  %v3058_v8 = vpop.f32.mrb[28].mxu0  ;;  %v1374_v13 = vpop.f32.mrb[29].mxu1 }
 0x12f   : > { %v2426_v9 = vmax.f32 %v2362_v4, 0.0  ;;  %v2236_v10 = vadd.f32 %v3991_v42, %v2165_v62  ;;  %v1958_v12 = vadd.f32 %v3058_v8, %v2958_v3  ;;  %v1952_v14 = vpop.f32.mrb[29].mxu0  ;;  %v2308_v3 = vld [vmem:[%s3985_s15 + $0x118] sm:$0xff] }
 0x130   : > { %v2425_v15 = vmax.f32 %v2361_v63, 0.0  ;;  %v2235_v16 = vadd.f32 %v3991_v42, %v2164_v1  ;;  %v1953_v17 = vadd.f32 %v1952_v14, %v1374_v13  ;;  %v2307_v13 = vld [vmem:[%s3985_s15 + $0x110] sm:$0xff] }
 0x131   : > { %2491 = vst.msk [vmem:[%s4007_s29 + $0xc8] sm:$0xff] %vm2465_vm2, %v2426_v9  ;;  %v2364_v18 = vadd.f32 %v2300_v6, %v2236_v10  ;;  %v2167_v19 = vmul.f32 %v3979_v38, %v1958_v12  ;;  %v2961_v23 = vpop.f32.mrb[30].mxu1 }
 0x132   : > { %2490 = vst.msk [vmem:[%s4007_s29 + $0xc0] sm:$0xff] %vm2465_vm2, %v2425_v15  ;;  %v2363_v20 = vadd.f32 %v2299_v11, %v2235_v16  ;;  %v2166_v22 = vmul.f32 %v3979_v38, %v1953_v17  ;;  %v3061_v24 = vpop.f32.mrb[30].mxu0  ;;  %v1384_v29 = vpop.f32.mrb[31].mxu1 }
 0x133   : > { %v2428_v25 = vmax.f32 %v2364_v18, 0.0  ;;  %v2238_v26 = vadd.f32 %v3991_v42, %v2167_v19  ;;  %v1968_v28 = vadd.f32 %v3061_v24, %v2961_v23  ;;  %v1962_v30 = vpop.f32.mrb[31].mxu0  ;;  %v2310_v23 = vld [vmem:[%s3985_s15 + $0x128] sm:$0xff] }
 0x134   : > { %v2427_v31 = vmax.f32 %v2363_v20, 0.0  ;;  %v2237_v32 = vadd.f32 %v3991_v42, %v2166_v22  ;;  %v1963_v33 = vadd.f32 %v1962_v30, %v1384_v29  ;;  %v2309_v29 = vld [vmem:[%s3985_s15 + $0x120] sm:$0xff] }
 0x135   : > { %2493 = vst.msk [vmem:[%s4007_s29 + $0xd8] sm:$0xff] %vm2465_vm2, %v2428_v25  ;;  %v2366_v2 = vadd.f32 %v2302_v21, %v2238_v26  ;;  %v2169_v59 = vmul.f32 %v3979_v38, %v1968_v28  ;;  %v2964_v37 = vpop.f32.mrb[32].mxu1 }
 0x136   : > { %2492 = vst.msk [vmem:[%s4007_s29 + $0xd0] sm:$0xff] %vm2465_vm2, %v2427_v31  ;;  %v2365_v34 = vadd.f32 %v2301_v27, %v2237_v32  ;;  %v2168_v36 = vmul.f32 %v3979_v38, %v1963_v33  ;;  %v3064_v0 = vpop.f32.mrb[32].mxu0  ;;  %v1394_v43 = vpop.f32.mrb[33].mxu1 }
 0x137   : > { %v2430_v7 = vmax.f32 %v2366_v2, 0.0  ;;  %v2240_v39 = vadd.f32 %v3991_v42, %v2169_v59  ;;  %v1978_v41 = vadd.f32 %v3064_v0, %v2964_v37  ;;  %v1972_v44 = vpop.f32.mrb[33].mxu0  ;;  %v2312_v37 = vld [vmem:[%s3985_s15 + $0x138] sm:$0xff] }
 0x138   : > { %v2429_v45 = vmax.f32 %v2365_v34, 0.0  ;;  %v2239_v46 = vadd.f32 %v3991_v42, %v2168_v36  ;;  %v1973_v47 = vadd.f32 %v1972_v44, %v1394_v43  ;;  %v2311_v43 = vld [vmem:[%s3985_s15 + $0x130] sm:$0xff] }
 0x139   : > { %2495 = vst.msk [vmem:[%s4007_s29 + $0xe8] sm:$0xff] %vm2465_vm2, %v2430_v7  ;;  %v2368_v48 = vadd.f32 %v2304_v35, %v2240_v39  ;;  %v2171_v49 = vmul.f32 %v3979_v38, %v1978_v41  ;;  %v2967_v53 = vpop.f32.mrb[34].mxu1 }
 0x13a   : > { %2494 = vst.msk [vmem:[%s4007_s29 + $0xe0] sm:$0xff] %vm2465_vm2, %v2429_v45  ;;  %v2367_v50 = vadd.f32 %v2303_v40, %v2239_v46  ;;  %v2170_v52 = vmul.f32 %v3979_v38, %v1973_v47  ;;  %v3067_v54 = vpop.f32.mrb[34].mxu0  ;;  %v1404_v58 = vpop.f32.mrb[35].mxu1 }
 0x13b   : > { %v2432_v55 = vmax.f32 %v2368_v48, 0.0  ;;  %v2242_v56 = vadd.f32 %v3991_v42, %v2171_v49  ;;  %v1988_v5 = vadd.f32 %v3067_v54, %v2967_v53  ;;  %v1982_v60 = vpop.f32.mrb[35].mxu0  ;;  %v2314_v53 = vld [vmem:[%s3985_s15 + $0x148] sm:$0xff] }
 0x13c   : > { %v2431_v61 = vmax.f32 %v2367_v50, 0.0  ;;  %v2241_v4 = vadd.f32 %v3991_v42, %v2170_v52  ;;  %v1983_v62 = vadd.f32 %v1982_v60, %v1404_v58  ;;  %v2313_v58 = vld [vmem:[%s3985_s15 + $0x140] sm:$0xff] }
 0x13d   : > { %2497 = vst.msk [vmem:[%s4007_s29 + $0xf8] sm:$0xff] %vm2465_vm2, %v2432_v55  ;;  %v2370_v63 = vadd.f32 %v2306_v51, %v2242_v56  ;;  %v2173_v6 = vmul.f32 %v3979_v38, %v1988_v5  ;;  %v2970_v9 = vpop.f32.mrb[36].mxu1 }
 0x13e   : > { %2496 = vst.msk [vmem:[%s4007_s29 + $0xf0] sm:$0xff] %vm2465_vm2, %v2431_v61  ;;  %v2369_v1 = vadd.f32 %v2305_v57, %v2241_v4  ;;  %v2172_v8 = vmul.f32 %v3979_v38, %v1983_v62  ;;  %v3070_v10 = vpop.f32.mrb[36].mxu0  ;;  %v1414_v15 = vpop.f32.mrb[37].mxu1 }
 0x13f   : > { %v2434_v11 = vmax.f32 %v2370_v63, 0.0  ;;  %v2244_v12 = vadd.f32 %v3991_v42, %v2173_v6  ;;  %v1998_v14 = vadd.f32 %v3070_v10, %v2970_v9  ;;  %v1992_v16 = vpop.f32.mrb[37].mxu0  ;;  %v2316_v9 = vld [vmem:[%s3985_s15 + $0x158] sm:$0xff] }
 0x140   : > { %v2433_v17 = vmax.f32 %v2369_v1, 0.0  ;;  %v2243_v18 = vadd.f32 %v3991_v42, %v2172_v8  ;;  %v1993_v19 = vadd.f32 %v1992_v16, %v1414_v15  ;;  %v2315_v15 = vld [vmem:[%s3985_s15 + $0x150] sm:$0xff] }
 0x141   : > { %2499 = vst.msk [vmem:[%s4007_s29 + $0x108] sm:$0xff] %vm2465_vm2, %v2434_v11  ;;  %v2372_v20 = vadd.f32 %v2308_v3, %v2244_v12  ;;  %v2175_v21 = vmul.f32 %v3979_v38, %v1998_v14  ;;  %v2973_v25 = vpop.f32.mrb[38].mxu1 }
 0x142   : > { %2498 = vst.msk [vmem:[%s4007_s29 + $0x100] sm:$0xff] %vm2465_vm2, %v2433_v17  ;;  %v2371_v22 = vadd.f32 %v2307_v13, %v2243_v18  ;;  %v2174_v24 = vmul.f32 %v3979_v38, %v1993_v19  ;;  %v3073_v26 = vpop.f32.mrb[38].mxu0  ;;  %v1424_v31 = vpop.f32.mrb[39].mxu1 }
 0x143   : > { %v2436_v27 = vmax.f32 %v2372_v20, 0.0  ;;  %v2246_v28 = vadd.f32 %v3991_v42, %v2175_v21  ;;  %v2008_v30 = vadd.f32 %v3073_v26, %v2973_v25  ;;  %v2002_v32 = vpop.f32.mrb[39].mxu0  ;;  %v2318_v25 = vld [vmem:[%s3985_s15 + $0x168] sm:$0xff] }
 0x144   : > { %v2435_v33 = vmax.f32 %v2371_v22, 0.0  ;;  %v2245_v2 = vadd.f32 %v3991_v42, %v2174_v24  ;;  %v2003_v59 = vadd.f32 %v2002_v32, %v1424_v31  ;;  %v2317_v31 = vld [vmem:[%s3985_s15 + $0x160] sm:$0xff] }
 0x145   : > { %2501 = vst.msk [vmem:[%s4007_s29 + $0x118] sm:$0xff] %vm2465_vm2, %v2436_v27  ;;  %v2374_v34 = vadd.f32 %v2310_v23, %v2246_v28  ;;  %v2177_v35 = vmul.f32 %v3979_v38, %v2008_v30  ;;  %v2976_v7 = vpop.f32.mrb[40].mxu1 }
 0x146   : > { %2500 = vst.msk [vmem:[%s4007_s29 + $0x110] sm:$0xff] %vm2465_vm2, %v2435_v33  ;;  %v2373_v36 = vadd.f32 %v2309_v29, %v2245_v2  ;;  %v2176_v0 = vmul.f32 %v3979_v38, %v2003_v59  ;;  %v3076_v39 = vpop.f32.mrb[40].mxu0  ;;  %v1434_v45 = vpop.f32.mrb[41].mxu1 }
 0x147   : > { %v2438_v40 = vmax.f32 %v2374_v34, 0.0  ;;  %v2248_v41 = vadd.f32 %v3991_v42, %v2177_v35  ;;  %v2018_v44 = vadd.f32 %v3076_v39, %v2976_v7  ;;  %v2012_v46 = vpop.f32.mrb[41].mxu0  ;;  %v2320_v7 = vld [vmem:[%s3985_s15 + $0x178] sm:$0xff] }
 0x148   : > { %v2437_v47 = vmax.f32 %v2373_v36, 0.0  ;;  %v2247_v48 = vadd.f32 %v3991_v42, %v2176_v0  ;;  %v2013_v49 = vadd.f32 %v2012_v46, %v1434_v45  ;;  %v2319_v45 = vld [vmem:[%s3985_s15 + $0x170] sm:$0xff] }
 0x149   : > { %2503 = vst.msk [vmem:[%s4007_s29 + $0x128] sm:$0xff] %vm2465_vm2, %v2438_v40  ;;  %v2376_v50 = vadd.f32 %v2312_v37, %v2248_v41  ;;  %v2179_v51 = vmul.f32 %v3979_v38, %v2018_v44  ;;  %v2979_v55 = vpop.f32.mrb[42].mxu1 }
 0x14a   : > { %2502 = vst.msk [vmem:[%s4007_s29 + $0x120] sm:$0xff] %vm2465_vm2, %v2437_v47  ;;  %v2375_v52 = vadd.f32 %v2311_v43, %v2247_v48  ;;  %v2178_v54 = vmul.f32 %v3979_v38, %v2013_v49  ;;  %v3079_v56 = vpop.f32.mrb[42].mxu0  ;;  %v1444_v61 = vpop.f32.mrb[43].mxu1 }
 0x14b   : > { %v2440_v57 = vmax.f32 %v2376_v50, 0.0  ;;  %v2250_v5 = vadd.f32 %v3991_v42, %v2179_v51  ;;  %v2028_v60 = vadd.f32 %v3079_v56, %v2979_v55  ;;  %v2022_v4 = vpop.f32.mrb[43].mxu0  ;;  %v2322_v55 = vld [vmem:[%s3985_s15 + $0x188] sm:$0xff] }
 0x14c   : > { %v2439_v62 = vmax.f32 %v2375_v52, 0.0  ;;  %v2249_v63 = vadd.f32 %v3991_v42, %v2178_v54  ;;  %v2023_v6 = vadd.f32 %v2022_v4, %v1444_v61  ;;  %v2321_v61 = vld [vmem:[%s3985_s15 + $0x180] sm:$0xff] }
 0x14d   : > { %2505 = vst.msk [vmem:[%s4007_s29 + $0x138] sm:$0xff] %vm2465_vm2, %v2440_v57  ;;  %v2378_v1 = vadd.f32 %v2314_v53, %v2250_v5  ;;  %v2181_v3 = vmul.f32 %v3979_v38, %v2028_v60  ;;  %v2982_v11 = vpop.f32.mrb[44].mxu1 }
 0x14e   : > { %2504 = vst.msk [vmem:[%s4007_s29 + $0x130] sm:$0xff] %vm2465_vm2, %v2439_v62  ;;  %v2377_v8 = vadd.f32 %v2313_v58, %v2249_v63  ;;  %v2180_v10 = vmul.f32 %v3979_v38, %v2023_v6  ;;  %v3082_v12 = vpop.f32.mrb[44].mxu0  ;;  %v1454_v17 = vpop.f32.mrb[45].mxu1 }
 0x14f   : > { %v2442_v13 = vmax.f32 %v2378_v1, 0.0  ;;  %v2252_v14 = vadd.f32 %v3991_v42, %v2181_v3  ;;  %v2038_v16 = vadd.f32 %v3082_v12, %v2982_v11  ;;  %v2032_v18 = vpop.f32.mrb[45].mxu0  ;;  %v2324_v11 = vld [vmem:[%s3985_s15 + $0x198] sm:$0xff] }
 0x150   : > { %v2441_v19 = vmax.f32 %v2377_v8, 0.0  ;;  %v2251_v20 = vadd.f32 %v3991_v42, %v2180_v10  ;;  %v2033_v21 = vadd.f32 %v2032_v18, %v1454_v17  ;;  %v2323_v17 = vld [vmem:[%s3985_s15 + $0x190] sm:$0xff] }
 0x151   : > { %2507 = vst.msk [vmem:[%s4007_s29 + $0x148] sm:$0xff] %vm2465_vm2, %v2442_v13  ;;  %v2380_v22 = vadd.f32 %v2316_v9, %v2252_v14  ;;  %v2183_v23 = vmul.f32 %v3979_v38, %v2038_v16  ;;  %v2985_v27 = vpop.f32.mrb[46].mxu1 }
 0x152   : > { %2506 = vst.msk [vmem:[%s4007_s29 + $0x140] sm:$0xff] %vm2465_vm2, %v2441_v19  ;;  %v2379_v24 = vadd.f32 %v2315_v15, %v2251_v20  ;;  %v2182_v26 = vmul.f32 %v3979_v38, %v2033_v21  ;;  %v3085_v28 = vpop.f32.mrb[46].mxu0  ;;  %v1464_v33 = vpop.f32.mrb[47].mxu1 }
 0x153   : > { %v2444_v29 = vmax.f32 %v2380_v22, 0.0  ;;  %v2254_v30 = vadd.f32 %v3991_v42, %v2183_v23  ;;  %v2048_v32 = vadd.f32 %v3085_v28, %v2985_v27  ;;  %v2042_v2 = vpop.f32.mrb[47].mxu0  ;;  %v2326_v27 = vld [vmem:[%s3985_s15 + $0x1a8] sm:$0xff] }
 0x154   : > { %v2443_v59 = vmax.f32 %v2379_v24, 0.0  ;;  %v2253_v34 = vadd.f32 %v3991_v42, %v2182_v26  ;;  %v2043_v35 = vadd.f32 %v2042_v2, %v1464_v33  ;;  %v2325_v33 = vld [vmem:[%s3985_s15 + $0x1a0] sm:$0xff] }
 0x155   : > { %2509 = vst.msk [vmem:[%s4007_s29 + $0x158] sm:$0xff] %vm2465_vm2, %v2444_v29  ;;  %v2382_v36 = vadd.f32 %v2318_v25, %v2254_v30  ;;  %v2185_v37 = vmul.f32 %v3979_v38, %v2048_v32  ;;  %v2988_v40 = vpop.f32.mrb[48].mxu1 }
 0x156   : > { %2508 = vst.msk [vmem:[%s4007_s29 + $0x150] sm:$0xff] %vm2465_vm2, %v2443_v59  ;;  %v2381_v0 = vadd.f32 %v2317_v31, %v2253_v34  ;;  %v2184_v39 = vmul.f32 %v3979_v38, %v2043_v35  ;;  %v3088_v41 = vpop.f32.mrb[48].mxu0  ;;  %v1474_v47 = vpop.f32.mrb[49].mxu1 }
 0x157   : > { %v2446_v43 = vmax.f32 %v2382_v36, 0.0  ;;  %v2256_v44 = vadd.f32 %v3991_v42, %v2185_v37  ;;  %v2058_v46 = vadd.f32 %v3088_v41, %v2988_v40  ;;  %v2052_v48 = vpop.f32.mrb[49].mxu0  ;;  %v2328_v40 = vld [vmem:[%s3985_s15 + $0x1b8] sm:$0xff] }
 0x158   : > { %v2445_v49 = vmax.f32 %v2381_v0, 0.0  ;;  %v2255_v50 = vadd.f32 %v3991_v42, %v2184_v39  ;;  %v2053_v51 = vadd.f32 %v2052_v48, %v1474_v47  ;;  %v2327_v47 = vld [vmem:[%s3985_s15 + $0x1b0] sm:$0xff] }
 0x159   : > { %2511 = vst.msk [vmem:[%s4007_s29 + $0x168] sm:$0xff] %vm2465_vm2, %v2446_v43  ;;  %v2384_v52 = vadd.f32 %v2320_v7, %v2256_v44  ;;  %v2187_v53 = vmul.f32 %v3979_v38, %v2058_v46  ;;  %v2991_v57 = vpop.f32.mrb[50].mxu1 }
 0x15a   : > { %2510 = vst.msk [vmem:[%s4007_s29 + $0x160] sm:$0xff] %vm2465_vm2, %v2445_v49  ;;  %v2383_v54 = vadd.f32 %v2319_v45, %v2255_v50  ;;  %v2186_v56 = vmul.f32 %v3979_v38, %v2053_v51  ;;  %v3091_v5 = vpop.f32.mrb[50].mxu0  ;;  %v1484_v62 = vpop.f32.mrb[51].mxu1 }
 0x15b   : > { %v2448_v58 = vmax.f32 %v2384_v52, 0.0  ;;  %v2258_v60 = vadd.f32 %v3991_v42, %v2187_v53  ;;  %v2068_v4 = vadd.f32 %v3091_v5, %v2991_v57  ;;  %v2062_v63 = vpop.f32.mrb[51].mxu0  ;;  %v2330_v57 = vld [vmem:[%s3985_s15 + $0x1c8] sm:$0xff]  ;;  %v3223_v5 = vld [vmem:[%s4370_s9] ss:$0 sm:$0xff] }
 0x15c   : > { %v2447_v6 = vmax.f32 %v2383_v54, 0.0  ;;  %v2257_v1 = vadd.f32 %v3991_v42, %v2186_v56  ;;  %v2063_v3 = vadd.f32 %v2062_v63, %v1484_v62  ;;  %v2329_v63 = vld [vmem:[%s3985_s15 + $0x1c0] sm:$0xff] }
 0x15d   : > { %2513 = vst.msk [vmem:[%s4007_s29 + $0x178] sm:$0xff] %vm2465_vm2, %v2448_v58  ;;  %v2386_v8 = vadd.f32 %v2322_v55, %v2258_v60  ;;  %v2189_v9 = vmul.f32 %v3979_v38, %v2068_v4  ;;  %v2994_v13 = vpop.f32.mrb[52].mxu1 }
 0x15e   : > { %2512 = vst.msk [vmem:[%s4007_s29 + $0x170] sm:$0xff] %vm2465_vm2, %v2447_v6  ;;  %v2385_v10 = vadd.f32 %v2321_v61, %v2257_v1  ;;  %v2188_v12 = vmul.f32 %v3979_v38, %v2063_v3  ;;  %v3094_v14 = vpop.f32.mrb[52].mxu0  ;;  %v1494_v19 = vpop.f32.mrb[53].mxu1 }
 0x15f   : > { %v2450_v15 = vmax.f32 %v2386_v8, 0.0  ;;  %v2260_v16 = vadd.f32 %v3991_v42, %v2189_v9  ;;  %v2078_v18 = vadd.f32 %v3094_v14, %v2994_v13  ;;  %v2072_v20 = vpop.f32.mrb[53].mxu0  ;;  %v3224_v8 = vld [vmem:[%s4371_s10] ss:$0 sm:$0xff]  ;;  %v2332_v13 = vld [vmem:[%s3985_s15 + $0x1d8] sm:$0xff] }
 0x160   : > { %v2449_v21 = vmax.f32 %v2385_v10, 0.0  ;;  %v2259_v22 = vadd.f32 %v3991_v42, %v2188_v12  ;;  %v2073_v23 = vadd.f32 %v2072_v20, %v1494_v19  ;;  %v2331_v19 = vld [vmem:[%s3985_s15 + $0x1d0] sm:$0xff] }
 0x161   : > { %2515 = vst.msk [vmem:[%s4007_s29 + $0x188] sm:$0xff] %vm2465_vm2, %v2450_v15  ;;  %v2388_v24 = vadd.f32 %v2324_v11, %v2260_v16  ;;  %v2191_v25 = vmul.f32 %v3979_v38, %v2078_v18  ;;  %v2997_v29 = vpop.f32.mrb[54].mxu1 }
 0x162   : > { %2514 = vst.msk [vmem:[%s4007_s29 + $0x180] sm:$0xff] %vm2465_vm2, %v2449_v21  ;;  %v2387_v26 = vadd.f32 %v2323_v17, %v2259_v22  ;;  %v2190_v28 = vmul.f32 %v3979_v38, %v2073_v23  ;;  %v3097_v30 = vpop.f32.mrb[54].mxu0  ;;  %v1504_v59 = vpop.f32.mrb[55].mxu1 }
 0x163   : > { %v2452_v31 = vmax.f32 %v2388_v24, 0.0  ;;  %v2262_v32 = vadd.f32 %v3991_v42, %v2191_v25  ;;  %v2088_v2 = vadd.f32 %v3097_v30, %v2997_v29  ;;  %v2082_v34 = vpop.f32.mrb[55].mxu0  ;;  %v2334_v29 = vld [vmem:[%s3985_s15 + $0x1e8] sm:$0xff] }
 0x164   : > { %v2451_v35 = vmax.f32 %v2387_v26, 0.0  ;;  %v2261_v36 = vadd.f32 %v3991_v42, %v2190_v28  ;;  %v2083_v37 = vadd.f32 %v2082_v34, %v1504_v59  ;;  %v2333_v59 = vld [vmem:[%s3985_s15 + $0x1e0] sm:$0xff] }
 0x165   : > { %2517 = vst.msk [vmem:[%s4007_s29 + $0x198] sm:$0xff] %vm2465_vm2, %v2452_v31  ;;  %v2390_v0 = vadd.f32 %v2326_v27, %v2262_v32  ;;  %v2193_v7 = vmul.f32 %v3979_v38, %v2088_v2  ;;  %v3000_v43 = vpop.f32.mrb[56].mxu1 }
 0x166   : > { %2516 = vst.msk [vmem:[%s4007_s29 + $0x190] sm:$0xff] %vm2465_vm2, %v2451_v35  ;;  %v2389_v39 = vadd.f32 %v2325_v33, %v2261_v36  ;;  %v2192_v41 = vmul.f32 %v3979_v38, %v2083_v37  ;;  %v3100_v44 = vpop.f32.mrb[56].mxu0  ;;  %v1514_v49 = vpop.f32.mrb[57].mxu1 }
 0x167   : > { %v2454_v45 = vmax.f32 %v2390_v0, 0.0  ;;  %v2264_v46 = vadd.f32 %v3991_v42, %v2193_v7  ;;  %v2098_v48 = vadd.f32 %v3100_v44, %v3000_v43  ;;  %v2092_v50 = vpop.f32.mrb[57].mxu0  ;;  %v2336_v43 = vld [vmem:[%s3985_s15 + $0x1f8] sm:$0xff] }
 0x168   : > { %v2453_v51 = vmax.f32 %v2389_v39, 0.0  ;;  %v2263_v52 = vadd.f32 %v3991_v42, %v2192_v41  ;;  %v2093_v53 = vadd.f32 %v2092_v50, %v1514_v49 }
 0x169   : > { %2519 = vst.msk [vmem:[%s4007_s29 + $0x1a8] sm:$0xff] %vm2465_vm2, %v2454_v45  ;;  %v2392_v54 = vadd.f32 %v2328_v40, %v2264_v46  ;;  %v2195_v55 = vmul.f32 %v3979_v38, %v2098_v48  ;;  %v3003_v60 = vpop.f32.mrb[58].mxu1 }
 0x16a   : > { %2518 = vst.msk [vmem:[%s4007_s29 + $0x1a0] sm:$0xff] %vm2465_vm2, %v2453_v51  ;;  %v2391_v56 = vadd.f32 %v2327_v47, %v2263_v52  ;;  %v2194_v58 = vmul.f32 %v3223_v5, %v2093_v53  ;;  %v3103_v61 = vpop.f32.mrb[58].mxu0  ;;  %v1524_v38 = vpop.f32.mrb[59].mxu1  ;;  %v2335_v47 = vld [vmem:[%s3985_s15 + $0x1f0] sm:$0xff]  ;;  %s3225_s15 = scalar_lea.vmem %s4312_s24, 8192 }
 0x16b   : > { %v2456_v4 = vmax.f32 %v2392_v54, 0.0  ;;  %v2266_v62 = vadd.f32 %v3991_v42, %v2195_v55  ;;  %v2108_v6 = vadd.f32 %v3103_v61, %v3003_v60  ;;  %v2102_v1 = vpop.f32.mrb[59].mxu0  ;;  %p3226_p11 = scmp.ne.s32.totalorder %s4312_s24, %s3225_s15  ;;  %p3233_p1 = scmp.lt.s32.totalorder %s3231_s12, %s3225_s15 }
 0x16c   : > { %v2455_v3 = vmax.f32 %v2391_v56, 0.0  ;;  %v2265_v9 = vadd.f32 %v3224_v8, %v2194_v58  ;;  %v2103_v10 = vadd.f32 %v2102_v1, %v1524_v38 }
 0x16d   : > { %2521 = vst.msk [vmem:[%s4007_s29 + $0x1b8] sm:$0xff] %vm2465_vm2, %v2456_v4  ;;  %v2394_v11 = vadd.f32 %v2330_v57, %v2266_v62  ;;  %v2197_v12 = vmul.f32 %v3223_v5, %v2108_v6  ;;  %v3006_v15 = vpop.f32.mrb[60].mxu1  ;;  %p3227_p12 = pnand %p3226_p11, %p3390_p5  ;;  %p3234_p2 = por %p3233_p1, %p3232_p0 }
 0x16e   : > { %2520 = vst.msk [vmem:[%s4007_s29 + $0x1b0] sm:$0xff] %vm2465_vm2, %v2455_v3  ;;  %v2393_v42 = vadd.f32 %v2329_v63, %v2265_v9  ;;  %v2196_v14 = vmul.f32 %v3223_v5, %v2103_v10  ;;  %v3106_v16 = vpop.f32.mrb[60].mxu0  ;;  %v1534_v21 = vpop.f32.mrb[61].mxu1 }
 0x16f   : > { %v2458_v17 = vmax.f32 %v2394_v11, 0.0  ;;  %v2268_v18 = vadd.f32 %v3224_v8, %v2197_v12  ;;  %v2118_v20 = vadd.f32 %v3106_v16, %v3006_v15  ;;  %v2112_v22 = vpop.f32.mrb[61].mxu0  ;;  %p3228_p13 = pneg %p3227_p12 }
 0x170   : > { %v2457_v23 = vmax.f32 %v2393_v42, 0.0  ;;  %v2267_v24 = vadd.f32 %v3224_v8, %v2196_v14  ;;  %v2113_v25 = vadd.f32 %v2112_v22, %v1534_v21 }
 0x171   : > { %2523 = vst.msk [vmem:[%s4007_s29 + $0x1c8] sm:$0xff] %vm2465_vm2, %v2458_v17  ;;  %v2396_v26 = vadd.f32 %v2332_v13, %v2268_v18  ;;  %v2199_v27 = vmul.f32 %v3223_v5, %v2118_v20  ;;  %v3009_v31 = vpop.f32.mrb[62].mxu1  ;;  %p3235_p3 = pnand %p3234_p2, %p3228_p13 }
 0x172   : > { %2522 = vst.msk [vmem:[%s4007_s29 + $0x1c0] sm:$0xff] %vm2465_vm2, %v2457_v23  ;;  %v2395_v28 = vadd.f32 %v2331_v19, %v2267_v24  ;;  %v2198_v30 = vmul.f32 %v3223_v5, %v2113_v25  ;;  %v3109_v32 = vpop.f32.mrb[62].mxu0  ;;  %v1544_v35 = vpop.f32.mrb[63].mxu1 }
 0x173   : > { %v2460_v33 = vmax.f32 %v2396_v26, 0.0  ;;  %v2270_v2 = vadd.f32 %v3224_v8, %v2199_v27  ;;  %v2128_v34 = vadd.f32 %v3109_v32, %v3009_v31  ;;  %v2122_v36 = vpop.f32.mrb[63].mxu0 }
 0x174   : > { %v2459_v37 = vmax.f32 %v2395_v28, 0.0  ;;  %v2269_v0 = vadd.f32 %v3224_v8, %v2198_v30  ;;  %v2123_v7 = vadd.f32 %v2122_v36, %v1544_v35 }
 0x175   : > { %2525 = vst.msk [vmem:[%s4007_s29 + $0x1d8] sm:$0xff] %vm2465_vm2, %v2460_v33  ;;  %v2398_v39 = vadd.f32 %v2334_v29, %v2270_v2  ;;  %v2201_v40 = vmul.f32 %v3223_v5, %v2128_v34 }
 0x176   : > { %2524 = vst.msk [vmem:[%s4007_s29 + $0x1d0] sm:$0xff] %vm2465_vm2, %v2459_v37  ;;  %v2397_v41 = vadd.f32 %v2333_v59, %v2269_v0  ;;  %v2200_v44 = vmul.f32 %v3223_v5, %v2123_v7 }
 0x177   : > { %v2462_v45 = vmax.f32 %v2398_v39, 0.0  ;;  %v2272_v46 = vadd.f32 %v3224_v8, %v2201_v40 }
 0x178   : > { %v2461_v48 = vmax.f32 %v2397_v41, 0.0  ;;  %v2271_v49 = vadd.f32 %v3224_v8, %v2200_v44 }
 0x179   : > { %2527 = vst.msk [vmem:[%s4007_s29 + $0x1e8] sm:$0xff] %vm2465_vm2, %v2462_v45  ;;  %v2400_v50 = vadd.f32 %v2336_v43, %v2272_v46 }
 0x17a   : > { %2526 = vst.msk [vmem:[%s4007_s29 + $0x1e0] sm:$0xff] %vm2465_vm2, %v2461_v48  ;;  %v2399_v51 = vadd.f32 %v2335_v47, %v2271_v49 }
 0x17b   : > { %v2464_v52 = vmax.f32 %v2400_v50, 0.0 }
 0x17c   : > { %v2463_v53 = vmax.f32 %v2399_v51, 0.0 }
 0x17d   : > { %2529 = vst.msk [vmem:[%s4007_s29 + $0x1f8] sm:$0xff] %vm2465_vm2, %v2464_v52 }
 0x17e   : > { %2528 = vst.msk [vmem:[%s4007_s29 + $0x1f0] sm:$0xff] %vm2465_vm2, %v2463_v53 }
 0x17f   : > { %3238 = shalt.err (!%p3235_p3)
}
 0x180   : > { %s3239_s16 = scalar_lea.hbm %s4310_s30, 8192  ;;  %s3243_s25 = scalar_lea.hbm %s4372_s11, 32768 }
 0x181   : > { %p3240_p4 = scmp.ne.s32.totalorder %s4310_s30, %s3239_s16  ;;  %p3244_p9 = scmp.lt.u32.totalorder %s4310_s30, %s4372_s11 }
 0x182   : > { %p3245_p10 = scmp.lt.u32.totalorder %s3243_s25, %s3239_s16  ;;  %p3247_p12 = scmp.lt.u32.totalorder %s3239_s16, %s4310_s30 }
 0x183   : > { %p3241_p7 = pnand %p3240_p4, %p3390_p5 }
 0x184   : > { %p3246_p11 = por %p3245_p10, %p3244_p9 }
 0x185   : > { %p3242_p8 = pneg %p3241_p7 }
 0x186   : > { %p3248_p13 = por %p3247_p12, %p3246_p11 }
 0x188   : > { %p3249_p0 = pnand %p3248_p13, %p3242_p8 }
 0x18a   : > { %3252 = shalt.err (!%p3249_p0)
}
 0x18b   : > { %s3290_s15 = smov 128   ;;  %s3291_s14 = smov 8  }
 0x18c   : > { %3178 = dma.vmem_to_hbm [thread:$0]  (%p3390_p5), %s4312_s24, 8192, %s4310_s30, %s4320_s21, %s3290_s15, %s3290_s15, %s3291_s14  }
 0x18d PF: > { %p3184_p1 = scmp.ge.s32.totalorder %s3287_s20, 2  ;;  %s2559_s12 = sand.u32 1, %s3275_s17  }
 0x18e   : > { %s2560_s16 = scalar_lea.sflag [#allocation3], %s2559_s12 }
 0x18f   : > { %p3181_p2 = pnand %p3184_p1, %p3394_p6 }
 0x191   : > { %3270 = dma.done.wait (!%p3181_p2), %s2560_s16, 8192  }
 0x192   : > { %3272 = vsyncadd (!%p3181_p2), %s2560_s16, 4294959104  ;;  %p21_p3 = scmp.ge.s32.totalorder %s3377_s23, 6   ;;  %s4377_s17 = smov %s3279_s18 }
 0x193   : > { %s4378_s18 = smov %s3283_s19  ;;  %s4379_s19 = smov %s3388_s26 }
 0x194   : > { %s4380_s20 = smov %s3377_s23  ;;  %23 = sbr.rel (!%p21_p3) target bundleno = 5 (0x5), region = 105 }
 0x19b   :  { %2565 = vsyncpa [#allocation3], 1 }
 0x19c   :  { %2567 = vsyncpa [#allocation3 + $0x1], 1 }

</bundles_post_ra>
